<compile_context>
chip_gen: v7x
topology: tpu7x:2x2x1
jax: 0.10.0
libtpu: 0.0.40
codegen_flags: <defaults>
</compile_context>

<pallas_src>
import functools

import jax
import jax.numpy as jnp
from jax.experimental import pallas as pl
from jax.experimental.pallas import tpu as pltpu


def _round_up(n, m):
    return (n + m - 1) // m * m


def fcnet_kernel(x_ref, w1_ref, b1_ref, w2_ref, b2_ref, w3_ref, b3_ref, o_ref):
    # Layer 1: (TB, Fp) @ (Fp, 2048) + (1, 2048)  -- bf16 x bf16 -> f32 acc.
    h1 = jnp.dot(x_ref[...], w1_ref[...], preferred_element_type=jnp.float32)
    h1 = h1 + b1_ref[...]
    # Layer 2: (TB, 2048) @ (2048, 1024) + (1, 1024)
    h2 = jnp.dot(h1.astype(jnp.bfloat16), w2_ref[...],
                 preferred_element_type=jnp.float32)
    h2 = h2 + b2_ref[...]
    # Layer 3: (TB, 1024) @ (1024, Cp) + (1, Cp)
    logits = jnp.dot(h2.astype(jnp.bfloat16), w3_ref[...],
                     preferred_element_type=jnp.float32)
    logits = logits + b3_ref[...]
    # Sigmoid: exp on the EUP, approximate EUP reciprocal.
    o_ref[...] = pl.reciprocal(1.0 + jnp.exp(-logits), approx=True).astype(o_ref.dtype)


@functools.partial(jax.jit, static_argnames=("block_b",))
def fcnet_forward(x, w1, b1, w2, b2, w3, b3, block_b=256):
    B, F = x.shape
    H1 = w1.shape[1]
    H2 = w2.shape[1]
    C = w3.shape[1]

    # Pad the reduction dim to a lane multiple (zero rows/cols don't change
    # x @ W1) and the class dim to a full 128-lane register so the output
    # stores are lane-dense.
    Fp = _round_up(F, 128)
    Cp = _round_up(C, 128)

    # Batch tile: multiple of 8 sublanes, capped so the (TB, 2048) f32
    # intermediate stays small as B grows.
    tb = min(block_b, _round_up(B, 8))
    Bp = _round_up(B, tb)
    nb = Bp // tb

    xb = x.astype(jnp.bfloat16)
    if Bp != B or Fp != F:
        xb = jnp.pad(xb, ((0, Bp - B), (0, Fp - F)))
    w1p = jnp.pad(w1, ((0, Fp - F), (0, 0))) if Fp != F else w1
    w3p = jnp.pad(w3, ((0, 0), (0, Cp - C))) if Cp != C else w3
    b3p = jnp.pad(b3, ((0, 0), (0, Cp - C))) if Cp != C else b3

    flops = 2 * Bp * (Fp * H1 + H1 * H2 + H2 * Cp)
    bytes_accessed = (
        xb.size * 2                                     # bf16 activations in
        + (w1p.size + w2.size + w3p.size) * 2           # bf16 weights
        + (b1.size + b2.size + b3p.size) * 4            # f32 biases
        + Bp * Cp * 4                                   # f32 output
    )

    out = pl.pallas_call(
        fcnet_kernel,
        out_shape=jax.ShapeDtypeStruct((Bp, Cp), jnp.float32),
        grid=(nb,),
        in_specs=[
            pl.BlockSpec((tb, Fp), lambda i: (i, 0)),    # x: pipelined over batch
            pl.BlockSpec((Fp, H1), lambda i: (0, 0)),    # weights: fetched once,
            pl.BlockSpec((1, H1), lambda i: (0, 0)),     # VMEM-resident across grid
            pl.BlockSpec((H1, H2), lambda i: (0, 0)),
            pl.BlockSpec((1, H2), lambda i: (0, 0)),
            pl.BlockSpec((H2, Cp), lambda i: (0, 0)),
            pl.BlockSpec((1, Cp), lambda i: (0, 0)),
        ],
        out_specs=pl.BlockSpec((tb, Cp), lambda i: (i, 0)),
        compiler_params=pltpu.CompilerParams(
            dimension_semantics=("parallel",),
            vmem_limit_bytes=32 << 20,
        ),
        cost_estimate=pl.CostEstimate(
            flops=flops,
            transcendentals=Bp * Cp,
            bytes_accessed=bytes_accessed,
        ),
    )(xb, w1p, b1, w2, b2, w3p, b3p)
    return out[:B, :C]


def init_linear_params(key, fan_in, fan_out):
    # Deterministic init mimicking PyTorch's nn.Linear default
    # (U[-1/sqrt(in), 1/sqrt(in)]).  Weights stored as (in, out) in bf16,
    # biases kept in f32 (negligible bytes, keeps the epilogue accurate).
    kw, kb = jax.random.split(key)
    bound = 1.0 / jnp.sqrt(fan_in)
    w = jax.random.uniform(kw, (fan_in, fan_out), jnp.float32, -bound, bound)
    b = jax.random.uniform(kb, (1, fan_out), jnp.float32, -bound, bound)
    return w.astype(jnp.bfloat16), b


if __name__ == "__main__":
    in_features = 256
    n_classes = 16
    batch = 8

    root = jax.random.PRNGKey(0)
    kx, k1, k2, k3 = jax.random.split(root, 4)

    x = jax.random.normal(kx, (batch, in_features), jnp.float32)
    w1, b1 = init_linear_params(k1, in_features, 2048)
    w2, b2 = init_linear_params(k2, 2048, 1024)
    w3, b3 = init_linear_params(k3, 1024, n_classes)

    out = fcnet_forward(x, w1, b1, w2, b2, w3, b3)
    out = jax.block_until_ready(out)

    # Cross-check against a plain-JAX reference mirroring the kernel math
    # (bf16 operands, f32 accumulation).
    xf = x.astype(jnp.bfloat16).astype(jnp.float32)
    w1f = w1.astype(jnp.float32)
    w2f = w2.astype(jnp.float32)
    w3f = w3.astype(jnp.float32)
    h1 = xf @ w1f + b1
    h2 = h1.astype(jnp.bfloat16).astype(jnp.float32) @ w2f + b2
    logits = h2.astype(jnp.bfloat16).astype(jnp.float32) @ w3f + b3
    ref = jax.nn.sigmoid(logits)

    assert out.shape == (batch, n_classes)
    assert jnp.allclose(out, ref, atol=5e-3, rtol=5e-3), float(
        jnp.max(jnp.abs(out - ref))
    )

    print("KERNEL_OK")
</pallas_src>

<mosaic_0001>
module attributes {stable_mosaic.version = 11 : i64} {
  func.func @fcnet_kernel(%arg0: i32, %arg1: memref<8x256xbf16, #tpu.memory_space<vmem>>, %arg2: memref<256x2048xbf16, #tpu.memory_space<vmem>>, %arg3: memref<1x2048xf32, #tpu.memory_space<vmem>>, %arg4: memref<2048x1024xbf16, #tpu.memory_space<vmem>>, %arg5: memref<1x1024xf32, #tpu.memory_space<vmem>>, %arg6: memref<1024x128xbf16, #tpu.memory_space<vmem>>, %arg7: memref<1x128xf32, #tpu.memory_space<vmem>>, %arg8: memref<8x128xf32, #tpu.memory_space<vmem>>) attributes {dimension_semantics = [#tpu.dimension_semantics<parallel>], iteration_bounds = array<i64: 1>, scalar_prefetch = 0 : i64, scratch_operands = 0 : i64, tpu.core_type = #tpu.core_type<tc>, window_params = [{transform_indices = @transform_0, window_bounds = array<i64: 8, 256>}, {pipeline_mode = #tpu.pipeline_mode<synchronous>, transform_indices = @transform_1, window_bounds = array<i64: 256, 2048>}, {pipeline_mode = #tpu.pipeline_mode<synchronous>, transform_indices = @transform_2, window_bounds = array<i64: 1, 2048>}, {pipeline_mode = #tpu.pipeline_mode<synchronous>, transform_indices = @transform_3, window_bounds = array<i64: 2048, 1024>}, {pipeline_mode = #tpu.pipeline_mode<synchronous>, transform_indices = @transform_4, window_bounds = array<i64: 1, 1024>}, {pipeline_mode = #tpu.pipeline_mode<synchronous>, transform_indices = @transform_5, window_bounds = array<i64: 1024, 128>}, {pipeline_mode = #tpu.pipeline_mode<synchronous>, transform_indices = @transform_6, window_bounds = array<i64: 1, 128>}, {transform_indices = @transform_7, window_bounds = array<i64: 8, 128>}]} {
    %c0 = arith.constant 0 : index
    %c0_0 = arith.constant 0 : index
    %0 = vector.load %arg1[%c0, %c0_0] : memref<8x256xbf16, #tpu.memory_space<vmem>>, vector<8x256xbf16>
    %c0_1 = arith.constant 0 : index
    %c0_2 = arith.constant 0 : index
    %1 = vector.load %arg2[%c0_1, %c0_2] : memref<256x2048xbf16, #tpu.memory_space<vmem>>, vector<256x2048xbf16>
    %cst = arith.constant dense<0.000000e+00> : vector<8x2048xf32>
    %2 = tpu.matmul %0, %1, %cst {dimension_numbers = #tpu.dot_dimension_numbers<[1], [0], [0], [1], [0, 0, 1, 1], [], []>} : vector<8x256xbf16>, vector<256x2048xbf16>, vector<8x2048xf32> -> vector<8x2048xf32>
    %c0_3 = arith.constant 0 : index
    %c0_4 = arith.constant 0 : index
    %3 = vector.load %arg3[%c0_3, %c0_4] : memref<1x2048xf32, #tpu.memory_space<vmem>>, vector<1x2048xf32>
    %4 = vector.broadcast %3 : vector<1x2048xf32> to vector<8x2048xf32>
    %5 = arith.addf %2, %4 : vector<8x2048xf32>
    %6 = arith.truncf %5 : vector<8x2048xf32> to vector<8x2048xbf16>
    %c0_5 = arith.constant 0 : index
    %c0_6 = arith.constant 0 : index
    %7 = vector.load %arg4[%c0_5, %c0_6] : memref<2048x1024xbf16, #tpu.memory_space<vmem>>, vector<2048x1024xbf16>
    %cst_7 = arith.constant dense<0.000000e+00> : vector<8x1024xf32>
    %8 = tpu.matmul %6, %7, %cst_7 {dimension_numbers = #tpu.dot_dimension_numbers<[1], [0], [0], [1], [0, 0, 1, 1], [], []>} : vector<8x2048xbf16>, vector<2048x1024xbf16>, vector<8x1024xf32> -> vector<8x1024xf32>
    %c0_8 = arith.constant 0 : index
    %c0_9 = arith.constant 0 : index
    %9 = vector.load %arg5[%c0_8, %c0_9] : memref<1x1024xf32, #tpu.memory_space<vmem>>, vector<1x1024xf32>
    %10 = vector.broadcast %9 : vector<1x1024xf32> to vector<8x1024xf32>
    %11 = arith.addf %8, %10 : vector<8x1024xf32>
    %12 = arith.truncf %11 : vector<8x1024xf32> to vector<8x1024xbf16>
    %c0_10 = arith.constant 0 : index
    %c0_11 = arith.constant 0 : index
    %13 = vector.load %arg6[%c0_10, %c0_11] : memref<1024x128xbf16, #tpu.memory_space<vmem>>, vector<1024x128xbf16>
    %cst_12 = arith.constant dense<0.000000e+00> : vector<8x128xf32>
    %14 = tpu.matmul %12, %13, %cst_12 {dimension_numbers = #tpu.dot_dimension_numbers<[1], [0], [0], [1], [0, 0, 1, 1], [], []>} : vector<8x1024xbf16>, vector<1024x128xbf16>, vector<8x128xf32> -> vector<8x128xf32>
    %c0_13 = arith.constant 0 : index
    %c0_14 = arith.constant 0 : index
    %15 = vector.load %arg7[%c0_13, %c0_14] : memref<1x128xf32, #tpu.memory_space<vmem>>, vector<1x128xf32>
    %16 = vector.broadcast %15 : vector<1x128xf32> to vector<8x128xf32>
    %17 = arith.addf %14, %16 : vector<8x128xf32>
    %cst_15 = arith.constant 0.000000e+00 : f32
    %18 = vector.broadcast %cst_15 : f32 to vector<8x128xf32>
    %19 = arith.subf %18, %17 : vector<8x128xf32>
    %20 = math.exp %19 : vector<8x128xf32>
    %cst_16 = arith.constant 1.000000e+00 : f32
    %21 = vector.broadcast %cst_16 : f32 to vector<8x128xf32>
    %22 = arith.addf %21, %20 : vector<8x128xf32>
    %23 = tpu.reciprocal %22 {approx = true} : vector<8x128xf32> -> vector<8x128xf32>
    %c0_17 = arith.constant 0 : index
    %c0_18 = arith.constant 0 : index
    %24 = vector.load %arg8[%c0_17, %c0_18] : memref<8x128xf32, #tpu.memory_space<vmem>>, vector<8x128xf32>
    tpu.vector_store %arg8[%c0_17, %c0_18], %23 {strides = array<i32>} : memref<8x128xf32, #tpu.memory_space<vmem>>, vector<8x128xf32>,
    return
  }
  func.func @transform_0(%arg0: i32) -> (i32, i32) {
    %c0_i32 = arith.constant 0 : i32
    %c0_i32_0 = arith.constant 0 : i32
    return %arg0, %c0_i32 : i32, i32
  }
  func.func @transform_1(%arg0: i32) -> (i32, i32) {
    %c0_i32 = arith.constant 0 : i32
    %c0_i32_0 = arith.constant 0 : i32
    %c0_i32_1 = arith.constant 0 : i32
    return %c0_i32, %c0_i32_0 : i32, i32
  }
  func.func @transform_2(%arg0: i32) -> (i32, i32) {
    %c0_i32 = arith.constant 0 : i32
    %c0_i32_0 = arith.constant 0 : i32
    %c0_i32_1 = arith.constant 0 : i32
    return %c0_i32, %c0_i32_0 : i32, i32
  }
  func.func @transform_3(%arg0: i32) -> (i32, i32) {
    %c0_i32 = arith.constant 0 : i32
    %c0_i32_0 = arith.constant 0 : i32
    %c0_i32_1 = arith.constant 0 : i32
    return %c0_i32, %c0_i32_0 : i32, i32
  }
  func.func @transform_4(%arg0: i32) -> (i32, i32) {
    %c0_i32 = arith.constant 0 : i32
    %c0_i32_0 = arith.constant 0 : i32
    %c0_i32_1 = arith.constant 0 : i32
    return %c0_i32, %c0_i32_0 : i32, i32
  }
  func.func @transform_5(%arg0: i32) -> (i32, i32) {
    %c0_i32 = arith.constant 0 : i32
    %c0_i32_0 = arith.constant 0 : i32
    %c0_i32_1 = arith.constant 0 : i32
    return %c0_i32, %c0_i32_0 : i32, i32
  }
  func.func @transform_6(%arg0: i32) -> (i32, i32) {
    %c0_i32 = arith.constant 0 : i32
    %c0_i32_0 = arith.constant 0 : i32
    %c0_i32_1 = arith.constant 0 : i32
    return %c0_i32, %c0_i32_0 : i32, i32
  }
  func.func @transform_7(%arg0: i32) -> (i32, i32) {
    %c0_i32 = arith.constant 0 : i32
    %c0_i32_0 = arith.constant 0 : i32
    return %arg0, %c0_i32 : i32, i32
  }
}

</mosaic_0001>

<bundles_post_ra>
// kernel: fcnet_forward.1
= control target key start
LH: loop header
LB: loop body
LE: loop exit
PB: predicated region body
PF: predicated region fallthrough
CT: control target
= control target key end

     0   :  { %12 = vsyncpa [#allocation3], 0  ;;  %s12590_s0 = inlined_call_operand.vmem [shape: bf16[8,256], index: 0, kind: input, shape index: {}]   ;;  %s12591_s1 = inlined_call_operand.hbm [shape: bf16[256,2048], index: 1, kind: input, shape index: {}]   ;;  %s12592_s2 = inlined_call_operand.hbm [shape: f32[1,2048], index: 2, kind: input, shape index: {}]   ;;  %s12593_s3 = inlined_call_operand.hbm [shape: bf16[2048,1024], index: 3, kind: input, shape index: {}]   ;;  %s12594_s4 = inlined_call_operand.hbm [shape: f32[1,1024], index: 4, kind: input, shape index: {}]   ;;  %s12595_s5 = inlined_call_operand.vmem [shape: bf16[1024,128], index: 5, kind: input, shape index: {}]   ;;  %s12596_s6 = inlined_call_operand.vmem [shape: f32[1,128], index: 6, kind: input, shape index: {}]   ;;  %s12597_s7 = inlined_call_operand.hbm [shape: f32[8,128], index: 7, kind: output, shape index: {}]  }
   0x1   :  { %13 = vsyncpa [#allocation6], 0 }
   0x2   :  { %14 = vsyncpa [#allocation9], 0 }
   0x3   :  { %15 = vsyncpa [#allocation4], 0  ;;  %s12013_s24 = smov [#allocation5]   ;;  %s12014_s26 = smov [#allocation2]  }
   0x4   :  { %s36_s25 = sshll.u32 %s12013_s24, 4  ;;  %s23_s27 = sshll.u32 %s12014_s26, 4  ;;  %s37_s25 = int_to_ptr.vmem [resolvable:$true] %s36_s25  ;;  %s12062_s27 = int_to_ptr.vmem [resolvable:$true] %s23_s27 }
   0x5   :  { %s11895_s30 = scalar_lea.hbm %s12592_s2, 256 }
   0x6   :  { %p11896_p0 = scmp.ne.s32.totalorder %s12592_s2, %s11895_s30  ;;  %p11899_p1 = scmp.lt.u32.totalorder %s11895_s30, %s12592_s2 }
   0x8   :  { %p11901_p2 = pnand %p11899_p1, %p11896_p0 }
   0xa   :  { %11904 = shalt.err (!%p11901_p2)
}
   0xb   :  { %s11905_s12 = scalar_lea.vmem %s37_s25, 256  ;;  %p11910_p4 = scmp.lt.s32.totalorder %s37_s25, %s37_s25 }
   0xc   :  { %p11906_p3 = scmp.ne.s32.totalorder %s37_s25, %s11905_s12  ;;  %p11911_p5 = scmp.lt.s32.totalorder %s11905_s12, %s11905_s12 }
   0xe   :  { %p11912_p6 = por %p11911_p5, %p11910_p4 }
  0x10   :  { %p11913_p7 = pnand %p11912_p6, %p11906_p3 }
  0x12   :  { %11916 = shalt.err (!%p11913_p7)
}
  0x13   :  { %39 = dma.hbm_to_vmem [thread:$0]  %s12592_s2, 256, %s37_s25, [#allocation6]  }
  0x14   :  { %s11917_s17 = scalar_lea.hbm %s12591_s1, 32768 }
  0x15   :  { %p11918_p8 = scmp.ne.s32.totalorder %s12591_s1, %s11917_s17  ;;  %p11921_p9 = scmp.lt.u32.totalorder %s11917_s17, %s12591_s1 }
  0x17   :  { %p11923_p10 = pnand %p11921_p9, %p11918_p8 }
  0x19   :  { %11926 = shalt.err (!%p11923_p10)
}
  0x1a   :  { %s11927_s22 = scalar_lea.vmem %s12062_s27, 32768  ;;  %p11932_p12 = scmp.lt.s32.totalorder %s12062_s27, %s12062_s27 }
  0x1b   :  { %p11928_p11 = scmp.ne.s32.totalorder %s12062_s27, %s11927_s22  ;;  %p11933_p13 = scmp.lt.s32.totalorder %s11927_s22, %s11927_s22 }
  0x1d   :  { %p11934_p0 = por %p11933_p13, %p11932_p12 }
  0x1f   :  { %p11935_p1 = pnand %p11934_p0, %p11928_p11 }
  0x21   :  { %11938 = shalt.err (!%p11935_p1)
}
  0x22   :  { %s12015_s2 = smov 1024   ;;  %s12016_s23 = smov 64  }
  0x23   :  { %29 = dma.hbm_to_vmem [thread:$0]  %s12591_s1, 32768, %s12062_s27, [#allocation3], %s12015_s2, %s12015_s2, %s12016_s23  }
  0x24   :  { %s12017_s26 = smov [#allocation7]   ;;  %s11939_s8 = scalar_lea.hbm %s12593_s3, 131072 }
  0x25   :  { %s45_s28 = sshll.u32 %s12017_s26, 4  ;;  %p11940_p2 = scmp.ne.s32.totalorder %s12593_s3, %s11939_s8  ;;  %s46_s28 = int_to_ptr.vmem [resolvable:$true] %s45_s28 }
  0x26   :  { %p11943_p3 = scmp.lt.u32.totalorder %s11939_s8, %s12593_s3 }
  0x28   :  { %p11945_p4 = pnand %p11943_p3, %p11940_p2 }
  0x2a   :  { %11948 = shalt.err (!%p11945_p4)
}
  0x2b   :  { %s11949_s13 = scalar_lea.vmem %s46_s28, 131072  ;;  %p11954_p6 = scmp.lt.s32.totalorder %s46_s28, %s46_s28 }
  0x2c   :  { %p11950_p5 = scmp.ne.s32.totalorder %s46_s28, %s11949_s13  ;;  %p11955_p7 = scmp.lt.s32.totalorder %s11949_s13, %s11949_s13 }
  0x2e   :  { %p11956_p8 = por %p11955_p7, %p11954_p6 }
  0x30   :  { %p11957_p9 = pnand %p11956_p8, %p11950_p5 }
  0x32   :  { %11960 = shalt.err (!%p11957_p9)
}
  0x33   :  { %s12018_s1 = smov 512   ;;  %s12019_s27 = smov 32  }
  0x34   :  { %51 = dma.hbm_to_vmem [thread:$0]  %s12593_s3, 131072, %s46_s28, [#allocation6], %s12018_s1, %s12018_s1, %s12019_s27  }
  0x35   :  { %s12020_s16 = smov [#allocation8]   ;;  %s11961_s20 = scalar_lea.hbm %s12594_s4, 128 }
  0x36   :  { %s58_s17 = sshll.u32 %s12020_s16, 4  ;;  %p11962_p10 = scmp.ne.s32.totalorder %s12594_s4, %s11961_s20  ;;  %s59_s17 = int_to_ptr.vmem [resolvable:$true] %s58_s17 }
  0x37   :  { %p11965_p11 = scmp.lt.u32.totalorder %s11961_s20, %s12594_s4 }
  0x39   :  { %p11967_p12 = pnand %p11965_p11, %p11962_p10 }
  0x3b   :  { %11970 = shalt.err (!%p11967_p12)
}
  0x3c   :  { %s11971_s24 = scalar_lea.vmem %s59_s17, 128  ;;  %p11976_p0 = scmp.lt.s32.totalorder %s59_s17, %s59_s17 }
  0x3d   :  { %p11972_p13 = scmp.ne.s32.totalorder %s59_s17, %s11971_s24  ;;  %p11977_p1 = scmp.lt.s32.totalorder %s11971_s24, %s11971_s24 }
  0x3f   :  { %p11978_p2 = por %p11977_p1, %p11976_p0 }
  0x41   :  { %p11979_p3 = pnand %p11978_p2, %p11972_p13 }
  0x43   :  { %11982 = shalt.err (!%p11979_p3)
}
  0x44   :  { %61 = dma.hbm_to_vmem [thread:$0]  %s12594_s4, 128, %s59_s17, [#allocation9]  }
  0x45   :  { %12005 = dma.done.wait [#allocation3], 32768  }
  0x46   :  { %12006 = vsyncadd [#allocation3], 4294934528 }
  0x47   :  { %12007 = dma.done.wait [#allocation6], 131328  }
  0x48   :  { %12008 = vsyncadd [#allocation6], 4294835968 }
  0x49   :  { %12009 = dma.done.wait [#allocation9], 128  }
  0x4a   :  { %12010 = vsyncadd [#allocation9], 4294967168  ;;  %v80_v0 = vld [vmem:[#allocation2] sm:$0xff]  ;;  %v81_v2 = vld [vmem:[#allocation2 + $0x8] sm:$0xff] }
  0x4b   :  { %v88_v1 = vld [vmem:[#allocation2 + $0x40] sm:$0xff]  ;;  %v89_v4 = vld [vmem:[#allocation2 + $0x48] sm:$0xff] }
  0x4c   :  { %v10262_v3 = vcombine.high %v80_v0, %v88_v1  ;;  %v10261_v5 = vcombine.low %v80_v0, %v88_v1  ;;  %v96_v6 = vld [vmem:[#allocation2 + $0x80] sm:$0xff]  ;;  %v10264_v8 = vcombine.high %v81_v2, %v89_v4  ;;  %v10263_v9 = vcombine.low %v81_v2, %v89_v4  ;;  %v97_v11 = vld [vmem:[#allocation2 + $0x88] sm:$0xff] }
  0x4d   :  { %v104_v7 = vld [vmem:[#allocation2 + $0xc0] sm:$0xff]  ;;  %v105_v12 = vld [vmem:[#allocation2 + $0xc8] sm:$0xff] }
  0x4e   :  { %v10278_v10 = vcombine.high %v96_v6, %v104_v7  ;;  %v112_v13 = vld [vmem:[#allocation2 + $0x100] sm:$0xff]  ;;  %1707 = vmatprep.subr.bf16.mxu0 %v10262_v3  ;;  %v10280_v14 = vcombine.high %v97_v11, %v105_v12  ;;  %v113_v16 = vld [vmem:[#allocation2 + $0x108] sm:$0xff]  ;;  %1748 = vmatprep.subr.bf16.mxu1 %v10264_v8  ;;  %v10277_v18 = vcombine.low %v96_v6, %v104_v7 }
  0x4f   :  { %v120_v15 = vld [vmem:[#allocation2 + $0x140] sm:$0xff]  ;;  %v121_v17 = vld [vmem:[#allocation2 + $0x148] sm:$0xff]  ;;  %1708 = vmatpush1.bf16.msra.mxu0 %v10261_v5  ;;  %1749 = vmatpush1.bf16.msra.mxu1 %v10263_v9  ;;  %v10279_v19 = vcombine.low %v97_v11, %v105_v12 }
  0x50   :  { %1709 = vmatprep.subr.bf16.mxu0 %v10278_v10  ;;  %v10294_v20 = vcombine.high %v112_v13, %v120_v15  ;;  %1750 = vmatprep.subr.bf16.mxu1 %v10280_v14  ;;  %v10296_v21 = vcombine.high %v113_v16, %v121_v17  ;;  %v128_v22 = vld [vmem:[#allocation2 + $0x180] sm:$0xff]  ;;  %v129_v24 = vld [vmem:[#allocation2 + $0x188] sm:$0xff]  ;;  %v10293_v26 = vcombine.low %v112_v13, %v120_v15 }
  0x51   :  { %v136_v23 = vld [vmem:[#allocation2 + $0x1c0] sm:$0xff]  ;;  %v137_v25 = vld [vmem:[#allocation2 + $0x1c8] sm:$0xff]  ;;  %v10295_v27 = vcombine.low %v113_v16, %v121_v17 }
  0x52   :  { %v10310_v28 = vcombine.high %v128_v22, %v136_v23  ;;  %v10312_v29 = vcombine.high %v129_v24, %v137_v25  ;;  %v144_v30 = vld [vmem:[#allocation2 + $0x200] sm:$0xff]  ;;  %v145_v32 = vld [vmem:[#allocation2 + $0x208] sm:$0xff]  ;;  %v10309_v34 = vcombine.low %v128_v22, %v136_v23  ;;  %v10311_v35 = vcombine.low %v129_v24, %v137_v25 }
  0x53   :  { %1710 = vmatpush1.bf16.msra.mxu0 %v10277_v18  ;;  %1751 = vmatpush1.bf16.msra.mxu1 %v10279_v19  ;;  %v152_v31 = vld [vmem:[#allocation2 + $0x240] sm:$0xff]  ;;  %v153_v33 = vld [vmem:[#allocation2 + $0x248] sm:$0xff] }
  0x54   :  { %1711 = vmatprep.subr.bf16.mxu0 %v10294_v20  ;;  %1752 = vmatprep.subr.bf16.mxu1 %v10296_v21  ;;  %v10326_v36 = vcombine.high %v144_v30, %v152_v31  ;;  %v10328_v37 = vcombine.high %v145_v32, %v153_v33  ;;  %v160_v38 = vld [vmem:[#allocation2 + $0x280] sm:$0xff]  ;;  %v161_v40 = vld [vmem:[#allocation2 + $0x288] sm:$0xff]  ;;  %v10325_v42 = vcombine.low %v144_v30, %v152_v31 }
  0x55   :  { %v168_v39 = vld [vmem:[#allocation2 + $0x2c0] sm:$0xff]  ;;  %v169_v41 = vld [vmem:[#allocation2 + $0x2c8] sm:$0xff]  ;;  %v10327_v43 = vcombine.low %v145_v32, %v153_v33 }
  0x56   :  { %v10342_v44 = vcombine.high %v160_v38, %v168_v39  ;;  %v10344_v45 = vcombine.high %v161_v40, %v169_v41  ;;  %v176_v46 = vld [vmem:[#allocation2 + $0x300] sm:$0xff]  ;;  %v177_v48 = vld [vmem:[#allocation2 + $0x308] sm:$0xff]  ;;  %v10341_v50 = vcombine.low %v160_v38, %v168_v39  ;;  %v10343_v51 = vcombine.low %v161_v40, %v169_v41 }
  0x57   :  { %1712 = vmatpush1.bf16.msra.mxu0 %v10293_v26  ;;  %1753 = vmatpush1.bf16.msra.mxu1 %v10295_v27  ;;  %v184_v47 = vld [vmem:[#allocation2 + $0x340] sm:$0xff]  ;;  %v185_v49 = vld [vmem:[#allocation2 + $0x348] sm:$0xff] }
  0x58   :  { %1713 = vmatprep.subr.bf16.mxu0 %v10310_v28  ;;  %1754 = vmatprep.subr.bf16.mxu1 %v10312_v29  ;;  %v10358_v52 = vcombine.high %v176_v46, %v184_v47  ;;  %v12120_v53 = vld [vmem:[%s12590_s0] sm:$0xff]  ;;  %v10360_v54 = vcombine.high %v177_v48, %v185_v49  ;;  %v193_v58 = vld [vmem:[#allocation2 + $0x388] sm:$0xff]  ;;  %v10357_v60 = vcombine.low %v176_v46, %v184_v47 }
  0x59   :  { %v192_v55 = vld [vmem:[#allocation2 + $0x380] sm:$0xff]  ;;  %v12124_v57 = vcombine.high %v12120_v53, %v12120_v53  ;;  %v201_v59 = vld [vmem:[#allocation2 + $0x3c8] sm:$0xff]  ;;  %v10359_v61 = vcombine.low %v177_v48, %v185_v49 }
  0x5a   :  { %v200_v56 = vld [vmem:[#allocation2 + $0x3c0] sm:$0xff]  ;;  %v10376_v63 = vcombine.high %v193_v58, %v201_v59  ;;  %v209_v2 = vld [vmem:[#allocation2 + $0x408] sm:$0xff]  ;;  %v10375_v5 = vcombine.low %v193_v58, %v201_v59 }
  0x5b   :  { %1714 = vmatpush1.bf16.msra.mxu0 %v10309_v34  ;;  %1755 = vmatpush1.bf16.msra.mxu1 %v10311_v35  ;;  %v10374_v62 = vcombine.high %v192_v55, %v200_v56  ;;  %v208_v0 = vld [vmem:[#allocation2 + $0x400] sm:$0xff]  ;;  %v217_v3 = vld [vmem:[#allocation2 + $0x448] sm:$0xff]  ;;  %v10373_v4 = vcombine.low %v192_v55, %v200_v56 }
  0x5c   :  { %1715 = vmatprep.subr.bf16.mxu0 %v10326_v36  ;;  %1756 = vmatprep.subr.bf16.mxu1 %v10328_v37  ;;  %v216_v1 = vld [vmem:[#allocation2 + $0x440] sm:$0xff]  ;;  %v10392_v7 = vcombine.high %v209_v2, %v217_v3  ;;  %v225_v10 = vld [vmem:[#allocation2 + $0x488] sm:$0xff]  ;;  %v10391_v13 = vcombine.low %v209_v2, %v217_v3  ;;  %v82_v2 = vld [vmem:[#allocation2 + $0x10] sm:$0xff] }
  0x5d   :  { %1739 = vmatprep.mubr.bf16.mxu0 %v12124_v57  ;;  %1780 = vmatprep.mubr.bf16.mxu1 %v12124_v57  ;;  %v10390_v6 = vcombine.high %v208_v0, %v216_v1  ;;  %v224_v8 = vld [vmem:[#allocation2 + $0x480] sm:$0xff]  ;;  %v233_v11 = vld [vmem:[#allocation2 + $0x4c8] sm:$0xff]  ;;  %v10389_v12 = vcombine.low %v208_v0, %v216_v1  ;;  %v90_v3 = vld [vmem:[#allocation2 + $0x50] sm:$0xff] }
  0x5e   :  { %v232_v9 = vld [vmem:[#allocation2 + $0x4c0] sm:$0xff]  ;;  %v10408_v15 = vcombine.high %v225_v10, %v233_v11  ;;  %v241_v18 = vld [vmem:[#allocation2 + $0x508] sm:$0xff]  ;;  %v10407_v21 = vcombine.low %v225_v10, %v233_v11  ;;  %v98_v10 = vld [vmem:[#allocation2 + $0x90] sm:$0xff] }
  0x5f   :  { %1716 = vmatpush1.bf16.msra.mxu0 %v10325_v42  ;;  %1757 = vmatpush1.bf16.msra.mxu1 %v10327_v43  ;;  %v10406_v14 = vcombine.high %v224_v8, %v232_v9  ;;  %v240_v16 = vld [vmem:[#allocation2 + $0x500] sm:$0xff]  ;;  %v249_v19 = vld [vmem:[#allocation2 + $0x548] sm:$0xff]  ;;  %v10405_v20 = vcombine.low %v224_v8, %v232_v9  ;;  %v10266_v8 = vcombine.high %v82_v2, %v90_v3  ;;  %v106_v11 = vld [vmem:[#allocation2 + $0xd0] sm:$0xff] }
  0x60   :  { %1717 = vmatprep.subr.bf16.mxu0 %v10342_v44  ;;  %1758 = vmatprep.subr.bf16.mxu1 %v10344_v45  ;;  %v248_v17 = vld [vmem:[#allocation2 + $0x540] sm:$0xff]  ;;  %v10424_v23 = vcombine.high %v241_v18, %v249_v19  ;;  %v257_v26 = vld [vmem:[#allocation2 + $0x588] sm:$0xff]  ;;  %v10423_v29 = vcombine.low %v241_v18, %v249_v19  ;;  %v114_v18 = vld [vmem:[#allocation2 + $0x110] sm:$0xff] }
  0x61   :  { %v10422_v22 = vcombine.high %v240_v16, %v248_v17  ;;  %v256_v24 = vld [vmem:[#allocation2 + $0x580] sm:$0xff]  ;;  %v265_v27 = vld [vmem:[#allocation2 + $0x5c8] sm:$0xff]  ;;  %v10421_v28 = vcombine.low %v240_v16, %v248_v17  ;;  %v10282_v17 = vcombine.high %v98_v10, %v106_v11  ;;  %v122_v19 = vld [vmem:[#allocation2 + $0x150] sm:$0xff] }
  0x62   :  { %v264_v25 = vld [vmem:[#allocation2 + $0x5c0] sm:$0xff]  ;;  %v10440_v31 = vcombine.high %v257_v26, %v265_v27  ;;  %v273_v34 = vld [vmem:[#allocation2 + $0x608] sm:$0xff]  ;;  %v10439_v37 = vcombine.low %v257_v26, %v265_v27  ;;  %v138_v26 = vld [vmem:[#allocation2 + $0x1d0] sm:$0xff] }
  0x63   :  { %1718 = vmatpush1.bf16.msra.mxu0 %v10341_v50  ;;  %1759 = vmatpush1.bf16.msra.mxu1 %v10343_v51  ;;  %v10438_v30 = vcombine.high %v256_v24, %v264_v25  ;;  %v272_v32 = vld [vmem:[#allocation2 + $0x600] sm:$0xff]  ;;  %v281_v35 = vld [vmem:[#allocation2 + $0x648] sm:$0xff]  ;;  %v10437_v36 = vcombine.low %v256_v24, %v264_v25  ;;  %v10298_v24 = vcombine.high %v114_v18, %v122_v19  ;;  %v130_v25 = vld [vmem:[#allocation2 + $0x190] sm:$0xff] }
  0x64   :  { %1719 = vmatprep.subr.bf16.mxu0 %v10358_v52  ;;  %1760 = vmatprep.subr.bf16.mxu1 %v10360_v54  ;;  %v280_v33 = vld [vmem:[#allocation2 + $0x640] sm:$0xff]  ;;  %v10456_v39 = vcombine.high %v273_v34, %v281_v35  ;;  %v289_v42 = vld [vmem:[#allocation2 + $0x688] sm:$0xff]  ;;  %v10455_v45 = vcombine.low %v273_v34, %v281_v35  ;;  %v131_v27 = vld [vmem:[#allocation2 + $0x198] sm:$0xff] }
  0x65   :  { %v10454_v38 = vcombine.high %v272_v32, %v280_v33  ;;  %v288_v40 = vld [vmem:[#allocation2 + $0x680] sm:$0xff]  ;;  %v297_v43 = vld [vmem:[#allocation2 + $0x6c8] sm:$0xff]  ;;  %v10453_v44 = vcombine.low %v272_v32, %v280_v33  ;;  %v10314_v32 = vcombine.high %v130_v25, %v138_v26  ;;  %v146_v33 = vld [vmem:[#allocation2 + $0x210] sm:$0xff] }
  0x66   :  { %v296_v41 = vld [vmem:[#allocation2 + $0x6c0] sm:$0xff]  ;;  %v10472_v47 = vcombine.high %v289_v42, %v297_v43  ;;  %v305_v50 = vld [vmem:[#allocation2 + $0x708] sm:$0xff]  ;;  %v10471_v54 = vcombine.low %v289_v42, %v297_v43  ;;  %v154_v34 = vld [vmem:[#allocation2 + $0x250] sm:$0xff] }
  0x67   :  { %1720 = vmatpush1.bf16.msra.mxu0 %v10357_v60  ;;  %1761 = vmatpush1.bf16.msra.mxu1 %v10359_v61  ;;  %v10470_v46 = vcombine.high %v288_v40, %v296_v41  ;;  %v304_v48 = vld [vmem:[#allocation2 + $0x700] sm:$0xff]  ;;  %v313_v51 = vld [vmem:[#allocation2 + $0x748] sm:$0xff]  ;;  %v10469_v52 = vcombine.low %v288_v40, %v296_v41  ;;  %v147_v35 = vld [vmem:[#allocation2 + $0x218] sm:$0xff]  ;;  %v10330_v40 = vcombine.high %v146_v33, %v154_v34 }
  0x68   :  { %1721 = vmatprep.subr.bf16.mxu0 %v10374_v62  ;;  %1762 = vmatprep.subr.bf16.mxu1 %v10376_v63  ;;  %v312_v49 = vld [vmem:[#allocation2 + $0x740] sm:$0xff]  ;;  %v10488_v56 = vcombine.high %v305_v50, %v313_v51  ;;  %v321_v60 = vld [vmem:[#allocation2 + $0x788] sm:$0xff]  ;;  %v10487_v63 = vcombine.low %v305_v50, %v313_v51  ;;  %v162_v41 = vld [vmem:[#allocation2 + $0x290] sm:$0xff] }
  0x69   :  { %v10486_v55 = vcombine.high %v304_v48, %v312_v49  ;;  %v320_v58 = vld [vmem:[#allocation2 + $0x780] sm:$0xff]  ;;  %v329_v61 = vld [vmem:[#allocation2 + $0x7c8] sm:$0xff]  ;;  %v10485_v62 = vcombine.low %v304_v48, %v312_v49  ;;  %v170_v42 = vld [vmem:[#allocation2 + $0x2d0] sm:$0xff] }
  0x6a   :  { %v328_v59 = vld [vmem:[#allocation2 + $0x7c0] sm:$0xff]  ;;  %v10504_v1 = vcombine.high %v321_v60, %v329_v61  ;;  %v163_v43 = vld [vmem:[#allocation2 + $0x298] sm:$0xff]  ;;  %v10346_v48 = vcombine.high %v162_v41, %v170_v42  ;;  %v178_v49 = vld [vmem:[#allocation2 + $0x310] sm:$0xff] }
  0x6b   :  { %1722 = vmatpush1.bf16.msra.mxu0 %v10373_v4  ;;  %1763 = vmatpush1.bf16.msra.mxu1 %v10375_v5  ;;  %v10502_v0 = vcombine.high %v320_v58, %v328_v59  ;;  %v83_v4 = vld [vmem:[#allocation2 + $0x18] sm:$0xff]  ;;  %v186_v50 = vld [vmem:[#allocation2 + $0x350] sm:$0xff] }
  0x6c   :  { %1723 = vmatprep.subr.bf16.mxu0 %v10390_v6  ;;  %1764 = vmatprep.subr.bf16.mxu1 %v10392_v7  ;;  %v91_v5 = vld [vmem:[#allocation2 + $0x58] sm:$0xff]  ;;  %v10501_v6 = vcombine.low %v320_v58, %v328_v59  ;;  %v10503_v7 = vcombine.low %v321_v60, %v329_v61  ;;  %v10362_v58 = vcombine.high %v178_v49, %v186_v50  ;;  %v194_v59 = vld [vmem:[#allocation2 + $0x390] sm:$0xff] }
  0x6d   :  { %v10268_v9 = vcombine.high %v83_v4, %v91_v5  ;;  %v10267_v16 = vcombine.low %v83_v4, %v91_v5  ;;  %v179_v51 = vld [vmem:[#allocation2 + $0x318] sm:$0xff]  ;;  %v202_v60 = vld [vmem:[#allocation2 + $0x3d0] sm:$0xff] }
  0x6e   :  { %v195_v61 = vld [vmem:[#allocation2 + $0x398] sm:$0xff]  ;;  %v218_v4 = vld [vmem:[#allocation2 + $0x450] sm:$0xff] }
  0x6f   :  { %1724 = vmatpush1.bf16.msra.mxu0 %v10389_v12  ;;  %1765 = vmatpush1.bf16.msra.mxu1 %v10391_v13  ;;  %v12130_v12 = vcombine.low %v12120_v53, %v12120_v53  ;;  %v99_v13 = vld [vmem:[#allocation2 + $0x98] sm:$0xff]  ;;  %v10281_v53 = vcombine.low %v98_v10, %v106_v11  ;;  %v226_v11 = vld [vmem:[#allocation2 + $0x490] sm:$0xff] }
  0x70   :  { %1725 = vmatprep.subr.bf16.mxu0 %v10406_v14  ;;  %1766 = vmatprep.subr.bf16.mxu1 %v10408_v15  ;;  %v107_v14 = vld [vmem:[#allocation2 + $0xd8] sm:$0xff]  ;;  %v10265_v15 = vcombine.low %v82_v2, %v90_v3  ;;  %v10378_v2 = vcombine.high %v194_v59, %v202_v60  ;;  %v210_v3 = vld [vmem:[#allocation2 + $0x410] sm:$0xff] }
  0x71   :  { %v211_v5 = vld [vmem:[#allocation2 + $0x418] sm:$0xff]  ;;  %v10394_v10 = vcombine.high %v210_v3, %v218_v4 }
  0x73   :  { %1726 = vmatpush1.bf16.msra.mxu0 %v10405_v20  ;;  %1767 = vmatpush1.bf16.msra.mxu1 %v10407_v21  ;;  %v115_v20 = vld [vmem:[#allocation2 + $0x118] sm:$0xff]  ;;  %v10284_v21 = vcombine.high %v99_v13, %v107_v14 }
  0x74   :  { %1727 = vmatprep.subr.bf16.mxu0 %v10422_v22  ;;  %1768 = vmatprep.subr.bf16.mxu1 %v10424_v23  ;;  %v123_v22 = vld [vmem:[#allocation2 + $0x158] sm:$0xff]  ;;  %v10283_v23 = vcombine.low %v99_v13, %v107_v14  ;;  %v234_v13 = vld [vmem:[#allocation2 + $0x4d0] sm:$0xff] }
  0x75   :  { %v227_v14 = vld [vmem:[#allocation2 + $0x498] sm:$0xff] }
  0x77   :  { %1728 = vmatpush1.bf16.msra.mxu0 %v10421_v28  ;;  %1769 = vmatpush1.bf16.msra.mxu1 %v10423_v29  ;;  %v10300_v28 = vcombine.high %v115_v20, %v123_v22  ;;  %v139_v29 = vld [vmem:[#allocation2 + $0x1d8] sm:$0xff] }
  0x78   :  { %1729 = vmatprep.subr.bf16.mxu0 %v10438_v30  ;;  %1770 = vmatprep.subr.bf16.mxu1 %v10440_v31  ;;  %v10297_v30 = vcombine.low %v114_v18, %v122_v19  ;;  %v10299_v31 = vcombine.low %v115_v20, %v123_v22  ;;  %v10410_v19 = vcombine.high %v226_v11, %v234_v13  ;;  %v242_v20 = vld [vmem:[#allocation2 + $0x510] sm:$0xff]  ;;  %v243_v22 = vld [vmem:[#allocation2 + $0x518] sm:$0xff] }
  0x7b   :  { %1730 = vmatpush1.bf16.msra.mxu0 %v10437_v36  ;;  %1771 = vmatpush1.bf16.msra.mxu1 %v10439_v37  ;;  %v10316_v36 = vcombine.high %v131_v27, %v139_v29  ;;  %v155_v37 = vld [vmem:[#allocation2 + $0x258] sm:$0xff] }
  0x7c   :  { %1731 = vmatprep.subr.bf16.mxu0 %v10454_v38  ;;  %1772 = vmatprep.subr.bf16.mxu1 %v10456_v39  ;;  %v10313_v38 = vcombine.low %v130_v25, %v138_v26  ;;  %v10315_v39 = vcombine.low %v131_v27, %v139_v29  ;;  %v258_v27 = vld [vmem:[#allocation2 + $0x590] sm:$0xff]  ;;  %v259_v29 = vld [vmem:[#allocation2 + $0x598] sm:$0xff] }
  0x7f   :  { %1732 = vmatpush1.bf16.msra.mxu0 %v10453_v44  ;;  %1773 = vmatpush1.bf16.msra.mxu1 %v10455_v45  ;;  %v10332_v44 = vcombine.high %v147_v35, %v155_v37  ;;  %v171_v45 = vld [vmem:[#allocation2 + $0x2d8] sm:$0xff] }
  0x80   :  { %1733 = vmatprep.subr.bf16.mxu0 %v10470_v46  ;;  %1774 = vmatprep.subr.bf16.mxu1 %v10472_v47  ;;  %v10329_v46 = vcombine.low %v146_v33, %v154_v34  ;;  %v10331_v47 = vcombine.low %v147_v35, %v155_v37  ;;  %v274_v35 = vld [vmem:[#allocation2 + $0x610] sm:$0xff]  ;;  %v275_v37 = vld [vmem:[#allocation2 + $0x618] sm:$0xff] }
  0x83   :  { %1734 = vmatpush1.bf16.msra.mxu0 %v10469_v52  ;;  %1775 = vmatpush1.bf16.msra.mxu1 %v10471_v54  ;;  %v10348_v52 = vcombine.high %v163_v43, %v171_v45  ;;  %v187_v54 = vld [vmem:[#allocation2 + $0x358] sm:$0xff] }
  0x84   :  { %1735 = vmatprep.subr.bf16.mxu0 %v10486_v55  ;;  %1776 = vmatprep.subr.bf16.mxu1 %v10488_v56  ;;  %v10345_v55 = vcombine.low %v162_v41, %v170_v42  ;;  %v10347_v56 = vcombine.low %v163_v43, %v171_v45  ;;  %v290_v43 = vld [vmem:[#allocation2 + $0x690] sm:$0xff]  ;;  %v291_v45 = vld [vmem:[#allocation2 + $0x698] sm:$0xff] }
  0x87   :  { %1736 = vmatpush1.bf16.msra.mxu0 %v10485_v62  ;;  %1777 = vmatpush1.bf16.msra.mxu1 %v10487_v63  ;;  %v10364_v62 = vcombine.high %v179_v51, %v187_v54  ;;  %v203_v63 = vld [vmem:[#allocation2 + $0x3d8] sm:$0xff] }
  0x88   :  { %1737 = vmatprep.subr.bf16.mxu0 %v10502_v0  ;;  %1778 = vmatprep.subr.bf16.mxu1 %v10504_v1  ;;  %v10361_v0 = vcombine.low %v178_v49, %v186_v50  ;;  %v10363_v1 = vcombine.low %v179_v51, %v187_v54  ;;  %v306_v51 = vld [vmem:[#allocation2 + $0x710] sm:$0xff]  ;;  %v307_v54 = vld [vmem:[#allocation2 + $0x718] sm:$0xff] }
  0x8b   :  { %1738 = vmatpush1.bf16.msra.mxu0 %v10501_v6  ;;  %1779 = vmatpush1.bf16.msra.mxu1 %v10503_v7  ;;  %v10380_v6 = vcombine.high %v195_v61, %v203_v63  ;;  %v219_v7 = vld [vmem:[#allocation2 + $0x458] sm:$0xff] }
  0x8c   :  { %1789 = vmatprep.subr.bf16.mxu0 %v10266_v8  ;;  %1830 = vmatprep.subr.bf16.mxu1 %v10268_v9  ;;  %v10377_v8 = vcombine.low %v194_v59, %v202_v60  ;;  %v10379_v9 = vcombine.low %v195_v61, %v203_v63  ;;  %v10395_v18 = vcombine.low %v211_v5, %v219_v7  ;;  %v322_v61 = vld [vmem:[#allocation2 + $0x790] sm:$0xff]  ;;  %v323_v63 = vld [vmem:[#allocation2 + $0x798] sm:$0xff] }
  0x8e   :  { %1740 = vmatmul.mubr.bf16.vlgmr.msra.gmra.mrb[0].mxu0 %v12130_v12  ;;  %1781 = vmatmul.mubr.bf16.vlgmr.msra.gmra.mrb[0].mxu1 %v12130_v12 }
  0x8f   :  { %1790 = vmatpush1.bf16.msra.mxu0 %v10265_v15  ;;  %1831 = vmatpush1.bf16.msra.mxu1 %v10267_v16  ;;  %v10396_v15 = vcombine.high %v211_v5, %v219_v7  ;;  %v235_v16 = vld [vmem:[#allocation2 + $0x4d8] sm:$0xff]  ;;  %v84_v5 = vld [vmem:[#allocation2 + $0x20] sm:$0xff]  ;;  %v85_v7 = vld [vmem:[#allocation2 + $0x28] sm:$0xff] }
  0x90   :  { %1791 = vmatprep.subr.bf16.mxu0 %v10282_v17  ;;  %1832 = vmatprep.subr.bf16.mxu1 %v10284_v21  ;;  %v10393_v17 = vcombine.low %v210_v3, %v218_v4  ;;  %v250_v21 = vld [vmem:[#allocation2 + $0x550] sm:$0xff]  ;;  %v10411_v25 = vcombine.low %v227_v14, %v235_v16 }
  0x91   :  { %1821 = vmatprep.mubr.bf16.mxu0 %v12124_v57  ;;  %1862 = vmatprep.mubr.bf16.mxu1 %v12124_v57  ;;  %v10426_v26 = vcombine.high %v242_v20, %v250_v21 }
  0x93   :  { %1792 = vmatpush1.bf16.msra.mxu0 %v10281_v53  ;;  %1833 = vmatpush1.bf16.msra.mxu1 %v10283_v23  ;;  %v10412_v53 = vcombine.high %v227_v14, %v235_v16  ;;  %v251_v23 = vld [vmem:[#allocation2 + $0x558] sm:$0xff]  ;;  %v100_v14 = vld [vmem:[#allocation2 + $0xa0] sm:$0xff]  ;;  %v101_v16 = vld [vmem:[#allocation2 + $0xa8] sm:$0xff] }
  0x94   :  { %1793 = vmatprep.subr.bf16.mxu0 %v10298_v24  ;;  %1834 = vmatprep.subr.bf16.mxu1 %v10300_v28  ;;  %v10409_v24 = vcombine.low %v226_v11, %v234_v13  ;;  %v266_v28 = vld [vmem:[#allocation2 + $0x5d0] sm:$0xff]  ;;  %v10427_v33 = vcombine.low %v243_v22, %v251_v23 }
  0x95   :  { %v10442_v34 = vcombine.high %v258_v27, %v266_v28 }
  0x97   :  { %1794 = vmatpush1.bf16.msra.mxu0 %v10297_v30  ;;  %1835 = vmatpush1.bf16.msra.mxu1 %v10299_v31  ;;  %v10428_v30 = vcombine.high %v243_v22, %v251_v23  ;;  %v267_v31 = vld [vmem:[#allocation2 + $0x5d8] sm:$0xff]  ;;  %v124_v23 = vld [vmem:[#allocation2 + $0x160] sm:$0xff] }
  0x98   :  { %1795 = vmatprep.subr.bf16.mxu0 %v10314_v32  ;;  %1836 = vmatprep.subr.bf16.mxu1 %v10316_v36  ;;  %v10425_v32 = vcombine.low %v242_v20, %v250_v21  ;;  %v282_v36 = vld [vmem:[#allocation2 + $0x650] sm:$0xff]  ;;  %v10443_v41 = vcombine.low %v259_v29, %v267_v31 }
  0x99   :  { %v10458_v42 = vcombine.high %v274_v35, %v282_v36 }
  0x9b   :  { %1796 = vmatpush1.bf16.msra.mxu0 %v10313_v38  ;;  %1837 = vmatpush1.bf16.msra.mxu1 %v10315_v39  ;;  %v10444_v38 = vcombine.high %v259_v29, %v267_v31  ;;  %v283_v39 = vld [vmem:[#allocation2 + $0x658] sm:$0xff]  ;;  %v140_v31 = vld [vmem:[#allocation2 + $0x1e0] sm:$0xff] }
  0x9c   :  { %1797 = vmatprep.subr.bf16.mxu0 %v10330_v40  ;;  %1838 = vmatprep.subr.bf16.mxu1 %v10332_v44  ;;  %v10441_v40 = vcombine.low %v258_v27, %v266_v28  ;;  %v298_v44 = vld [vmem:[#allocation2 + $0x6d0] sm:$0xff]  ;;  %v10459_v49 = vcombine.low %v275_v37, %v283_v39 }
  0x9d   :  { %v10474_v50 = vcombine.high %v290_v43, %v298_v44 }
  0x9f   :  { %1798 = vmatpush1.bf16.msra.mxu0 %v10329_v46  ;;  %1839 = vmatpush1.bf16.msra.mxu1 %v10331_v47  ;;  %v10460_v46 = vcombine.high %v275_v37, %v283_v39  ;;  %v299_v47 = vld [vmem:[#allocation2 + $0x6d8] sm:$0xff]  ;;  %v156_v39 = vld [vmem:[#allocation2 + $0x260] sm:$0xff] }
  0xa0   :  { %1799 = vmatprep.subr.bf16.mxu0 %v10346_v48  ;;  %1840 = vmatprep.subr.bf16.mxu1 %v10348_v52  ;;  %v10457_v48 = vcombine.low %v274_v35, %v282_v36  ;;  %v314_v52 = vld [vmem:[#allocation2 + $0x750] sm:$0xff]  ;;  %v10475_v59 = vcombine.low %v291_v45, %v299_v47 }
  0xa1   :  { %v10490_v60 = vcombine.high %v306_v51, %v314_v52 }
  0xa3   :  { %1800 = vmatpush1.bf16.msra.mxu0 %v10345_v55  ;;  %1841 = vmatpush1.bf16.msra.mxu1 %v10347_v56  ;;  %v10476_v55 = vcombine.high %v291_v45, %v299_v47  ;;  %v315_v56 = vld [vmem:[#allocation2 + $0x758] sm:$0xff]  ;;  %v172_v47 = vld [vmem:[#allocation2 + $0x2e0] sm:$0xff] }
  0xa4   :  { %1801 = vmatprep.subr.bf16.mxu0 %v10362_v58  ;;  %1842 = vmatprep.subr.bf16.mxu1 %v10364_v62  ;;  %v10473_v58 = vcombine.low %v290_v43, %v298_v44  ;;  %v330_v62 = vld [vmem:[#allocation2 + $0x7d0] sm:$0xff]  ;;  %v10491_v3 = vcombine.low %v307_v54, %v315_v56 }
  0xa5   :  { %v10506_v4 = vcombine.high %v322_v61, %v330_v62 }
  0xa7   :  { %1802 = vmatpush1.bf16.msra.mxu0 %v10361_v0  ;;  %1843 = vmatpush1.bf16.msra.mxu1 %v10363_v1  ;;  %v10492_v0 = vcombine.high %v307_v54, %v315_v56  ;;  %v331_v1 = vld [vmem:[#allocation2 + $0x7d8] sm:$0xff]  ;;  %v188_v56 = vld [vmem:[#allocation2 + $0x360] sm:$0xff] }
  0xa8   :  { %1803 = vmatprep.subr.bf16.mxu0 %v10378_v2  ;;  %1844 = vmatprep.subr.bf16.mxu1 %v10380_v6  ;;  %v10489_v2 = vcombine.low %v306_v51, %v314_v52  ;;  %v92_v6 = vld [vmem:[#allocation2 + $0x60] sm:$0xff]  ;;  %v10507_v11 = vcombine.low %v323_v63, %v331_v1 }
  0xa9   :  { %v10270_v13 = vcombine.high %v84_v5, %v92_v6 }
  0xab   :  { %1804 = vmatpush1.bf16.msra.mxu0 %v10377_v8  ;;  %1845 = vmatpush1.bf16.msra.mxu1 %v10379_v9  ;;  %v10508_v8 = vcombine.high %v323_v63, %v331_v1  ;;  %v93_v9 = vld [vmem:[#allocation2 + $0x68] sm:$0xff]  ;;  %v204_v1 = vld [vmem:[#allocation2 + $0x3e0] sm:$0xff] }
  0xac   :  { %1805 = vmatprep.subr.bf16.mxu0 %v10394_v10  ;;  %1846 = vmatprep.subr.bf16.mxu1 %v10396_v15  ;;  %v10505_v10 = vcombine.low %v322_v61, %v330_v62  ;;  %v108_v15 = vld [vmem:[#allocation2 + $0xe0] sm:$0xff]  ;;  %v10271_v20 = vcombine.low %v85_v7, %v93_v9 }
  0xad   :  { %v10286_v21 = vcombine.high %v100_v14, %v108_v15 }
  0xaf   :  { %1806 = vmatpush1.bf16.msra.mxu0 %v10393_v17  ;;  %1847 = vmatpush1.bf16.msra.mxu1 %v10395_v18  ;;  %v10272_v17 = vcombine.high %v85_v7, %v93_v9  ;;  %v109_v18 = vld [vmem:[#allocation2 + $0xe8] sm:$0xff]  ;;  %v220_v9 = vld [vmem:[#allocation2 + $0x460] sm:$0xff] }
  0xb0   :  { %1807 = vmatprep.subr.bf16.mxu0 %v10410_v19  ;;  %1848 = vmatprep.subr.bf16.mxu1 %v10412_v53  ;;  %v10269_v19 = vcombine.low %v84_v5, %v92_v6  ;;  %v10288_v22 = vcombine.high %v101_v16, %v109_v18  ;;  %v116_v53 = vld [vmem:[#allocation2 + $0x120] sm:$0xff]  ;;  %v10287_v27 = vcombine.low %v101_v16, %v109_v18 }
  0xb1   :  { %v10302_v28 = vcombine.high %v116_v53, %v124_v23  ;;  %v236_v18 = vld [vmem:[#allocation2 + $0x4e0] sm:$0xff] }
  0xb3   :  { %1808 = vmatpush1.bf16.msra.mxu0 %v10409_v24  ;;  %1849 = vmatpush1.bf16.msra.mxu1 %v10411_v25  ;;  %v117_v24 = vld [vmem:[#allocation2 + $0x128] sm:$0xff] }
  0xb4   :  { %1809 = vmatprep.subr.bf16.mxu0 %v10426_v26  ;;  %1850 = vmatprep.subr.bf16.mxu1 %v10428_v30  ;;  %v125_v25 = vld [vmem:[#allocation2 + $0x168] sm:$0xff]  ;;  %v10285_v26 = vcombine.low %v100_v14, %v108_v15  ;;  %v132_v30 = vld [vmem:[#allocation2 + $0x1a0] sm:$0xff] }
  0xb5   :  { %v10304_v29 = vcombine.high %v117_v24, %v125_v25  ;;  %v10303_v35 = vcombine.low %v117_v24, %v125_v25  ;;  %v10318_v36 = vcombine.high %v132_v30, %v140_v31  ;;  %v244_v24 = vld [vmem:[#allocation2 + $0x520] sm:$0xff] }
  0xb6   :  { %v252_v25 = vld [vmem:[#allocation2 + $0x560] sm:$0xff] }
  0xb7   :  { %1810 = vmatpush1.bf16.msra.mxu0 %v10425_v32  ;;  %1851 = vmatpush1.bf16.msra.mxu1 %v10427_v33  ;;  %v133_v32 = vld [vmem:[#allocation2 + $0x1a8] sm:$0xff] }
  0xb8   :  { %1811 = vmatprep.subr.bf16.mxu0 %v10442_v34  ;;  %1852 = vmatprep.subr.bf16.mxu1 %v10444_v38  ;;  %v141_v33 = vld [vmem:[#allocation2 + $0x1e8] sm:$0xff]  ;;  %v10301_v34 = vcombine.low %v116_v53, %v124_v23  ;;  %v148_v38 = vld [vmem:[#allocation2 + $0x220] sm:$0xff] }
  0xb9   :  { %v10320_v37 = vcombine.high %v133_v32, %v141_v33  ;;  %v10319_v43 = vcombine.low %v133_v32, %v141_v33  ;;  %v10334_v44 = vcombine.high %v148_v38, %v156_v39  ;;  %v260_v32 = vld [vmem:[#allocation2 + $0x5a0] sm:$0xff] }
  0xba   :  { %v268_v33 = vld [vmem:[#allocation2 + $0x5e0] sm:$0xff] }
  0xbb   :  { %1812 = vmatpush1.bf16.msra.mxu0 %v10441_v40  ;;  %1853 = vmatpush1.bf16.msra.mxu1 %v10443_v41  ;;  %v149_v40 = vld [vmem:[#allocation2 + $0x228] sm:$0xff] }
  0xbc   :  { %1813 = vmatprep.subr.bf16.mxu0 %v10458_v42  ;;  %1854 = vmatprep.subr.bf16.mxu1 %v10460_v46  ;;  %v157_v41 = vld [vmem:[#allocation2 + $0x268] sm:$0xff]  ;;  %v10317_v42 = vcombine.low %v132_v30, %v140_v31  ;;  %v164_v46 = vld [vmem:[#allocation2 + $0x2a0] sm:$0xff]  ;;  %v10430_v30 = vcombine.high %v244_v24, %v252_v25 }
  0xbd   :  { %v10336_v45 = vcombine.high %v149_v40, %v157_v41  ;;  %v10335_v51 = vcombine.low %v149_v40, %v157_v41  ;;  %v10350_v52 = vcombine.high %v164_v46, %v172_v47  ;;  %v276_v40 = vld [vmem:[#allocation2 + $0x620] sm:$0xff] }
  0xbe   :  { %v284_v41 = vld [vmem:[#allocation2 + $0x660] sm:$0xff] }
  0xbf   :  { %1814 = vmatpush1.bf16.msra.mxu0 %v10457_v48  ;;  %1855 = vmatpush1.bf16.msra.mxu1 %v10459_v49  ;;  %v165_v48 = vld [vmem:[#allocation2 + $0x2a8] sm:$0xff] }
  0xc0   :  { %1815 = vmatprep.subr.bf16.mxu0 %v10474_v50  ;;  %1856 = vmatprep.subr.bf16.mxu1 %v10476_v55  ;;  %v173_v49 = vld [vmem:[#allocation2 + $0x2e8] sm:$0xff]  ;;  %v10333_v50 = vcombine.low %v148_v38, %v156_v39  ;;  %v180_v55 = vld [vmem:[#allocation2 + $0x320] sm:$0xff]  ;;  %v10446_v38 = vcombine.high %v260_v32, %v268_v33 }
  0xc1   :  { %v10352_v54 = vcombine.high %v165_v48, %v173_v49  ;;  %v10351_v61 = vcombine.low %v165_v48, %v173_v49  ;;  %v10366_v62 = vcombine.high %v180_v55, %v188_v56  ;;  %v292_v48 = vld [vmem:[#allocation2 + $0x6a0] sm:$0xff] }
  0xc2   :  { %v300_v49 = vld [vmem:[#allocation2 + $0x6e0] sm:$0xff] }
  0xc3   :  { %1816 = vmatpush1.bf16.msra.mxu0 %v10473_v58  ;;  %1857 = vmatpush1.bf16.msra.mxu1 %v10475_v59  ;;  %v181_v58 = vld [vmem:[#allocation2 + $0x328] sm:$0xff] }
  0xc4   :  { %1817 = vmatprep.subr.bf16.mxu0 %v10490_v60  ;;  %1858 = vmatprep.subr.bf16.mxu1 %v10492_v0  ;;  %v189_v59 = vld [vmem:[#allocation2 + $0x368] sm:$0xff]  ;;  %v10349_v60 = vcombine.low %v164_v46, %v172_v47  ;;  %v196_v0 = vld [vmem:[#allocation2 + $0x3a0] sm:$0xff]  ;;  %v10462_v46 = vcombine.high %v276_v40, %v284_v41 }
  0xc5   :  { %v10368_v63 = vcombine.high %v181_v58, %v189_v59  ;;  %v10367_v5 = vcombine.low %v181_v58, %v189_v59  ;;  %v10382_v6 = vcombine.high %v196_v0, %v204_v1  ;;  %v308_v58 = vld [vmem:[#allocation2 + $0x720] sm:$0xff] }
  0xc6   :  { %v316_v59 = vld [vmem:[#allocation2 + $0x760] sm:$0xff] }
  0xc7   :  { %1818 = vmatpush1.bf16.msra.mxu0 %v10489_v2  ;;  %1859 = vmatpush1.bf16.msra.mxu1 %v10491_v3  ;;  %v197_v2 = vld [vmem:[#allocation2 + $0x3a8] sm:$0xff] }
  0xc8   :  { %1819 = vmatprep.subr.bf16.mxu0 %v10506_v4  ;;  %1860 = vmatprep.subr.bf16.mxu1 %v10508_v8  ;;  %v205_v3 = vld [vmem:[#allocation2 + $0x3e8] sm:$0xff]  ;;  %v10365_v4 = vcombine.low %v180_v55, %v188_v56  ;;  %v212_v8 = vld [vmem:[#allocation2 + $0x420] sm:$0xff]  ;;  %v10478_v55 = vcombine.high %v292_v48, %v300_v49 }
  0xc9   :  { %v10384_v7 = vcombine.high %v197_v2, %v205_v3  ;;  %v10383_v14 = vcombine.low %v197_v2, %v205_v3  ;;  %v10398_v15 = vcombine.high %v212_v8, %v220_v9  ;;  %v324_v2 = vld [vmem:[#allocation2 + $0x7a0] sm:$0xff] }
  0xca   :  { %v332_v3 = vld [vmem:[#allocation2 + $0x7e0] sm:$0xff] }
  0xcb   :  { %1820 = vmatpush1.bf16.msra.mxu0 %v10505_v10  ;;  %1861 = vmatpush1.bf16.msra.mxu1 %v10507_v11  ;;  %v213_v10 = vld [vmem:[#allocation2 + $0x428] sm:$0xff] }
  0xcc   :  { %1871 = vmatprep.subr.bf16.mxu0 %v10270_v13  ;;  %1912 = vmatprep.subr.bf16.mxu1 %v10272_v17  ;;  %v221_v11 = vld [vmem:[#allocation2 + $0x468] sm:$0xff]  ;;  %v10381_v13 = vcombine.low %v196_v0, %v204_v1  ;;  %v228_v17 = vld [vmem:[#allocation2 + $0x4a0] sm:$0xff]  ;;  %v10494_v0 = vcombine.high %v308_v58, %v316_v59 }
  0xcd   :  { %v10400_v16 = vcombine.high %v213_v10, %v221_v11  ;;  %v10414_v53 = vcombine.high %v228_v17, %v236_v18 }
  0xce   :  { %1822 = vmatmul.mubr.bf16.vlgmr.msra.gmra.mrb[4].mxu0 %v12130_v12  ;;  %1863 = vmatmul.mubr.bf16.vlgmr.msra.gmra.mrb[4].mxu1 %v12130_v12 }
  0xcf   :  { %1872 = vmatpush1.bf16.msra.mxu0 %v10269_v19  ;;  %1913 = vmatpush1.bf16.msra.mxu1 %v10271_v20  ;;  %v229_v19 = vld [vmem:[#allocation2 + $0x4a8] sm:$0xff] }
  0xd0   :  { %1873 = vmatprep.subr.bf16.mxu0 %v10286_v21  ;;  %1914 = vmatprep.subr.bf16.mxu1 %v10288_v22  ;;  %v237_v20 = vld [vmem:[#allocation2 + $0x4e8] sm:$0xff]  ;;  %v10397_v21 = vcombine.low %v212_v8, %v220_v9  ;;  %v10399_v22 = vcombine.low %v213_v10, %v221_v11  ;;  %v10510_v8 = vcombine.high %v324_v2, %v332_v3  ;;  %v86_v10 = vld [vmem:[#allocation2 + $0x30] sm:$0xff] }
  0xd1   :  { %1903 = vmatprep.mubr.bf16.mxu0 %v12124_v57  ;;  %1944 = vmatprep.mubr.bf16.mxu1 %v12124_v57  ;;  %v10416_v23 = vcombine.high %v229_v19, %v237_v20  ;;  %v94_v11 = vld [vmem:[#allocation2 + $0x70] sm:$0xff] }
  0xd3   :  { %1874 = vmatpush1.bf16.msra.mxu0 %v10285_v26  ;;  %1915 = vmatpush1.bf16.msra.mxu1 %v10287_v27  ;;  %v245_v26 = vld [vmem:[#allocation2 + $0x528] sm:$0xff] }
  0xd4   :  { %1875 = vmatprep.subr.bf16.mxu0 %v10302_v28  ;;  %1916 = vmatprep.subr.bf16.mxu1 %v10304_v29  ;;  %v253_v27 = vld [vmem:[#allocation2 + $0x568] sm:$0xff]  ;;  %v10413_v28 = vcombine.low %v228_v17, %v236_v18  ;;  %v10415_v29 = vcombine.low %v229_v19, %v237_v20  ;;  %v10274_v17 = vcombine.high %v86_v10, %v94_v11  ;;  %v102_v19 = vld [vmem:[#allocation2 + $0xb0] sm:$0xff] }
  0xd5   :  { %v10432_v31 = vcombine.high %v245_v26, %v253_v27  ;;  %v110_v20 = vld [vmem:[#allocation2 + $0xf0] sm:$0xff] }
  0xd7   :  { %1876 = vmatpush1.bf16.msra.mxu0 %v10301_v34  ;;  %1917 = vmatpush1.bf16.msra.mxu1 %v10303_v35  ;;  %v261_v34 = vld [vmem:[#allocation2 + $0x5a8] sm:$0xff] }
  0xd8   :  { %1877 = vmatprep.subr.bf16.mxu0 %v10318_v36  ;;  %1918 = vmatprep.subr.bf16.mxu1 %v10320_v37  ;;  %v269_v35 = vld [vmem:[#allocation2 + $0x5e8] sm:$0xff]  ;;  %v10429_v36 = vcombine.low %v244_v24, %v252_v25  ;;  %v10431_v37 = vcombine.low %v245_v26, %v253_v27  ;;  %v10290_v24 = vcombine.high %v102_v19, %v110_v20  ;;  %v118_v26 = vld [vmem:[#allocation2 + $0x130] sm:$0xff] }
  0xd9   :  { %v10448_v39 = vcombine.high %v261_v34, %v269_v35  ;;  %v126_v27 = vld [vmem:[#allocation2 + $0x170] sm:$0xff] }
  0xdb   :  { %1878 = vmatpush1.bf16.msra.mxu0 %v10317_v42  ;;  %1919 = vmatpush1.bf16.msra.mxu1 %v10319_v43  ;;  %v277_v42 = vld [vmem:[#allocation2 + $0x628] sm:$0xff] }
  0xdc   :  { %1879 = vmatprep.subr.bf16.mxu0 %v10334_v44  ;;  %1920 = vmatprep.subr.bf16.mxu1 %v10336_v45  ;;  %v285_v43 = vld [vmem:[#allocation2 + $0x668] sm:$0xff]  ;;  %v10445_v44 = vcombine.low %v260_v32, %v268_v33  ;;  %v10447_v45 = vcombine.low %v261_v34, %v269_v35  ;;  %v10306_v32 = vcombine.high %v118_v26, %v126_v27  ;;  %v134_v34 = vld [vmem:[#allocation2 + $0x1b0] sm:$0xff] }
  0xdd   :  { %v10464_v47 = vcombine.high %v277_v42, %v285_v43  ;;  %v142_v35 = vld [vmem:[#allocation2 + $0x1f0] sm:$0xff] }
  0xdf   :  { %1880 = vmatpush1.bf16.msra.mxu0 %v10333_v50  ;;  %1921 = vmatpush1.bf16.msra.mxu1 %v10335_v51  ;;  %v293_v50 = vld [vmem:[#allocation2 + $0x6a8] sm:$0xff] }
  0xe0   :  { %1881 = vmatprep.subr.bf16.mxu0 %v10350_v52  ;;  %1922 = vmatprep.subr.bf16.mxu1 %v10352_v54  ;;  %v301_v51 = vld [vmem:[#allocation2 + $0x6e8] sm:$0xff]  ;;  %v10461_v52 = vcombine.low %v276_v40, %v284_v41  ;;  %v10463_v54 = vcombine.low %v277_v42, %v285_v43  ;;  %v10322_v40 = vcombine.high %v134_v34, %v142_v35  ;;  %v150_v42 = vld [vmem:[#allocation2 + $0x230] sm:$0xff] }
  0xe1   :  { %v10480_v56 = vcombine.high %v293_v50, %v301_v51  ;;  %v158_v43 = vld [vmem:[#allocation2 + $0x270] sm:$0xff] }
  0xe3   :  { %1882 = vmatpush1.bf16.msra.mxu0 %v10349_v60  ;;  %1923 = vmatpush1.bf16.msra.mxu1 %v10351_v61  ;;  %v309_v60 = vld [vmem:[#allocation2 + $0x728] sm:$0xff] }
  0xe4   :  { %1883 = vmatprep.subr.bf16.mxu0 %v10366_v62  ;;  %1924 = vmatprep.subr.bf16.mxu1 %v10368_v63  ;;  %v317_v61 = vld [vmem:[#allocation2 + $0x768] sm:$0xff]  ;;  %v10477_v62 = vcombine.low %v292_v48, %v300_v49  ;;  %v10479_v63 = vcombine.low %v293_v50, %v301_v51  ;;  %v10338_v48 = vcombine.high %v150_v42, %v158_v43  ;;  %v166_v49 = vld [vmem:[#allocation2 + $0x2b0] sm:$0xff]  ;;  %v167_v51 = vld [vmem:[#allocation2 + $0x2b8] sm:$0xff] }
  0xe5   :  { %v10496_v1 = vcombine.high %v309_v60, %v317_v61  ;;  %v174_v50 = vld [vmem:[#allocation2 + $0x2f0] sm:$0xff] }
  0xe7   :  { %1884 = vmatpush1.bf16.msra.mxu0 %v10365_v4  ;;  %1925 = vmatpush1.bf16.msra.mxu1 %v10367_v5  ;;  %v325_v4 = vld [vmem:[#allocation2 + $0x7a8] sm:$0xff] }
  0xe8   :  { %1885 = vmatprep.subr.bf16.mxu0 %v10382_v6  ;;  %1926 = vmatprep.subr.bf16.mxu1 %v10384_v7  ;;  %v333_v5 = vld [vmem:[#allocation2 + $0x7e8] sm:$0xff]  ;;  %v10493_v6 = vcombine.low %v308_v58, %v316_v59  ;;  %v10495_v7 = vcombine.low %v309_v60, %v317_v61  ;;  %v182_v59 = vld [vmem:[#allocation2 + $0x330] sm:$0xff]  ;;  %v183_v61 = vld [vmem:[#allocation2 + $0x338] sm:$0xff] }
  0xe9   :  { %v10512_v9 = vcombine.high %v325_v4, %v333_v5  ;;  %v190_v60 = vld [vmem:[#allocation2 + $0x370] sm:$0xff] }
  0xeb   :  { %1886 = vmatpush1.bf16.msra.mxu0 %v10381_v13  ;;  %1927 = vmatpush1.bf16.msra.mxu1 %v10383_v14  ;;  %v87_v13 = vld [vmem:[#allocation2 + $0x38] sm:$0xff] }
  0xec   :  { %1887 = vmatprep.subr.bf16.mxu0 %v10398_v15  ;;  %1928 = vmatprep.subr.bf16.mxu1 %v10400_v16  ;;  %v95_v14 = vld [vmem:[#allocation2 + $0x78] sm:$0xff]  ;;  %v10509_v15 = vcombine.low %v324_v2, %v332_v3  ;;  %v10511_v16 = vcombine.low %v325_v4, %v333_v5  ;;  %v198_v3 = vld [vmem:[#allocation2 + $0x3b0] sm:$0xff] }
  0xed   :  { %v10276_v18 = vcombine.high %v87_v13, %v95_v14  ;;  %v206_v4 = vld [vmem:[#allocation2 + $0x3f0] sm:$0xff]  ;;  %v199_v5 = vld [vmem:[#allocation2 + $0x3b8] sm:$0xff] }
  0xef   :  { %1888 = vmatpush1.bf16.msra.mxu0 %v10397_v21  ;;  %1929 = vmatpush1.bf16.msra.mxu1 %v10399_v22  ;;  %v103_v21 = vld [vmem:[#allocation2 + $0xb8] sm:$0xff] }
  0xf0   :  { %1889 = vmatprep.subr.bf16.mxu0 %v10414_v53  ;;  %1930 = vmatprep.subr.bf16.mxu1 %v10416_v23  ;;  %v111_v22 = vld [vmem:[#allocation2 + $0xf8] sm:$0xff]  ;;  %v10273_v53 = vcombine.low %v86_v10, %v94_v11  ;;  %v10275_v23 = vcombine.low %v87_v13, %v95_v14  ;;  %v214_v11 = vld [vmem:[#allocation2 + $0x430] sm:$0xff] }
  0xf1   :  { %v10292_v25 = vcombine.high %v103_v21, %v111_v22  ;;  %v222_v13 = vld [vmem:[#allocation2 + $0x470] sm:$0xff]  ;;  %v215_v14 = vld [vmem:[#allocation2 + $0x438] sm:$0xff] }
  0xf3   :  { %1890 = vmatpush1.bf16.msra.mxu0 %v10413_v28  ;;  %1931 = vmatpush1.bf16.msra.mxu1 %v10415_v29  ;;  %v119_v28 = vld [vmem:[#allocation2 + $0x138] sm:$0xff] }
  0xf4   :  { %1891 = vmatprep.subr.bf16.mxu0 %v10430_v30  ;;  %1932 = vmatprep.subr.bf16.mxu1 %v10432_v31  ;;  %v127_v29 = vld [vmem:[#allocation2 + $0x178] sm:$0xff]  ;;  %v10289_v30 = vcombine.low %v102_v19, %v110_v20  ;;  %v10291_v31 = vcombine.low %v103_v21, %v111_v22  ;;  %v230_v20 = vld [vmem:[#allocation2 + $0x4b0] sm:$0xff] }
  0xf5   :  { %v10308_v33 = vcombine.high %v119_v28, %v127_v29  ;;  %v238_v21 = vld [vmem:[#allocation2 + $0x4f0] sm:$0xff]  ;;  %v231_v22 = vld [vmem:[#allocation2 + $0x4b8] sm:$0xff] }
  0xf7   :  { %1892 = vmatpush1.bf16.msra.mxu0 %v10429_v36  ;;  %1933 = vmatpush1.bf16.msra.mxu1 %v10431_v37  ;;  %v135_v36 = vld [vmem:[#allocation2 + $0x1b8] sm:$0xff] }
  0xf8   :  { %1893 = vmatprep.subr.bf16.mxu0 %v10446_v38  ;;  %1934 = vmatprep.subr.bf16.mxu1 %v10448_v39  ;;  %v143_v37 = vld [vmem:[#allocation2 + $0x1f8] sm:$0xff]  ;;  %v10305_v38 = vcombine.low %v118_v26, %v126_v27  ;;  %v10307_v39 = vcombine.low %v119_v28, %v127_v29  ;;  %v246_v27 = vld [vmem:[#allocation2 + $0x530] sm:$0xff] }
  0xf9   :  { %v10324_v41 = vcombine.high %v135_v36, %v143_v37  ;;  %v254_v28 = vld [vmem:[#allocation2 + $0x570] sm:$0xff]  ;;  %v247_v29 = vld [vmem:[#allocation2 + $0x538] sm:$0xff] }
  0xfb   :  { %1894 = vmatpush1.bf16.msra.mxu0 %v10445_v44  ;;  %1935 = vmatpush1.bf16.msra.mxu1 %v10447_v45  ;;  %v151_v44 = vld [vmem:[#allocation2 + $0x238] sm:$0xff] }
  0xfc   :  { %1895 = vmatprep.subr.bf16.mxu0 %v10462_v46  ;;  %1936 = vmatprep.subr.bf16.mxu1 %v10464_v47  ;;  %v159_v45 = vld [vmem:[#allocation2 + $0x278] sm:$0xff]  ;;  %v10321_v46 = vcombine.low %v134_v34, %v142_v35  ;;  %v10323_v47 = vcombine.low %v135_v36, %v143_v37  ;;  %v262_v35 = vld [vmem:[#allocation2 + $0x5b0] sm:$0xff] }
  0xfd   :  { %v270_v36 = vld [vmem:[#allocation2 + $0x5f0] sm:$0xff]  ;;  %v263_v37 = vld [vmem:[#allocation2 + $0x5b8] sm:$0xff] }
  0xff   :  { %1896 = vmatpush1.bf16.msra.mxu0 %v10461_v52  ;;  %1937 = vmatpush1.bf16.msra.mxu1 %v10463_v54  ;;  %v175_v52 = vld [vmem:[#allocation2 + $0x2f8] sm:$0xff]  ;;  %v10337_v54 = vcombine.low %v150_v42, %v158_v43  ;;  %v278_v43 = vld [vmem:[#allocation2 + $0x630] sm:$0xff] }
 0x100   :  { %1897 = vmatprep.subr.bf16.mxu0 %v10478_v55  ;;  %1938 = vmatprep.subr.bf16.mxu1 %v10480_v56  ;;  %v10339_v55 = vcombine.low %v151_v44, %v159_v45  ;;  %v10354_v56 = vcombine.high %v166_v49, %v174_v50  ;;  %v10356_v58 = vcombine.high %v167_v51, %v175_v52 }
 0x103   :  { %1898 = vmatpush1.bf16.msra.mxu0 %v10477_v62  ;;  %1939 = vmatpush1.bf16.msra.mxu1 %v10479_v63  ;;  %v191_v62 = vld [vmem:[#allocation2 + $0x378] sm:$0xff]  ;;  %v10353_v63 = vcombine.low %v166_v49, %v174_v50  ;;  %v294_v50 = vld [vmem:[#allocation2 + $0x6b0] sm:$0xff] }
 0x104   :  { %1899 = vmatprep.subr.bf16.mxu0 %v10494_v0  ;;  %1940 = vmatprep.subr.bf16.mxu1 %v10496_v1  ;;  %v10355_v0 = vcombine.low %v167_v51, %v175_v52  ;;  %v10370_v1 = vcombine.high %v182_v59, %v190_v60  ;;  %v10372_v2 = vcombine.high %v183_v61, %v191_v62  ;;  %v302_v51 = vld [vmem:[#allocation2 + $0x6f0] sm:$0xff]  ;;  %v295_v52 = vld [vmem:[#allocation2 + $0x6b8] sm:$0xff] }
 0x107   :  { %1900 = vmatpush1.bf16.msra.mxu0 %v10493_v6  ;;  %1941 = vmatpush1.bf16.msra.mxu1 %v10495_v7  ;;  %v207_v6 = vld [vmem:[#allocation2 + $0x3f8] sm:$0xff]  ;;  %v10369_v7 = vcombine.low %v182_v59, %v190_v60  ;;  %v310_v60 = vld [vmem:[#allocation2 + $0x730] sm:$0xff] }
 0x108   :  { %1901 = vmatprep.subr.bf16.mxu0 %v10510_v8  ;;  %1942 = vmatprep.subr.bf16.mxu1 %v10512_v9  ;;  %v10371_v8 = vcombine.low %v183_v61, %v191_v62  ;;  %v10386_v9 = vcombine.high %v198_v3, %v206_v4  ;;  %v10388_v10 = vcombine.high %v199_v5, %v207_v6  ;;  %v318_v61 = vld [vmem:[#allocation2 + $0x770] sm:$0xff]  ;;  %v311_v62 = vld [vmem:[#allocation2 + $0x738] sm:$0xff] }
 0x10b   :  { %1902 = vmatpush1.bf16.msra.mxu0 %v10509_v15  ;;  %1943 = vmatpush1.bf16.msra.mxu1 %v10511_v16  ;;  %v223_v15 = vld [vmem:[#allocation2 + $0x478] sm:$0xff]  ;;  %v10385_v16 = vcombine.low %v198_v3, %v206_v4  ;;  %v326_v4 = vld [vmem:[#allocation2 + $0x7b0] sm:$0xff] }
 0x10c   :  { %1953 = vmatprep.subr.bf16.mxu0 %v10274_v17  ;;  %1994 = vmatprep.subr.bf16.mxu1 %v10276_v18  ;;  %v10387_v17 = vcombine.low %v199_v5, %v207_v6  ;;  %v10402_v18 = vcombine.high %v214_v11, %v222_v13  ;;  %v10404_v19 = vcombine.high %v215_v14, %v223_v15  ;;  %v334_v5 = vld [vmem:[#allocation2 + $0x7f0] sm:$0xff]  ;;  %v327_v6 = vld [vmem:[#allocation2 + $0x7b8] sm:$0xff] }
 0x10e   :  { %1904 = vmatmul.mubr.bf16.vlgmr.msra.gmra.mrb[8].mxu0 %v12130_v12  ;;  %1945 = vmatmul.mubr.bf16.vlgmr.msra.gmra.mrb[8].mxu1 %v12130_v12 }
 0x10f   :  { %1954 = vmatpush1.bf16.msra.mxu0 %v10273_v53  ;;  %1995 = vmatpush1.bf16.msra.mxu1 %v10275_v23  ;;  %v239_v53 = vld [vmem:[#allocation2 + $0x4f8] sm:$0xff]  ;;  %v10401_v23 = vcombine.low %v214_v11, %v222_v13  ;;  %v2051_v13 = vld [vmem:[#allocation7] sm:$0xff] }
 0x110   :  { %1955 = vmatprep.subr.bf16.mxu0 %v10290_v24  ;;  %1996 = vmatprep.subr.bf16.mxu1 %v10292_v25  ;;  %v10403_v24 = vcombine.low %v215_v14, %v223_v15  ;;  %v10418_v25 = vcombine.high %v230_v20, %v238_v21  ;;  %v10420_v26 = vcombine.high %v231_v22, %v239_v53  ;;  %v2055_v14 = vld [vmem:[#allocation7 + $0x20] sm:$0xff]  ;;  %v2052_v15 = vld [vmem:[#allocation7 + $0x8] sm:$0xff] }
 0x111   :  { %1985 = vmatprep.mubr.bf16.mxu0 %v12124_v57  ;;  %2026 = vmatprep.mubr.bf16.mxu1 %v12124_v57  ;;  %v10340_v57 = vcombine.high %v151_v44, %v159_v45  ;;  %v286_v44 = vld [vmem:[#allocation2 + $0x670] sm:$0xff]  ;;  %v279_v45 = vld [vmem:[#allocation2 + $0x638] sm:$0xff] }
 0x113   :  { %1956 = vmatpush1.bf16.msra.mxu0 %v10289_v30  ;;  %1997 = vmatpush1.bf16.msra.mxu1 %v10291_v31  ;;  %v255_v30 = vld [vmem:[#allocation2 + $0x578] sm:$0xff]  ;;  %v10417_v31 = vcombine.low %v230_v20, %v238_v21  ;;  %v2059_v21 = vld [vmem:[#allocation7 + $0x40] sm:$0xff] }
 0x114   :  { %1957 = vmatprep.subr.bf16.mxu0 %v10306_v32  ;;  %1998 = vmatprep.subr.bf16.mxu1 %v10308_v33  ;;  %v10419_v32 = vcombine.low %v231_v22, %v239_v53  ;;  %v10434_v33 = vcombine.high %v246_v27, %v254_v28  ;;  %v10436_v34 = vcombine.high %v247_v29, %v255_v30  ;;  %v2063_v22 = vld [vmem:[#allocation7 + $0x60] sm:$0xff]  ;;  %v2060_v53 = vld [vmem:[#allocation7 + $0x48] sm:$0xff] }
 0x117   :  { %1958 = vmatpush1.bf16.msra.mxu0 %v10305_v38  ;;  %1999 = vmatpush1.bf16.msra.mxu1 %v10307_v39  ;;  %v271_v38 = vld [vmem:[#allocation2 + $0x5f8] sm:$0xff]  ;;  %v10433_v39 = vcombine.low %v246_v27, %v254_v28  ;;  %v2067_v28 = vld [vmem:[#allocation7 + $0x80] sm:$0xff] }
 0x118   :  { %1959 = vmatprep.subr.bf16.mxu0 %v10322_v40  ;;  %2000 = vmatprep.subr.bf16.mxu1 %v10324_v41  ;;  %v10435_v40 = vcombine.low %v247_v29, %v255_v30  ;;  %v10450_v41 = vcombine.high %v262_v35, %v270_v36  ;;  %v10452_v42 = vcombine.high %v263_v37, %v271_v38  ;;  %v2071_v29 = vld [vmem:[#allocation7 + $0xa0] sm:$0xff]  ;;  %v2068_v30 = vld [vmem:[#allocation7 + $0x88] sm:$0xff] }
 0x11b   :  { %1960 = vmatpush1.bf16.msra.mxu0 %v10321_v46  ;;  %2001 = vmatpush1.bf16.msra.mxu1 %v10323_v47  ;;  %v287_v46 = vld [vmem:[#allocation2 + $0x678] sm:$0xff]  ;;  %v10449_v47 = vcombine.low %v262_v35, %v270_v36  ;;  %v2075_v36 = vld [vmem:[#allocation7 + $0xc0] sm:$0xff] }
 0x11c   :  { %1961 = vmatprep.subr.bf16.mxu0 %v10338_v48  ;;  %2002 = vmatprep.subr.bf16.mxu1 %v10340_v57  ;;  %v10451_v48 = vcombine.low %v263_v37, %v271_v38  ;;  %v10466_v57 = vcombine.high %v278_v43, %v286_v44  ;;  %v10468_v49 = vcombine.high %v279_v45, %v287_v46  ;;  %v2079_v37 = vld [vmem:[#allocation7 + $0xe0] sm:$0xff]  ;;  %v2076_v38 = vld [vmem:[#allocation7 + $0xc8] sm:$0xff] }
 0x11f   :  { %1962 = vmatpush1.bf16.msra.mxu0 %v10337_v54  ;;  %2003 = vmatpush1.bf16.msra.mxu1 %v10339_v55  ;;  %v303_v54 = vld [vmem:[#allocation2 + $0x6f8] sm:$0xff]  ;;  %v10465_v55 = vcombine.low %v278_v43, %v286_v44  ;;  %v10542_v43 = vcombine.high %v2075_v36, %v2079_v37  ;;  %v2083_v44 = vld [vmem:[#allocation7 + $0x100] sm:$0xff] }
 0x120   :  { %1963 = vmatprep.subr.bf16.mxu0 %v10354_v56  ;;  %2004 = vmatprep.subr.bf16.mxu1 %v10356_v58  ;;  %v10467_v56 = vcombine.low %v279_v45, %v287_v46  ;;  %v10482_v58 = vcombine.high %v294_v50, %v302_v51  ;;  %v10484_v59 = vcombine.high %v295_v52, %v303_v54  ;;  %v2087_v45 = vld [vmem:[#allocation7 + $0x120] sm:$0xff]  ;;  %v2084_v46 = vld [vmem:[#allocation7 + $0x108] sm:$0xff] }
 0x123   :  { %1964 = vmatpush1.bf16.msra.mxu0 %v10353_v63  ;;  %2005 = vmatpush1.bf16.msra.mxu1 %v10355_v0  ;;  %v319_v63 = vld [vmem:[#allocation2 + $0x778] sm:$0xff]  ;;  %v10481_v0 = vcombine.low %v294_v50, %v302_v51  ;;  %v10550_v50 = vcombine.high %v2083_v44, %v2087_v45 }
 0x124   :  { %1965 = vmatprep.subr.bf16.mxu0 %v10370_v1  ;;  %2006 = vmatprep.subr.bf16.mxu1 %v10372_v2  ;;  %v10483_v1 = vcombine.low %v295_v52, %v303_v54  ;;  %v10498_v2 = vcombine.high %v310_v60, %v318_v61  ;;  %v10500_v3 = vcombine.high %v311_v62, %v319_v63  ;;  %v2091_v52 = vld [vmem:[#allocation7 + $0x140] sm:$0xff] }
 0x125   :  { %v2095_v54 = vld [vmem:[#allocation7 + $0x160] sm:$0xff] }
 0x127   :  { %1966 = vmatpush1.bf16.msra.mxu0 %v10369_v7  ;;  %2007 = vmatpush1.bf16.msra.mxu1 %v10371_v8  ;;  %v335_v7 = vld [vmem:[#allocation2 + $0x7f8] sm:$0xff]  ;;  %v10497_v8 = vcombine.low %v310_v60, %v318_v61  ;;  %v12151_v61 = vld [vmem:[#allocation5] sm:$0xff] }
 0x128   :  { %1967 = vmatprep.subr.bf16.mxu0 %v10386_v9  ;;  %2008 = vmatprep.subr.bf16.mxu1 %v10388_v10  ;;  %v10499_v9 = vcombine.low %v311_v62, %v319_v63  ;;  %v10514_v10 = vcombine.high %v326_v4, %v334_v5  ;;  %v10516_v11 = vcombine.high %v327_v6, %v335_v7 }
 0x129   :  { %v10558_v62 = vcombine.high %v2091_v52, %v2095_v54 }
 0x12b   :  { %1968 = vmatpush1.bf16.msra.mxu0 %v10385_v16  ;;  %2009 = vmatpush1.bf16.msra.mxu1 %v10387_v17  ;;  %v2056_v16 = vld [vmem:[#allocation7 + $0x28] sm:$0xff]  ;;  %v10513_v17 = vcombine.low %v326_v4, %v334_v5  ;;  %v10557_v5 = vcombine.low %v2091_v52, %v2095_v54 }
 0x12c   :  { %1969 = vmatprep.subr.bf16.mxu0 %v10402_v18  ;;  %2010 = vmatprep.subr.bf16.mxu1 %v10404_v19  ;;  %v10515_v18 = vcombine.low %v327_v6, %v335_v7  ;;  %v10518_v19 = vcombine.high %v2051_v13, %v2055_v14  ;;  %v10520_v20 = vcombine.high %v2052_v15, %v2056_v16  ;;  %v2140_v52 = vld [vmem:[#allocation7 + $0x2c8] sm:$0xff] }
 0x12d   :  { %v2144_v54 = vld [vmem:[#allocation7 + $0x2e8] sm:$0xff] }
 0x12f   :  { %1970 = vmatpush1.bf16.msra.mxu0 %v10401_v23  ;;  %2011 = vmatpush1.bf16.msra.mxu1 %v10403_v24  ;;  %v2064_v23 = vld [vmem:[#allocation7 + $0x68] sm:$0xff]  ;;  %v10517_v24 = vcombine.low %v2051_v13, %v2055_v14  ;;  %v2111_v14 = vld [vmem:[#allocation7 + $0x1e0] sm:$0xff] }
 0x130   :  { %1971 = vmatprep.subr.bf16.mxu0 %v10418_v25  ;;  %2012 = vmatprep.subr.bf16.mxu1 %v10420_v26  ;;  %v10519_v25 = vcombine.low %v2052_v15, %v2056_v16  ;;  %v10526_v26 = vcombine.high %v2059_v21, %v2063_v22  ;;  %v10528_v27 = vcombine.high %v2060_v53, %v2064_v23  ;;  %v2108_v15 = vld [vmem:[#allocation7 + $0x1c8] sm:$0xff] }
 0x131   :  { %v2112_v16 = vld [vmem:[#allocation7 + $0x1e8] sm:$0xff] }
 0x133   :  { %1972 = vmatpush1.bf16.msra.mxu0 %v10417_v31  ;;  %2013 = vmatpush1.bf16.msra.mxu1 %v10419_v32  ;;  %v2072_v31 = vld [vmem:[#allocation7 + $0xa8] sm:$0xff]  ;;  %v10525_v32 = vcombine.low %v2059_v21, %v2063_v22 }
 0x134   :  { %1973 = vmatprep.subr.bf16.mxu0 %v10434_v33  ;;  %2014 = vmatprep.subr.bf16.mxu1 %v10436_v34  ;;  %v10527_v33 = vcombine.low %v2060_v53, %v2064_v23  ;;  %v10534_v34 = vcombine.high %v2067_v28, %v2071_v29  ;;  %v10536_v35 = vcombine.high %v2068_v30, %v2072_v31 }
 0x137   :  { %1974 = vmatpush1.bf16.msra.mxu0 %v10433_v39  ;;  %2015 = vmatpush1.bf16.msra.mxu1 %v10435_v40  ;;  %v2080_v39 = vld [vmem:[#allocation7 + $0xe8] sm:$0xff]  ;;  %v10533_v40 = vcombine.low %v2067_v28, %v2071_v29  ;;  %v2119_v28 = vld [vmem:[#allocation7 + $0x220] sm:$0xff] }
 0x138   :  { %1975 = vmatprep.subr.bf16.mxu0 %v10450_v41  ;;  %2016 = vmatprep.subr.bf16.mxu1 %v10452_v42  ;;  %v340_v41 = vlaneseq  ;;  %v10535_v42 = vcombine.low %v2068_v30, %v2072_v31  ;;  %v2116_v29 = vld [vmem:[#allocation7 + $0x208] sm:$0xff] }
 0x139   :  { %v2120_v30 = vld [vmem:[#allocation7 + $0x228] sm:$0xff] }
 0x13b   :  { %1976 = vmatpush1.bf16.msra.mxu0 %v10449_v47  ;;  %2017 = vmatpush1.bf16.msra.mxu1 %v10451_v48  ;;  %v2088_v47 = vld [vmem:[#allocation7 + $0x128] sm:$0xff]  ;;  %v10541_v48 = vcombine.low %v2075_v36, %v2079_v37  ;;  %v2127_v36 = vld [vmem:[#allocation7 + $0x260] sm:$0xff] }
 0x13c   :  { %1977 = vmatprep.subr.bf16.mxu0 %v10466_v57  ;;  %2018 = vmatprep.subr.bf16.mxu1 %v10468_v49  ;;  %v12146_v57 = vshrl.u32 %v340_v41, 7  ;;  %v10543_v49 = vcombine.low %v2076_v38, %v2080_v39  ;;  %v10552_v51 = vcombine.high %v2084_v46, %v2088_v47  ;;  %v10551_v60 = vcombine.low %v2084_v46, %v2088_v47  ;;  %v2124_v37 = vld [vmem:[#allocation7 + $0x248] sm:$0xff] }
 0x13f   :  { %1978 = vmatpush1.bf16.msra.mxu0 %v10465_v55  ;;  %2019 = vmatpush1.bf16.msra.mxu1 %v10467_v56  ;;  %v2092_v55 = vld [vmem:[#allocation7 + $0x148] sm:$0xff] }
 0x140   :  { %1979 = vmatprep.subr.bf16.mxu0 %v10482_v58  ;;  %2020 = vmatprep.subr.bf16.mxu1 %v10484_v59  ;;  %v2096_v56 = vld [vmem:[#allocation7 + $0x168] sm:$0xff]  ;;  %v10549_v58 = vcombine.low %v2083_v44, %v2087_v45  ;;  %v12149_v59 = vsub.s32 1, %v12146_v57 }
 0x141   :  { %v10560_v63 = vcombine.high %v2092_v55, %v2096_v56  ;;  %v10559_v6 = vcombine.low %v2092_v55, %v2096_v56  ;;  %v2132_v44 = vld [vmem:[#allocation7 + $0x288] sm:$0xff] }
 0x142   :  { %v347_v4 = vrot.slane %v12151_v61, %v12149_v59  ;;  %v2136_v45 = vld [vmem:[#allocation7 + $0x2a8] sm:$0xff] }
 0x143   :  { %1980 = vmatpush1.bf16.msra.mxu0 %v10481_v0  ;;  %2021 = vmatpush1.bf16.msra.mxu1 %v10483_v1  ;;  %v2099_v0 = vld [vmem:[#allocation7 + $0x180] sm:$0xff]  ;;  %v10599_v56 = vcombine.low %v2132_v44, %v2136_v45 }
 0x144   :  { %1981 = vmatprep.subr.bf16.mxu0 %v10498_v2  ;;  %2022 = vmatprep.subr.bf16.mxu1 %v10500_v3  ;;  %v2103_v1 = vld [vmem:[#allocation7 + $0x1a0] sm:$0xff]  ;;  %v2100_v2 = vld [vmem:[#allocation7 + $0x188] sm:$0xff] }
 0x145   :  { %v2104_v3 = vld [vmem:[#allocation7 + $0x1a8] sm:$0xff]  ;;  %v10566_v7 = vcombine.high %v2099_v0, %v2103_v1 }
 0x146   :  { %v10567_v53 = vcombine.low %v2100_v2, %v2104_v3 }
 0x147   :  { %1982 = vmatpush1.bf16.msra.mxu0 %v10497_v8  ;;  %2023 = vmatpush1.bf16.msra.mxu1 %v10499_v9  ;;  %v10568_v9 = vcombine.high %v2100_v2, %v2104_v3  ;;  %v10607_v3 = vcombine.low %v2140_v52, %v2144_v54 }
 0x148   :  { %1983 = vmatprep.subr.bf16.mxu0 %v10514_v10  ;;  %2024 = vmatprep.subr.bf16.mxu1 %v10516_v11  ;;  %v2107_v10 = vld [vmem:[#allocation7 + $0x1c0] sm:$0xff] }
 0x149   :  { %v10573_v31 = vcombine.low %v2107_v10, %v2111_v14 }
 0x14b   :  { %1984 = vmatpush1.bf16.msra.mxu0 %v10513_v17  ;;  %2025 = vmatpush1.bf16.msra.mxu1 %v10515_v18 }
 0x14c   :  { %8237 = vmatprep.subr.bf16.mxu0 %v10518_v19  ;;  %8565 = vmatprep.subr.bf16.mxu1 %v10520_v20  ;;  %v10565_v20 = vcombine.low %v2099_v0, %v2103_v1  ;;  %v2148_v0 = vld [vmem:[#allocation7 + $0x308] sm:$0xff] }
 0x14d   :  { %v2152_v1 = vld [vmem:[#allocation7 + $0x328] sm:$0xff] }
 0x14e   :  { %1986 = vmatmul.mubr.bf16.vlgmr.msra.gmra.mrb[12].mxu0 %v12130_v12  ;;  %2027 = vmatmul.mubr.bf16.vlgmr.msra.gmra.mrb[12].mxu1 %v12130_v12  ;;  %v10544_v12 = vcombine.high %v2076_v38, %v2080_v39  ;;  %v2128_v38 = vld [vmem:[#allocation7 + $0x268] sm:$0xff] }
 0x14f   :  { %8238 = vmatpush1.bf16.msra.mxu0 %v10517_v24  ;;  %8566 = vmatpush1.bf16.msra.mxu1 %v10519_v25  ;;  %v10574_v25 = vcombine.high %v2107_v10, %v2111_v14  ;;  %v10591_v47 = vcombine.low %v2124_v37, %v2128_v38  ;;  %v2160_v10 = vld [vmem:[#allocation7 + $0x368] sm:$0xff]  ;;  %v10615_v14 = vcombine.low %v2148_v0, %v2152_v1 }
 0x150   :  { %8239 = vmatprep.subr.bf16.mxu0 %v10526_v26  ;;  %8567 = vmatprep.subr.bf16.mxu1 %v10528_v27  ;;  %v10576_v26 = vcombine.high %v2108_v15, %v2112_v16  ;;  %v2115_v27 = vld [vmem:[#allocation7 + $0x200] sm:$0xff] }
 0x151   :  { %v10581_v39 = vcombine.low %v2115_v27, %v2119_v28 }
 0x153   :  { %8240 = vmatpush1.bf16.msra.mxu0 %v10525_v32  ;;  %8568 = vmatpush1.bf16.msra.mxu1 %v10527_v33  ;;  %v10575_v32 = vcombine.low %v2108_v15, %v2112_v16  ;;  %v10582_v33 = vcombine.high %v2115_v27, %v2119_v28  ;;  %v2171_v27 = vld [vmem:[#allocation7 + $0x3c0] sm:$0xff] }
 0x154   :  { %8241 = vmatprep.subr.bf16.mxu0 %v10534_v34  ;;  %8569 = vmatprep.subr.bf16.mxu1 %v10536_v35  ;;  %v10584_v34 = vcombine.high %v2116_v29, %v2120_v30  ;;  %v2123_v35 = vld [vmem:[#allocation7 + $0x240] sm:$0xff] }
 0x155   :  { %v10590_v41 = vcombine.high %v2123_v35, %v2127_v36  ;;  %v10589_v46 = vcombine.low %v2123_v35, %v2127_v36  ;;  %v2175_v28 = vld [vmem:[#allocation7 + $0x3e0] sm:$0xff] }
 0x156   :  { %v10638_v35 = vcombine.high %v2171_v27, %v2175_v28 }
 0x157   :  { %8242 = vmatpush1.bf16.msra.mxu0 %v10533_v40  ;;  %8570 = vmatpush1.bf16.msra.mxu1 %v10535_v42  ;;  %v10583_v40 = vcombine.low %v2116_v29, %v2120_v30  ;;  %v10592_v42 = vcombine.high %v2124_v37, %v2128_v38  ;;  %v12169_v29 = vsub.s32 3, %v12146_v57  ;;  %v2172_v30 = vld [vmem:[#allocation7 + $0x3c8] sm:$0xff]  ;;  %v2179_v37 = vld [vmem:[#allocation7 + $0x400] sm:$0xff] }
 0x158   :  { %8243 = vmatprep.subr.bf16.mxu0 %v10542_v43  ;;  %8571 = vmatprep.subr.bf16.mxu1 %v10544_v12  ;;  %v2131_v43 = vld [vmem:[#allocation7 + $0x280] sm:$0xff] }
 0x159   :  { %v2135_v12 = vld [vmem:[#allocation7 + $0x2a0] sm:$0xff] }
 0x15a   :  { %v10597_v55 = vcombine.low %v2131_v43, %v2135_v12  ;;  %v2183_v38 = vld [vmem:[#allocation7 + $0x420] sm:$0xff] }
 0x15b   :  { %8244 = vmatpush1.bf16.msra.mxu0 %v10541_v48  ;;  %8572 = vmatpush1.bf16.msra.mxu1 %v10543_v49  ;;  %v10598_v48 = vcombine.high %v2131_v43, %v2135_v12  ;;  %v10600_v49 = vcombine.high %v2132_v44, %v2136_v45  ;;  %v10646_v44 = vcombine.high %v2179_v37, %v2183_v38 }
 0x15c   :  { %8245 = vmatprep.subr.bf16.mxu0 %v10550_v50  ;;  %8573 = vmatprep.subr.bf16.mxu1 %v10552_v51  ;;  %v2139_v50 = vld [vmem:[#allocation7 + $0x2c0] sm:$0xff] }
 0x15d   :  { %v2143_v51 = vld [vmem:[#allocation7 + $0x2e0] sm:$0xff] }
 0x15e   :  { %v10605_v2 = vcombine.low %v2139_v50, %v2143_v51 }
 0x15f   :  { %8246 = vmatpush1.bf16.msra.mxu0 %v10549_v58  ;;  %8574 = vmatpush1.bf16.msra.mxu1 %v10551_v60  ;;  %v10606_v58 = vcombine.high %v2139_v50, %v2143_v51  ;;  %v10608_v60 = vcombine.high %v2140_v52, %v2144_v54  ;;  %v2188_v50 = vld [vmem:[#allocation7 + $0x448] sm:$0xff] }
 0x160   :  { %8247 = vmatprep.subr.bf16.mxu0 %v10558_v62  ;;  %8575 = vmatprep.subr.bf16.mxu1 %v10560_v63  ;;  %v2147_v62 = vld [vmem:[#allocation7 + $0x300] sm:$0xff]  ;;  %v2192_v51 = vld [vmem:[#allocation7 + $0x468] sm:$0xff] }
 0x161   :  { %v12155_v8 = vpop.f32.mrb[0].mxu0  ;;  %v12157_v11 = vpop.f32.mrb[0].mxu1  ;;  %v2151_v63 = vld [vmem:[#allocation7 + $0x320] sm:$0xff] }
 0x162   :  { %v1743_v13 = vpop.f32.mrb[1].mxu0  ;;  %v12159_v18 = vpop.f32.mrb[1].mxu1 }
 0x163   :  { %v1744_v17 = vadd.f32 %v1743_v13, %v347_v4  ;;  %v1745_v19 = vpop.f32.mrb[2].mxu0  ;;  %8248 = vmatpush1.bf16.msra.mxu0 %v10557_v5  ;;  %v1786_v21 = vpop.f32.mrb[2].mxu1  ;;  %8576 = vmatpush1.bf16.msra.mxu1 %v10559_v6  ;;  %v10614_v4 = vcombine.high %v2147_v62, %v2151_v63  ;;  %v10616_v5 = vcombine.high %v2148_v0, %v2152_v1  ;;  %v2155_v6 = vld [vmem:[#allocation7 + $0x340] sm:$0xff] }
 0x164   :  { %v1746_v22 = vpop.f32.mrb[3].mxu0  ;;  %8249 = vmatprep.subr.bf16.mxu0 %v10566_v7  ;;  %v1787_v24 = vpop.f32.mrb[3].mxu1  ;;  %8577 = vmatprep.subr.bf16.mxu1 %v10568_v9  ;;  %v2159_v7 = vld [vmem:[#allocation7 + $0x360] sm:$0xff]  ;;  %v2156_v9 = vld [vmem:[#allocation7 + $0x348] sm:$0xff]  ;;  %v10613_v13 = vcombine.low %v2147_v62, %v2151_v63  ;;  %v10655_v0 = vcombine.low %v2188_v50, %v2192_v51 }
 0x165   :  { %v12161_v23 = vpack.c.bf16 %v1744_v17, %v1744_v17  ;;  %v10622_v15 = vcombine.high %v2155_v6, %v2159_v7  ;;  %v10624_v16 = vcombine.high %v2156_v9, %v2160_v10  ;;  %v2163_v17 = vld [vmem:[#allocation7 + $0x380] sm:$0xff]  ;;  %v2168_v21 = vld [vmem:[#allocation7 + $0x3a8] sm:$0xff]  ;;  %v10621_v22 = vcombine.low %v2155_v6, %v2159_v7 }
 0x166   :  { %v2167_v19 = vld [vmem:[#allocation7 + $0x3a0] sm:$0xff]  ;;  %v10623_v24 = vcombine.low %v2156_v9, %v2160_v10  ;;  %v2200_v62 = vld [vmem:[#allocation7 + $0x4a8] sm:$0xff] }
 0x167   :  { %8250 = vmatpush1.bf16.msra.mxu0 %v10565_v20  ;;  %8269 = vmatprep.mubr.bf16.mxu0 %v12161_v23  ;;  %v2164_v20 = vld [vmem:[#allocation7 + $0x388] sm:$0xff] }
 0x168   :  { %8578 = vmatpush1.bf16.msra.mxu1 %v10567_v53  ;;  %8597 = vmatprep.mubr.bf16.mxu1 %v12161_v23  ;;  %v12166_v53 = vsub.s32 0, %v12146_v57  ;;  %v2208_v6 = vld [vmem:[#allocation7 + $0x4e8] sm:$0xff] }
 0x169   :  { %8251 = vmatprep.subr.bf16.mxu0 %v10574_v25  ;;  %8579 = vmatprep.subr.bf16.mxu1 %v10576_v26  ;;  %v10630_v25 = vcombine.high %v2163_v17, %v2167_v19  ;;  %v10632_v26 = vcombine.high %v2164_v20, %v2168_v21 }
 0x16b   :  { %8252 = vmatpush1.bf16.msra.mxu0 %v10573_v31  ;;  %v2176_v31 = vld [vmem:[#allocation7 + $0x3e8] sm:$0xff] }
 0x16c   :  { %8580 = vmatpush1.bf16.msra.mxu1 %v10575_v32  ;;  %8253 = vmatprep.subr.bf16.mxu0 %v10582_v33  ;;  %v10629_v32 = vcombine.low %v2163_v17, %v2167_v19  ;;  %v343_v33 = vrot.slane %v12151_v61, %v12166_v53  ;;  %v10640_v36 = vcombine.high %v2172_v30, %v2176_v31  ;;  %v2216_v17 = vld [vmem:[#allocation7 + $0x528] sm:$0xff] }
 0x16d   :  { %8581 = vmatprep.subr.bf16.mxu1 %v10584_v34  ;;  %v10631_v34 = vcombine.low %v2164_v20, %v2168_v21  ;;  %v10639_v12 = vcombine.low %v2172_v30, %v2176_v31 }
 0x16e   :  { %v1742_v43 = vadd.f32 %v12155_v8, %v343_v33  ;;  %v2227_v33 = vld [vmem:[#allocation7 + $0x580] sm:$0xff] }
 0x16f   :  { %8254 = vmatpush1.bf16.msra.mxu0 %v10581_v39  ;;  %v355_v39 = vrot.slane %v12151_v61, %v12169_v29 }
 0x170   :  { %8582 = vmatpush1.bf16.msra.mxu1 %v10583_v40  ;;  %8255 = vmatprep.subr.bf16.mxu0 %v10590_v41  ;;  %v2180_v40 = vld [vmem:[#allocation7 + $0x408] sm:$0xff]  ;;  %v12177_v52 = vpack.c.bf16 %v1742_v43, %v1742_v43  ;;  %v2239_v43 = vld [vmem:[#allocation7 + $0x5e0] sm:$0xff] }
 0x171   :  { %8583 = vmatprep.subr.bf16.mxu1 %v10592_v42  ;;  %v2184_v41 = vld [vmem:[#allocation7 + $0x428] sm:$0xff]  ;;  %v10637_v42 = vcombine.low %v2171_v27, %v2175_v28 }
 0x172   :  { %v10648_v45 = vcombine.high %v2180_v40, %v2184_v41  ;;  %v10647_v54 = vcombine.low %v2180_v40, %v2184_v41  ;;  %v2224_v27 = vld [vmem:[#allocation7 + $0x568] sm:$0xff] }
 0x173   :  { %8256 = vmatpush1.bf16.msra.mxu0 %v10589_v46  ;;  %v1785_v46 = vadd.f32 %v12159_v18, %v355_v39  ;;  %v10656_v18 = vcombine.high %v2188_v50, %v2192_v51 }
 0x174   :  { %8584 = vmatpush1.bf16.msra.mxu1 %v10591_v47  ;;  %8257 = vmatprep.subr.bf16.mxu0 %v10598_v48  ;;  %v2187_v47 = vld [vmem:[#allocation7 + $0x440] sm:$0xff] }
 0x175   :  { %8585 = vmatprep.subr.bf16.mxu1 %v10600_v49  ;;  %v2191_v48 = vld [vmem:[#allocation7 + $0x460] sm:$0xff]  ;;  %v10645_v49 = vcombine.low %v2179_v37, %v2183_v38 }
 0x176   :  { %v10654_v8 = vcombine.high %v2187_v47, %v2191_v48  ;;  %v10653_v63 = vcombine.low %v2187_v47, %v2191_v48 }
 0x177   :  { %8258 = vmatpush1.bf16.msra.mxu0 %v10597_v55  ;;  %v2195_v55 = vld [vmem:[#allocation7 + $0x480] sm:$0xff] }
 0x178   :  { %8586 = vmatpush1.bf16.msra.mxu1 %v10599_v56  ;;  %8259 = vmatprep.subr.bf16.mxu0 %v10606_v58  ;;  %v2199_v56 = vld [vmem:[#allocation7 + $0x4a0] sm:$0xff]  ;;  %v12179_v58 = vpack.c.bf16 %v1785_v46, %v1785_v46  ;;  %v2240_v46 = vld [vmem:[#allocation7 + $0x5e8] sm:$0xff] }
 0x179   :  { %8587 = vmatprep.subr.bf16.mxu1 %v10608_v60  ;;  %v2196_v60 = vld [vmem:[#allocation7 + $0x488] sm:$0xff]  ;;  %v10662_v1 = vcombine.high %v2195_v55, %v2199_v56  ;;  %v10661_v7 = vcombine.low %v2195_v55, %v2199_v56 }
 0x17a   :  { %v10663_v9 = vcombine.low %v2196_v60, %v2200_v62 }
 0x17b   :  { %8260 = vmatpush1.bf16.msra.mxu0 %v10605_v2  ;;  %v10664_v2 = vcombine.high %v2196_v60, %v2200_v62  ;;  %v2247_v60 = vld [vmem:[#allocation7 + $0x620] sm:$0xff]  ;;  %v2244_v62 = vld [vmem:[#allocation7 + $0x608] sm:$0xff] }
 0x17c   :  { %8588 = vmatpush1.bf16.msra.mxu1 %v10607_v3  ;;  %8261 = vmatprep.subr.bf16.mxu0 %v10614_v4  ;;  %v2203_v3 = vld [vmem:[#allocation7 + $0x4c0] sm:$0xff] }
 0x17d   :  { %8589 = vmatprep.subr.bf16.mxu1 %v10616_v5  ;;  %v2207_v4 = vld [vmem:[#allocation7 + $0x4e0] sm:$0xff]  ;;  %v2204_v5 = vld [vmem:[#allocation7 + $0x4c8] sm:$0xff] }
 0x17e   :  { %v10670_v10 = vcombine.high %v2203_v3, %v2207_v4  ;;  %v10669_v19 = vcombine.low %v2203_v3, %v2207_v4  ;;  %v10671_v20 = vcombine.low %v2204_v5, %v2208_v6  ;;  %v2251_v4 = vld [vmem:[#allocation7 + $0x640] sm:$0xff] }
 0x17f   :  { %8262 = vmatpush1.bf16.msra.mxu0 %v10613_v13  ;;  %v10672_v13 = vcombine.high %v2204_v5, %v2208_v6  ;;  %v2255_v5 = vld [vmem:[#allocation7 + $0x660] sm:$0xff]  ;;  %v2252_v6 = vld [vmem:[#allocation7 + $0x648] sm:$0xff] }
 0x180   :  { %8590 = vmatpush1.bf16.msra.mxu1 %v10615_v14  ;;  %8263 = vmatprep.subr.bf16.mxu0 %v10622_v15  ;;  %v2211_v14 = vld [vmem:[#allocation7 + $0x500] sm:$0xff] }
 0x181   :  { %8591 = vmatprep.subr.bf16.mxu1 %v10624_v16  ;;  %v2215_v15 = vld [vmem:[#allocation7 + $0x520] sm:$0xff]  ;;  %v2212_v16 = vld [vmem:[#allocation7 + $0x508] sm:$0xff] }
 0x182   :  { %v10678_v21 = vcombine.high %v2211_v14, %v2215_v15  ;;  %v10677_v28 = vcombine.low %v2211_v14, %v2215_v15  ;;  %v10679_v30 = vcombine.low %v2212_v16, %v2216_v17  ;;  %v2259_v15 = vld [vmem:[#allocation7 + $0x680] sm:$0xff] }
 0x183   :  { %8264 = vmatpush1.bf16.msra.mxu0 %v10621_v22  ;;  %v10680_v22 = vcombine.high %v2212_v16, %v2216_v17  ;;  %v2263_v16 = vld [vmem:[#allocation7 + $0x6a0] sm:$0xff]  ;;  %v2260_v17 = vld [vmem:[#allocation7 + $0x688] sm:$0xff] }
 0x184   :  { %8592 = vmatpush1.bf16.msra.mxu1 %v10623_v24  ;;  %8265 = vmatprep.subr.bf16.mxu0 %v10630_v25  ;;  %v2219_v24 = vld [vmem:[#allocation7 + $0x540] sm:$0xff] }
 0x185   :  { %8593 = vmatprep.subr.bf16.mxu1 %v10632_v26  ;;  %v2223_v25 = vld [vmem:[#allocation7 + $0x560] sm:$0xff]  ;;  %v2220_v26 = vld [vmem:[#allocation7 + $0x548] sm:$0xff] }
 0x186   :  { %v10686_v31 = vcombine.high %v2219_v24, %v2223_v25  ;;  %v10685_v37 = vcombine.low %v2219_v24, %v2223_v25  ;;  %v10687_v38 = vcombine.low %v2220_v26, %v2224_v27  ;;  %v2267_v25 = vld [vmem:[#allocation7 + $0x6c0] sm:$0xff] }
 0x187   :  { %8266 = vmatpush1.bf16.msra.mxu0 %v10629_v32  ;;  %v10688_v32 = vcombine.high %v2220_v26, %v2224_v27  ;;  %v2271_v26 = vld [vmem:[#allocation7 + $0x6e0] sm:$0xff]  ;;  %v2268_v27 = vld [vmem:[#allocation7 + $0x6c8] sm:$0xff] }
 0x188   :  { %8594 = vmatpush1.bf16.msra.mxu1 %v10631_v34  ;;  %8267 = vmatprep.subr.bf16.mxu0 %v10638_v35  ;;  %v2231_v34 = vld [vmem:[#allocation7 + $0x5a0] sm:$0xff]  ;;  %v2228_v35 = vld [vmem:[#allocation7 + $0x588] sm:$0xff] }
 0x189   :  { %8595 = vmatprep.subr.bf16.mxu1 %v10640_v36  ;;  %v2232_v36 = vld [vmem:[#allocation7 + $0x5a8] sm:$0xff]  ;;  %v10694_v39 = vcombine.high %v2227_v33, %v2231_v34 }
 0x18a   :  { %v10696_v41 = vcombine.high %v2228_v35, %v2232_v36 }
 0x18b   :  { %8268 = vmatpush1.bf16.msra.mxu0 %v10637_v42  ;;  %v2235_v42 = vld [vmem:[#allocation7 + $0x5c0] sm:$0xff] }
 0x18c   :  { %8596 = vmatpush1.bf16.msra.mxu1 %v10639_v12  ;;  %8278 = vmatprep.subr.bf16.mxu0 %v10646_v44 }
 0x18d   :  { %8606 = vmatprep.subr.bf16.mxu1 %v10648_v45  ;;  %v2236_v45 = vld [vmem:[#allocation7 + $0x5c8] sm:$0xff] }
 0x18e   :  { %8270 = vmatmul.mubr.bf16.vlgmr.msra.gmra.mrb[16].mxu0 %v12177_v52  ;;  %v10704_v56 = vcombine.high %v2236_v45, %v2240_v46 }
 0x18f   :  { %8598 = vmatmul.mubr.bf16.vlgmr.msra.gmra.mrb[16].mxu1 %v12177_v52  ;;  %8279 = vmatpush1.bf16.msra.mxu0 %v10645_v49  ;;  %v10693_v49 = vcombine.low %v2227_v33, %v2231_v34  ;;  %v2275_v34 = vld [vmem:[#allocation7 + $0x700] sm:$0xff] }
 0x190   :  { %8310 = vmatprep.mubr.bf16.mxu0 %v12179_v58  ;;  %8607 = vmatpush1.bf16.msra.mxu1 %v10647_v54  ;;  %v10695_v54 = vcombine.low %v2228_v35, %v2232_v36  ;;  %v2279_v35 = vld [vmem:[#allocation7 + $0x720] sm:$0xff]  ;;  %v2276_v36 = vld [vmem:[#allocation7 + $0x708] sm:$0xff] }
 0x191   :  { %8638 = vmatprep.mubr.bf16.mxu1 %v12179_v58  ;;  %8280 = vmatprep.subr.bf16.mxu0 %v10654_v8  ;;  %v10702_v8 = vcombine.high %v2235_v42, %v2239_v43 }
 0x192   :  { %8608 = vmatprep.subr.bf16.mxu1 %v10656_v18  ;;  %v2243_v18 = vld [vmem:[#allocation7 + $0x600] sm:$0xff] }
 0x193   :  { %8281 = vmatpush1.bf16.msra.mxu0 %v10653_v63  ;;  %v2248_v63 = vld [vmem:[#allocation7 + $0x628] sm:$0xff] }
 0x194   :  { %8609 = vmatpush1.bf16.msra.mxu1 %v10655_v0  ;;  %8282 = vmatprep.subr.bf16.mxu0 %v10662_v1  ;;  %v10701_v0 = vcombine.low %v2235_v42, %v2239_v43  ;;  %v10703_v1 = vcombine.low %v2236_v45, %v2240_v46  ;;  %v10712_v3 = vcombine.high %v2244_v62, %v2248_v63  ;;  %v2283_v43 = vld [vmem:[#allocation7 + $0x740] sm:$0xff]  ;;  %v2284_v46 = vld [vmem:[#allocation7 + $0x748] sm:$0xff] }
 0x195   :  { %8610 = vmatprep.subr.bf16.mxu1 %v10664_v2  ;;  %v10710_v2 = vcombine.high %v2243_v18, %v2247_v60  ;;  %v2287_v45 = vld [vmem:[#allocation7 + $0x760] sm:$0xff] }
 0x197   :  { %8283 = vmatpush1.bf16.msra.mxu0 %v10661_v7  ;;  %v2256_v7 = vld [vmem:[#allocation7 + $0x668] sm:$0xff] }
 0x198   :  { %8611 = vmatpush1.bf16.msra.mxu1 %v10663_v9  ;;  %8284 = vmatprep.subr.bf16.mxu0 %v10670_v10  ;;  %v10709_v9 = vcombine.low %v2243_v18, %v2247_v60  ;;  %v10711_v10 = vcombine.low %v2244_v62, %v2248_v63  ;;  %v10720_v14 = vcombine.high %v2252_v6, %v2256_v7  ;;  %v2296_v18 = vld [vmem:[#allocation7 + $0x7a8] sm:$0xff]  ;;  %v12194_v62 = vsub.s32 2, %v12146_v57 }
 0x199   :  { %8612 = vmatprep.subr.bf16.mxu1 %v10672_v13  ;;  %v10718_v13 = vcombine.high %v2251_v4, %v2255_v5  ;;  %v10749_v60 = vcombine.low %v2283_v43, %v2287_v45 }
 0x19b   :  { %8285 = vmatpush1.bf16.msra.mxu0 %v10669_v19  ;;  %v2264_v19 = vld [vmem:[#allocation7 + $0x6a8] sm:$0xff] }
 0x19c   :  { %8613 = vmatpush1.bf16.msra.mxu1 %v10671_v20  ;;  %8286 = vmatprep.subr.bf16.mxu0 %v10678_v21  ;;  %v10717_v20 = vcombine.low %v2251_v4, %v2255_v5  ;;  %v10719_v21 = vcombine.low %v2252_v6, %v2256_v7  ;;  %v10728_v24 = vcombine.high %v2260_v17, %v2264_v19  ;;  %v12197_v4 = vsub.s32 5, %v12146_v57  ;;  %v2300_v5 = vld [vmem:[#allocation7 + $0x7c8] sm:$0xff] }
 0x19d   :  { %8614 = vmatprep.subr.bf16.mxu1 %v10680_v22  ;;  %v10726_v22 = vcombine.high %v2259_v15, %v2263_v16  ;;  %v2304_v6 = vld [vmem:[#allocation7 + $0x7e8] sm:$0xff] }
 0x19f   :  { %8287 = vmatpush1.bf16.msra.mxu0 %v10677_v28  ;;  %v2272_v28 = vld [vmem:[#allocation7 + $0x6e8] sm:$0xff] }
 0x1a0   :  { %8615 = vmatpush1.bf16.msra.mxu1 %v10679_v30  ;;  %8288 = vmatprep.subr.bf16.mxu0 %v10686_v31  ;;  %v10725_v30 = vcombine.low %v2259_v15, %v2263_v16  ;;  %v10727_v31 = vcombine.low %v2260_v17, %v2264_v19  ;;  %v10736_v33 = vcombine.high %v2268_v27, %v2272_v28  ;;  %v2307_v15 = vld [vmem:[#allocation7 + $0x800] sm:$0xff]  ;;  %v2308_v19 = vld [vmem:[#allocation7 + $0x808] sm:$0xff] }
 0x1a1   :  { %v12185_v40 = vpop.f32.mrb[4].mxu0  ;;  %8616 = vmatprep.subr.bf16.mxu1 %v10688_v32  ;;  %v12187_v12 = vpop.f32.mrb[4].mxu1  ;;  %v10734_v32 = vcombine.high %v2267_v25, %v2271_v26  ;;  %v2311_v16 = vld [vmem:[#allocation7 + $0x820] sm:$0xff]  ;;  %v363_v17 = vrot.slane %v12151_v61, %v12197_v4 }
 0x1a2   :  { %v12189_v44 = vpop.f32.mrb[5].mxu0  ;;  %v12191_v47 = vpop.f32.mrb[5].mxu1 }
 0x1a3   :  { %v1827_v48 = vpop.f32.mrb[6].mxu0  ;;  %8289 = vmatpush1.bf16.msra.mxu0 %v10685_v37  ;;  %v1868_v50 = vpop.f32.mrb[6].mxu1  ;;  %v2280_v37 = vld [vmem:[#allocation7 + $0x728] sm:$0xff] }
 0x1a4   :  { %8617 = vmatpush1.bf16.msra.mxu1 %v10687_v38  ;;  %v1828_v51 = vpop.f32.mrb[7].mxu0  ;;  %8290 = vmatprep.subr.bf16.mxu0 %v10694_v39  ;;  %v1869_v55 = vpop.f32.mrb[7].mxu1  ;;  %v10733_v38 = vcombine.low %v2267_v25, %v2271_v26  ;;  %v10735_v39 = vcombine.low %v2268_v27, %v2272_v28  ;;  %v10744_v42 = vcombine.high %v2276_v36, %v2280_v37  ;;  %v2288_v48 = vld [vmem:[#allocation7 + $0x768] sm:$0xff]  ;;  %v2315_v28 = vld [vmem:[#allocation7 + $0x840] sm:$0xff] }
 0x1a5   :  { %8618 = vmatprep.subr.bf16.mxu1 %v10696_v41  ;;  %v10742_v41 = vcombine.high %v2275_v34, %v2279_v35  ;;  %v10743_v50 = vcombine.low %v2276_v36, %v2280_v37  ;;  %v10750_v51 = vcombine.high %v2283_v43, %v2287_v45  ;;  %v2295_v55 = vld [vmem:[#allocation7 + $0x7a0] sm:$0xff]  ;;  %v10751_v63 = vcombine.low %v2284_v46, %v2288_v48 }
 0x1a6   :  { %v10774_v25 = vcombine.high %v2307_v15, %v2311_v16  ;;  %v1826_v27 = vadd.f32 %v12189_v44, %v363_v17  ;;  %v2327_v36 = vld [vmem:[#allocation7 + $0x8a0] sm:$0xff] }
 0x1a7   :  { %8291 = vmatpush1.bf16.msra.mxu0 %v10693_v49  ;;  %v10741_v49 = vcombine.low %v2275_v34, %v2279_v35  ;;  %v2323_v35 = vld [vmem:[#allocation7 + $0x880] sm:$0xff] }
 0x1a8   :  { %8619 = vmatpush1.bf16.msra.mxu1 %v10695_v54  ;;  %8292 = vmatprep.subr.bf16.mxu0 %v10702_v8  ;;  %v10752_v54 = vcombine.high %v2284_v46, %v2288_v48  ;;  %v2291_v8 = vld [vmem:[#allocation7 + $0x780] sm:$0xff]  ;;  %v12207_v37 = vpack.c.bf16 %v1826_v27, %v1826_v27  ;;  %v10790_v43 = vcombine.high %v2323_v35, %v2327_v36 }
 0x1a9   :  { %8620 = vmatprep.subr.bf16.mxu1 %v10704_v56  ;;  %v2292_v56 = vld [vmem:[#allocation7 + $0x788] sm:$0xff]  ;;  %v10757_v7 = vcombine.low %v2291_v8, %v2295_v55  ;;  %v2331_v46 = vld [vmem:[#allocation7 + $0x8c0] sm:$0xff] }
 0x1aa   :  { %v2335_v48 = vld [vmem:[#allocation7 + $0x8e0] sm:$0xff] }
 0x1ab   :  { %8293 = vmatpush1.bf16.msra.mxu0 %v10701_v0  ;;  %v10758_v0 = vcombine.high %v2291_v8, %v2295_v55  ;;  %v10798_v8 = vcombine.high %v2331_v46, %v2335_v48  ;;  %v2359_v17 = vld [vmem:[#allocation7 + $0x9a0] sm:$0xff] }
 0x1ac   :  { %8621 = vmatpush1.bf16.msra.mxu1 %v10703_v1  ;;  %8294 = vmatprep.subr.bf16.mxu0 %v10710_v2  ;;  %v10760_v1 = vcombine.high %v2292_v56, %v2296_v18  ;;  %v2299_v2 = vld [vmem:[#allocation7 + $0x7c0] sm:$0xff] }
 0x1ad   :  { %8622 = vmatprep.subr.bf16.mxu1 %v10712_v3  ;;  %v2303_v3 = vld [vmem:[#allocation7 + $0x7e0] sm:$0xff] }
 0x1ae   :  { %v2363_v27 = vld [vmem:[#allocation7 + $0x9c0] sm:$0xff] }
 0x1af   :  { %8295 = vmatpush1.bf16.msra.mxu0 %v10709_v9  ;;  %v351_v9 = vrot.slane %v12151_v61, %v12194_v62  ;;  %v2320_v61 = vld [vmem:[#allocation7 + $0x868] sm:$0xff] }
 0x1b0   :  { %8623 = vmatpush1.bf16.msra.mxu1 %v10711_v10  ;;  %8296 = vmatprep.subr.bf16.mxu0 %v10718_v13  ;;  %v10759_v10 = vcombine.low %v2292_v56, %v2296_v18  ;;  %v10766_v13 = vcombine.high %v2299_v2, %v2303_v3  ;;  %v2339_v56 = vld [vmem:[#allocation7 + $0x900] sm:$0xff] }
 0x1b1   :  { %8624 = vmatprep.subr.bf16.mxu1 %v10720_v14  ;;  %v10768_v14 = vcombine.high %v2300_v5, %v2304_v6  ;;  %v2343_v18 = vld [vmem:[#allocation7 + $0x920] sm:$0xff] }
 0x1b3   :  { %8297 = vmatpush1.bf16.msra.mxu0 %v10717_v20  ;;  %v2312_v20 = vld [vmem:[#allocation7 + $0x828] sm:$0xff] }
 0x1b4   :  { %8625 = vmatpush1.bf16.msra.mxu1 %v10719_v21  ;;  %8298 = vmatprep.subr.bf16.mxu0 %v10726_v22  ;;  %v10765_v21 = vcombine.low %v2299_v2, %v2303_v3  ;;  %v1783_v22 = vadd.f32 %v12157_v11, %v351_v9  ;;  %v10776_v26 = vcombine.high %v2308_v19, %v2312_v20  ;;  %v2352_v9 = vld [vmem:[#allocation7 + $0x968] sm:$0xff] }
 0x1b5   :  { %8626 = vmatprep.subr.bf16.mxu1 %v10728_v24  ;;  %v10767_v24 = vcombine.low %v2300_v5, %v2304_v6  ;;  %v10775_v34 = vcombine.low %v2308_v19, %v2312_v20  ;;  %v10806_v2 = vcombine.high %v2339_v56, %v2343_v18  ;;  %v2347_v5 = vld [vmem:[#allocation7 + $0x940] sm:$0xff]  ;;  %v2356_v19 = vld [vmem:[#allocation7 + $0x988] sm:$0xff] }
 0x1b6   :  { %v2351_v6 = vld [vmem:[#allocation7 + $0x960] sm:$0xff]  ;;  %v2360_v20 = vld [vmem:[#allocation7 + $0x9a8] sm:$0xff] }
 0x1b7   :  { %8299 = vmatpush1.bf16.msra.mxu0 %v10725_v30  ;;  %v2319_v30 = vld [vmem:[#allocation7 + $0x860] sm:$0xff] }
 0x1b8   :  { %8627 = vmatpush1.bf16.msra.mxu1 %v10727_v31  ;;  %8300 = vmatprep.subr.bf16.mxu0 %v10734_v32  ;;  %v10773_v31 = vcombine.low %v2307_v15, %v2311_v16  ;;  %v2316_v32 = vld [vmem:[#allocation7 + $0x848] sm:$0xff]  ;;  %v10782_v11 = vcombine.high %v2315_v28, %v2319_v30  ;;  %v2355_v16 = vld [vmem:[#allocation7 + $0x980] sm:$0xff] }
 0x1b9   :  { %8628 = vmatprep.subr.bf16.mxu1 %v10736_v33  ;;  %v12205_v33 = vpack.c.bf16 %v1783_v22, %v1783_v22  ;;  %v10784_v44 = vcombine.high %v2316_v32, %v2320_v61 }
 0x1bb   :  { %8301 = vmatpush1.bf16.msra.mxu0 %v10733_v38  ;;  %v2324_v38 = vld [vmem:[#allocation7 + $0x888] sm:$0xff] }
 0x1bc   :  { %8629 = vmatpush1.bf16.msra.mxu1 %v10735_v39  ;;  %8302 = vmatprep.subr.bf16.mxu0 %v10742_v41  ;;  %v2328_v39 = vld [vmem:[#allocation7 + $0x8a8] sm:$0xff]  ;;  %v10781_v41 = vcombine.low %v2315_v28, %v2319_v30  ;;  %v2367_v28 = vld [vmem:[#allocation7 + $0x9e0] sm:$0xff] }
 0x1bd   :  { %8630 = vmatprep.subr.bf16.mxu1 %v10744_v42  ;;  %v10783_v42 = vcombine.low %v2316_v32, %v2320_v61  ;;  %v10792_v45 = vcombine.high %v2324_v38, %v2328_v39  ;;  %v2364_v32 = vld [vmem:[#allocation7 + $0x9c8] sm:$0xff] }
 0x1be   :  { %v2368_v61 = vld [vmem:[#allocation7 + $0x9e8] sm:$0xff] }
 0x1bf   :  { %8303 = vmatpush1.bf16.msra.mxu0 %v10741_v49  ;;  %v2332_v49 = vld [vmem:[#allocation7 + $0x8c8] sm:$0xff] }
 0x1c0   :  { %8631 = vmatpush1.bf16.msra.mxu1 %v10743_v50  ;;  %8304 = vmatprep.subr.bf16.mxu0 %v10750_v51  ;;  %v2336_v50 = vld [vmem:[#allocation7 + $0x8e8] sm:$0xff]  ;;  %v10789_v51 = vcombine.low %v2323_v35, %v2327_v36  ;;  %v10821_v35 = vcombine.low %v2355_v16, %v2359_v17 }
 0x1c1   :  { %8632 = vmatprep.subr.bf16.mxu1 %v10752_v54  ;;  %v10791_v54 = vcombine.low %v2324_v38, %v2328_v39  ;;  %v10800_v55 = vcombine.high %v2332_v49, %v2336_v50  ;;  %v10823_v38 = vcombine.low %v2356_v19, %v2360_v20  ;;  %v10830_v39 = vcombine.high %v2363_v27, %v2367_v28 }
 0x1c3   :  { %8305 = vmatpush1.bf16.msra.mxu0 %v10749_v60  ;;  %v2340_v60 = vld [vmem:[#allocation7 + $0x908] sm:$0xff] }
 0x1c4   :  { %8633 = vmatpush1.bf16.msra.mxu1 %v10751_v63  ;;  %8306 = vmatprep.subr.bf16.mxu0 %v10758_v0  ;;  %v2344_v63 = vld [vmem:[#allocation7 + $0x928] sm:$0xff]  ;;  %v10797_v0 = vcombine.low %v2331_v46, %v2335_v48 }
 0x1c5   :  { %8634 = vmatprep.subr.bf16.mxu1 %v10760_v1  ;;  %v10799_v1 = vcombine.low %v2332_v49, %v2336_v50  ;;  %v10808_v3 = vcombine.high %v2340_v60, %v2344_v63  ;;  %v2372_v46 = vld [vmem:[#allocation7 + $0xa08] sm:$0xff]  ;;  %v10829_v49 = vcombine.low %v2363_v27, %v2367_v28  ;;  %v10831_v50 = vcombine.low %v2364_v32, %v2368_v61 }
 0x1c6   :  { %v2376_v48 = vld [vmem:[#allocation7 + $0xa28] sm:$0xff] }
 0x1c7   :  { %8307 = vmatpush1.bf16.msra.mxu0 %v10757_v7  ;;  %v2348_v7 = vld [vmem:[#allocation7 + $0x948] sm:$0xff] }
 0x1c8   :  { %8635 = vmatpush1.bf16.msra.mxu1 %v10759_v10  ;;  %8308 = vmatprep.subr.bf16.mxu0 %v10766_v13  ;;  %v10805_v10 = vcombine.low %v2339_v56, %v2343_v18  ;;  %v10807_v13 = vcombine.low %v2340_v60, %v2344_v63  ;;  %v10816_v15 = vcombine.high %v2348_v7, %v2352_v9  ;;  %v2380_v56 = vld [vmem:[#allocation7 + $0xa48] sm:$0xff] }
 0x1c9   :  { %8636 = vmatprep.subr.bf16.mxu1 %v10768_v14  ;;  %v10814_v14 = vcombine.high %v2347_v5, %v2351_v6  ;;  %v10815_v22 = vcombine.low %v2348_v7, %v2352_v9  ;;  %v2384_v18 = vld [vmem:[#allocation7 + $0xa68] sm:$0xff]  ;;  %v10839_v63 = vcombine.low %v2372_v46, %v2376_v48 }
 0x1ca   :  { %v10847_v9 = vcombine.low %v2380_v56, %v2384_v18  ;;  %v2404_v27 = vld [vmem:[#allocation7 + $0xb08] sm:$0xff] }
 0x1cb   :  { %8309 = vmatpush1.bf16.msra.mxu0 %v10765_v21  ;;  %v10813_v21 = vcombine.low %v2347_v5, %v2351_v6  ;;  %v2388_v5 = vld [vmem:[#allocation7 + $0xa88] sm:$0xff] }
 0x1cc   :  { %8637 = vmatpush1.bf16.msra.mxu1 %v10767_v24  ;;  %8319 = vmatprep.subr.bf16.mxu0 %v10774_v25  ;;  %v10822_v24 = vcombine.high %v2355_v16, %v2359_v17  ;;  %v2392_v6 = vld [vmem:[#allocation7 + $0xaa8] sm:$0xff] }
 0x1cd   :  { %8647 = vmatprep.subr.bf16.mxu1 %v10776_v26  ;;  %v10824_v26 = vcombine.high %v2356_v19, %v2360_v20  ;;  %v2396_v16 = vld [vmem:[#allocation7 + $0xac8] sm:$0xff]  ;;  %v10855_v20 = vcombine.low %v2388_v5, %v2392_v6 }
 0x1ce   :  { %8311 = vmatmul.mubr.bf16.vlgmr.msra.gmra.mrb[16].mxu0 %v12205_v33  ;;  %v2400_v17 = vld [vmem:[#allocation7 + $0xae8] sm:$0xff] }
 0x1cf   :  { %8639 = vmatmul.mubr.bf16.vlgmr.msra.gmra.mrb[16].mxu1 %v12205_v33  ;;  %8320 = vmatpush1.bf16.msra.mxu0 %v10773_v31  ;;  %v2408_v28 = vld [vmem:[#allocation7 + $0xb28] sm:$0xff] }
 0x1d0   :  { %8351 = vmatprep.mubr.bf16.mxu0 %v12207_v37  ;;  %8648 = vmatpush1.bf16.msra.mxu1 %v10775_v34 }
 0x1d1   :  { %8679 = vmatprep.mubr.bf16.mxu1 %v12207_v37  ;;  %8321 = vmatprep.subr.bf16.mxu0 %v10782_v11 }
 0x1d2   :  { %8649 = vmatprep.subr.bf16.mxu1 %v10784_v44 }
 0x1d3   :  { %8322 = vmatpush1.bf16.msra.mxu0 %v10781_v41 }
 0x1d4   :  { %8650 = vmatpush1.bf16.msra.mxu1 %v10783_v42  ;;  %8323 = vmatprep.subr.bf16.mxu0 %v10790_v43  ;;  %v10832_v42 = vcombine.high %v2364_v32, %v2368_v61  ;;  %v2371_v43 = vld [vmem:[#allocation7 + $0xa00] sm:$0xff]  ;;  %v10863_v61 = vcombine.low %v2396_v16, %v2400_v17 }
 0x1d5   :  { %8651 = vmatprep.subr.bf16.mxu1 %v10792_v45  ;;  %v2375_v45 = vld [vmem:[#allocation7 + $0xa20] sm:$0xff] }
 0x1d6   :  { %v10837_v60 = vcombine.low %v2371_v43, %v2375_v45 }
 0x1d7   :  { %8324 = vmatpush1.bf16.msra.mxu0 %v10789_v51  ;;  %v10838_v51 = vcombine.high %v2371_v43, %v2375_v45 }
 0x1d8   :  { %8652 = vmatpush1.bf16.msra.mxu1 %v10791_v54  ;;  %8325 = vmatprep.subr.bf16.mxu0 %v10798_v8  ;;  %v10840_v54 = vcombine.high %v2372_v46, %v2376_v48  ;;  %v2379_v8 = vld [vmem:[#allocation7 + $0xa40] sm:$0xff] }
 0x1d9   :  { %8653 = vmatprep.subr.bf16.mxu1 %v10800_v55  ;;  %v2383_v55 = vld [vmem:[#allocation7 + $0xa60] sm:$0xff] }
 0x1da   :  { %v10845_v7 = vcombine.low %v2379_v8, %v2383_v55  ;;  %v2419_v46 = vld [vmem:[#allocation7 + $0xb80] sm:$0xff] }
 0x1db   :  { %8326 = vmatpush1.bf16.msra.mxu0 %v10797_v0  ;;  %v10846_v0 = vcombine.high %v2379_v8, %v2383_v55  ;;  %v2423_v48 = vld [vmem:[#allocation7 + $0xba0] sm:$0xff] }
 0x1dc   :  { %8654 = vmatpush1.bf16.msra.mxu1 %v10799_v1  ;;  %8327 = vmatprep.subr.bf16.mxu0 %v10806_v2  ;;  %v10848_v1 = vcombine.high %v2380_v56, %v2384_v18  ;;  %v2387_v2 = vld [vmem:[#allocation7 + $0xa80] sm:$0xff]  ;;  %v10886_v55 = vcombine.high %v2419_v46, %v2423_v48 }
 0x1dd   :  { %8655 = vmatprep.subr.bf16.mxu1 %v10808_v3  ;;  %v2391_v3 = vld [vmem:[#allocation7 + $0xaa0] sm:$0xff] }
 0x1de   :  { %v10853_v19 = vcombine.low %v2387_v2, %v2391_v3  ;;  %v2427_v18 = vld [vmem:[#allocation7 + $0xbc0] sm:$0xff] }
 0x1df   :  { %8328 = vmatpush1.bf16.msra.mxu0 %v10805_v10  ;;  %v10854_v10 = vcombine.high %v2387_v2, %v2391_v3  ;;  %v10885_v2 = vcombine.low %v2419_v46, %v2423_v48  ;;  %v12227_v3 = vld [vmem:[#allocation5] sm:$0xff]  ;;  %v2459_v48 = vld [vmem:[#allocation7 + $0xcc0] sm:$0xff] }
 0x1e0   :  { %8656 = vmatpush1.bf16.msra.mxu1 %v10807_v13  ;;  %8329 = vmatprep.subr.bf16.mxu0 %v10814_v14  ;;  %v10856_v13 = vcombine.high %v2388_v5, %v2392_v6  ;;  %v2395_v14 = vld [vmem:[#allocation7 + $0xac0] sm:$0xff] }
 0x1e1   :  { %v12213_v25 = vpop.f32.mrb[8].mxu0  ;;  %8657 = vmatprep.subr.bf16.mxu1 %v10816_v15  ;;  %v12215_v30 = vpop.f32.mrb[8].mxu1  ;;  %v2399_v15 = vld [vmem:[#allocation7 + $0xae0] sm:$0xff] }
 0x1e2   :  { %v12217_v31 = vpop.f32.mrb[9].mxu0  ;;  %v12219_v34 = vpop.f32.mrb[9].mxu1  ;;  %v10861_v32 = vcombine.low %v2395_v14, %v2399_v15 }
 0x1e3   :  { %v1909_v11 = vpop.f32.mrb[10].mxu0  ;;  %8330 = vmatpush1.bf16.msra.mxu0 %v10813_v21  ;;  %v1950_v36 = vpop.f32.mrb[10].mxu1  ;;  %v10862_v21 = vcombine.high %v2395_v14, %v2399_v15  ;;  %v2436_v15 = vld [vmem:[#allocation7 + $0xc08] sm:$0xff] }
 0x1e4   :  { %8658 = vmatpush1.bf16.msra.mxu1 %v10815_v22  ;;  %v1910_v44 = vpop.f32.mrb[11].mxu0  ;;  %8331 = vmatprep.subr.bf16.mxu0 %v10822_v24  ;;  %v1951_v41 = vpop.f32.mrb[11].mxu1  ;;  %v10864_v22 = vcombine.high %v2396_v16, %v2400_v17  ;;  %v2403_v24 = vld [vmem:[#allocation7 + $0xb00] sm:$0xff]  ;;  %v2440_v16 = vld [vmem:[#allocation7 + $0xc28] sm:$0xff] }
 0x1e5   :  { %8659 = vmatprep.subr.bf16.mxu1 %v10824_v26  ;;  %v2407_v26 = vld [vmem:[#allocation7 + $0xb20] sm:$0xff] }
 0x1e6   :  { %v10870_v11 = vcombine.high %v2403_v24, %v2407_v26  ;;  %v2411_v36 = vld [vmem:[#allocation7 + $0xb40] sm:$0xff]  ;;  %v10869_v41 = vcombine.low %v2403_v24, %v2407_v26 }
 0x1e7   :  { %8332 = vmatpush1.bf16.msra.mxu0 %v10821_v35  ;;  %v10872_v35 = vcombine.high %v2404_v27, %v2408_v28  ;;  %v2415_v44 = vld [vmem:[#allocation7 + $0xb60] sm:$0xff] }
 0x1e8   :  { %8660 = vmatpush1.bf16.msra.mxu1 %v10823_v38  ;;  %8333 = vmatprep.subr.bf16.mxu0 %v10830_v39  ;;  %v2412_v38 = vld [vmem:[#allocation7 + $0xb48] sm:$0xff]  ;;  %v10878_v43 = vcombine.high %v2411_v36, %v2415_v44  ;;  %v2443_v26 = vld [vmem:[#allocation7 + $0xc40] sm:$0xff] }
 0x1e9   :  { %8661 = vmatprep.subr.bf16.mxu1 %v10832_v42  ;;  %v2416_v39 = vld [vmem:[#allocation7 + $0xb68] sm:$0xff]  ;;  %v10871_v42 = vcombine.low %v2404_v27, %v2408_v28  ;;  %v2447_v27 = vld [vmem:[#allocation7 + $0xc60] sm:$0xff] }
 0x1ea   :  { %v10880_v45 = vcombine.high %v2412_v38, %v2416_v39  ;;  %v10879_v8 = vcombine.low %v2412_v38, %v2416_v39  ;;  %v2452_v39 = vld [vmem:[#allocation7 + $0xc88] sm:$0xff] }
 0x1eb   :  { %8334 = vmatpush1.bf16.msra.mxu0 %v10829_v49  ;;  %v2420_v49 = vld [vmem:[#allocation7 + $0xb88] sm:$0xff] }
 0x1ec   :  { %8662 = vmatpush1.bf16.msra.mxu1 %v10831_v50  ;;  %8335 = vmatprep.subr.bf16.mxu0 %v10838_v51  ;;  %v2424_v50 = vld [vmem:[#allocation7 + $0xba8] sm:$0xff]  ;;  %v10877_v51 = vcombine.low %v2411_v36, %v2415_v44  ;;  %v2451_v36 = vld [vmem:[#allocation7 + $0xc80] sm:$0xff] }
 0x1ed   :  { %8663 = vmatprep.subr.bf16.mxu1 %v10840_v54  ;;  %v12222_v54 = vsub.s32 4, %v12146_v57  ;;  %v10888_v56 = vcombine.high %v2420_v49, %v2424_v50  ;;  %v10887_v6 = vcombine.low %v2420_v49, %v2424_v50  ;;  %v2455_v44 = vld [vmem:[#allocation7 + $0xca0] sm:$0xff]  ;;  %v2460_v50 = vld [vmem:[#allocation7 + $0xcc8] sm:$0xff] }
 0x1ee   :  { %v2463_v49 = vld [vmem:[#allocation7 + $0xce0] sm:$0xff] }
 0x1ef   :  { %8336 = vmatpush1.bf16.msra.mxu0 %v10837_v60  ;;  %v2431_v60 = vld [vmem:[#allocation7 + $0xbe0] sm:$0xff]  ;;  %v359_v5 = vrot.slane %v12227_v3, %v12222_v54 }
 0x1f0   :  { %8664 = vmatpush1.bf16.msra.mxu1 %v10839_v63  ;;  %8337 = vmatprep.subr.bf16.mxu0 %v10846_v0  ;;  %v12225_v63 = vsub.s32 7, %v12146_v57  ;;  %v2428_v0 = vld [vmem:[#allocation7 + $0xbc8] sm:$0xff]  ;;  %v10893_v17 = vcombine.low %v2427_v18, %v2431_v60 }
 0x1f1   :  { %8665 = vmatprep.subr.bf16.mxu1 %v10848_v1  ;;  %v2432_v1 = vld [vmem:[#allocation7 + $0xbe8] sm:$0xff] }
 0x1f2   :  { %v371_v14 = vrot.slane %v12227_v3, %v12225_v63 }
 0x1f3   :  { %8338 = vmatpush1.bf16.msra.mxu0 %v10845_v7  ;;  %v10894_v7 = vcombine.high %v2427_v18, %v2431_v60  ;;  %v2467_v60 = vld [vmem:[#allocation7 + $0xd00] sm:$0xff] }
 0x1f4   :  { %8666 = vmatpush1.bf16.msra.mxu1 %v10847_v9  ;;  %8339 = vmatprep.subr.bf16.mxu0 %v10854_v10  ;;  %v10896_v9 = vcombine.high %v2428_v0, %v2432_v1  ;;  %v2435_v10 = vld [vmem:[#allocation7 + $0xc00] sm:$0xff]  ;;  %v1867_v24 = vadd.f32 %v12191_v47, %v371_v14  ;;  %v2476_v14 = vld [vmem:[#allocation7 + $0xd48] sm:$0xff] }
 0x1f5   :  { %8667 = vmatprep.subr.bf16.mxu1 %v10856_v13  ;;  %v2439_v13 = vld [vmem:[#allocation7 + $0xc20] sm:$0xff] }
 0x1f6   :  { %v10901_v28 = vcombine.low %v2435_v10, %v2439_v13  ;;  %v12237_v38 = vpack.c.bf16 %v1867_v24, %v1867_v24  ;;  %v2484_v24 = vld [vmem:[#allocation7 + $0xd88] sm:$0xff] }
 0x1f7   :  { %8340 = vmatpush1.bf16.msra.mxu0 %v10853_v19  ;;  %v1824_v19 = vadd.f32 %v12185_v40, %v359_v5  ;;  %v10910_v40 = vcombine.high %v2443_v26, %v2447_v27  ;;  %v10925_v5 = vcombine.low %v2459_v48, %v2463_v49 }
 0x1f8   :  { %8668 = vmatpush1.bf16.msra.mxu1 %v10855_v20  ;;  %8341 = vmatprep.subr.bf16.mxu0 %v10862_v21  ;;  %v10895_v20 = vcombine.low %v2428_v0, %v2432_v1  ;;  %v10902_v21 = vcombine.high %v2435_v10, %v2439_v13  ;;  %v2471_v0 = vld [vmem:[#allocation7 + $0xd20] sm:$0xff]  ;;  %v2468_v1 = vld [vmem:[#allocation7 + $0xd08] sm:$0xff] }
 0x1f9   :  { %8669 = vmatprep.subr.bf16.mxu1 %v10864_v22  ;;  %v10904_v22 = vcombine.high %v2436_v15, %v2440_v16  ;;  %v2475_v10 = vld [vmem:[#allocation7 + $0xd40] sm:$0xff] }
 0x1fa   :  { %v2479_v13 = vld [vmem:[#allocation7 + $0xd60] sm:$0xff] }
 0x1fb   :  { %8342 = vmatpush1.bf16.msra.mxu0 %v10861_v32  ;;  %v2444_v32 = vld [vmem:[#allocation7 + $0xc48] sm:$0xff] }
 0x1fc   :  { %8670 = vmatpush1.bf16.msra.mxu1 %v10863_v61  ;;  %8343 = vmatprep.subr.bf16.mxu0 %v10870_v11  ;;  %v2448_v61 = vld [vmem:[#allocation7 + $0xc68] sm:$0xff]  ;;  %v12235_v11 = vpack.c.bf16 %v1824_v19, %v1824_v19  ;;  %v10942_v19 = vcombine.high %v2475_v10, %v2479_v13 }
 0x1fd   :  { %8671 = vmatprep.subr.bf16.mxu1 %v10872_v35  ;;  %v10903_v35 = vcombine.low %v2436_v15, %v2440_v16  ;;  %v10912_v47 = vcombine.high %v2444_v32, %v2448_v61  ;;  %v2480_v15 = vld [vmem:[#allocation7 + $0xd68] sm:$0xff]  ;;  %v10933_v16 = vcombine.low %v2467_v60, %v2471_v0 }
 0x1ff   :  { %8344 = vmatpush1.bf16.msra.mxu0 %v10869_v41  ;;  %v2456_v41 = vld [vmem:[#allocation7 + $0xca8] sm:$0xff] }
 0x200   :  { %8672 = vmatpush1.bf16.msra.mxu1 %v10871_v42  ;;  %8345 = vmatprep.subr.bf16.mxu0 %v10878_v43  ;;  %v10909_v42 = vcombine.low %v2443_v26, %v2447_v27  ;;  %v10911_v43 = vcombine.low %v2444_v32, %v2448_v61  ;;  %v10920_v46 = vcombine.high %v2452_v39, %v2456_v41  ;;  %v2488_v26 = vld [vmem:[#allocation7 + $0xda8] sm:$0xff] }
 0x201   :  { %8673 = vmatprep.subr.bf16.mxu1 %v10880_v45  ;;  %v10918_v45 = vcombine.high %v2451_v36, %v2455_v44  ;;  %v10941_v27 = vcombine.low %v2475_v10, %v2479_v13  ;;  %v2512_v10 = vld [vmem:[#allocation7 + $0xe68] sm:$0xff] }
 0x203   :  { %8346 = vmatpush1.bf16.msra.mxu0 %v10877_v51  ;;  %v2464_v51 = vld [vmem:[#allocation7 + $0xce8] sm:$0xff] }
 0x204   :  { %8674 = vmatpush1.bf16.msra.mxu1 %v10879_v8  ;;  %8347 = vmatprep.subr.bf16.mxu0 %v10886_v55  ;;  %v10917_v8 = vcombine.low %v2451_v36, %v2455_v44  ;;  %v10919_v55 = vcombine.low %v2452_v39, %v2456_v41  ;;  %v10928_v18 = vcombine.high %v2460_v50, %v2464_v51  ;;  %v2495_v36 = vld [vmem:[#allocation7 + $0xde0] sm:$0xff]  ;;  %v2492_v39 = vld [vmem:[#allocation7 + $0xdc8] sm:$0xff] }
 0x205   :  { %8675 = vmatprep.subr.bf16.mxu1 %v10888_v56  ;;  %v10926_v56 = vcombine.high %v2459_v48, %v2463_v49  ;;  %v2496_v41 = vld [vmem:[#allocation7 + $0xde8] sm:$0xff]  ;;  %v10951_v49 = vcombine.low %v2484_v24, %v2488_v26 }
 0x207   :  { %8348 = vmatpush1.bf16.msra.mxu0 %v10885_v2  ;;  %v2472_v2 = vld [vmem:[#allocation7 + $0xd28] sm:$0xff] }
 0x208   :  { %8676 = vmatpush1.bf16.msra.mxu1 %v10887_v6  ;;  %8349 = vmatprep.subr.bf16.mxu0 %v10894_v7  ;;  %v10927_v6 = vcombine.low %v2460_v50, %v2464_v51  ;;  %v10934_v7 = vcombine.high %v2467_v60, %v2471_v0  ;;  %v2504_v60 = vld [vmem:[#allocation7 + $0xe28] sm:$0xff] }
 0x209   :  { %8677 = vmatprep.subr.bf16.mxu1 %v10896_v9  ;;  %v10936_v9 = vcombine.high %v2468_v1, %v2472_v2 }
 0x20b   :  { %8350 = vmatpush1.bf16.msra.mxu0 %v10893_v17  ;;  %v10935_v17 = vcombine.low %v2468_v1, %v2472_v2  ;;  %v10959_v1 = vcombine.low %v2492_v39, %v2496_v41 }
 0x20c   :  { %8678 = vmatpush1.bf16.msra.mxu1 %v10895_v20  ;;  %8360 = vmatprep.subr.bf16.mxu0 %v10902_v21  ;;  %v10944_v20 = vcombine.high %v2476_v14, %v2480_v15  ;;  %v2483_v21 = vld [vmem:[#allocation7 + $0xd80] sm:$0xff] }
 0x20d   :  { %8688 = vmatprep.subr.bf16.mxu1 %v10904_v22  ;;  %v2487_v22 = vld [vmem:[#allocation7 + $0xda0] sm:$0xff] }
 0x20e   :  { %8352 = vmatmul.mubr.bf16.vlgmr.msra.gmra.mrb[16].mxu0 %v12235_v11  ;;  %v10950_v32 = vcombine.high %v2483_v21, %v2487_v22 }
 0x20f   :  { %8680 = vmatmul.mubr.bf16.vlgmr.msra.gmra.mrb[16].mxu1 %v12235_v11  ;;  %8361 = vmatpush1.bf16.msra.mxu0 %v10901_v28  ;;  %v10943_v28 = vcombine.low %v2476_v14, %v2480_v15 }
 0x210   :  { %8392 = vmatprep.mubr.bf16.mxu0 %v12237_v38  ;;  %8689 = vmatpush1.bf16.msra.mxu1 %v10903_v35  ;;  %v10952_v35 = vcombine.high %v2484_v24, %v2488_v26 }
 0x211   :  { %8720 = vmatprep.mubr.bf16.mxu1 %v12237_v38  ;;  %8362 = vmatprep.subr.bf16.mxu0 %v10910_v40  ;;  %v2491_v40 = vld [vmem:[#allocation7 + $0xdc0] sm:$0xff] }
 0x212   :  { %8690 = vmatprep.subr.bf16.mxu1 %v10912_v47  ;;  %v10958_v50 = vcombine.high %v2491_v40, %v2495_v36  ;;  %v10957_v0 = vcombine.low %v2491_v40, %v2495_v36  ;;  %v2528_v40 = vld [vmem:[#allocation7 + $0xee8] sm:$0xff] }
 0x213   :  { %8363 = vmatpush1.bf16.msra.mxu0 %v10909_v42 }
 0x214   :  { %8691 = vmatpush1.bf16.msra.mxu1 %v10911_v43  ;;  %8364 = vmatprep.subr.bf16.mxu0 %v10918_v45  ;;  %v10949_v45 = vcombine.low %v2483_v21, %v2487_v22  ;;  %v2520_v21 = vld [vmem:[#allocation7 + $0xea8] sm:$0xff] }
 0x215   :  { %8692 = vmatprep.subr.bf16.mxu1 %v10920_v46 }
 0x217   :  { %8365 = vmatpush1.bf16.msra.mxu0 %v10917_v8  ;;  %v10960_v8 = vcombine.high %v2492_v39, %v2496_v41 }
 0x218   :  { %8693 = vmatpush1.bf16.msra.mxu1 %v10919_v55  ;;  %8366 = vmatprep.subr.bf16.mxu0 %v10926_v56  ;;  %v2499_v55 = vld [vmem:[#allocation7 + $0xe00] sm:$0xff] }
 0x219   :  { %8694 = vmatprep.subr.bf16.mxu1 %v10928_v18  ;;  %v2503_v56 = vld [vmem:[#allocation7 + $0xe20] sm:$0xff]  ;;  %v2500_v18 = vld [vmem:[#allocation7 + $0xe08] sm:$0xff] }
 0x21a   :  { %v10966_v2 = vcombine.high %v2499_v55, %v2503_v56  ;;  %v10965_v13 = vcombine.low %v2499_v55, %v2503_v56  ;;  %v10967_v14 = vcombine.low %v2500_v18, %v2504_v60  ;;  %v2539_v56 = vld [vmem:[#allocation7 + $0xf40] sm:$0xff] }
 0x21b   :  { %8367 = vmatpush1.bf16.msra.mxu0 %v10925_v5  ;;  %v10968_v5 = vcombine.high %v2500_v18, %v2504_v60  ;;  %v2543_v18 = vld [vmem:[#allocation7 + $0xf60] sm:$0xff]  ;;  %v2540_v60 = vld [vmem:[#allocation7 + $0xf48] sm:$0xff] }
 0x21c   :  { %8695 = vmatpush1.bf16.msra.mxu1 %v10927_v6  ;;  %8368 = vmatprep.subr.bf16.mxu0 %v10934_v7  ;;  %v2507_v6 = vld [vmem:[#allocation7 + $0xe40] sm:$0xff] }
 0x21d   :  { %8696 = vmatprep.subr.bf16.mxu1 %v10936_v9  ;;  %v2511_v7 = vld [vmem:[#allocation7 + $0xe60] sm:$0xff]  ;;  %v2508_v9 = vld [vmem:[#allocation7 + $0xe48] sm:$0xff] }
 0x21e   :  { %v10974_v15 = vcombine.high %v2507_v6, %v2511_v7  ;;  %v10973_v22 = vcombine.low %v2507_v6, %v2511_v7  ;;  %v10975_v24 = vcombine.low %v2508_v9, %v2512_v10  ;;  %v2547_v7 = vld [vmem:[#allocation7 + $0xf80] sm:$0xff] }
 0x21f   :  { %8369 = vmatpush1.bf16.msra.mxu0 %v10933_v16  ;;  %v10976_v16 = vcombine.high %v2508_v9, %v2512_v10  ;;  %v2551_v9 = vld [vmem:[#allocation7 + $0xfa0] sm:$0xff]  ;;  %v2548_v10 = vld [vmem:[#allocation7 + $0xf88] sm:$0xff] }
 0x220   :  { %8697 = vmatpush1.bf16.msra.mxu1 %v10935_v17  ;;  %8370 = vmatprep.subr.bf16.mxu0 %v10942_v19  ;;  %v2515_v17 = vld [vmem:[#allocation7 + $0xe80] sm:$0xff] }
 0x221   :  { %v12243_v61 = vpop.f32.mrb[12].mxu0  ;;  %8698 = vmatprep.subr.bf16.mxu1 %v10944_v20  ;;  %v12245_v44 = vpop.f32.mrb[12].mxu1  ;;  %v2519_v19 = vld [vmem:[#allocation7 + $0xea0] sm:$0xff]  ;;  %v2516_v20 = vld [vmem:[#allocation7 + $0xe88] sm:$0xff] }
 0x222   :  { %v12247_v47 = vpop.f32.mrb[13].mxu0  ;;  %v12249_v42 = vpop.f32.mrb[13].mxu1  ;;  %v10982_v26 = vcombine.high %v2515_v17, %v2519_v19  ;;  %v10981_v36 = vcombine.low %v2515_v17, %v2519_v19  ;;  %v10983_v39 = vcombine.low %v2516_v20, %v2520_v21  ;;  %v11014_v17 = vcombine.high %v2547_v7, %v2551_v9 }
 0x223   :  { %v1991_v43 = vpop.f32.mrb[14].mxu0  ;;  %8371 = vmatpush1.bf16.msra.mxu0 %v10941_v27  ;;  %v2032_v46 = vpop.f32.mrb[14].mxu1  ;;  %v10984_v27 = vcombine.high %v2516_v20, %v2520_v21  ;;  %v2555_v20 = vld [vmem:[#allocation7 + $0xfc0] sm:$0xff] }
 0x224   :  { %8699 = vmatpush1.bf16.msra.mxu1 %v10943_v28  ;;  %v1992_v48 = vpop.f32.mrb[15].mxu0  ;;  %8372 = vmatprep.subr.bf16.mxu0 %v10950_v32  ;;  %v2033_v51 = vpop.f32.mrb[15].mxu1  ;;  %v2523_v28 = vld [vmem:[#allocation7 + $0xec0] sm:$0xff] }
 0x225   :  { %8700 = vmatprep.subr.bf16.mxu1 %v10952_v35  ;;  %v2527_v32 = vld [vmem:[#allocation7 + $0xee0] sm:$0xff]  ;;  %v2524_v35 = vld [vmem:[#allocation7 + $0xec8] sm:$0xff] }
 0x226   :  { %v10990_v41 = vcombine.high %v2523_v28, %v2527_v32  ;;  %v10992_v43 = vcombine.high %v2524_v35, %v2528_v40  ;;  %v2535_v46 = vld [vmem:[#allocation7 + $0xf20] sm:$0xff]  ;;  %v2532_v48 = vld [vmem:[#allocation7 + $0xf08] sm:$0xff]  ;;  %v10991_v51 = vcombine.low %v2524_v35, %v2528_v40 }
 0x227   :  { %8373 = vmatpush1.bf16.msra.mxu0 %v10949_v45  ;;  %v2531_v45 = vld [vmem:[#allocation7 + $0xf00] sm:$0xff] }
 0x228   :  { %8701 = vmatpush1.bf16.msra.mxu1 %v10951_v49  ;;  %8374 = vmatprep.subr.bf16.mxu0 %v10958_v50  ;;  %v2536_v49 = vld [vmem:[#allocation7 + $0xf28] sm:$0xff]  ;;  %v10989_v50 = vcombine.low %v2523_v28, %v2527_v32  ;;  %v2559_v21 = vld [vmem:[#allocation7 + $0xfe0] sm:$0xff] }
 0x229   :  { %8702 = vmatprep.subr.bf16.mxu1 %v10960_v8  ;;  %v10998_v8 = vcombine.high %v2531_v45, %v2535_v46  ;;  %v11000_v55 = vcombine.high %v2532_v48, %v2536_v49  ;;  %v11022_v32 = vcombine.high %v2555_v20, %v2559_v21  ;;  %v2563_v40 = vld [vmem:[#allocation7 + $0x1000] sm:$0xff] }
 0x22b   :  { %8375 = vmatpush1.bf16.msra.mxu0 %v10957_v0  ;;  %v2544_v0 = vld [vmem:[#allocation7 + $0xf68] sm:$0xff] }
 0x22c   :  { %8703 = vmatpush1.bf16.msra.mxu1 %v10959_v1  ;;  %8376 = vmatprep.subr.bf16.mxu0 %v10966_v2  ;;  %v10997_v1 = vcombine.low %v2531_v45, %v2535_v46  ;;  %v10999_v2 = vcombine.low %v2532_v48, %v2536_v49  ;;  %v11008_v6 = vcombine.high %v2540_v60, %v2544_v0 }
 0x22d   :  { %8704 = vmatprep.subr.bf16.mxu1 %v10968_v5  ;;  %v11006_v5 = vcombine.high %v2539_v56, %v2543_v18  ;;  %v11021_v45 = vcombine.low %v2555_v20, %v2559_v21  ;;  %v2592_v20 = vld [vmem:[#allocation7 + $0x10e8] sm:$0xff] }
 0x22f   :  { %8377 = vmatpush1.bf16.msra.mxu0 %v10965_v13  ;;  %v2552_v13 = vld [vmem:[#allocation7 + $0xfa8] sm:$0xff] }
 0x230   :  { %8705 = vmatpush1.bf16.msra.mxu1 %v10967_v14  ;;  %8378 = vmatprep.subr.bf16.mxu0 %v10974_v15  ;;  %v11005_v14 = vcombine.low %v2539_v56, %v2543_v18  ;;  %v12252_v15 = vsub.s32 6, %v12146_v57  ;;  %v11016_v19 = vcombine.high %v2548_v10, %v2552_v13  ;;  %v11015_v57 = vcombine.low %v2548_v10, %v2552_v13  ;;  %v2572_v56 = vld [vmem:[#allocation7 + $0x1048] sm:$0xff] }
 0x231   :  { %8706 = vmatprep.subr.bf16.mxu1 %v10976_v16  ;;  %v11007_v16 = vcombine.low %v2540_v60, %v2544_v0  ;;  %v2576_v18 = vld [vmem:[#allocation7 + $0x1068] sm:$0xff] }
 0x232   :  { %v367_v28 = vrot.slane %v12227_v3, %v12252_v15  ;;  %v11039_v10 = vcombine.low %v2572_v56, %v2576_v18 }
 0x233   :  { %8379 = vmatpush1.bf16.msra.mxu0 %v10973_v22  ;;  %v2556_v22 = vld [vmem:[#allocation7 + $0xfc8] sm:$0xff] }
 0x234   :  { %8707 = vmatpush1.bf16.msra.mxu1 %v10975_v24  ;;  %8380 = vmatprep.subr.bf16.mxu0 %v10982_v26  ;;  %v2560_v24 = vld [vmem:[#allocation7 + $0xfe8] sm:$0xff]  ;;  %v12254_v26 = vld [vmem:[#allocation5 + $0x8] sm:$0xff]  ;;  %v1865_v46 = vadd.f32 %v12187_v12, %v367_v28  ;;  %v2595_v28 = vld [vmem:[#allocation7 + $0x1100] sm:$0xff] }
 0x235   :  { %8708 = vmatprep.subr.bf16.mxu1 %v10984_v27  ;;  %v11013_v27 = vcombine.low %v2547_v7, %v2551_v9  ;;  %v11024_v35 = vcombine.high %v2556_v22, %v2560_v24  ;;  %v11023_v3 = vcombine.low %v2556_v22, %v2560_v24  ;;  %v2584_v7 = vld [vmem:[#allocation7 + $0x10a8] sm:$0xff] }
 0x236   :  { %v12262_v60 = vpack.c.bf16 %v1865_v46, %v1865_v46  ;;  %v2604_v46 = vld [vmem:[#allocation7 + $0x1148] sm:$0xff] }
 0x237   :  { %8381 = vmatpush1.bf16.msra.mxu0 %v10981_v36  ;;  %v2567_v36 = vld [vmem:[#allocation7 + $0x1020] sm:$0xff] }
 0x238   :  { %8709 = vmatpush1.bf16.msra.mxu1 %v10983_v39  ;;  %8382 = vmatprep.subr.bf16.mxu0 %v10990_v41  ;;  %v379_v39 = vrot.slane %v12254_v26, %v12149_v59  ;;  %v2564_v41 = vld [vmem:[#allocation7 + $0x1008] sm:$0xff]  ;;  %v11030_v48 = vcombine.high %v2563_v40, %v2567_v36 }
 0x239   :  { %8710 = vmatprep.subr.bf16.mxu1 %v10992_v43  ;;  %v2568_v43 = vld [vmem:[#allocation7 + $0x1028] sm:$0xff] }
 0x23a   :  { %v11032_v49 = vcombine.high %v2564_v41, %v2568_v43  ;;  %v11031_v0 = vcombine.low %v2564_v41, %v2568_v43  ;;  %v2603_v43 = vld [vmem:[#allocation7 + $0x1140] sm:$0xff] }
 0x23b   :  { %8383 = vmatpush1.bf16.msra.mxu0 %v10989_v50  ;;  %v1908_v50 = vadd.f32 %v12217_v31, %v379_v39  ;;  %v11040_v31 = vcombine.high %v2572_v56, %v2576_v18  ;;  %v2612_v56 = vld [vmem:[#allocation7 + $0x1188] sm:$0xff] }
 0x23c   :  { %8711 = vmatpush1.bf16.msra.mxu1 %v10991_v51  ;;  %8384 = vmatprep.subr.bf16.mxu0 %v10998_v8  ;;  %v2571_v51 = vld [vmem:[#allocation7 + $0x1040] sm:$0xff]  ;;  %v2616_v18 = vld [vmem:[#allocation7 + $0x11a8] sm:$0xff] }
 0x23d   :  { %8712 = vmatprep.subr.bf16.mxu1 %v11000_v55  ;;  %v2575_v8 = vld [vmem:[#allocation7 + $0x1060] sm:$0xff]  ;;  %v11029_v55 = vcombine.low %v2563_v40, %v2567_v36 }
 0x23e   :  { %v11038_v12 = vcombine.high %v2571_v51, %v2575_v8  ;;  %v11037_v9 = vcombine.low %v2571_v51, %v2575_v8  ;;  %v2611_v8 = vld [vmem:[#allocation7 + $0x1180] sm:$0xff] }
 0x23f   :  { %8385 = vmatpush1.bf16.msra.mxu0 %v10997_v1  ;;  %v2579_v1 = vld [vmem:[#allocation7 + $0x1080] sm:$0xff] }
 0x240   :  { %8713 = vmatpush1.bf16.msra.mxu1 %v10999_v2  ;;  %8386 = vmatprep.subr.bf16.mxu0 %v11006_v5  ;;  %v2583_v2 = vld [vmem:[#allocation7 + $0x10a0] sm:$0xff]  ;;  %v12264_v5 = vpack.c.bf16 %v1908_v50, %v1908_v50 }
 0x241   :  { %8714 = vmatprep.subr.bf16.mxu1 %v11008_v6  ;;  %v2580_v6 = vld [vmem:[#allocation7 + $0x1088] sm:$0xff]  ;;  %v11046_v13 = vcombine.high %v2579_v1, %v2583_v2  ;;  %v11045_v21 = vcombine.low %v2579_v1, %v2583_v2  ;;  %v11080_v2 = vcombine.high %v2612_v56, %v2616_v18 }
 0x242   :  { %v11047_v22 = vcombine.low %v2580_v6, %v2584_v7 }
 0x243   :  { %8387 = vmatpush1.bf16.msra.mxu0 %v11005_v14  ;;  %v11048_v14 = vcombine.high %v2580_v6, %v2584_v7  ;;  %v2623_v6 = vld [vmem:[#allocation7 + $0x11e0] sm:$0xff]  ;;  %v2620_v7 = vld [vmem:[#allocation7 + $0x11c8] sm:$0xff] }
 0x244   :  { %8715 = vmatpush1.bf16.msra.mxu1 %v11007_v16  ;;  %8388 = vmatprep.subr.bf16.mxu0 %v11014_v17  ;;  %v2587_v16 = vld [vmem:[#allocation7 + $0x10c0] sm:$0xff] }
 0x245   :  { %8716 = vmatprep.subr.bf16.mxu1 %v11016_v19  ;;  %v2591_v17 = vld [vmem:[#allocation7 + $0x10e0] sm:$0xff]  ;;  %v2588_v19 = vld [vmem:[#allocation7 + $0x10c8] sm:$0xff] }
 0x246   :  { %v11054_v24 = vcombine.high %v2587_v16, %v2591_v17  ;;  %v11053_v40 = vcombine.low %v2587_v16, %v2591_v17  ;;  %v11055_v36 = vcombine.low %v2588_v19, %v2592_v20  ;;  %v2627_v17 = vld [vmem:[#allocation7 + $0x1200] sm:$0xff] }
 0x247   :  { %8389 = vmatpush1.bf16.msra.mxu0 %v11013_v27  ;;  %v11056_v27 = vcombine.high %v2588_v19, %v2592_v20  ;;  %v2631_v19 = vld [vmem:[#allocation7 + $0x1220] sm:$0xff]  ;;  %v2628_v20 = vld [vmem:[#allocation7 + $0x1208] sm:$0xff] }
 0x248   :  { %8717 = vmatpush1.bf16.msra.mxu1 %v11015_v57  ;;  %8390 = vmatprep.subr.bf16.mxu0 %v11022_v32  ;;  %v2599_v57 = vld [vmem:[#allocation7 + $0x1120] sm:$0xff]  ;;  %v2596_v32 = vld [vmem:[#allocation7 + $0x1108] sm:$0xff] }
 0x249   :  { %8718 = vmatprep.subr.bf16.mxu1 %v11024_v35  ;;  %v2600_v35 = vld [vmem:[#allocation7 + $0x1128] sm:$0xff]  ;;  %v11062_v39 = vcombine.high %v2595_v28, %v2599_v57 }
 0x24a   :  { %v11064_v41 = vcombine.high %v2596_v32, %v2600_v35 }
 0x24b   :  { %8391 = vmatpush1.bf16.msra.mxu0 %v11021_v45  ;;  %v2607_v45 = vld [vmem:[#allocation7 + $0x1160] sm:$0xff] }
 0x24c   :  { %8719 = vmatpush1.bf16.msra.mxu1 %v11023_v3  ;;  %8401 = vmatprep.subr.bf16.mxu0 %v11030_v48  ;;  %v2608_v3 = vld [vmem:[#allocation7 + $0x1168] sm:$0xff]  ;;  %v11061_v48 = vcombine.low %v2595_v28, %v2599_v57  ;;  %v11070_v50 = vcombine.high %v2603_v43, %v2607_v45  ;;  %v2635_v57 = vld [vmem:[#allocation7 + $0x1240] sm:$0xff] }
 0x24d   :  { %8729 = vmatprep.subr.bf16.mxu1 %v11032_v49  ;;  %v11063_v49 = vcombine.low %v2596_v32, %v2600_v35  ;;  %v11072_v51 = vcombine.high %v2604_v46, %v2608_v3  ;;  %v2639_v32 = vld [vmem:[#allocation7 + $0x1260] sm:$0xff]  ;;  %v2636_v35 = vld [vmem:[#allocation7 + $0x1248] sm:$0xff] }
 0x24e   :  { %8393 = vmatmul.mubr.bf16.vlgmr.msra.gmra.mrb[16].mxu0 %v12262_v60 }
 0x24f   :  { %8721 = vmatmul.mubr.bf16.vlgmr.msra.gmra.mrb[16].mxu1 %v12262_v60  ;;  %8402 = vmatpush1.bf16.msra.mxu0 %v11029_v55  ;;  %v2615_v55 = vld [vmem:[#allocation7 + $0x11a0] sm:$0xff] }
 0x250   :  { %8433 = vmatprep.mubr.bf16.mxu0 %v12264_v5  ;;  %8730 = vmatpush1.bf16.msra.mxu1 %v11031_v0  ;;  %v11069_v0 = vcombine.low %v2603_v43, %v2607_v45  ;;  %v11078_v1 = vcombine.high %v2611_v8, %v2615_v55  ;;  %v2643_v45 = vld [vmem:[#allocation7 + $0x1280] sm:$0xff] }
 0x251   :  { %8761 = vmatprep.mubr.bf16.mxu1 %v12264_v5  ;;  %8403 = vmatprep.subr.bf16.mxu0 %v11038_v12  ;;  %v11071_v12 = vcombine.low %v2604_v46, %v2608_v3  ;;  %v2647_v46 = vld [vmem:[#allocation7 + $0x12a0] sm:$0xff]  ;;  %v2644_v3 = vld [vmem:[#allocation7 + $0x1288] sm:$0xff] }
 0x252   :  { %8731 = vmatprep.subr.bf16.mxu1 %v11040_v31  ;;  %v2619_v31 = vld [vmem:[#allocation7 + $0x11c0] sm:$0xff] }
 0x253   :  { %8404 = vmatpush1.bf16.msra.mxu0 %v11037_v9  ;;  %v2624_v9 = vld [vmem:[#allocation7 + $0x11e8] sm:$0xff] }
 0x254   :  { %8732 = vmatpush1.bf16.msra.mxu1 %v11039_v10  ;;  %8405 = vmatprep.subr.bf16.mxu0 %v11046_v13  ;;  %v11077_v10 = vcombine.low %v2611_v8, %v2615_v55  ;;  %v11079_v13 = vcombine.low %v2612_v56, %v2616_v18  ;;  %v11088_v16 = vcombine.high %v2620_v7, %v2624_v9  ;;  %v2651_v55 = vld [vmem:[#allocation7 + $0x12c0] sm:$0xff]  ;;  %v2652_v18 = vld [vmem:[#allocation7 + $0x12c8] sm:$0xff] }
 0x255   :  { %8733 = vmatprep.subr.bf16.mxu1 %v11048_v14  ;;  %v11086_v14 = vcombine.high %v2619_v31, %v2623_v6  ;;  %v2655_v56 = vld [vmem:[#allocation7 + $0x12e0] sm:$0xff] }
 0x257   :  { %8406 = vmatpush1.bf16.msra.mxu0 %v11045_v21  ;;  %v2632_v21 = vld [vmem:[#allocation7 + $0x1228] sm:$0xff] }
 0x258   :  { %8734 = vmatpush1.bf16.msra.mxu1 %v11047_v22  ;;  %8407 = vmatprep.subr.bf16.mxu0 %v11054_v24  ;;  %v11085_v22 = vcombine.low %v2619_v31, %v2623_v6  ;;  %v11087_v24 = vcombine.low %v2620_v7, %v2624_v9  ;;  %v11096_v28 = vcombine.high %v2628_v20, %v2632_v21  ;;  %v2659_v6 = vld [vmem:[#allocation7 + $0x1300] sm:$0xff]  ;;  %v2660_v9 = vld [vmem:[#allocation7 + $0x1308] sm:$0xff] }
 0x259   :  { %8735 = vmatprep.subr.bf16.mxu1 %v11056_v27  ;;  %v11094_v27 = vcombine.high %v2627_v17, %v2631_v19  ;;  %v2663_v7 = vld [vmem:[#allocation7 + $0x1320] sm:$0xff] }
 0x25b   :  { %8408 = vmatpush1.bf16.msra.mxu0 %v11053_v40  ;;  %v2640_v40 = vld [vmem:[#allocation7 + $0x1268] sm:$0xff] }
 0x25c   :  { %8736 = vmatpush1.bf16.msra.mxu1 %v11055_v36  ;;  %8409 = vmatprep.subr.bf16.mxu0 %v11062_v39  ;;  %v11093_v36 = vcombine.low %v2627_v17, %v2631_v19  ;;  %v11095_v39 = vcombine.low %v2628_v20, %v2632_v21  ;;  %v11104_v43 = vcombine.high %v2636_v35, %v2640_v40  ;;  %v2667_v19 = vld [vmem:[#allocation7 + $0x1340] sm:$0xff]  ;;  %v2668_v21 = vld [vmem:[#allocation7 + $0x1348] sm:$0xff] }
 0x25d   :  { %8737 = vmatprep.subr.bf16.mxu1 %v11064_v41  ;;  %v11102_v41 = vcombine.high %v2635_v57, %v2639_v32  ;;  %v2671_v20 = vld [vmem:[#allocation7 + $0x1360] sm:$0xff] }
 0x25f   :  { %8410 = vmatpush1.bf16.msra.mxu0 %v11061_v48  ;;  %v2648_v48 = vld [vmem:[#allocation7 + $0x12a8] sm:$0xff] }
 0x260   :  { %8738 = vmatpush1.bf16.msra.mxu1 %v11063_v49  ;;  %8411 = vmatprep.subr.bf16.mxu0 %v11070_v50  ;;  %v11101_v49 = vcombine.low %v2635_v57, %v2639_v32  ;;  %v11103_v50 = vcombine.low %v2636_v35, %v2640_v40  ;;  %v11112_v8 = vcombine.high %v2644_v3, %v2648_v48  ;;  %v2675_v32 = vld [vmem:[#allocation7 + $0x1380] sm:$0xff]  ;;  %v2676_v40 = vld [vmem:[#allocation7 + $0x1388] sm:$0xff] }
 0x261   :  { %8739 = vmatprep.subr.bf16.mxu1 %v11072_v51  ;;  %v11110_v51 = vcombine.high %v2643_v45, %v2647_v46  ;;  %v2679_v35 = vld [vmem:[#allocation7 + $0x13a0] sm:$0xff] }
 0x263   :  { %8412 = vmatpush1.bf16.msra.mxu0 %v11069_v0  ;;  %v2656_v0 = vld [vmem:[#allocation7 + $0x12e8] sm:$0xff] }
 0x264   :  { %8740 = vmatpush1.bf16.msra.mxu1 %v11071_v12  ;;  %8413 = vmatprep.subr.bf16.mxu0 %v11078_v1  ;;  %v11109_v12 = vcombine.low %v2643_v45, %v2647_v46  ;;  %v11111_v1 = vcombine.low %v2644_v3, %v2648_v48  ;;  %v11120_v31 = vcombine.high %v2652_v18, %v2656_v0  ;;  %v2683_v46 = vld [vmem:[#allocation7 + $0x13c0] sm:$0xff]  ;;  %v2684_v48 = vld [vmem:[#allocation7 + $0x13c8] sm:$0xff] }
 0x265   :  { %8741 = vmatprep.subr.bf16.mxu1 %v11080_v2  ;;  %v11118_v2 = vcombine.high %v2651_v55, %v2655_v56  ;;  %v2687_v3 = vld [vmem:[#allocation7 + $0x13e0] sm:$0xff] }
 0x267   :  { %8414 = vmatpush1.bf16.msra.mxu0 %v11077_v10  ;;  %v2664_v10 = vld [vmem:[#allocation7 + $0x1328] sm:$0xff] }
 0x268   :  { %8742 = vmatpush1.bf16.msra.mxu1 %v11079_v13  ;;  %8415 = vmatprep.subr.bf16.mxu0 %v11086_v14  ;;  %v11117_v13 = vcombine.low %v2651_v55, %v2655_v56  ;;  %v11119_v14 = vcombine.low %v2652_v18, %v2656_v0  ;;  %v11128_v17 = vcombine.high %v2660_v9, %v2664_v10  ;;  %v2691_v18 = vld [vmem:[#allocation7 + $0x1400] sm:$0xff] }
 0x269   :  { %8743 = vmatprep.subr.bf16.mxu1 %v11088_v16  ;;  %v11126_v16 = vcombine.high %v2659_v6, %v2663_v7  ;;  %v11150_v55 = vcombine.high %v2683_v46, %v2687_v3  ;;  %v2695_v0 = vld [vmem:[#allocation7 + $0x1420] sm:$0xff] }
 0x26b   :  { %8416 = vmatpush1.bf16.msra.mxu0 %v11085_v22  ;;  %v2672_v22 = vld [vmem:[#allocation7 + $0x1368] sm:$0xff] }
 0x26c   :  { %8744 = vmatpush1.bf16.msra.mxu1 %v11087_v24  ;;  %8417 = vmatprep.subr.bf16.mxu0 %v11094_v27  ;;  %v11125_v24 = vcombine.low %v2659_v6, %v2663_v7  ;;  %v11127_v27 = vcombine.low %v2660_v9, %v2664_v10  ;;  %v11136_v57 = vcombine.high %v2668_v21, %v2672_v22 }
 0x26d   :  { %8745 = vmatprep.subr.bf16.mxu1 %v11096_v28  ;;  %v11134_v28 = vcombine.high %v2667_v19, %v2671_v20  ;;  %v11158_v9 = vcombine.high %v2691_v18, %v2695_v0 }
 0x26f   :  { %8418 = vmatpush1.bf16.msra.mxu0 %v11093_v36  ;;  %v2680_v36 = vld [vmem:[#allocation7 + $0x13a8] sm:$0xff] }
 0x270   :  { %8746 = vmatpush1.bf16.msra.mxu1 %v11095_v39  ;;  %8419 = vmatprep.subr.bf16.mxu0 %v11102_v41  ;;  %v11133_v39 = vcombine.low %v2667_v19, %v2671_v20  ;;  %v11135_v41 = vcombine.low %v2668_v21, %v2672_v22  ;;  %v11144_v45 = vcombine.high %v2676_v40, %v2680_v36  ;;  %v2700_v19 = vld [vmem:[#allocation7 + $0x1448] sm:$0xff] }
 0x271   :  { %8747 = vmatprep.subr.bf16.mxu1 %v11104_v43  ;;  %v11142_v43 = vcombine.high %v2675_v32, %v2679_v35  ;;  %v2704_v20 = vld [vmem:[#allocation7 + $0x1468] sm:$0xff] }
 0x273   :  { %8420 = vmatpush1.bf16.msra.mxu0 %v11101_v49  ;;  %v2688_v49 = vld [vmem:[#allocation7 + $0x13e8] sm:$0xff] }
 0x274   :  { %8748 = vmatpush1.bf16.msra.mxu1 %v11103_v50  ;;  %8421 = vmatprep.subr.bf16.mxu0 %v11110_v51  ;;  %v11141_v50 = vcombine.low %v2675_v32, %v2679_v35  ;;  %v375_v51 = vrot.slane %v12254_v26, %v12166_v53  ;;  %v11152_v56 = vcombine.high %v2684_v48, %v2688_v49  ;;  %v2712_v32 = vld [vmem:[#allocation7 + $0x14a8] sm:$0xff] }
 0x275   :  { %8749 = vmatprep.subr.bf16.mxu1 %v11112_v8  ;;  %v11143_v8 = vcombine.low %v2676_v40, %v2680_v36  ;;  %v11151_v7 = vcombine.low %v2684_v48, %v2688_v49  ;;  %v11167_v40 = vcombine.low %v2700_v19, %v2704_v20 }
 0x276   :  { %v1906_v6 = vadd.f32 %v12213_v25, %v375_v51  ;;  %v2723_v51 = vld [vmem:[#allocation7 + $0x1500] sm:$0xff] }
 0x277   :  { %8422 = vmatpush1.bf16.msra.mxu0 %v11109_v12  ;;  %v387_v12 = vrot.slane %v12254_v26, %v12169_v29 }
 0x278   :  { %8750 = vmatpush1.bf16.msra.mxu1 %v11111_v1  ;;  %8423 = vmatprep.subr.bf16.mxu0 %v11118_v2  ;;  %v2692_v1 = vld [vmem:[#allocation7 + $0x1408] sm:$0xff]  ;;  %v12276_v21 = vpack.c.bf16 %v1906_v6, %v1906_v6 }
 0x279   :  { %8751 = vmatprep.subr.bf16.mxu1 %v11120_v31  ;;  %v2696_v2 = vld [vmem:[#allocation7 + $0x1428] sm:$0xff]  ;;  %v11149_v31 = vcombine.low %v2683_v46, %v2687_v3 }
 0x27a   :  { %v11160_v10 = vcombine.high %v2692_v1, %v2696_v2  ;;  %v11159_v22 = vcombine.low %v2692_v1, %v2696_v2  ;;  %v2720_v46 = vld [vmem:[#allocation7 + $0x14e8] sm:$0xff]  ;;  %v2731_v2 = vld [vmem:[#allocation7 + $0x1540] sm:$0xff] }
 0x27b   :  { %8424 = vmatpush1.bf16.msra.mxu0 %v11117_v13  ;;  %v1949_v13 = vadd.f32 %v12219_v34, %v387_v12  ;;  %v11168_v34 = vcombine.high %v2700_v19, %v2704_v20  ;;  %v2732_v6 = vld [vmem:[#allocation7 + $0x1548] sm:$0xff] }
 0x27c   :  { %8752 = vmatpush1.bf16.msra.mxu1 %v11119_v14  ;;  %8425 = vmatprep.subr.bf16.mxu0 %v11126_v16  ;;  %v2699_v14 = vld [vmem:[#allocation7 + $0x1440] sm:$0xff]  ;;  %v2740_v19 = vld [vmem:[#allocation7 + $0x1588] sm:$0xff] }
 0x27d   :  { %8753 = vmatprep.subr.bf16.mxu1 %v11128_v17  ;;  %v2703_v16 = vld [vmem:[#allocation7 + $0x1460] sm:$0xff]  ;;  %v11157_v17 = vcombine.low %v2691_v18, %v2695_v0  ;;  %v2744_v20 = vld [vmem:[#allocation7 + $0x15a8] sm:$0xff] }
 0x27e   :  { %v11166_v25 = vcombine.high %v2699_v14, %v2703_v16  ;;  %v11165_v35 = vcombine.low %v2699_v14, %v2703_v16  ;;  %v2739_v16 = vld [vmem:[#allocation7 + $0x1580] sm:$0xff] }
 0x27f   :  { %8426 = vmatpush1.bf16.msra.mxu0 %v11125_v24  ;;  %v2707_v24 = vld [vmem:[#allocation7 + $0x1480] sm:$0xff] }
 0x280   :  { %8754 = vmatpush1.bf16.msra.mxu1 %v11127_v27  ;;  %8427 = vmatprep.subr.bf16.mxu0 %v11134_v28  ;;  %v2711_v27 = vld [vmem:[#allocation7 + $0x14a0] sm:$0xff]  ;;  %v12278_v28 = vpack.c.bf16 %v1949_v13, %v1949_v13 }
 0x281   :  { %8755 = vmatprep.subr.bf16.mxu1 %v11136_v57  ;;  %v2708_v57 = vld [vmem:[#allocation7 + $0x1488] sm:$0xff]  ;;  %v11174_v36 = vcombine.high %v2707_v24, %v2711_v27  ;;  %v11173_v3 = vcombine.low %v2707_v24, %v2711_v27  ;;  %v11208_v27 = vcombine.high %v2740_v19, %v2744_v20 }
 0x282   :  { %v11175_v48 = vcombine.low %v2708_v57, %v2712_v32 }
 0x283   :  { %8428 = vmatpush1.bf16.msra.mxu0 %v11133_v39  ;;  %v11176_v39 = vcombine.high %v2708_v57, %v2712_v32  ;;  %v2751_v57 = vld [vmem:[#allocation7 + $0x15e0] sm:$0xff]  ;;  %v2748_v32 = vld [vmem:[#allocation7 + $0x15c8] sm:$0xff] }
 0x284   :  { %8756 = vmatpush1.bf16.msra.mxu1 %v11135_v41  ;;  %8429 = vmatprep.subr.bf16.mxu0 %v11142_v43  ;;  %v2715_v41 = vld [vmem:[#allocation7 + $0x14c0] sm:$0xff] }
 0x285   :  { %8757 = vmatprep.subr.bf16.mxu1 %v11144_v45  ;;  %v2719_v43 = vld [vmem:[#allocation7 + $0x14e0] sm:$0xff]  ;;  %v2716_v45 = vld [vmem:[#allocation7 + $0x14c8] sm:$0xff] }
 0x286   :  { %v11182_v49 = vcombine.high %v2715_v41, %v2719_v43  ;;  %v11181_v18 = vcombine.low %v2715_v41, %v2719_v43  ;;  %v11183_v0 = vcombine.low %v2716_v45, %v2720_v46  ;;  %v2755_v43 = vld [vmem:[#allocation7 + $0x1600] sm:$0xff] }
 0x287   :  { %8430 = vmatpush1.bf16.msra.mxu0 %v11141_v50  ;;  %v11184_v50 = vcombine.high %v2716_v45, %v2720_v46  ;;  %v2759_v45 = vld [vmem:[#allocation7 + $0x1620] sm:$0xff]  ;;  %v2756_v46 = vld [vmem:[#allocation7 + $0x1608] sm:$0xff] }
 0x288   :  { %8758 = vmatpush1.bf16.msra.mxu1 %v11143_v8  ;;  %8431 = vmatprep.subr.bf16.mxu0 %v11150_v55  ;;  %v2727_v8 = vld [vmem:[#allocation7 + $0x1520] sm:$0xff]  ;;  %v2724_v55 = vld [vmem:[#allocation7 + $0x1508] sm:$0xff] }
 0x289   :  { %8759 = vmatprep.subr.bf16.mxu1 %v11152_v56  ;;  %v2728_v56 = vld [vmem:[#allocation7 + $0x1528] sm:$0xff]  ;;  %v11190_v12 = vcombine.high %v2723_v51, %v2727_v8 }
 0x28a   :  { %v11192_v1 = vcombine.high %v2724_v55, %v2728_v56 }
 0x28b   :  { %8432 = vmatpush1.bf16.msra.mxu0 %v11149_v31  ;;  %v2735_v31 = vld [vmem:[#allocation7 + $0x1560] sm:$0xff] }
 0x28c   :  { %8760 = vmatpush1.bf16.msra.mxu1 %v11151_v7  ;;  %8442 = vmatprep.subr.bf16.mxu0 %v11158_v9  ;;  %v2736_v7 = vld [vmem:[#allocation7 + $0x1568] sm:$0xff]  ;;  %v11189_v9 = vcombine.low %v2723_v51, %v2727_v8  ;;  %v11198_v13 = vcombine.high %v2731_v2, %v2735_v31  ;;  %v2763_v8 = vld [vmem:[#allocation7 + $0x1640] sm:$0xff] }
 0x28d   :  { %8770 = vmatprep.subr.bf16.mxu1 %v11160_v10  ;;  %v11191_v10 = vcombine.low %v2724_v55, %v2728_v56  ;;  %v11200_v14 = vcombine.high %v2732_v6, %v2736_v7  ;;  %v2767_v55 = vld [vmem:[#allocation7 + $0x1660] sm:$0xff]  ;;  %v2764_v56 = vld [vmem:[#allocation7 + $0x1648] sm:$0xff] }
 0x28e   :  { %8434 = vmatmul.mubr.bf16.vlgmr.msra.gmra.mrb[16].mxu0 %v12276_v21 }
 0x28f   :  { %8762 = vmatmul.mubr.bf16.vlgmr.msra.gmra.mrb[16].mxu1 %v12276_v21  ;;  %8443 = vmatpush1.bf16.msra.mxu0 %v11157_v17  ;;  %v2743_v17 = vld [vmem:[#allocation7 + $0x15a0] sm:$0xff] }
 0x290   :  { %8474 = vmatprep.mubr.bf16.mxu0 %v12278_v28  ;;  %8771 = vmatpush1.bf16.msra.mxu1 %v11159_v22  ;;  %v11197_v22 = vcombine.low %v2731_v2, %v2735_v31  ;;  %v11206_v24 = vcombine.high %v2739_v16, %v2743_v17  ;;  %v2771_v31 = vld [vmem:[#allocation7 + $0x1680] sm:$0xff] }
 0x291   :  { %8802 = vmatprep.mubr.bf16.mxu1 %v12278_v28  ;;  %8444 = vmatprep.subr.bf16.mxu0 %v11166_v25  ;;  %v11199_v25 = vcombine.low %v2732_v6, %v2736_v7  ;;  %v2775_v6 = vld [vmem:[#allocation7 + $0x16a0] sm:$0xff]  ;;  %v2772_v7 = vld [vmem:[#allocation7 + $0x1688] sm:$0xff] }
 0x292   :  { %8772 = vmatprep.subr.bf16.mxu1 %v11168_v34  ;;  %v2747_v34 = vld [vmem:[#allocation7 + $0x15c0] sm:$0xff] }
 0x293   :  { %8445 = vmatpush1.bf16.msra.mxu0 %v11165_v35  ;;  %v2752_v35 = vld [vmem:[#allocation7 + $0x15e8] sm:$0xff] }
 0x294   :  { %8773 = vmatpush1.bf16.msra.mxu1 %v11167_v40  ;;  %8446 = vmatprep.subr.bf16.mxu0 %v11174_v36  ;;  %v11205_v40 = vcombine.low %v2739_v16, %v2743_v17  ;;  %v11207_v36 = vcombine.low %v2740_v19, %v2744_v20  ;;  %v11216_v41 = vcombine.high %v2748_v32, %v2752_v35  ;;  %v2779_v17 = vld [vmem:[#allocation7 + $0x16c0] sm:$0xff]  ;;  %v2780_v20 = vld [vmem:[#allocation7 + $0x16c8] sm:$0xff] }
 0x295   :  { %8774 = vmatprep.subr.bf16.mxu1 %v11176_v39  ;;  %v11214_v39 = vcombine.high %v2747_v34, %v2751_v57  ;;  %v2783_v19 = vld [vmem:[#allocation7 + $0x16e0] sm:$0xff] }
 0x297   :  { %8447 = vmatpush1.bf16.msra.mxu0 %v11173_v3  ;;  %v2760_v3 = vld [vmem:[#allocation7 + $0x1628] sm:$0xff] }
 0x298   :  { %8775 = vmatpush1.bf16.msra.mxu1 %v11175_v48  ;;  %8448 = vmatprep.subr.bf16.mxu0 %v11182_v49  ;;  %v11213_v48 = vcombine.low %v2747_v34, %v2751_v57  ;;  %v11215_v49 = vcombine.low %v2748_v32, %v2752_v35  ;;  %v11224_v51 = vcombine.high %v2756_v46, %v2760_v3  ;;  %v2787_v57 = vld [vmem:[#allocation7 + $0x1700] sm:$0xff]  ;;  %v2788_v35 = vld [vmem:[#allocation7 + $0x1708] sm:$0xff] }
 0x299   :  { %8776 = vmatprep.subr.bf16.mxu1 %v11184_v50  ;;  %v11222_v50 = vcombine.high %v2755_v43, %v2759_v45  ;;  %v2791_v32 = vld [vmem:[#allocation7 + $0x1720] sm:$0xff] }
 0x29b   :  { %8449 = vmatpush1.bf16.msra.mxu0 %v11181_v18  ;;  %v2768_v18 = vld [vmem:[#allocation7 + $0x1668] sm:$0xff] }
 0x29c   :  { %8777 = vmatpush1.bf16.msra.mxu1 %v11183_v0  ;;  %8450 = vmatprep.subr.bf16.mxu0 %v11190_v12  ;;  %v11221_v0 = vcombine.low %v2755_v43, %v2759_v45  ;;  %v11223_v12 = vcombine.low %v2756_v46, %v2760_v3  ;;  %v11232_v2 = vcombine.high %v2764_v56, %v2768_v18  ;;  %v2795_v45 = vld [vmem:[#allocation7 + $0x1740] sm:$0xff]  ;;  %v2796_v3 = vld [vmem:[#allocation7 + $0x1748] sm:$0xff] }
 0x29d   :  { %8778 = vmatprep.subr.bf16.mxu1 %v11192_v1  ;;  %v11230_v1 = vcombine.high %v2763_v8, %v2767_v55  ;;  %v2799_v46 = vld [vmem:[#allocation7 + $0x1760] sm:$0xff] }
 0x29f   :  { %8451 = vmatpush1.bf16.msra.mxu0 %v11189_v9  ;;  %v2776_v9 = vld [vmem:[#allocation7 + $0x16a8] sm:$0xff] }
 0x2a0   :  { %8779 = vmatpush1.bf16.msra.mxu1 %v11191_v10  ;;  %8452 = vmatprep.subr.bf16.mxu0 %v11198_v13  ;;  %v11229_v10 = vcombine.low %v2763_v8, %v2767_v55  ;;  %v11231_v13 = vcombine.low %v2764_v56, %v2768_v18  ;;  %v11240_v16 = vcombine.high %v2772_v7, %v2776_v9  ;;  %v2803_v55 = vld [vmem:[#allocation7 + $0x1780] sm:$0xff]  ;;  %v2804_v18 = vld [vmem:[#allocation7 + $0x1788] sm:$0xff] }
 0x2a1   :  { %8780 = vmatprep.subr.bf16.mxu1 %v11200_v14  ;;  %v11238_v14 = vcombine.high %v2771_v31, %v2775_v6  ;;  %v2807_v56 = vld [vmem:[#allocation7 + $0x17a0] sm:$0xff] }
 0x2a3   :  { %8453 = vmatpush1.bf16.msra.mxu0 %v11197_v22  ;;  %v2784_v22 = vld [vmem:[#allocation7 + $0x16e8] sm:$0xff] }
 0x2a4   :  { %8781 = vmatpush1.bf16.msra.mxu1 %v11199_v25  ;;  %8454 = vmatprep.subr.bf16.mxu0 %v11206_v24  ;;  %v11237_v25 = vcombine.low %v2771_v31, %v2775_v6  ;;  %v11239_v24 = vcombine.low %v2772_v7, %v2776_v9  ;;  %v11248_v34 = vcombine.high %v2780_v20, %v2784_v22  ;;  %v2811_v6 = vld [vmem:[#allocation7 + $0x17c0] sm:$0xff]  ;;  %v2812_v9 = vld [vmem:[#allocation7 + $0x17c8] sm:$0xff] }
 0x2a5   :  { %8782 = vmatprep.subr.bf16.mxu1 %v11208_v27  ;;  %v11246_v27 = vcombine.high %v2779_v17, %v2783_v19  ;;  %v2815_v7 = vld [vmem:[#allocation7 + $0x17e0] sm:$0xff] }
 0x2a7   :  { %8455 = vmatpush1.bf16.msra.mxu0 %v11205_v40  ;;  %v2792_v40 = vld [vmem:[#allocation7 + $0x1728] sm:$0xff] }
 0x2a8   :  { %8783 = vmatpush1.bf16.msra.mxu1 %v11207_v36  ;;  %8456 = vmatprep.subr.bf16.mxu0 %v11214_v39  ;;  %v11245_v36 = vcombine.low %v2779_v17, %v2783_v19  ;;  %v11247_v39 = vcombine.low %v2780_v20, %v2784_v22  ;;  %v11256_v43 = vcombine.high %v2788_v35, %v2792_v40  ;;  %v2819_v20 = vld [vmem:[#allocation7 + $0x1800] sm:$0xff] }
 0x2a9   :  { %8784 = vmatprep.subr.bf16.mxu1 %v11216_v41  ;;  %v11254_v41 = vcombine.high %v2787_v57, %v2791_v32  ;;  %v11278_v17 = vcombine.high %v2811_v6, %v2815_v7  ;;  %v2823_v22 = vld [vmem:[#allocation7 + $0x1820] sm:$0xff] }
 0x2ab   :  { %8457 = vmatpush1.bf16.msra.mxu0 %v11213_v48  ;;  %v2800_v48 = vld [vmem:[#allocation7 + $0x1768] sm:$0xff] }
 0x2ac   :  { %8785 = vmatpush1.bf16.msra.mxu1 %v11215_v49  ;;  %8458 = vmatprep.subr.bf16.mxu0 %v11222_v50  ;;  %v11253_v49 = vcombine.low %v2787_v57, %v2791_v32  ;;  %v11255_v50 = vcombine.low %v2788_v35, %v2792_v40  ;;  %v11264_v8 = vcombine.high %v2796_v3, %v2800_v48 }
 0x2ad   :  { %8786 = vmatprep.subr.bf16.mxu1 %v11224_v51  ;;  %v11262_v51 = vcombine.high %v2795_v45, %v2799_v46  ;;  %v11286_v35 = vcombine.high %v2819_v20, %v2823_v22 }
 0x2af   :  { %8459 = vmatpush1.bf16.msra.mxu0 %v11221_v0  ;;  %v2808_v0 = vld [vmem:[#allocation7 + $0x17a8] sm:$0xff] }
 0x2b0   :  { %8787 = vmatpush1.bf16.msra.mxu1 %v11223_v12  ;;  %8460 = vmatprep.subr.bf16.mxu0 %v11230_v1  ;;  %v11261_v12 = vcombine.low %v2795_v45, %v2799_v46  ;;  %v11263_v1 = vcombine.low %v2796_v3, %v2800_v48  ;;  %v11272_v31 = vcombine.high %v2804_v18, %v2808_v0  ;;  %v2828_v45 = vld [vmem:[#allocation7 + $0x1848] sm:$0xff]  ;;  %v2835_v48 = vld [vmem:[#allocation7 + $0x1880] sm:$0xff] }
 0x2b1   :  { %8788 = vmatprep.subr.bf16.mxu1 %v11232_v2  ;;  %v11270_v2 = vcombine.high %v2803_v55, %v2807_v56 }
 0x2b3   :  { %8461 = vmatpush1.bf16.msra.mxu0 %v11229_v10  ;;  %v2816_v10 = vld [vmem:[#allocation7 + $0x17e8] sm:$0xff] }
 0x2b4   :  { %8789 = vmatpush1.bf16.msra.mxu1 %v11231_v13  ;;  %8462 = vmatprep.subr.bf16.mxu0 %v11238_v14  ;;  %v11269_v13 = vcombine.low %v2803_v55, %v2807_v56  ;;  %v383_v14 = vrot.slane %v12254_v26, %v12194_v62  ;;  %v11280_v19 = vcombine.high %v2812_v9, %v2816_v10 }
 0x2b5   :  { %8790 = vmatprep.subr.bf16.mxu1 %v11240_v16  ;;  %v11271_v16 = vcombine.low %v2804_v18, %v2808_v0  ;;  %v11279_v32 = vcombine.low %v2812_v9, %v2816_v10 }
 0x2b6   :  { %v1947_v57 = vadd.f32 %v12215_v30, %v383_v14  ;;  %v2855_v14 = vld [vmem:[#allocation7 + $0x1920] sm:$0xff] }
 0x2b7   :  { %8463 = vmatpush1.bf16.msra.mxu0 %v11237_v25  ;;  %v395_v25 = vrot.slane %v12254_v26, %v12197_v4  ;;  %v2832_v26 = vld [vmem:[#allocation7 + $0x1868] sm:$0xff] }
 0x2b8   :  { %8791 = vmatpush1.bf16.msra.mxu1 %v11239_v24  ;;  %8464 = vmatprep.subr.bf16.mxu0 %v11246_v27  ;;  %v2820_v24 = vld [vmem:[#allocation7 + $0x1808] sm:$0xff]  ;;  %v12290_v46 = vpack.c.bf16 %v1947_v57, %v1947_v57  ;;  %v11295_v56 = vcombine.low %v2828_v45, %v2832_v26 }
 0x2b9   :  { %8792 = vmatprep.subr.bf16.mxu1 %v11248_v34  ;;  %v2824_v27 = vld [vmem:[#allocation7 + $0x1828] sm:$0xff]  ;;  %v11277_v34 = vcombine.low %v2811_v6, %v2815_v7 }
 0x2ba   :  { %v11288_v40 = vcombine.high %v2820_v24, %v2824_v27  ;;  %v11287_v3 = vcombine.low %v2820_v24, %v2824_v27  ;;  %v2859_v24 = vld [vmem:[#allocation7 + $0x1940] sm:$0xff]  ;;  %v2864_v57 = vld [vmem:[#allocation7 + $0x1968] sm:$0xff] }
 0x2bb   :  { %8465 = vmatpush1.bf16.msra.mxu0 %v11245_v36  ;;  %v1990_v36 = vadd.f32 %v12247_v47, %v395_v25  ;;  %v11296_v47 = vcombine.high %v2828_v45, %v2832_v26  ;;  %v2863_v27 = vld [vmem:[#allocation7 + $0x1960] sm:$0xff]  ;;  %v2872_v45 = vld [vmem:[#allocation7 + $0x19a8] sm:$0xff] }
 0x2bc   :  { %8793 = vmatpush1.bf16.msra.mxu1 %v11247_v39  ;;  %8466 = vmatprep.subr.bf16.mxu0 %v11254_v41  ;;  %v2827_v39 = vld [vmem:[#allocation7 + $0x1840] sm:$0xff]  ;;  %v11325_v26 = vcombine.low %v2859_v24, %v2863_v27 }
 0x2bd   :  { %8794 = vmatprep.subr.bf16.mxu1 %v11256_v43  ;;  %v2831_v41 = vld [vmem:[#allocation7 + $0x1860] sm:$0xff]  ;;  %v11285_v43 = vcombine.low %v2819_v20, %v2823_v22 }
 0x2be   :  { %v11294_v30 = vcombine.high %v2827_v39, %v2831_v41  ;;  %v11293_v55 = vcombine.low %v2827_v39, %v2831_v41  ;;  %v2867_v39 = vld [vmem:[#allocation7 + $0x1980] sm:$0xff] }
 0x2bf   :  { %8467 = vmatpush1.bf16.msra.mxu0 %v11253_v49  ;;  %v2839_v49 = vld [vmem:[#allocation7 + $0x18a0] sm:$0xff] }
 0x2c0   :  { %8795 = vmatpush1.bf16.msra.mxu1 %v11255_v50  ;;  %8468 = vmatprep.subr.bf16.mxu0 %v11262_v51  ;;  %v12292_v50 = vpack.c.bf16 %v1990_v36, %v1990_v36  ;;  %v2836_v51 = vld [vmem:[#allocation7 + $0x1888] sm:$0xff]  ;;  %v11302_v18 = vcombine.high %v2835_v48, %v2839_v49  ;;  %v11301_v6 = vcombine.low %v2835_v48, %v2839_v49  ;;  %v2871_v41 = vld [vmem:[#allocation7 + $0x19a0] sm:$0xff] }
 0x2c1   :  { %8796 = vmatprep.subr.bf16.mxu1 %v11264_v8  ;;  %v2840_v8 = vld [vmem:[#allocation7 + $0x18a8] sm:$0xff]  ;;  %v2875_v49 = vld [vmem:[#allocation7 + $0x19c0] sm:$0xff] }
 0x2c2   :  { %v11304_v0 = vcombine.high %v2836_v51, %v2840_v8  ;;  %v11303_v7 = vcombine.low %v2836_v51, %v2840_v8  ;;  %v2876_v51 = vld [vmem:[#allocation7 + $0x19c8] sm:$0xff] }
 0x2c3   :  { %8469 = vmatpush1.bf16.msra.mxu0 %v11261_v12  ;;  %v2843_v12 = vld [vmem:[#allocation7 + $0x18c0] sm:$0xff]  ;;  %v2880_v8 = vld [vmem:[#allocation7 + $0x19e8] sm:$0xff] }
 0x2c4   :  { %8797 = vmatpush1.bf16.msra.mxu1 %v11263_v1  ;;  %8470 = vmatprep.subr.bf16.mxu0 %v11270_v2  ;;  %v2847_v1 = vld [vmem:[#allocation7 + $0x18e0] sm:$0xff]  ;;  %v2844_v2 = vld [vmem:[#allocation7 + $0x18c8] sm:$0xff] }
 0x2c5   :  { %8798 = vmatprep.subr.bf16.mxu1 %v11272_v31  ;;  %v2848_v31 = vld [vmem:[#allocation7 + $0x18e8] sm:$0xff]  ;;  %v11310_v9 = vcombine.high %v2843_v12, %v2847_v1 }
 0x2c6   :  { %v11312_v10 = vcombine.high %v2844_v2, %v2848_v31  ;;  %v11311_v20 = vcombine.low %v2844_v2, %v2848_v31  ;;  %v2884_v2 = vld [vmem:[#allocation7 + $0x1a08] sm:$0xff] }
 0x2c7   :  { %8471 = vmatpush1.bf16.msra.mxu0 %v11269_v13  ;;  %v2851_v13 = vld [vmem:[#allocation7 + $0x1900] sm:$0xff]  ;;  %v2888_v31 = vld [vmem:[#allocation7 + $0x1a28] sm:$0xff] }
 0x2c8   :  { %8799 = vmatpush1.bf16.msra.mxu1 %v11271_v16  ;;  %8472 = vmatprep.subr.bf16.mxu0 %v11278_v17  ;;  %v2852_v16 = vld [vmem:[#allocation7 + $0x1908] sm:$0xff]  ;;  %v11318_v22 = vcombine.high %v2851_v13, %v2855_v14 }
 0x2c9   :  { %8800 = vmatprep.subr.bf16.mxu1 %v11280_v19  ;;  %v2856_v17 = vld [vmem:[#allocation7 + $0x1928] sm:$0xff]  ;;  %v11309_v19 = vcombine.low %v2843_v12, %v2847_v1  ;;  %v2883_v12 = vld [vmem:[#allocation7 + $0x1a00] sm:$0xff] }
 0x2ca   :  { %v11320_v25 = vcombine.high %v2852_v16, %v2856_v17  ;;  %v2887_v1 = vld [vmem:[#allocation7 + $0x1a20] sm:$0xff] }
 0x2cb   :  { %8473 = vmatpush1.bf16.msra.mxu0 %v11277_v34  ;;  %v2860_v34 = vld [vmem:[#allocation7 + $0x1948] sm:$0xff] }
 0x2cc   :  { %8801 = vmatpush1.bf16.msra.mxu1 %v11279_v32  ;;  %8483 = vmatprep.subr.bf16.mxu0 %v11286_v35  ;;  %v11317_v32 = vcombine.low %v2851_v13, %v2855_v14  ;;  %v11319_v35 = vcombine.low %v2852_v16, %v2856_v17  ;;  %v11328_v36 = vcombine.high %v2860_v34, %v2864_v57  ;;  %v2891_v13 = vld [vmem:[#allocation7 + $0x1a40] sm:$0xff]  ;;  %v2892_v16 = vld [vmem:[#allocation7 + $0x1a48] sm:$0xff] }
 0x2cd   :  { %8811 = vmatprep.subr.bf16.mxu1 %v11288_v40  ;;  %v11326_v40 = vcombine.high %v2859_v24, %v2863_v27  ;;  %v2895_v14 = vld [vmem:[#allocation7 + $0x1a60] sm:$0xff]  ;;  %v2896_v17 = vld [vmem:[#allocation7 + $0x1a68] sm:$0xff] }
 0x2ce   :  { %8475 = vmatmul.mubr.bf16.vlgmr.msra.gmra.mrb[16].mxu0 %v12290_v46  ;;  %v2899_v24 = vld [vmem:[#allocation7 + $0x1a80] sm:$0xff] }
 0x2cf   :  { %8803 = vmatmul.mubr.bf16.vlgmr.msra.gmra.mrb[16].mxu1 %v12290_v46  ;;  %8484 = vmatpush1.bf16.msra.mxu0 %v11285_v43  ;;  %v2868_v43 = vld [vmem:[#allocation7 + $0x1988] sm:$0xff]  ;;  %v2903_v27 = vld [vmem:[#allocation7 + $0x1aa0] sm:$0xff] }
 0x2d0   :  { %8515 = vmatprep.mubr.bf16.mxu0 %v12292_v50  ;;  %8812 = vmatpush1.bf16.msra.mxu1 %v11287_v3  ;;  %v11327_v3 = vcombine.low %v2860_v34, %v2864_v57  ;;  %v11336_v48 = vcombine.high %v2868_v43, %v2872_v45  ;;  %v2900_v34 = vld [vmem:[#allocation7 + $0x1a88] sm:$0xff] }
 0x2d1   :  { %8843 = vmatprep.mubr.bf16.mxu1 %v12292_v50  ;;  %8485 = vmatprep.subr.bf16.mxu0 %v11294_v30  ;;  %v11334_v30 = vcombine.high %v2867_v39, %v2871_v41  ;;  %v2904_v57 = vld [vmem:[#allocation7 + $0x1aa8] sm:$0xff] }
 0x2d2   :  { %8813 = vmatprep.subr.bf16.mxu1 %v11296_v47  ;;  %v2879_v47 = vld [vmem:[#allocation7 + $0x19e0] sm:$0xff] }
 0x2d3   :  { %8486 = vmatpush1.bf16.msra.mxu0 %v11293_v55  ;;  %v11333_v55 = vcombine.low %v2867_v39, %v2871_v41  ;;  %v2907_v39 = vld [vmem:[#allocation7 + $0x1ac0] sm:$0xff] }
 0x2d4   :  { %8814 = vmatpush1.bf16.msra.mxu1 %v11295_v56  ;;  %8487 = vmatprep.subr.bf16.mxu0 %v11302_v18  ;;  %v11335_v56 = vcombine.low %v2868_v43, %v2872_v45  ;;  %v11342_v18 = vcombine.high %v2875_v49, %v2879_v47  ;;  %v2911_v41 = vld [vmem:[#allocation7 + $0x1ae0] sm:$0xff]  ;;  %v2908_v43 = vld [vmem:[#allocation7 + $0x1ac8] sm:$0xff] }
 0x2d5   :  { %8815 = vmatprep.subr.bf16.mxu1 %v11304_v0  ;;  %v11344_v0 = vcombine.high %v2876_v51, %v2880_v8  ;;  %v2912_v45 = vld [vmem:[#allocation7 + $0x1ae8] sm:$0xff] }
 0x2d7   :  { %8488 = vmatpush1.bf16.msra.mxu0 %v11301_v6  ;;  %v11341_v6 = vcombine.low %v2875_v49, %v2879_v47  ;;  %v2915_v49 = vld [vmem:[#allocation7 + $0x1b00] sm:$0xff] }
 0x2d8   :  { %8816 = vmatpush1.bf16.msra.mxu1 %v11303_v7  ;;  %8489 = vmatprep.subr.bf16.mxu0 %v11310_v9  ;;  %v11343_v7 = vcombine.low %v2876_v51, %v2880_v8  ;;  %v11350_v9 = vcombine.high %v2883_v12, %v2887_v1  ;;  %v2919_v47 = vld [vmem:[#allocation7 + $0x1b20] sm:$0xff]  ;;  %v2916_v51 = vld [vmem:[#allocation7 + $0x1b08] sm:$0xff] }
 0x2d9   :  { %8817 = vmatprep.subr.bf16.mxu1 %v11312_v10  ;;  %v11352_v10 = vcombine.high %v2884_v2, %v2888_v31  ;;  %v2920_v8 = vld [vmem:[#allocation7 + $0x1b28] sm:$0xff] }
 0x2db   :  { %8490 = vmatpush1.bf16.msra.mxu0 %v11309_v19  ;;  %v11349_v19 = vcombine.low %v2883_v12, %v2887_v1  ;;  %v2923_v12 = vld [vmem:[#allocation7 + $0x1b40] sm:$0xff] }
 0x2dc   :  { %8818 = vmatpush1.bf16.msra.mxu1 %v11311_v20  ;;  %8491 = vmatprep.subr.bf16.mxu0 %v11318_v22  ;;  %v11351_v20 = vcombine.low %v2884_v2, %v2888_v31  ;;  %v11358_v22 = vcombine.high %v2891_v13, %v2895_v14  ;;  %v2927_v1 = vld [vmem:[#allocation7 + $0x1b60] sm:$0xff]  ;;  %v2924_v2 = vld [vmem:[#allocation7 + $0x1b48] sm:$0xff] }
 0x2dd   :  { %8819 = vmatprep.subr.bf16.mxu1 %v11320_v25  ;;  %v11360_v25 = vcombine.high %v2892_v16, %v2896_v17  ;;  %v2928_v31 = vld [vmem:[#allocation7 + $0x1b68] sm:$0xff] }
 0x2df   :  { %8492 = vmatpush1.bf16.msra.mxu0 %v11317_v32  ;;  %v11357_v32 = vcombine.low %v2891_v13, %v2895_v14  ;;  %v2931_v13 = vld [vmem:[#allocation7 + $0x1b80] sm:$0xff] }
 0x2e0   :  { %8820 = vmatpush1.bf16.msra.mxu1 %v11319_v35  ;;  %8493 = vmatprep.subr.bf16.mxu0 %v11326_v40  ;;  %v11359_v35 = vcombine.low %v2892_v16, %v2896_v17  ;;  %v11366_v40 = vcombine.high %v2899_v24, %v2903_v27  ;;  %v2935_v14 = vld [vmem:[#allocation7 + $0x1ba0] sm:$0xff]  ;;  %v2932_v16 = vld [vmem:[#allocation7 + $0x1b88] sm:$0xff] }
 0x2e1   :  { %8821 = vmatprep.subr.bf16.mxu1 %v11328_v36  ;;  %v11368_v36 = vcombine.high %v2900_v34, %v2904_v57  ;;  %v2936_v17 = vld [vmem:[#allocation7 + $0x1ba8] sm:$0xff] }
 0x2e3   :  { %8494 = vmatpush1.bf16.msra.mxu0 %v11325_v26  ;;  %v11365_v26 = vcombine.low %v2899_v24, %v2903_v27  ;;  %v2939_v24 = vld [vmem:[#allocation7 + $0x1bc0] sm:$0xff] }
 0x2e4   :  { %8822 = vmatpush1.bf16.msra.mxu1 %v11327_v3  ;;  %8495 = vmatprep.subr.bf16.mxu0 %v11334_v30  ;;  %v11367_v3 = vcombine.low %v2900_v34, %v2904_v57  ;;  %v11374_v30 = vcombine.high %v2907_v39, %v2911_v41  ;;  %v2943_v27 = vld [vmem:[#allocation7 + $0x1be0] sm:$0xff]  ;;  %v2940_v34 = vld [vmem:[#allocation7 + $0x1bc8] sm:$0xff] }
 0x2e5   :  { %8823 = vmatprep.subr.bf16.mxu1 %v11336_v48  ;;  %v11376_v48 = vcombine.high %v2908_v43, %v2912_v45  ;;  %v2944_v57 = vld [vmem:[#allocation7 + $0x1be8] sm:$0xff] }
 0x2e7   :  { %8496 = vmatpush1.bf16.msra.mxu0 %v11333_v55  ;;  %v11373_v55 = vcombine.low %v2907_v39, %v2911_v41  ;;  %v11406_v39 = vcombine.high %v2939_v24, %v2943_v27  ;;  %v11408_v41 = vcombine.high %v2940_v34, %v2944_v57 }
 0x2e8   :  { %8824 = vmatpush1.bf16.msra.mxu1 %v11335_v56  ;;  %8497 = vmatprep.subr.bf16.mxu0 %v11342_v18  ;;  %v11375_v56 = vcombine.low %v2908_v43, %v2912_v45  ;;  %v11382_v18 = vcombine.high %v2915_v49, %v2919_v47  ;;  %v2947_v43 = vld [vmem:[#allocation7 + $0x1c00] sm:$0xff] }
 0x2e9   :  { %8825 = vmatprep.subr.bf16.mxu1 %v11344_v0  ;;  %v11384_v0 = vcombine.high %v2916_v51, %v2920_v8  ;;  %v2951_v45 = vld [vmem:[#allocation7 + $0x1c20] sm:$0xff] }
 0x2eb   :  { %8498 = vmatpush1.bf16.msra.mxu0 %v11341_v6  ;;  %v11381_v6 = vcombine.low %v2915_v49, %v2919_v47  ;;  %v11407_v47 = vcombine.low %v2940_v34, %v2944_v57 }
 0x2ec   :  { %8826 = vmatpush1.bf16.msra.mxu1 %v11343_v7  ;;  %8499 = vmatprep.subr.bf16.mxu0 %v11350_v9  ;;  %v11383_v7 = vcombine.low %v2916_v51, %v2920_v8  ;;  %v11390_v9 = vcombine.high %v2923_v12, %v2927_v1  ;;  %v11414_v51 = vcombine.high %v2947_v43, %v2951_v45 }
 0x2ed   :  { %8827 = vmatprep.subr.bf16.mxu1 %v11352_v10  ;;  %v11392_v10 = vcombine.high %v2924_v2, %v2928_v31 }
 0x2ef   :  { %8500 = vmatpush1.bf16.msra.mxu0 %v11349_v19  ;;  %v11389_v19 = vcombine.low %v2923_v12, %v2927_v1  ;;  %v2956_v12 = vld [vmem:[#allocation7 + $0x1c48] sm:$0xff] }
 0x2f0   :  { %8828 = vmatpush1.bf16.msra.mxu1 %v11351_v20  ;;  %8501 = vmatprep.subr.bf16.mxu0 %v11358_v22  ;;  %v11391_v20 = vcombine.low %v2924_v2, %v2928_v31  ;;  %v11398_v22 = vcombine.high %v2931_v13, %v2935_v14  ;;  %v2960_v1 = vld [vmem:[#allocation7 + $0x1c68] sm:$0xff] }
 0x2f1   :  { %8829 = vmatprep.subr.bf16.mxu1 %v11360_v25  ;;  %v11400_v25 = vcombine.high %v2932_v16, %v2936_v17 }
 0x2f3   :  { %8502 = vmatpush1.bf16.msra.mxu0 %v11357_v32  ;;  %v11397_v32 = vcombine.low %v2931_v13, %v2935_v14  ;;  %v2968_v13 = vld [vmem:[#allocation7 + $0x1ca8] sm:$0xff] }
 0x2f4   :  { %8830 = vmatpush1.bf16.msra.mxu1 %v11359_v35  ;;  %8503 = vmatprep.subr.bf16.mxu0 %v11366_v40  ;;  %v12298_v35 = vld [vmem:[#allocation5 + $0x8] sm:$0xff] }
 0x2f5   :  { %8831 = vmatprep.subr.bf16.mxu1 %v11368_v36  ;;  %v391_v40 = vrot.slane %v12298_v35, %v12222_v54  ;;  %v11399_v36 = vcombine.low %v2932_v16, %v2936_v17  ;;  %v11423_v16 = vcombine.low %v2956_v12, %v2960_v1 }
 0x2f7   :  { %8504 = vmatpush1.bf16.msra.mxu0 %v11365_v26  ;;  %v403_v26 = vrot.slane %v12298_v35, %v12225_v63  ;;  %v1988_v49 = vadd.f32 %v12243_v61, %v391_v40  ;;  %v2979_v40 = vld [vmem:[#allocation7 + $0x1d00] sm:$0xff] }
 0x2f8   :  { %8832 = vmatpush1.bf16.msra.mxu1 %v11367_v3  ;;  %8505 = vmatprep.subr.bf16.mxu0 %v11374_v30  ;;  %v2948_v3 = vld [vmem:[#allocation7 + $0x1c08] sm:$0xff] }
 0x2f9   :  { %8833 = vmatprep.subr.bf16.mxu1 %v11376_v48  ;;  %v2952_v30 = vld [vmem:[#allocation7 + $0x1c28] sm:$0xff]  ;;  %v11405_v48 = vcombine.low %v2939_v24, %v2943_v27  ;;  %v12306_v2 = vpack.c.bf16 %v1988_v49, %v1988_v49 }
 0x2fa   :  { %v11416_v8 = vcombine.high %v2948_v3, %v2952_v30  ;;  %v11415_v31 = vcombine.low %v2948_v3, %v2952_v30  ;;  %v2976_v24 = vld [vmem:[#allocation7 + $0x1ce8] sm:$0xff]  ;;  %v2987_v30 = vld [vmem:[#allocation7 + $0x1d40] sm:$0xff] }
 0x2fb   :  { %8506 = vmatpush1.bf16.msra.mxu0 %v11373_v55  ;;  %v2031_v55 = vadd.f32 %v12249_v42, %v403_v26  ;;  %v11424_v42 = vcombine.high %v2956_v12, %v2960_v1  ;;  %v2988_v49 = vld [vmem:[#allocation7 + $0x1d48] sm:$0xff] }
 0x2fc   :  { %8834 = vmatpush1.bf16.msra.mxu1 %v11375_v56  ;;  %8507 = vmatprep.subr.bf16.mxu0 %v11382_v18  ;;  %v2955_v56 = vld [vmem:[#allocation7 + $0x1c40] sm:$0xff]  ;;  %v2996_v12 = vld [vmem:[#allocation7 + $0x1d88] sm:$0xff] }
 0x2fd   :  { %8835 = vmatprep.subr.bf16.mxu1 %v11384_v0  ;;  %v2959_v18 = vld [vmem:[#allocation7 + $0x1c60] sm:$0xff]  ;;  %v11413_v0 = vcombine.low %v2947_v43, %v2951_v45  ;;  %v3000_v1 = vld [vmem:[#allocation7 + $0x1da8] sm:$0xff] }
 0x2fe   :  { %v11422_v61 = vcombine.high %v2955_v56, %v2959_v18  ;;  %v11421_v14 = vcombine.low %v2955_v56, %v2959_v18  ;;  %v2995_v18 = vld [vmem:[#allocation7 + $0x1d80] sm:$0xff] }
 0x2ff   :  { %8508 = vmatpush1.bf16.msra.mxu0 %v11381_v6  ;;  %v2963_v6 = vld [vmem:[#allocation7 + $0x1c80] sm:$0xff] }
 0x300   :  { %8836 = vmatpush1.bf16.msra.mxu1 %v11383_v7  ;;  %8509 = vmatprep.subr.bf16.mxu0 %v11390_v9  ;;  %v2967_v7 = vld [vmem:[#allocation7 + $0x1ca0] sm:$0xff]  ;;  %v12308_v9 = vpack.c.bf16 %v2031_v55, %v2031_v55 }
 0x301   :  { %8837 = vmatprep.subr.bf16.mxu1 %v11392_v10  ;;  %v2964_v10 = vld [vmem:[#allocation7 + $0x1c88] sm:$0xff]  ;;  %v11430_v17 = vcombine.high %v2963_v6, %v2967_v7  ;;  %v11429_v27 = vcombine.low %v2963_v6, %v2967_v7  ;;  %v11464_v7 = vcombine.high %v2996_v12, %v3000_v1 }
 0x302   :  { %v11431_v34 = vcombine.low %v2964_v10, %v2968_v13 }
 0x303   :  { %8510 = vmatpush1.bf16.msra.mxu0 %v11389_v19  ;;  %v11432_v19 = vcombine.high %v2964_v10, %v2968_v13  ;;  %v3007_v10 = vld [vmem:[#allocation7 + $0x1de0] sm:$0xff]  ;;  %v3004_v13 = vld [vmem:[#allocation7 + $0x1dc8] sm:$0xff] }
 0x304   :  { %8838 = vmatpush1.bf16.msra.mxu1 %v11391_v20  ;;  %8511 = vmatprep.subr.bf16.mxu0 %v11398_v22  ;;  %v2971_v20 = vld [vmem:[#allocation7 + $0x1cc0] sm:$0xff] }
 0x305   :  { %8839 = vmatprep.subr.bf16.mxu1 %v11400_v25  ;;  %v2975_v22 = vld [vmem:[#allocation7 + $0x1ce0] sm:$0xff]  ;;  %v2972_v25 = vld [vmem:[#allocation7 + $0x1cc8] sm:$0xff] }
 0x306   :  { %v11438_v57 = vcombine.high %v2971_v20, %v2975_v22  ;;  %v11437_v43 = vcombine.low %v2971_v20, %v2975_v22  ;;  %v11439_v45 = vcombine.low %v2972_v25, %v2976_v24  ;;  %v3011_v22 = vld [vmem:[#allocation7 + $0x1e00] sm:$0xff] }
 0x307   :  { %8512 = vmatpush1.bf16.msra.mxu0 %v11397_v32  ;;  %v11440_v32 = vcombine.high %v2972_v25, %v2976_v24  ;;  %v3015_v25 = vld [vmem:[#allocation7 + $0x1e20] sm:$0xff]  ;;  %v3012_v24 = vld [vmem:[#allocation7 + $0x1e08] sm:$0xff] }
 0x308   :  { %8840 = vmatpush1.bf16.msra.mxu1 %v11399_v36  ;;  %8513 = vmatprep.subr.bf16.mxu0 %v11406_v39  ;;  %v2983_v36 = vld [vmem:[#allocation7 + $0x1d20] sm:$0xff]  ;;  %v2980_v39 = vld [vmem:[#allocation7 + $0x1d08] sm:$0xff] }
 0x309   :  { %8841 = vmatprep.subr.bf16.mxu1 %v11408_v41  ;;  %v2984_v41 = vld [vmem:[#allocation7 + $0x1d28] sm:$0xff]  ;;  %v11446_v26 = vcombine.high %v2979_v40, %v2983_v36 }
 0x30a   :  { %v11448_v3 = vcombine.high %v2980_v39, %v2984_v41 }
 0x30b   :  { %8514 = vmatpush1.bf16.msra.mxu0 %v11405_v48  ;;  %v2991_v48 = vld [vmem:[#allocation7 + $0x1d60] sm:$0xff] }
 0x30c   :  { %8842 = vmatpush1.bf16.msra.mxu1 %v11407_v47  ;;  %8524 = vmatprep.subr.bf16.mxu0 %v11414_v51  ;;  %v2992_v47 = vld [vmem:[#allocation7 + $0x1d68] sm:$0xff]  ;;  %v11445_v51 = vcombine.low %v2979_v40, %v2983_v36  ;;  %v11454_v55 = vcombine.high %v2987_v30, %v2991_v48  ;;  %v3019_v36 = vld [vmem:[#allocation7 + $0x1e40] sm:$0xff] }
 0x30d   :  { %8852 = vmatprep.subr.bf16.mxu1 %v11416_v8  ;;  %v11447_v8 = vcombine.low %v2980_v39, %v2984_v41  ;;  %v11456_v56 = vcombine.high %v2988_v49, %v2992_v47  ;;  %v3023_v39 = vld [vmem:[#allocation7 + $0x1e60] sm:$0xff]  ;;  %v3020_v41 = vld [vmem:[#allocation7 + $0x1e48] sm:$0xff] }
 0x30e   :  { %8516 = vmatmul.mubr.bf16.vlgmr.msra.gmra.mrb[16].mxu0 %v12306_v2 }
 0x30f   :  { %8844 = vmatmul.mubr.bf16.vlgmr.msra.gmra.mrb[16].mxu1 %v12306_v2  ;;  %8525 = vmatpush1.bf16.msra.mxu0 %v11413_v0  ;;  %v2999_v0 = vld [vmem:[#allocation7 + $0x1da0] sm:$0xff] }
 0x310   :  { %8556 = vmatprep.mubr.bf16.mxu0 %v12308_v9  ;;  %8853 = vmatpush1.bf16.msra.mxu1 %v11415_v31  ;;  %v11453_v31 = vcombine.low %v2987_v30, %v2991_v48  ;;  %v11462_v6 = vcombine.high %v2995_v18, %v2999_v0  ;;  %v3027_v48 = vld [vmem:[#allocation7 + $0x1e80] sm:$0xff] }
 0x311   :  { %8884 = vmatprep.mubr.bf16.mxu1 %v12308_v9  ;;  %8526 = vmatprep.subr.bf16.mxu0 %v11422_v61  ;;  %v11455_v61 = vcombine.low %v2988_v49, %v2992_v47  ;;  %v3031_v49 = vld [vmem:[#allocation7 + $0x1ea0] sm:$0xff]  ;;  %v3028_v47 = vld [vmem:[#allocation7 + $0x1e88] sm:$0xff] }
 0x312   :  { %8854 = vmatprep.subr.bf16.mxu1 %v11424_v42  ;;  %v3003_v42 = vld [vmem:[#allocation7 + $0x1dc0] sm:$0xff] }
 0x313   :  { %8527 = vmatpush1.bf16.msra.mxu0 %v11421_v14  ;;  %v3008_v14 = vld [vmem:[#allocation7 + $0x1de8] sm:$0xff] }
 0x314   :  { %8855 = vmatpush1.bf16.msra.mxu1 %v11423_v16  ;;  %8528 = vmatprep.subr.bf16.mxu0 %v11430_v17  ;;  %v11461_v16 = vcombine.low %v2995_v18, %v2999_v0  ;;  %v11463_v17 = vcombine.low %v2996_v12, %v3000_v1  ;;  %v11472_v20 = vcombine.high %v3004_v13, %v3008_v14  ;;  %v3035_v0 = vld [vmem:[#allocation7 + $0x1ec0] sm:$0xff]  ;;  %v3036_v1 = vld [vmem:[#allocation7 + $0x1ec8] sm:$0xff] }
 0x315   :  { %8856 = vmatprep.subr.bf16.mxu1 %v11432_v19  ;;  %v11470_v19 = vcombine.high %v3003_v42, %v3007_v10  ;;  %v3039_v12 = vld [vmem:[#allocation7 + $0x1ee0] sm:$0xff] }
 0x317   :  { %8529 = vmatpush1.bf16.msra.mxu0 %v11429_v27  ;;  %v3016_v27 = vld [vmem:[#allocation7 + $0x1e28] sm:$0xff] }
 0x318   :  { %8857 = vmatpush1.bf16.msra.mxu1 %v11431_v34  ;;  %8530 = vmatprep.subr.bf16.mxu0 %v11438_v57  ;;  %v11469_v34 = vcombine.low %v3003_v42, %v3007_v10  ;;  %v11471_v57 = vcombine.low %v3004_v13, %v3008_v14  ;;  %v11480_v40 = vcombine.high %v3012_v24, %v3016_v27  ;;  %v3043_v10 = vld [vmem:[#allocation7 + $0x1f00] sm:$0xff]  ;;  %v3044_v14 = vld [vmem:[#allocation7 + $0x1f08] sm:$0xff] }
 0x319   :  { %8858 = vmatprep.subr.bf16.mxu1 %v11440_v32  ;;  %v11478_v32 = vcombine.high %v3011_v22, %v3015_v25  ;;  %v3047_v13 = vld [vmem:[#allocation7 + $0x1f20] sm:$0xff] }
 0x31b   :  { %8531 = vmatpush1.bf16.msra.mxu0 %v11437_v43  ;;  %v3024_v43 = vld [vmem:[#allocation7 + $0x1e68] sm:$0xff] }
 0x31c   :  { %8859 = vmatpush1.bf16.msra.mxu1 %v11439_v45  ;;  %8532 = vmatprep.subr.bf16.mxu0 %v11446_v26  ;;  %v11477_v45 = vcombine.low %v3011_v22, %v3015_v25  ;;  %v11479_v26 = vcombine.low %v3012_v24, %v3016_v27  ;;  %v11488_v30 = vcombine.high %v3020_v41, %v3024_v43  ;;  %v3051_v25 = vld [vmem:[#allocation7 + $0x1f40] sm:$0xff]  ;;  %v3052_v27 = vld [vmem:[#allocation7 + $0x1f48] sm:$0xff] }
 0x31d   :  { %8860 = vmatprep.subr.bf16.mxu1 %v11448_v3  ;;  %v11486_v3 = vcombine.high %v3019_v36, %v3023_v39  ;;  %v3055_v24 = vld [vmem:[#allocation7 + $0x1f60] sm:$0xff] }
 0x31f   :  { %8533 = vmatpush1.bf16.msra.mxu0 %v11445_v51  ;;  %v3032_v51 = vld [vmem:[#allocation7 + $0x1ea8] sm:$0xff] }
 0x320   :  { %8861 = vmatpush1.bf16.msra.mxu1 %v11447_v8  ;;  %8534 = vmatprep.subr.bf16.mxu0 %v11454_v55  ;;  %v11485_v8 = vcombine.low %v3019_v36, %v3023_v39  ;;  %v11487_v55 = vcombine.low %v3020_v41, %v3024_v43  ;;  %v11496_v18 = vcombine.high %v3028_v47, %v3032_v51  ;;  %v3059_v39 = vld [vmem:[#allocation7 + $0x1f80] sm:$0xff]  ;;  %v3060_v43 = vld [vmem:[#allocation7 + $0x1f88] sm:$0xff] }
 0x321   :  { %8862 = vmatprep.subr.bf16.mxu1 %v11456_v56  ;;  %v11494_v56 = vcombine.high %v3027_v48, %v3031_v49  ;;  %v3063_v41 = vld [vmem:[#allocation7 + $0x1fa0] sm:$0xff] }
 0x323   :  { %8535 = vmatpush1.bf16.msra.mxu0 %v11453_v31  ;;  %v3040_v31 = vld [vmem:[#allocation7 + $0x1ee8] sm:$0xff] }
 0x324   :  { %8863 = vmatpush1.bf16.msra.mxu1 %v11455_v61  ;;  %8536 = vmatprep.subr.bf16.mxu0 %v11462_v6  ;;  %v11493_v61 = vcombine.low %v3027_v48, %v3031_v49  ;;  %v11495_v6 = vcombine.low %v3028_v47, %v3032_v51  ;;  %v11504_v42 = vcombine.high %v3036_v1, %v3040_v31  ;;  %v3067_v49 = vld [vmem:[#allocation7 + $0x1fc0] sm:$0xff]  ;;  %v3068_v51 = vld [vmem:[#allocation7 + $0x1fc8] sm:$0xff] }
 0x325   :  { %8864 = vmatprep.subr.bf16.mxu1 %v11464_v7  ;;  %v11502_v7 = vcombine.high %v3035_v0, %v3039_v12  ;;  %v3071_v47 = vld [vmem:[#allocation7 + $0x1fe0] sm:$0xff] }
 0x327   :  { %8537 = vmatpush1.bf16.msra.mxu0 %v11461_v16  ;;  %v3048_v16 = vld [vmem:[#allocation7 + $0x1f28] sm:$0xff] }
 0x328   :  { %8865 = vmatpush1.bf16.msra.mxu1 %v11463_v17  ;;  %8538 = vmatprep.subr.bf16.mxu0 %v11470_v19  ;;  %v11501_v17 = vcombine.low %v3035_v0, %v3039_v12  ;;  %v11503_v19 = vcombine.low %v3036_v1, %v3040_v31  ;;  %v11512_v22 = vcombine.high %v3044_v14, %v3048_v16  ;;  %v2053_v1 = vld [vmem:[#allocation7 + $0x10] sm:$0xff] }
 0x329   :  { %8866 = vmatprep.subr.bf16.mxu1 %v11472_v20  ;;  %v11510_v20 = vcombine.high %v3043_v10, %v3047_v13  ;;  %v11534_v0 = vcombine.high %v3067_v49, %v3071_v47  ;;  %v2057_v31 = vld [vmem:[#allocation7 + $0x30] sm:$0xff] }
 0x32b   :  { %8539 = vmatpush1.bf16.msra.mxu0 %v11469_v34  ;;  %v3056_v34 = vld [vmem:[#allocation7 + $0x1f68] sm:$0xff] }
 0x32c   :  { %8867 = vmatpush1.bf16.msra.mxu1 %v11471_v57  ;;  %8540 = vmatprep.subr.bf16.mxu0 %v11478_v32  ;;  %v11509_v57 = vcombine.low %v3043_v10, %v3047_v13  ;;  %v11511_v32 = vcombine.low %v3044_v14, %v3048_v16  ;;  %v11520_v36 = vcombine.high %v3052_v27, %v3056_v34  ;;  %v2061_v14 = vld [vmem:[#allocation7 + $0x50] sm:$0xff] }
 0x32d   :  { %8868 = vmatprep.subr.bf16.mxu1 %v11480_v40  ;;  %v11518_v40 = vcombine.high %v3051_v25, %v3055_v24  ;;  %v10522_v13 = vcombine.high %v2053_v1, %v2057_v31  ;;  %v2065_v16 = vld [vmem:[#allocation7 + $0x70] sm:$0xff] }
 0x32f   :  { %8541 = vmatpush1.bf16.msra.mxu0 %v11477_v45  ;;  %v3064_v45 = vld [vmem:[#allocation7 + $0x1fa8] sm:$0xff] }
 0x330   :  { %8869 = vmatpush1.bf16.msra.mxu1 %v11479_v26  ;;  %8542 = vmatprep.subr.bf16.mxu0 %v11486_v3  ;;  %v11517_v26 = vcombine.low %v3051_v25, %v3055_v24  ;;  %v11519_v3 = vcombine.low %v3052_v27, %v3056_v34  ;;  %v11528_v48 = vcombine.high %v3060_v43, %v3064_v45  ;;  %v2073_v27 = vld [vmem:[#allocation7 + $0xb0] sm:$0xff] }
 0x331   :  { %8870 = vmatprep.subr.bf16.mxu1 %v11488_v30  ;;  %v11526_v30 = vcombine.high %v3059_v39, %v3063_v41  ;;  %v10530_v24 = vcombine.high %v2061_v14, %v2065_v16 }
 0x333   :  { %8543 = vmatpush1.bf16.msra.mxu0 %v11485_v8  ;;  %v3072_v8 = vld [vmem:[#allocation7 + $0x1fe8] sm:$0xff] }
 0x334   :  { %8871 = vmatpush1.bf16.msra.mxu1 %v11487_v55  ;;  %8544 = vmatprep.subr.bf16.mxu0 %v11494_v56  ;;  %v11525_v55 = vcombine.low %v3059_v39, %v3063_v41  ;;  %v399_v56 = vrot.slane %v12298_v35, %v12252_v15  ;;  %v11536_v12 = vcombine.high %v3068_v51, %v3072_v8 }
 0x335   :  { %8872 = vmatprep.subr.bf16.mxu1 %v11496_v18  ;;  %v11527_v18 = vcombine.low %v3060_v43, %v3064_v45  ;;  %v11535_v10 = vcombine.low %v3068_v51, %v3072_v8  ;;  %v2077_v43 = vld [vmem:[#allocation7 + $0xd0] sm:$0xff] }
 0x336   :  { %v2081_v45 = vld [vmem:[#allocation7 + $0xf0] sm:$0xff] }
 0x337   :  { %8545 = vmatpush1.bf16.msra.mxu0 %v11493_v61  ;;  %v2054_v61 = vld [vmem:[#allocation7 + $0x18] sm:$0xff]  ;;  %v2085_v51 = vld [vmem:[#allocation7 + $0x110] sm:$0xff] }
 0x338   :  { %8873 = vmatpush1.bf16.msra.mxu1 %v11495_v6  ;;  %8546 = vmatprep.subr.bf16.mxu0 %v11502_v7  ;;  %v2058_v6 = vld [vmem:[#allocation7 + $0x38] sm:$0xff]  ;;  %v11533_v7 = vcombine.low %v3067_v49, %v3071_v47  ;;  %v10546_v49 = vcombine.high %v2077_v43, %v2081_v45  ;;  %v2089_v8 = vld [vmem:[#allocation7 + $0x130] sm:$0xff] }
 0x339   :  { %8874 = vmatprep.subr.bf16.mxu1 %v11504_v42  ;;  %v2029_v42 = vadd.f32 %v12245_v44, %v399_v56  ;;  %v10524_v35 = vcombine.high %v2054_v61, %v2058_v6  ;;  %v10523_v25 = vcombine.low %v2054_v61, %v2058_v6  ;;  %v2069_v44 = vld [vmem:[#allocation7 + $0x90] sm:$0xff]  ;;  %v2090_v56 = vld [vmem:[#allocation7 + $0x138] sm:$0xff] }
 0x33a   :  { %v10538_v39 = vcombine.high %v2069_v44, %v2073_v27  ;;  %v2094_v61 = vld [vmem:[#allocation7 + $0x158] sm:$0xff] }
 0x33b   :  { %8547 = vmatpush1.bf16.msra.mxu0 %v11501_v17  ;;  %v10521_v17 = vcombine.low %v2053_v1, %v2057_v31  ;;  %v2093_v1 = vld [vmem:[#allocation7 + $0x150] sm:$0xff]  ;;  %v2098_v6 = vld [vmem:[#allocation7 + $0x178] sm:$0xff] }
 0x33c   :  { %8875 = vmatpush1.bf16.msra.mxu1 %v11503_v19  ;;  %8548 = vmatprep.subr.bf16.mxu0 %v11510_v20  ;;  %v2062_v19 = vld [vmem:[#allocation7 + $0x58] sm:$0xff]  ;;  %v2097_v31 = vld [vmem:[#allocation7 + $0x170] sm:$0xff] }
 0x33d   :  { %8876 = vmatprep.subr.bf16.mxu1 %v11512_v22  ;;  %v2066_v20 = vld [vmem:[#allocation7 + $0x78] sm:$0xff]  ;;  %v12317_v22 = vpack.c.bf16 %v2029_v42, %v2029_v42 }
 0x33e   :  { %v10532_v34 = vcombine.high %v2062_v19, %v2066_v20 }
 0x33f   :  { %8549 = vmatpush1.bf16.msra.mxu0 %v11509_v57  ;;  %v2070_v57 = vld [vmem:[#allocation7 + $0x98] sm:$0xff] }
 0x340   :  { %8877 = vmatpush1.bf16.msra.mxu1 %v11511_v32  ;;  %8550 = vmatprep.subr.bf16.mxu0 %v11518_v40  ;;  %v2074_v32 = vld [vmem:[#allocation7 + $0xb8] sm:$0xff]  ;;  %v10529_v40 = vcombine.low %v2061_v14, %v2065_v16  ;;  %v2105_v14 = vld [vmem:[#allocation7 + $0x1b0] sm:$0xff] }
 0x341   :  { %8878 = vmatprep.subr.bf16.mxu1 %v11520_v36  ;;  %v10531_v36 = vcombine.low %v2062_v19, %v2066_v20  ;;  %v10540_v41 = vcombine.high %v2070_v57, %v2074_v32  ;;  %v2102_v16 = vld [vmem:[#allocation7 + $0x198] sm:$0xff]  ;;  %v10561_v19 = vcombine.low %v2093_v1, %v2097_v31  ;;  %v10563_v20 = vcombine.low %v2094_v61, %v2098_v6 }
 0x343   :  { %8551 = vmatpush1.bf16.msra.mxu0 %v11517_v26  ;;  %v2078_v26 = vld [vmem:[#allocation7 + $0xd8] sm:$0xff] }
 0x344   :  { %8879 = vmatpush1.bf16.msra.mxu1 %v11519_v3  ;;  %8552 = vmatprep.subr.bf16.mxu0 %v11526_v30  ;;  %v2082_v3 = vld [vmem:[#allocation7 + $0xf8] sm:$0xff]  ;;  %v10537_v30 = vcombine.low %v2069_v44, %v2073_v27  ;;  %v2109_v44 = vld [vmem:[#allocation7 + $0x1d0] sm:$0xff] }
 0x345   :  { %8880 = vmatprep.subr.bf16.mxu1 %v11528_v48  ;;  %v10539_v48 = vcombine.low %v2070_v57, %v2074_v32  ;;  %v10548_v47 = vcombine.high %v2078_v26, %v2082_v3  ;;  %v2113_v27 = vld [vmem:[#allocation7 + $0x1f0] sm:$0xff]  ;;  %v2114_v57 = vld [vmem:[#allocation7 + $0x1f8] sm:$0xff] }
 0x347   :  { %8553 = vmatpush1.bf16.msra.mxu0 %v11525_v55  ;;  %v2086_v55 = vld [vmem:[#allocation7 + $0x118] sm:$0xff] }
 0x348   :  { %8881 = vmatpush1.bf16.msra.mxu1 %v11527_v18  ;;  %8554 = vmatprep.subr.bf16.mxu0 %v11534_v0  ;;  %v10547_v18 = vcombine.low %v2078_v26, %v2082_v3  ;;  %v10554_v0 = vcombine.high %v2085_v51, %v2089_v8  ;;  %v10555_v42 = vcombine.low %v2086_v55, %v2090_v56  ;;  %v2122_v26 = vld [vmem:[#allocation7 + $0x238] sm:$0xff] }
 0x349   :  { %8882 = vmatprep.subr.bf16.mxu1 %v11536_v12  ;;  %v10556_v12 = vcombine.high %v2086_v55, %v2090_v56  ;;  %v10577_v3 = vcombine.low %v2109_v44, %v2113_v27  ;;  %v2130_v55 = vld [vmem:[#allocation7 + $0x278] sm:$0xff] }
 0x34b   :  { %8555 = vmatpush1.bf16.msra.mxu0 %v11533_v7  ;;  %v10553_v7 = vcombine.low %v2085_v51, %v2089_v8  ;;  %v2129_v51 = vld [vmem:[#allocation7 + $0x270] sm:$0xff]  ;;  %v2126_v8 = vld [vmem:[#allocation7 + $0x258] sm:$0xff] }
 0x34c   :  { %8883 = vmatpush1.bf16.msra.mxu1 %v11535_v10  ;;  %8893 = vmatprep.subr.bf16.mxu0 %v10522_v13  ;;  %v10562_v10 = vcombine.high %v2093_v1, %v2097_v31  ;;  %v10564_v13 = vcombine.high %v2094_v61, %v2098_v6  ;;  %v2137_v1 = vld [vmem:[#allocation7 + $0x2b0] sm:$0xff]  ;;  %v2134_v31 = vld [vmem:[#allocation7 + $0x298] sm:$0xff] }
 0x34d   :  { %9221 = vmatprep.subr.bf16.mxu1 %v10524_v35  ;;  %v2101_v35 = vld [vmem:[#allocation7 + $0x190] sm:$0xff]  ;;  %v2138_v61 = vld [vmem:[#allocation7 + $0x2b8] sm:$0xff] }
 0x34e   :  { %8557 = vmatmul.mubr.bf16.vlgmr.msra.gmra.mrb[16].mxu0 %v12317_v22  ;;  %v10569_v32 = vcombine.low %v2101_v35, %v2105_v14 }
 0x34f   :  { %8885 = vmatmul.mubr.bf16.vlgmr.msra.gmra.mrb[16].mxu1 %v12317_v22  ;;  %8894 = vmatpush1.bf16.msra.mxu0 %v10521_v17  ;;  %v2106_v17 = vld [vmem:[#allocation7 + $0x1b8] sm:$0xff] }
 0x350   :  { %8925 = vmatprep.mubr.bf16.mxu0 %v12161_v23  ;;  %9222 = vmatpush1.bf16.msra.mxu1 %v10523_v25  ;;  %v10570_v25 = vcombine.high %v2101_v35, %v2105_v14  ;;  %v2145_v35 = vld [vmem:[#allocation7 + $0x2f0] sm:$0xff]  ;;  %v2142_v14 = vld [vmem:[#allocation7 + $0x2d8] sm:$0xff] }
 0x351   :  { %9253 = vmatprep.mubr.bf16.mxu1 %v12161_v23  ;;  %8895 = vmatprep.subr.bf16.mxu0 %v10530_v24  ;;  %v10545_v23 = vcombine.low %v2077_v43, %v2081_v45  ;;  %v10572_v24 = vcombine.high %v2102_v16, %v2106_v17  ;;  %v2121_v43 = vld [vmem:[#allocation7 + $0x230] sm:$0xff]  ;;  %v2118_v45 = vld [vmem:[#allocation7 + $0x218] sm:$0xff] }
 0x352   :  { %9223 = vmatprep.subr.bf16.mxu1 %v10532_v34  ;;  %v2110_v34 = vld [vmem:[#allocation7 + $0x1d8] sm:$0xff] }
 0x353   :  { %8896 = vmatpush1.bf16.msra.mxu0 %v10529_v40  ;;  %v10571_v40 = vcombine.low %v2102_v16, %v2106_v17  ;;  %v2146_v16 = vld [vmem:[#allocation7 + $0x2f8] sm:$0xff] }
 0x354   :  { %9224 = vmatpush1.bf16.msra.mxu1 %v10531_v36  ;;  %8897 = vmatprep.subr.bf16.mxu0 %v10538_v39  ;;  %v10578_v36 = vcombine.high %v2109_v44, %v2113_v27  ;;  %v10580_v39 = vcombine.high %v2110_v34, %v2114_v57  ;;  %v2153_v44 = vld [vmem:[#allocation7 + $0x330] sm:$0xff]  ;;  %v2150_v27 = vld [vmem:[#allocation7 + $0x318] sm:$0xff] }
 0x355   :  { %9225 = vmatprep.subr.bf16.mxu1 %v10540_v41  ;;  %v2117_v41 = vld [vmem:[#allocation7 + $0x210] sm:$0xff] }
 0x356   :  { %v10585_v56 = vcombine.low %v2117_v41, %v2121_v43 }
 0x357   :  { %8898 = vmatpush1.bf16.msra.mxu0 %v10537_v30  ;;  %v10579_v30 = vcombine.low %v2110_v34, %v2114_v57  ;;  %v2154_v34 = vld [vmem:[#allocation7 + $0x338] sm:$0xff] }
 0x358   :  { %9226 = vmatpush1.bf16.msra.mxu1 %v10539_v48  ;;  %8899 = vmatprep.subr.bf16.mxu0 %v10546_v49  ;;  %v10586_v48 = vcombine.high %v2117_v41, %v2121_v43  ;;  %v10588_v49 = vcombine.high %v2118_v45, %v2122_v26  ;;  %v2161_v41 = vld [vmem:[#allocation7 + $0x370] sm:$0xff]  ;;  %v2158_v43 = vld [vmem:[#allocation7 + $0x358] sm:$0xff] }
 0x359   :  { %9227 = vmatprep.subr.bf16.mxu1 %v10548_v47  ;;  %v2125_v47 = vld [vmem:[#allocation7 + $0x250] sm:$0xff] }
 0x35a   :  { %v10593_v6 = vcombine.low %v2125_v47, %v2129_v51 }
 0x35b   :  { %8900 = vmatpush1.bf16.msra.mxu0 %v10545_v23  ;;  %v10587_v23 = vcombine.low %v2118_v45, %v2122_v26  ;;  %v2162_v45 = vld [vmem:[#allocation7 + $0x378] sm:$0xff] }
 0x35c   :  { %9228 = vmatpush1.bf16.msra.mxu1 %v10547_v18  ;;  %8901 = vmatprep.subr.bf16.mxu0 %v10554_v0  ;;  %v10594_v18 = vcombine.high %v2125_v47, %v2129_v51  ;;  %v10596_v0 = vcombine.high %v2126_v8, %v2130_v55  ;;  %v2169_v47 = vld [vmem:[#allocation7 + $0x3b0] sm:$0xff]  ;;  %v2166_v51 = vld [vmem:[#allocation7 + $0x398] sm:$0xff] }
 0x35d   :  { %9229 = vmatprep.subr.bf16.mxu1 %v10556_v12  ;;  %v2133_v12 = vld [vmem:[#allocation7 + $0x290] sm:$0xff] }
 0x35e   :  { %v10601_v17 = vcombine.low %v2133_v12, %v2137_v1 }
 0x35f   :  { %8902 = vmatpush1.bf16.msra.mxu0 %v10553_v7  ;;  %v10595_v7 = vcombine.low %v2126_v8, %v2130_v55  ;;  %v2170_v8 = vld [vmem:[#allocation7 + $0x3b8] sm:$0xff] }
 0x360   :  { %9230 = vmatpush1.bf16.msra.mxu1 %v10555_v42  ;;  %8903 = vmatprep.subr.bf16.mxu0 %v10562_v10  ;;  %v10602_v42 = vcombine.high %v2133_v12, %v2137_v1  ;;  %v10604_v10 = vcombine.high %v2134_v31, %v2138_v61  ;;  %v2177_v12 = vld [vmem:[#allocation7 + $0x3f0] sm:$0xff]  ;;  %v2174_v1 = vld [vmem:[#allocation7 + $0x3d8] sm:$0xff] }
 0x361   :  { %9231 = vmatprep.subr.bf16.mxu1 %v10564_v13  ;;  %v2141_v13 = vld [vmem:[#allocation7 + $0x2d0] sm:$0xff] }
 0x362   :  { %v10609_v57 = vcombine.low %v2141_v13, %v2145_v35 }
 0x363   :  { %8904 = vmatpush1.bf16.msra.mxu0 %v10561_v19  ;;  %v10603_v19 = vcombine.low %v2134_v31, %v2138_v61  ;;  %v2178_v31 = vld [vmem:[#allocation7 + $0x3f8] sm:$0xff] }
 0x364   :  { %9232 = vmatpush1.bf16.msra.mxu1 %v10563_v20  ;;  %8905 = vmatprep.subr.bf16.mxu0 %v10570_v25  ;;  %v10610_v20 = vcombine.high %v2141_v13, %v2145_v35  ;;  %v10612_v25 = vcombine.high %v2142_v14, %v2146_v16  ;;  %v2185_v13 = vld [vmem:[#allocation7 + $0x430] sm:$0xff]  ;;  %v2182_v35 = vld [vmem:[#allocation7 + $0x418] sm:$0xff] }
 0x365   :  { %9233 = vmatprep.subr.bf16.mxu1 %v10572_v24  ;;  %v2149_v24 = vld [vmem:[#allocation7 + $0x310] sm:$0xff] }
 0x366   :  { %v10617_v26 = vcombine.low %v2149_v24, %v2153_v44 }
 0x367   :  { %8906 = vmatpush1.bf16.msra.mxu0 %v10569_v32  ;;  %v10611_v32 = vcombine.low %v2142_v14, %v2146_v16  ;;  %v2186_v14 = vld [vmem:[#allocation7 + $0x438] sm:$0xff] }
 0x368   :  { %9234 = vmatpush1.bf16.msra.mxu1 %v10571_v40  ;;  %8907 = vmatprep.subr.bf16.mxu0 %v10578_v36  ;;  %v10618_v40 = vcombine.high %v2149_v24, %v2153_v44  ;;  %v10620_v36 = vcombine.high %v2150_v27, %v2154_v34  ;;  %v2193_v24 = vld [vmem:[#allocation7 + $0x470] sm:$0xff] }
 0x369   :  { %9235 = vmatprep.subr.bf16.mxu1 %v10580_v39  ;;  %v2157_v39 = vld [vmem:[#allocation7 + $0x350] sm:$0xff] }
 0x36a   :  { %v10625_v55 = vcombine.low %v2157_v39, %v2161_v41 }
 0x36b   :  { %8908 = vmatpush1.bf16.msra.mxu0 %v10577_v3  ;;  %v10619_v3 = vcombine.low %v2150_v27, %v2154_v34  ;;  %v2190_v27 = vld [vmem:[#allocation7 + $0x458] sm:$0xff] }
 0x36c   :  { %9236 = vmatpush1.bf16.msra.mxu1 %v10579_v30  ;;  %8909 = vmatprep.subr.bf16.mxu0 %v10586_v48  ;;  %v10626_v30 = vcombine.high %v2157_v39, %v2161_v41  ;;  %v10628_v48 = vcombine.high %v2158_v43, %v2162_v45  ;;  %v2194_v34 = vld [vmem:[#allocation7 + $0x478] sm:$0xff] }
 0x36d   :  { %9237 = vmatprep.subr.bf16.mxu1 %v10588_v49  ;;  %v2165_v49 = vld [vmem:[#allocation7 + $0x390] sm:$0xff]  ;;  %v10660_v39 = vcombine.high %v2190_v27, %v2194_v34  ;;  %v2198_v41 = vld [vmem:[#allocation7 + $0x498] sm:$0xff] }
 0x36e   :  { %v10633_v61 = vcombine.low %v2165_v49, %v2169_v47 }
 0x36f   :  { %8910 = vmatpush1.bf16.msra.mxu0 %v10585_v56  ;;  %v10627_v56 = vcombine.low %v2158_v43, %v2162_v45  ;;  %v2202_v43 = vld [vmem:[#allocation7 + $0x4b8] sm:$0xff] }
 0x370   :  { %9238 = vmatpush1.bf16.msra.mxu1 %v10587_v23  ;;  %8911 = vmatprep.subr.bf16.mxu0 %v10594_v18  ;;  %v10634_v23 = vcombine.high %v2165_v49, %v2169_v47  ;;  %v10636_v18 = vcombine.high %v2166_v51, %v2170_v8  ;;  %v2209_v49 = vld [vmem:[#allocation7 + $0x4f0] sm:$0xff]  ;;  %v2206_v47 = vld [vmem:[#allocation7 + $0x4d8] sm:$0xff] }
 0x371   :  { %9239 = vmatprep.subr.bf16.mxu1 %v10596_v0  ;;  %v2173_v0 = vld [vmem:[#allocation7 + $0x3d0] sm:$0xff] }
 0x372   :  { %v10641_v16 = vcombine.low %v2173_v0, %v2177_v12 }
 0x373   :  { %8912 = vmatpush1.bf16.msra.mxu0 %v10593_v6  ;;  %v10635_v6 = vcombine.low %v2166_v51, %v2170_v8  ;;  %v2210_v51 = vld [vmem:[#allocation7 + $0x4f8] sm:$0xff] }
 0x374   :  { %9240 = vmatpush1.bf16.msra.mxu1 %v10595_v7  ;;  %8913 = vmatprep.subr.bf16.mxu0 %v10602_v42  ;;  %v10642_v7 = vcombine.high %v2173_v0, %v2177_v12  ;;  %v10644_v42 = vcombine.high %v2174_v1, %v2178_v31  ;;  %v2214_v0 = vld [vmem:[#allocation7 + $0x518] sm:$0xff] }
 0x375   :  { %9241 = vmatprep.subr.bf16.mxu1 %v10604_v10  ;;  %v2181_v10 = vld [vmem:[#allocation7 + $0x410] sm:$0xff]  ;;  %v2218_v12 = vld [vmem:[#allocation7 + $0x538] sm:$0xff] }
 0x376   :  { %v10649_v44 = vcombine.low %v2181_v10, %v2185_v13 }
 0x377   :  { %8914 = vmatpush1.bf16.msra.mxu0 %v10601_v17  ;;  %v10643_v17 = vcombine.low %v2174_v1, %v2178_v31  ;;  %v10675_v1 = vcombine.low %v2206_v47, %v2210_v51 }
 0x378   :  { %9242 = vmatpush1.bf16.msra.mxu1 %v10603_v19  ;;  %8915 = vmatprep.subr.bf16.mxu0 %v10610_v20  ;;  %v10650_v19 = vcombine.high %v2181_v10, %v2185_v13  ;;  %v10652_v20 = vcombine.high %v2182_v35, %v2186_v14  ;;  %v2226_v10 = vld [vmem:[#allocation7 + $0x578] sm:$0xff] }
 0x379   :  { %9243 = vmatprep.subr.bf16.mxu1 %v10612_v25  ;;  %v2189_v25 = vld [vmem:[#allocation7 + $0x450] sm:$0xff] }
 0x37a   :  { %v10657_v45 = vcombine.low %v2189_v25, %v2193_v24 }
 0x37b   :  { %8916 = vmatpush1.bf16.msra.mxu0 %v10609_v57  ;;  %v10651_v57 = vcombine.low %v2182_v35, %v2186_v14  ;;  %v10683_v35 = vcombine.low %v2214_v0, %v2218_v12 }
 0x37c   :  { %9244 = vmatpush1.bf16.msra.mxu1 %v10611_v32  ;;  %8917 = vmatprep.subr.bf16.mxu0 %v10618_v40  ;;  %v10658_v32 = vcombine.high %v2189_v25, %v2193_v24  ;;  %v2197_v40 = vld [vmem:[#allocation7 + $0x490] sm:$0xff]  ;;  %v2234_v25 = vld [vmem:[#allocation7 + $0x5b8] sm:$0xff] }
 0x37d   :  { %9245 = vmatprep.subr.bf16.mxu1 %v10620_v36  ;;  %v2201_v36 = vld [vmem:[#allocation7 + $0x4b0] sm:$0xff] }
 0x37e   :  { %v10665_v8 = vcombine.low %v2197_v40, %v2201_v36 }
 0x37f   :  { %8918 = vmatpush1.bf16.msra.mxu0 %v10617_v26  ;;  %v10659_v26 = vcombine.low %v2190_v27, %v2194_v34 }
 0x380   :  { %9246 = vmatpush1.bf16.msra.mxu1 %v10619_v3  ;;  %8919 = vmatprep.subr.bf16.mxu0 %v10626_v30  ;;  %v10666_v3 = vcombine.high %v2197_v40, %v2201_v36  ;;  %v10668_v30 = vcombine.high %v2198_v41, %v2202_v43  ;;  %v2238_v40 = vld [vmem:[#allocation7 + $0x5d8] sm:$0xff] }
 0x381   :  { %9247 = vmatprep.subr.bf16.mxu1 %v10628_v48  ;;  %v2205_v48 = vld [vmem:[#allocation7 + $0x4d0] sm:$0xff]  ;;  %v2242_v36 = vld [vmem:[#allocation7 + $0x5f8] sm:$0xff] }
 0x383   :  { %8920 = vmatpush1.bf16.msra.mxu0 %v10625_v55  ;;  %v10674_v55 = vcombine.high %v2205_v48, %v2209_v49 }
 0x384   :  { %9248 = vmatpush1.bf16.msra.mxu1 %v10627_v56  ;;  %8921 = vmatprep.subr.bf16.mxu0 %v10634_v23  ;;  %v10676_v56 = vcombine.high %v2206_v47, %v2210_v51  ;;  %v2213_v23 = vld [vmem:[#allocation7 + $0x510] sm:$0xff]  ;;  %v10707_v47 = vcombine.low %v2238_v40, %v2242_v36 }
 0x385   :  { %9249 = vmatprep.subr.bf16.mxu1 %v10636_v18  ;;  %v2217_v18 = vld [vmem:[#allocation7 + $0x530] sm:$0xff] }
 0x386   :  { %v10682_v31 = vcombine.high %v2213_v23, %v2217_v18  ;;  %v10681_v13 = vcombine.low %v2213_v23, %v2217_v18  ;;  %v2258_v23 = vld [vmem:[#allocation7 + $0x678] sm:$0xff] }
 0x387   :  { %8922 = vmatpush1.bf16.msra.mxu0 %v10633_v61  ;;  %v10684_v61 = vcombine.high %v2214_v0, %v2218_v12 }
 0x388   :  { %9250 = vmatpush1.bf16.msra.mxu1 %v10635_v6  ;;  %8923 = vmatprep.subr.bf16.mxu0 %v10642_v7  ;;  %v2221_v6 = vld [vmem:[#allocation7 + $0x550] sm:$0xff] }
 0x389   :  { %9251 = vmatprep.subr.bf16.mxu1 %v10644_v42  ;;  %v2225_v7 = vld [vmem:[#allocation7 + $0x570] sm:$0xff]  ;;  %v2222_v42 = vld [vmem:[#allocation7 + $0x558] sm:$0xff] }
 0x38a   :  { %v10690_v14 = vcombine.high %v2221_v6, %v2225_v7  ;;  %v10689_v24 = vcombine.low %v2221_v6, %v2225_v7  ;;  %v2266_v6 = vld [vmem:[#allocation7 + $0x6b8] sm:$0xff] }
 0x38b   :  { %8924 = vmatpush1.bf16.msra.mxu0 %v10641_v16  ;;  %v10692_v16 = vcombine.high %v2222_v42, %v2226_v10 }
 0x38c   :  { %9252 = vmatpush1.bf16.msra.mxu1 %v10643_v17  ;;  %8934 = vmatprep.subr.bf16.mxu0 %v10650_v19  ;;  %v2229_v17 = vld [vmem:[#allocation7 + $0x590] sm:$0xff] }
 0x38d   :  { %9262 = vmatprep.subr.bf16.mxu1 %v10652_v20  ;;  %v2233_v19 = vld [vmem:[#allocation7 + $0x5b0] sm:$0xff]  ;;  %v2230_v20 = vld [vmem:[#allocation7 + $0x598] sm:$0xff] }
 0x38e   :  { %8926 = vmatmul.mubr.bf16.vlgmr.msra.gmra.mrb[20].mxu0 %v12177_v52  ;;  %v10698_v27 = vcombine.high %v2229_v17, %v2233_v19  ;;  %v10700_v34 = vcombine.high %v2230_v20, %v2234_v25 }
 0x38f   :  { %9254 = vmatmul.mubr.bf16.vlgmr.msra.gmra.mrb[20].mxu1 %v12177_v52  ;;  %8935 = vmatpush1.bf16.msra.mxu0 %v10649_v44  ;;  %v10667_v52 = vcombine.low %v2198_v41, %v2202_v43  ;;  %v10691_v44 = vcombine.low %v2222_v42, %v2226_v10  ;;  %v10699_v41 = vcombine.low %v2230_v20, %v2234_v25 }
 0x390   :  { %8966 = vmatprep.mubr.bf16.mxu0 %v12179_v58  ;;  %9263 = vmatpush1.bf16.msra.mxu1 %v10651_v57  ;;  %v2237_v57 = vld [vmem:[#allocation7 + $0x5d0] sm:$0xff] }
 0x391   :  { %9294 = vmatprep.mubr.bf16.mxu1 %v12179_v58  ;;  %8936 = vmatprep.subr.bf16.mxu0 %v10658_v32  ;;  %v10673_v58 = vcombine.low %v2205_v48, %v2209_v49  ;;  %v2241_v32 = vld [vmem:[#allocation7 + $0x5f0] sm:$0xff]  ;;  %v2250_v48 = vld [vmem:[#allocation7 + $0x638] sm:$0xff] }
 0x392   :  { %9264 = vmatprep.subr.bf16.mxu1 %v10660_v39  ;;  %v10697_v39 = vcombine.low %v2229_v17, %v2233_v19  ;;  %v10706_v43 = vcombine.high %v2237_v57, %v2241_v32  ;;  %v10705_v49 = vcombine.low %v2237_v57, %v2241_v32  ;;  %v2274_v17 = vld [vmem:[#allocation7 + $0x6f8] sm:$0xff] }
 0x393   :  { %8937 = vmatpush1.bf16.msra.mxu0 %v10657_v45  ;;  %v10708_v45 = vcombine.high %v2238_v40, %v2242_v36  ;;  %v2282_v57 = vld [vmem:[#allocation7 + $0x738] sm:$0xff] }
 0x394   :  { %9265 = vmatpush1.bf16.msra.mxu1 %v10659_v26  ;;  %8938 = vmatprep.subr.bf16.mxu0 %v10666_v3  ;;  %v2245_v26 = vld [vmem:[#allocation7 + $0x610] sm:$0xff] }
 0x395   :  { %9266 = vmatprep.subr.bf16.mxu1 %v10668_v30  ;;  %v2249_v3 = vld [vmem:[#allocation7 + $0x630] sm:$0xff]  ;;  %v2246_v30 = vld [vmem:[#allocation7 + $0x618] sm:$0xff] }
 0x396   :  { %v10714_v51 = vcombine.high %v2245_v26, %v2249_v3  ;;  %v10713_v18 = vcombine.low %v2245_v26, %v2249_v3  ;;  %v10715_v0 = vcombine.low %v2246_v30, %v2250_v48  ;;  %v2290_v26 = vld [vmem:[#allocation7 + $0x778] sm:$0xff] }
 0x397   :  { %8939 = vmatpush1.bf16.msra.mxu0 %v10665_v8  ;;  %v10716_v8 = vcombine.high %v2246_v30, %v2250_v48 }
 0x398   :  { %9267 = vmatpush1.bf16.msra.mxu1 %v10667_v52  ;;  %8940 = vmatprep.subr.bf16.mxu0 %v10674_v55  ;;  %v2253_v52 = vld [vmem:[#allocation7 + $0x650] sm:$0xff] }
 0x399   :  { %9268 = vmatprep.subr.bf16.mxu1 %v10676_v56  ;;  %v2257_v55 = vld [vmem:[#allocation7 + $0x670] sm:$0xff]  ;;  %v2254_v56 = vld [vmem:[#allocation7 + $0x658] sm:$0xff] }
 0x39a   :  { %v10722_v12 = vcombine.high %v2253_v52, %v2257_v55  ;;  %v10721_v7 = vcombine.low %v2253_v52, %v2257_v55  ;;  %v10723_v42 = vcombine.low %v2254_v56, %v2258_v23  ;;  %v2298_v52 = vld [vmem:[#allocation7 + $0x7b8] sm:$0xff] }
 0x39b   :  { %8941 = vmatpush1.bf16.msra.mxu0 %v10673_v58  ;;  %v10724_v58 = vcombine.high %v2254_v56, %v2258_v23 }
 0x39c   :  { %9269 = vmatpush1.bf16.msra.mxu1 %v10675_v1  ;;  %8942 = vmatprep.subr.bf16.mxu0 %v10682_v31  ;;  %v2261_v1 = vld [vmem:[#allocation7 + $0x690] sm:$0xff] }
 0x39d   :  { %9270 = vmatprep.subr.bf16.mxu1 %v10684_v61  ;;  %v2265_v31 = vld [vmem:[#allocation7 + $0x6b0] sm:$0xff]  ;;  %v2262_v61 = vld [vmem:[#allocation7 + $0x698] sm:$0xff] }
 0x39e   :  { %v10730_v10 = vcombine.high %v2261_v1, %v2265_v31  ;;  %v10729_v19 = vcombine.low %v2261_v1, %v2265_v31  ;;  %v10731_v20 = vcombine.low %v2262_v61, %v2266_v6  ;;  %v2306_v1 = vld [vmem:[#allocation7 + $0x7f8] sm:$0xff] }
 0x39f   :  { %8943 = vmatpush1.bf16.msra.mxu0 %v10681_v13  ;;  %v10732_v13 = vcombine.high %v2262_v61, %v2266_v6 }
 0x3a0   :  { %9271 = vmatpush1.bf16.msra.mxu1 %v10683_v35  ;;  %8944 = vmatprep.subr.bf16.mxu0 %v10690_v14  ;;  %v2269_v35 = vld [vmem:[#allocation7 + $0x6d0] sm:$0xff] }
 0x3a1   :  { %9272 = vmatprep.subr.bf16.mxu1 %v10692_v16  ;;  %v2273_v14 = vld [vmem:[#allocation7 + $0x6f0] sm:$0xff]  ;;  %v2270_v16 = vld [vmem:[#allocation7 + $0x6d8] sm:$0xff] }
 0x3a2   :  { %v10738_v25 = vcombine.high %v2269_v35, %v2273_v14  ;;  %v10737_v32 = vcombine.low %v2269_v35, %v2273_v14  ;;  %v10739_v40 = vcombine.low %v2270_v16, %v2274_v17  ;;  %v2314_v35 = vld [vmem:[#allocation7 + $0x838] sm:$0xff] }
 0x3a3   :  { %8945 = vmatpush1.bf16.msra.mxu0 %v10689_v24  ;;  %v10740_v24 = vcombine.high %v2270_v16, %v2274_v17 }
 0x3a4   :  { %9273 = vmatpush1.bf16.msra.mxu1 %v10691_v44  ;;  %8946 = vmatprep.subr.bf16.mxu0 %v10698_v27  ;;  %v2277_v44 = vld [vmem:[#allocation7 + $0x710] sm:$0xff] }
 0x3a5   :  { %9274 = vmatprep.subr.bf16.mxu1 %v10700_v34  ;;  %v2281_v27 = vld [vmem:[#allocation7 + $0x730] sm:$0xff]  ;;  %v2278_v34 = vld [vmem:[#allocation7 + $0x718] sm:$0xff] }
 0x3a6   :  { %v10746_v36 = vcombine.high %v2277_v44, %v2281_v27  ;;  %v10745_v3 = vcombine.low %v2277_v44, %v2281_v27  ;;  %v10747_v30 = vcombine.low %v2278_v34, %v2282_v57  ;;  %v2318_v44 = vld [vmem:[#allocation7 + $0x858] sm:$0xff] }
 0x3a7   :  { %8947 = vmatpush1.bf16.msra.mxu0 %v10697_v39  ;;  %v10748_v39 = vcombine.high %v2278_v34, %v2282_v57  ;;  %v2322_v27 = vld [vmem:[#allocation7 + $0x878] sm:$0xff] }
 0x3a8   :  { %9275 = vmatpush1.bf16.msra.mxu1 %v10699_v41  ;;  %8948 = vmatprep.subr.bf16.mxu0 %v10706_v43  ;;  %v2285_v41 = vld [vmem:[#allocation7 + $0x750] sm:$0xff] }
 0x3a9   :  { %9276 = vmatprep.subr.bf16.mxu1 %v10708_v45  ;;  %v2289_v43 = vld [vmem:[#allocation7 + $0x770] sm:$0xff]  ;;  %v2286_v45 = vld [vmem:[#allocation7 + $0x758] sm:$0xff] }
 0x3aa   :  { %v10754_v48 = vcombine.high %v2285_v41, %v2289_v43  ;;  %v10753_v55 = vcombine.low %v2285_v41, %v2289_v43  ;;  %v10755_v56 = vcombine.low %v2286_v45, %v2290_v26  ;;  %v2330_v41 = vld [vmem:[#allocation7 + $0x8b8] sm:$0xff] }
 0x3ab   :  { %8949 = vmatpush1.bf16.msra.mxu0 %v10705_v49  ;;  %v10756_v49 = vcombine.high %v2286_v45, %v2290_v26  ;;  %v10787_v45 = vcombine.low %v2318_v44, %v2322_v27 }
 0x3ac   :  { %9277 = vmatpush1.bf16.msra.mxu1 %v10707_v47  ;;  %8950 = vmatprep.subr.bf16.mxu0 %v10714_v51  ;;  %v2293_v47 = vld [vmem:[#allocation7 + $0x790] sm:$0xff] }
 0x3ad   :  { %9278 = vmatprep.subr.bf16.mxu1 %v10716_v8  ;;  %v2297_v51 = vld [vmem:[#allocation7 + $0x7b0] sm:$0xff]  ;;  %v2294_v8 = vld [vmem:[#allocation7 + $0x798] sm:$0xff] }
 0x3ae   :  { %v10762_v23 = vcombine.high %v2293_v47, %v2297_v51  ;;  %v10761_v31 = vcombine.low %v2293_v47, %v2297_v51  ;;  %v10763_v61 = vcombine.low %v2294_v8, %v2298_v52  ;;  %v2338_v47 = vld [vmem:[#allocation7 + $0x8f8] sm:$0xff] }
 0x3af   :  { %8951 = vmatpush1.bf16.msra.mxu0 %v10713_v18  ;;  %v10764_v18 = vcombine.high %v2294_v8, %v2298_v52 }
 0x3b0   :  { %9279 = vmatpush1.bf16.msra.mxu1 %v10715_v0  ;;  %8952 = vmatprep.subr.bf16.mxu0 %v10722_v12  ;;  %v2301_v0 = vld [vmem:[#allocation7 + $0x7d0] sm:$0xff] }
 0x3b1   :  { %9280 = vmatprep.subr.bf16.mxu1 %v10724_v58  ;;  %v2305_v12 = vld [vmem:[#allocation7 + $0x7f0] sm:$0xff]  ;;  %v2302_v58 = vld [vmem:[#allocation7 + $0x7d8] sm:$0xff] }
 0x3b2   :  { %v10770_v6 = vcombine.high %v2301_v0, %v2305_v12  ;;  %v10769_v14 = vcombine.low %v2301_v0, %v2305_v12  ;;  %v10771_v16 = vcombine.low %v2302_v58, %v2306_v1 }
 0x3b3   :  { %8953 = vmatpush1.bf16.msra.mxu0 %v10721_v7  ;;  %v10772_v7 = vcombine.high %v2302_v58, %v2306_v1  ;;  %v2349_v1 = vld [vmem:[#allocation7 + $0x950] sm:$0xff] }
 0x3b4   :  { %9281 = vmatpush1.bf16.msra.mxu1 %v10723_v42  ;;  %8954 = vmatprep.subr.bf16.mxu0 %v10730_v10  ;;  %v2309_v42 = vld [vmem:[#allocation7 + $0x810] sm:$0xff] }
 0x3b5   :  { %9282 = vmatprep.subr.bf16.mxu1 %v10732_v13  ;;  %v2313_v10 = vld [vmem:[#allocation7 + $0x830] sm:$0xff]  ;;  %v2310_v13 = vld [vmem:[#allocation7 + $0x818] sm:$0xff] }
 0x3b6   :  { %v10778_v17 = vcombine.high %v2309_v42, %v2313_v10  ;;  %v10779_v34 = vcombine.low %v2310_v13, %v2314_v35 }
 0x3b7   :  { %8955 = vmatpush1.bf16.msra.mxu0 %v10729_v19  ;;  %v10780_v19 = vcombine.high %v2310_v13, %v2314_v35  ;;  %v2357_v35 = vld [vmem:[#allocation7 + $0x990] sm:$0xff] }
 0x3b8   :  { %9283 = vmatpush1.bf16.msra.mxu1 %v10731_v20  ;;  %8956 = vmatprep.subr.bf16.mxu0 %v10738_v25  ;;  %v2317_v20 = vld [vmem:[#allocation7 + $0x850] sm:$0xff] }
 0x3b9   :  { %9284 = vmatprep.subr.bf16.mxu1 %v10740_v24  ;;  %v2321_v25 = vld [vmem:[#allocation7 + $0x870] sm:$0xff]  ;;  %v10777_v24 = vcombine.low %v2309_v42, %v2313_v10 }
 0x3ba   :  { %v10786_v57 = vcombine.high %v2317_v20, %v2321_v25  ;;  %v10785_v43 = vcombine.low %v2317_v20, %v2321_v25 }
 0x3bb   :  { %8957 = vmatpush1.bf16.msra.mxu0 %v10737_v32  ;;  %v2325_v32 = vld [vmem:[#allocation7 + $0x890] sm:$0xff] }
 0x3bc   :  { %9285 = vmatpush1.bf16.msra.mxu1 %v10739_v40  ;;  %8958 = vmatprep.subr.bf16.mxu0 %v10746_v36  ;;  %v2329_v40 = vld [vmem:[#allocation7 + $0x8b0] sm:$0xff]  ;;  %v10788_v36 = vcombine.high %v2318_v44, %v2322_v27 }
 0x3bd   :  { %9286 = vmatprep.subr.bf16.mxu1 %v10748_v39  ;;  %v2326_v39 = vld [vmem:[#allocation7 + $0x898] sm:$0xff]  ;;  %v10794_v26 = vcombine.high %v2325_v32, %v2329_v40  ;;  %v10793_v51 = vcombine.low %v2325_v32, %v2329_v40  ;;  %v2365_v44 = vld [vmem:[#allocation7 + $0x9d0] sm:$0xff] }
 0x3be   :  { %v2369_v27 = vld [vmem:[#allocation7 + $0x9f0] sm:$0xff] }
 0x3bf   :  { %8959 = vmatpush1.bf16.msra.mxu0 %v10745_v3  ;;  %v10796_v3 = vcombine.high %v2326_v39, %v2330_v41 }
 0x3c0   :  { %9287 = vmatpush1.bf16.msra.mxu1 %v10747_v30  ;;  %8960 = vmatprep.subr.bf16.mxu0 %v10754_v48  ;;  %v2333_v30 = vld [vmem:[#allocation7 + $0x8d0] sm:$0xff] }
 0x3c1   :  { %9288 = vmatprep.subr.bf16.mxu1 %v10756_v49  ;;  %v2337_v48 = vld [vmem:[#allocation7 + $0x8f0] sm:$0xff]  ;;  %v2334_v49 = vld [vmem:[#allocation7 + $0x8d8] sm:$0xff] }
 0x3c2   :  { %v10802_v8 = vcombine.high %v2333_v30, %v2337_v48  ;;  %v10804_v52 = vcombine.high %v2334_v49, %v2338_v47  ;;  %v10803_v0 = vcombine.low %v2334_v49, %v2338_v47  ;;  %v2381_v47 = vld [vmem:[#allocation7 + $0xa50] sm:$0xff] }
 0x3c3   :  { %8961 = vmatpush1.bf16.msra.mxu0 %v10753_v55  ;;  %v2341_v55 = vld [vmem:[#allocation7 + $0x910] sm:$0xff] }
 0x3c4   :  { %9289 = vmatpush1.bf16.msra.mxu1 %v10755_v56  ;;  %8962 = vmatprep.subr.bf16.mxu0 %v10762_v23  ;;  %v2345_v56 = vld [vmem:[#allocation7 + $0x930] sm:$0xff]  ;;  %v2342_v23 = vld [vmem:[#allocation7 + $0x918] sm:$0xff] }
 0x3c5   :  { %9290 = vmatprep.subr.bf16.mxu1 %v10764_v18  ;;  %v2346_v18 = vld [vmem:[#allocation7 + $0x938] sm:$0xff]  ;;  %v10810_v12 = vcombine.high %v2341_v55, %v2345_v56 }
 0x3c6   :  { %v10812_v58 = vcombine.high %v2342_v23, %v2346_v18  ;;  %v10811_v42 = vcombine.low %v2342_v23, %v2346_v18  ;;  %v2389_v18 = vld [vmem:[#allocation7 + $0xa90] sm:$0xff] }
 0x3c7   :  { %8963 = vmatpush1.bf16.msra.mxu0 %v10761_v31  ;;  %v2353_v31 = vld [vmem:[#allocation7 + $0x970] sm:$0xff] }
 0x3c8   :  { %9291 = vmatpush1.bf16.msra.mxu1 %v10763_v61  ;;  %8964 = vmatprep.subr.bf16.mxu0 %v10770_v6  ;;  %v2350_v61 = vld [vmem:[#allocation7 + $0x958] sm:$0xff]  ;;  %v10818_v10 = vcombine.high %v2349_v1, %v2353_v31 }
 0x3c9   :  { %9292 = vmatprep.subr.bf16.mxu1 %v10772_v7  ;;  %v2354_v6 = vld [vmem:[#allocation7 + $0x978] sm:$0xff]  ;;  %v10809_v7 = vcombine.low %v2341_v55, %v2345_v56 }
 0x3ca   :  { %v10820_v13 = vcombine.high %v2350_v61, %v2354_v6  ;;  %v10819_v20 = vcombine.low %v2350_v61, %v2354_v6  ;;  %v2397_v6 = vld [vmem:[#allocation7 + $0xad0] sm:$0xff] }
 0x3cb   :  { %8965 = vmatpush1.bf16.msra.mxu0 %v10769_v14  ;;  %v2361_v14 = vld [vmem:[#allocation7 + $0x9b0] sm:$0xff] }
 0x3cc   :  { %9293 = vmatpush1.bf16.msra.mxu1 %v10771_v16  ;;  %8975 = vmatprep.subr.bf16.mxu0 %v10778_v17  ;;  %v2358_v16 = vld [vmem:[#allocation7 + $0x998] sm:$0xff]  ;;  %v10826_v25 = vcombine.high %v2357_v35, %v2361_v14  ;;  %v10825_v32 = vcombine.low %v2357_v35, %v2361_v14 }
 0x3cd   :  { %9303 = vmatprep.subr.bf16.mxu1 %v10780_v19  ;;  %v2362_v17 = vld [vmem:[#allocation7 + $0x9b8] sm:$0xff]  ;;  %v10817_v19 = vcombine.low %v2349_v1, %v2353_v31 }
 0x3ce   :  { %8967 = vmatmul.mubr.bf16.vlgmr.msra.gmra.mrb[20].mxu0 %v12205_v33  ;;  %v10827_v40 = vcombine.low %v2358_v16, %v2362_v17 }
 0x3cf   :  { %9295 = vmatmul.mubr.bf16.vlgmr.msra.gmra.mrb[20].mxu1 %v12205_v33  ;;  %8976 = vmatpush1.bf16.msra.mxu0 %v10777_v24  ;;  %v10795_v33 = vcombine.low %v2326_v39, %v2330_v41  ;;  %v10828_v24 = vcombine.high %v2358_v16, %v2362_v17  ;;  %v2373_v41 = vld [vmem:[#allocation7 + $0xa10] sm:$0xff] }
 0x3d0   :  { %9007 = vmatprep.mubr.bf16.mxu0 %v12207_v37  ;;  %9304 = vmatpush1.bf16.msra.mxu1 %v10779_v34  ;;  %v2366_v34 = vld [vmem:[#allocation7 + $0x9d8] sm:$0xff]  ;;  %v2405_v17 = vld [vmem:[#allocation7 + $0xb10] sm:$0xff] }
 0x3d1   :  { %9335 = vmatprep.mubr.bf16.mxu1 %v12207_v37  ;;  %8977 = vmatprep.subr.bf16.mxu0 %v10786_v57  ;;  %v10801_v37 = vcombine.low %v2333_v30, %v2337_v48  ;;  %v2370_v57 = vld [vmem:[#allocation7 + $0x9f8] sm:$0xff] }
 0x3d2   :  { %9305 = vmatprep.subr.bf16.mxu1 %v10788_v36  ;;  %v10834_v36 = vcombine.high %v2365_v44, %v2369_v27  ;;  %v10836_v39 = vcombine.high %v2366_v34, %v2370_v57  ;;  %v10835_v30 = vcombine.low %v2366_v34, %v2370_v57  ;;  %v2413_v57 = vld [vmem:[#allocation7 + $0xb50] sm:$0xff] }
 0x3d3   :  { %8978 = vmatpush1.bf16.msra.mxu0 %v10785_v43  ;;  %v2377_v43 = vld [vmem:[#allocation7 + $0xa30] sm:$0xff] }
 0x3d4   :  { %9306 = vmatpush1.bf16.msra.mxu1 %v10787_v45  ;;  %8979 = vmatprep.subr.bf16.mxu0 %v10794_v26  ;;  %v2374_v45 = vld [vmem:[#allocation7 + $0xa18] sm:$0xff]  ;;  %v10842_v48 = vcombine.high %v2373_v41, %v2377_v43 }
 0x3d5   :  { %9307 = vmatprep.subr.bf16.mxu1 %v10796_v3  ;;  %v2378_v26 = vld [vmem:[#allocation7 + $0xa38] sm:$0xff]  ;;  %v10833_v3 = vcombine.low %v2365_v44, %v2369_v27 }
 0x3d6   :  { %v10844_v49 = vcombine.high %v2374_v45, %v2378_v26  ;;  %v10843_v55 = vcombine.low %v2374_v45, %v2378_v26  ;;  %v2421_v26 = vld [vmem:[#allocation7 + $0xb90] sm:$0xff] }
 0x3d7   :  { %8980 = vmatpush1.bf16.msra.mxu0 %v10793_v51  ;;  %v2385_v51 = vld [vmem:[#allocation7 + $0xa70] sm:$0xff] }
 0x3d8   :  { %9308 = vmatpush1.bf16.msra.mxu1 %v10795_v33  ;;  %8981 = vmatprep.subr.bf16.mxu0 %v10802_v8  ;;  %v2382_v33 = vld [vmem:[#allocation7 + $0xa58] sm:$0xff]  ;;  %v10850_v56 = vcombine.high %v2381_v47, %v2385_v51 }
 0x3d9   :  { %9309 = vmatprep.subr.bf16.mxu1 %v10804_v52  ;;  %v2386_v8 = vld [vmem:[#allocation7 + $0xa78] sm:$0xff]  ;;  %v10841_v52 = vcombine.low %v2373_v41, %v2377_v43 }
 0x3da   :  { %v10852_v23 = vcombine.high %v2382_v33, %v2386_v8  ;;  %v10851_v1 = vcombine.low %v2382_v33, %v2386_v8  ;;  %v2429_v8 = vld [vmem:[#allocation7 + $0xbd0] sm:$0xff] }
 0x3db   :  { %8982 = vmatpush1.bf16.msra.mxu0 %v10801_v37  ;;  %v2393_v37 = vld [vmem:[#allocation7 + $0xab0] sm:$0xff] }
 0x3dc   :  { %9310 = vmatpush1.bf16.msra.mxu1 %v10803_v0  ;;  %8983 = vmatprep.subr.bf16.mxu0 %v10810_v12  ;;  %v2390_v0 = vld [vmem:[#allocation7 + $0xa98] sm:$0xff]  ;;  %v10858_v31 = vcombine.high %v2389_v18, %v2393_v37 }
 0x3dd   :  { %9311 = vmatprep.subr.bf16.mxu1 %v10812_v58  ;;  %v2394_v12 = vld [vmem:[#allocation7 + $0xab8] sm:$0xff]  ;;  %v10849_v58 = vcombine.low %v2381_v47, %v2385_v51 }
 0x3de   :  { %v10860_v61 = vcombine.high %v2390_v0, %v2394_v12  ;;  %v10859_v35 = vcombine.low %v2390_v0, %v2394_v12  ;;  %v2437_v12 = vld [vmem:[#allocation7 + $0xc10] sm:$0xff] }
 0x3df   :  { %8984 = vmatpush1.bf16.msra.mxu0 %v10809_v7  ;;  %v2401_v7 = vld [vmem:[#allocation7 + $0xaf0] sm:$0xff] }
 0x3e0   :  { %9312 = vmatpush1.bf16.msra.mxu1 %v10811_v42  ;;  %8985 = vmatprep.subr.bf16.mxu0 %v10818_v10  ;;  %v2398_v42 = vld [vmem:[#allocation7 + $0xad8] sm:$0xff]  ;;  %v10866_v14 = vcombine.high %v2397_v6, %v2401_v7 }
 0x3e1   :  { %9313 = vmatprep.subr.bf16.mxu1 %v10820_v13  ;;  %v2402_v10 = vld [vmem:[#allocation7 + $0xaf8] sm:$0xff]  ;;  %v10857_v13 = vcombine.low %v2389_v18, %v2393_v37 }
 0x3e2   :  { %v10868_v16 = vcombine.high %v2398_v42, %v2402_v10  ;;  %v10867_v44 = vcombine.low %v2398_v42, %v2402_v10  ;;  %v2445_v10 = vld [vmem:[#allocation7 + $0xc50] sm:$0xff] }
 0x3e3   :  { %8986 = vmatpush1.bf16.msra.mxu0 %v10817_v19  ;;  %v2409_v19 = vld [vmem:[#allocation7 + $0xb30] sm:$0xff] }
 0x3e4   :  { %9314 = vmatpush1.bf16.msra.mxu1 %v10819_v20  ;;  %8987 = vmatprep.subr.bf16.mxu0 %v10826_v25  ;;  %v2406_v20 = vld [vmem:[#allocation7 + $0xb18] sm:$0xff]  ;;  %v10874_v27 = vcombine.high %v2405_v17, %v2409_v19 }
 0x3e5   :  { %9315 = vmatprep.subr.bf16.mxu1 %v10828_v24  ;;  %v2410_v25 = vld [vmem:[#allocation7 + $0xb38] sm:$0xff]  ;;  %v10865_v24 = vcombine.low %v2397_v6, %v2401_v7 }
 0x3e6   :  { %v10876_v34 = vcombine.high %v2406_v20, %v2410_v25  ;;  %v10875_v41 = vcombine.low %v2406_v20, %v2410_v25  ;;  %v2453_v20 = vld [vmem:[#allocation7 + $0xc90] sm:$0xff] }
 0x3e7   :  { %8988 = vmatpush1.bf16.msra.mxu0 %v10825_v32  ;;  %v2417_v32 = vld [vmem:[#allocation7 + $0xb70] sm:$0xff] }
 0x3e8   :  { %9316 = vmatpush1.bf16.msra.mxu1 %v10827_v40  ;;  %8989 = vmatprep.subr.bf16.mxu0 %v10834_v36  ;;  %v2414_v40 = vld [vmem:[#allocation7 + $0xb58] sm:$0xff]  ;;  %v10882_v43 = vcombine.high %v2413_v57, %v2417_v32  ;;  %v2457_v25 = vld [vmem:[#allocation7 + $0xcb0] sm:$0xff] }
 0x3e9   :  { %9317 = vmatprep.subr.bf16.mxu1 %v10836_v39  ;;  %v2418_v36 = vld [vmem:[#allocation7 + $0xb78] sm:$0xff]  ;;  %v10873_v39 = vcombine.low %v2405_v17, %v2409_v19 }
 0x3ea   :  { %v10884_v45 = vcombine.high %v2414_v40, %v2418_v36  ;;  %v10883_v47 = vcombine.low %v2414_v40, %v2418_v36  ;;  %v2461_v36 = vld [vmem:[#allocation7 + $0xcd0] sm:$0xff] }
 0x3eb   :  { %8990 = vmatpush1.bf16.msra.mxu0 %v10833_v3  ;;  %v2425_v3 = vld [vmem:[#allocation7 + $0xbb0] sm:$0xff] }
 0x3ec   :  { %9318 = vmatpush1.bf16.msra.mxu1 %v10835_v30  ;;  %8991 = vmatprep.subr.bf16.mxu0 %v10842_v48  ;;  %v2422_v30 = vld [vmem:[#allocation7 + $0xb98] sm:$0xff]  ;;  %v10890_v51 = vcombine.high %v2421_v26, %v2425_v3 }
 0x3ed   :  { %9319 = vmatprep.subr.bf16.mxu1 %v10844_v49  ;;  %v2426_v48 = vld [vmem:[#allocation7 + $0xbb8] sm:$0xff]  ;;  %v10881_v49 = vcombine.low %v2413_v57, %v2417_v32  ;;  %v10922_v32 = vcombine.high %v2453_v20, %v2457_v25 }
 0x3ee   :  { %v10892_v33 = vcombine.high %v2422_v30, %v2426_v48  ;;  %v10891_v18 = vcombine.low %v2422_v30, %v2426_v48  ;;  %v2469_v30 = vld [vmem:[#allocation7 + $0xd10] sm:$0xff] }
 0x3ef   :  { %8992 = vmatpush1.bf16.msra.mxu0 %v10841_v52  ;;  %v2433_v52 = vld [vmem:[#allocation7 + $0xbf0] sm:$0xff] }
 0x3f0   :  { %9320 = vmatpush1.bf16.msra.mxu1 %v10843_v55  ;;  %8993 = vmatprep.subr.bf16.mxu0 %v10850_v56  ;;  %v2430_v55 = vld [vmem:[#allocation7 + $0xbd8] sm:$0xff]  ;;  %v10898_v37 = vcombine.high %v2429_v8, %v2433_v52  ;;  %v2473_v48 = vld [vmem:[#allocation7 + $0xd30] sm:$0xff] }
 0x3f1   :  { %9321 = vmatprep.subr.bf16.mxu1 %v10852_v23  ;;  %v2434_v56 = vld [vmem:[#allocation7 + $0xbf8] sm:$0xff]  ;;  %v10889_v23 = vcombine.low %v2421_v26, %v2425_v3 }
 0x3f2   :  { %v10900_v0 = vcombine.high %v2430_v55, %v2434_v56  ;;  %v10899_v6 = vcombine.low %v2430_v55, %v2434_v56  ;;  %v2481_v55 = vld [vmem:[#allocation7 + $0xd70] sm:$0xff]  ;;  %v2478_v56 = vld [vmem:[#allocation7 + $0xd58] sm:$0xff] }
 0x3f3   :  { %8994 = vmatpush1.bf16.msra.mxu0 %v10849_v58  ;;  %v2441_v58 = vld [vmem:[#allocation7 + $0xc30] sm:$0xff] }
 0x3f4   :  { %9322 = vmatpush1.bf16.msra.mxu1 %v10851_v1  ;;  %8995 = vmatprep.subr.bf16.mxu0 %v10858_v31  ;;  %v2438_v1 = vld [vmem:[#allocation7 + $0xc18] sm:$0xff]  ;;  %v10906_v7 = vcombine.high %v2437_v12, %v2441_v58 }
 0x3f5   :  { %9323 = vmatprep.subr.bf16.mxu1 %v10860_v61  ;;  %v2442_v31 = vld [vmem:[#allocation7 + $0xc38] sm:$0xff]  ;;  %v10897_v61 = vcombine.low %v2429_v8, %v2433_v52  ;;  %v2477_v52 = vld [vmem:[#allocation7 + $0xd50] sm:$0xff] }
 0x3f6   :  { %v10908_v42 = vcombine.high %v2438_v1, %v2442_v31  ;;  %v10907_v17 = vcombine.low %v2438_v1, %v2442_v31  ;;  %v2489_v1 = vld [vmem:[#allocation7 + $0xdb0] sm:$0xff]  ;;  %v2486_v31 = vld [vmem:[#allocation7 + $0xd98] sm:$0xff] }
 0x3f7   :  { %8996 = vmatpush1.bf16.msra.mxu0 %v10857_v13  ;;  %v2449_v13 = vld [vmem:[#allocation7 + $0xc70] sm:$0xff] }
 0x3f8   :  { %9324 = vmatpush1.bf16.msra.mxu1 %v10859_v35  ;;  %8997 = vmatprep.subr.bf16.mxu0 %v10866_v14  ;;  %v10905_v35 = vcombine.low %v2437_v12, %v2441_v58  ;;  %v2446_v14 = vld [vmem:[#allocation7 + $0xc58] sm:$0xff]  ;;  %v10914_v19 = vcombine.high %v2445_v10, %v2449_v13  ;;  %v2485_v58 = vld [vmem:[#allocation7 + $0xd90] sm:$0xff] }
 0x3f9   :  { %9325 = vmatprep.subr.bf16.mxu1 %v10868_v16  ;;  %v2450_v16 = vld [vmem:[#allocation7 + $0xc78] sm:$0xff] }
 0x3fa   :  { %v10915_v57 = vcombine.low %v2446_v14, %v2450_v16 }
 0x3fb   :  { %8998 = vmatpush1.bf16.msra.mxu0 %v10865_v24  ;;  %v10916_v24 = vcombine.high %v2446_v14, %v2450_v16  ;;  %v2497_v14 = vld [vmem:[#allocation7 + $0xdf0] sm:$0xff] }
 0x3fc   :  { %9326 = vmatpush1.bf16.msra.mxu1 %v10867_v44  ;;  %8999 = vmatprep.subr.bf16.mxu0 %v10874_v27  ;;  %v2454_v44 = vld [vmem:[#allocation7 + $0xc98] sm:$0xff] }
 0x3fd   :  { %9327 = vmatprep.subr.bf16.mxu1 %v10876_v34  ;;  %v2458_v27 = vld [vmem:[#allocation7 + $0xcb8] sm:$0xff]  ;;  %v10913_v34 = vcombine.low %v2445_v10, %v2449_v13 }
 0x3fe   :  { %v10924_v40 = vcombine.high %v2454_v44, %v2458_v27 }
 0x3ff   :  { %9000 = vmatpush1.bf16.msra.mxu0 %v10873_v39  ;;  %v2465_v39 = vld [vmem:[#allocation7 + $0xcf0] sm:$0xff] }
 0x400   :  { %9328 = vmatpush1.bf16.msra.mxu1 %v10875_v41  ;;  %9001 = vmatprep.subr.bf16.mxu0 %v10882_v43  ;;  %v2462_v41 = vld [vmem:[#allocation7 + $0xcd8] sm:$0xff]  ;;  %v10930_v26 = vcombine.high %v2461_v36, %v2465_v39 }
 0x401   :  { %9329 = vmatprep.subr.bf16.mxu1 %v10884_v45  ;;  %v2466_v43 = vld [vmem:[#allocation7 + $0xcf8] sm:$0xff]  ;;  %v10921_v45 = vcombine.low %v2453_v20, %v2457_v25 }
 0x402   :  { %v10932_v3 = vcombine.high %v2462_v41, %v2466_v43  ;;  %v2498_v20 = vld [vmem:[#allocation7 + $0xdf8] sm:$0xff] }
 0x403   :  { %9002 = vmatpush1.bf16.msra.mxu0 %v10881_v49  ;;  %v2470_v49 = vld [vmem:[#allocation7 + $0xd18] sm:$0xff] }
 0x404   :  { %9330 = vmatpush1.bf16.msra.mxu1 %v10883_v47  ;;  %9003 = vmatprep.subr.bf16.mxu0 %v10890_v51  ;;  %v2474_v47 = vld [vmem:[#allocation7 + $0xd38] sm:$0xff]  ;;  %v10931_v51 = vcombine.low %v2462_v41, %v2466_v43  ;;  %v2505_v41 = vld [vmem:[#allocation7 + $0xe30] sm:$0xff] }
 0x405   :  { %9331 = vmatprep.subr.bf16.mxu1 %v10892_v33  ;;  %v10938_v33 = vcombine.high %v2469_v30, %v2473_v48  ;;  %v10940_v8 = vcombine.high %v2470_v49, %v2474_v47  ;;  %v2502_v43 = vld [vmem:[#allocation7 + $0xe18] sm:$0xff] }
 0x407   :  { %9004 = vmatpush1.bf16.msra.mxu0 %v10889_v23  ;;  %v2482_v23 = vld [vmem:[#allocation7 + $0xd78] sm:$0xff] }
 0x408   :  { %9332 = vmatpush1.bf16.msra.mxu1 %v10891_v18  ;;  %9005 = vmatprep.subr.bf16.mxu0 %v10898_v37  ;;  %v10937_v18 = vcombine.low %v2469_v30, %v2473_v48  ;;  %v10939_v37 = vcombine.low %v2470_v49, %v2474_v47  ;;  %v10948_v12 = vcombine.high %v2478_v56, %v2482_v23  ;;  %v2509_v48 = vld [vmem:[#allocation7 + $0xe50] sm:$0xff]  ;;  %v2510_v47 = vld [vmem:[#allocation7 + $0xe58] sm:$0xff] }
 0x409   :  { %9333 = vmatprep.subr.bf16.mxu1 %v10900_v0  ;;  %v10946_v0 = vcombine.high %v2477_v52, %v2481_v55  ;;  %v2513_v49 = vld [vmem:[#allocation7 + $0xe70] sm:$0xff] }
 0x40b   :  { %9006 = vmatpush1.bf16.msra.mxu0 %v10897_v61  ;;  %v2490_v61 = vld [vmem:[#allocation7 + $0xdb8] sm:$0xff] }
 0x40c   :  { %9334 = vmatpush1.bf16.msra.mxu1 %v10899_v6  ;;  %9016 = vmatprep.subr.bf16.mxu0 %v10906_v7  ;;  %v10945_v6 = vcombine.low %v2477_v52, %v2481_v55  ;;  %v10947_v7 = vcombine.low %v2478_v56, %v2482_v23  ;;  %v10956_v13 = vcombine.high %v2486_v31, %v2490_v61  ;;  %v2517_v55 = vld [vmem:[#allocation7 + $0xe90] sm:$0xff]  ;;  %v2518_v23 = vld [vmem:[#allocation7 + $0xe98] sm:$0xff] }
 0x40d   :  { %9344 = vmatprep.subr.bf16.mxu1 %v10908_v42  ;;  %v10954_v42 = vcombine.high %v2485_v58, %v2489_v1  ;;  %v2521_v56 = vld [vmem:[#allocation7 + $0xeb0] sm:$0xff] }
 0x40e   :  { %9008 = vmatmul.mubr.bf16.vlgmr.msra.gmra.mrb[20].mxu0 %v12235_v11 }
 0x40f   :  { %9336 = vmatmul.mubr.bf16.vlgmr.msra.gmra.mrb[20].mxu1 %v12235_v11  ;;  %9017 = vmatpush1.bf16.msra.mxu0 %v10905_v35  ;;  %v10923_v11 = vcombine.low %v2454_v44, %v2458_v27  ;;  %v2493_v35 = vld [vmem:[#allocation7 + $0xdd0] sm:$0xff]  ;;  %v10953_v44 = vcombine.low %v2485_v58, %v2489_v1 }
 0x410   :  { %9048 = vmatprep.mubr.bf16.mxu0 %v12237_v38  ;;  %9345 = vmatpush1.bf16.msra.mxu1 %v10907_v17  ;;  %v2525_v1 = vld [vmem:[#allocation7 + $0xed0] sm:$0xff] }
 0x411   :  { %9376 = vmatprep.mubr.bf16.mxu1 %v12237_v38  ;;  %9018 = vmatprep.subr.bf16.mxu0 %v10914_v19  ;;  %v10929_v38 = vcombine.low %v2461_v36, %v2465_v39  ;;  %v2494_v19 = vld [vmem:[#allocation7 + $0xdd8] sm:$0xff]  ;;  %v2501_v39 = vld [vmem:[#allocation7 + $0xe10] sm:$0xff] }
 0x412   :  { %9346 = vmatprep.subr.bf16.mxu1 %v10916_v24  ;;  %v10964_v36 = vcombine.high %v2494_v19, %v2498_v20 }
 0x413   :  { %9019 = vmatpush1.bf16.msra.mxu0 %v10913_v34 }
 0x414   :  { %9347 = vmatpush1.bf16.msra.mxu1 %v10915_v57  ;;  %9020 = vmatprep.subr.bf16.mxu0 %v10922_v32  ;;  %v10955_v57 = vcombine.low %v2486_v31, %v2490_v61  ;;  %v10962_v32 = vcombine.high %v2493_v35, %v2497_v14  ;;  %v2529_v31 = vld [vmem:[#allocation7 + $0xef0] sm:$0xff]  ;;  %v2526_v61 = vld [vmem:[#allocation7 + $0xed8] sm:$0xff] }
 0x415   :  { %9348 = vmatprep.subr.bf16.mxu1 %v10924_v40 }
 0x417   :  { %9021 = vmatpush1.bf16.msra.mxu0 %v10921_v45  ;;  %v2506_v45 = vld [vmem:[#allocation7 + $0xe38] sm:$0xff] }
 0x418   :  { %9349 = vmatpush1.bf16.msra.mxu1 %v10923_v11  ;;  %9022 = vmatprep.subr.bf16.mxu0 %v10930_v26  ;;  %v10961_v11 = vcombine.low %v2493_v35, %v2497_v14  ;;  %v10963_v26 = vcombine.low %v2494_v19, %v2498_v20  ;;  %v10972_v30 = vcombine.high %v2502_v43, %v2506_v45  ;;  %v2533_v14 = vld [vmem:[#allocation7 + $0xf10] sm:$0xff]  ;;  %v2534_v20 = vld [vmem:[#allocation7 + $0xf18] sm:$0xff] }
 0x419   :  { %9350 = vmatprep.subr.bf16.mxu1 %v10932_v3  ;;  %v10970_v3 = vcombine.high %v2501_v39, %v2505_v41  ;;  %v2537_v19 = vld [vmem:[#allocation7 + $0xf30] sm:$0xff] }
 0x41b   :  { %9023 = vmatpush1.bf16.msra.mxu0 %v10929_v38  ;;  %v2514_v38 = vld [vmem:[#allocation7 + $0xe78] sm:$0xff] }
 0x41c   :  { %9351 = vmatpush1.bf16.msra.mxu1 %v10931_v51  ;;  %9024 = vmatprep.subr.bf16.mxu0 %v10938_v33  ;;  %v10969_v51 = vcombine.low %v2501_v39, %v2505_v41  ;;  %v10971_v33 = vcombine.low %v2502_v43, %v2506_v45  ;;  %v10980_v52 = vcombine.high %v2510_v47, %v2514_v38  ;;  %v2546_v39 = vld [vmem:[#allocation7 + $0xf78] sm:$0xff] }
 0x41d   :  { %9352 = vmatprep.subr.bf16.mxu1 %v10940_v8  ;;  %v10978_v8 = vcombine.high %v2509_v48, %v2513_v49  ;;  %v11001_v41 = vcombine.low %v2533_v14, %v2537_v19 }
 0x41f   :  { %9025 = vmatpush1.bf16.msra.mxu0 %v10937_v18  ;;  %v2522_v18 = vld [vmem:[#allocation7 + $0xeb8] sm:$0xff] }
 0x420   :  { %9353 = vmatpush1.bf16.msra.mxu1 %v10939_v37  ;;  %9026 = vmatprep.subr.bf16.mxu0 %v10946_v0  ;;  %v10977_v37 = vcombine.low %v2509_v48, %v2513_v49  ;;  %v10979_v0 = vcombine.low %v2510_v47, %v2514_v38  ;;  %v10988_v58 = vcombine.high %v2518_v23, %v2522_v18  ;;  %v2554_v48 = vld [vmem:[#allocation7 + $0xfb8] sm:$0xff] }
 0x421   :  { %v12335_v10 = vpop.f32.mrb[16].mxu0  ;;  %9354 = vmatprep.subr.bf16.mxu1 %v10948_v12  ;;  %v10986_v12 = vcombine.high %v2517_v55, %v2521_v56 }
 0x422   :  { %v12337_v16 = vpop.f32.mrb[16].mxu1  ;;  %v12339_v17 = vpop.f32.mrb[17].mxu0 }
 0x423   :  { %v12341_v25 = vpop.f32.mrb[17].mxu1  ;;  %v8562_v24 = vpop.f32.mrb[18].mxu0  ;;  %9027 = vmatpush1.bf16.msra.mxu0 %v10945_v6  ;;  %v2530_v6 = vld [vmem:[#allocation7 + $0xef8] sm:$0xff] }
 0x424   :  { %v8890_v27 = vpop.f32.mrb[18].mxu1  ;;  %9355 = vmatpush1.bf16.msra.mxu1 %v10947_v7  ;;  %v8563_v34 = vpop.f32.mrb[19].mxu0  ;;  %9028 = vmatprep.subr.bf16.mxu0 %v10954_v42  ;;  %v10985_v7 = vcombine.low %v2517_v55, %v2521_v56  ;;  %v10987_v42 = vcombine.low %v2518_v23, %v2522_v18  ;;  %v10996_v35 = vcombine.high %v2526_v61, %v2530_v6  ;;  %v2538_v24 = vld [vmem:[#allocation7 + $0xf38] sm:$0xff] }
 0x425   :  { %v8891_v40 = vpop.f32.mrb[19].mxu1  ;;  %9356 = vmatprep.subr.bf16.mxu1 %v10956_v13  ;;  %v10994_v13 = vcombine.high %v2525_v1, %v2529_v31  ;;  %v10995_v27 = vcombine.low %v2526_v61, %v2530_v6  ;;  %v11002_v34 = vcombine.high %v2533_v14, %v2537_v19  ;;  %v11003_v43 = vcombine.low %v2534_v20, %v2538_v24  ;;  %v2562_v55 = vld [vmem:[#allocation7 + $0xff8] sm:$0xff] }
 0x426   :  { %v2545_v40 = vld [vmem:[#allocation7 + $0xf70] sm:$0xff]  ;;  %v2574_v14 = vld [vmem:[#allocation7 + $0x1058] sm:$0xff] }
 0x427   :  { %9029 = vmatpush1.bf16.msra.mxu0 %v10953_v44  ;;  %v10993_v44 = vcombine.low %v2525_v1, %v2529_v31  ;;  %v2570_v1 = vld [vmem:[#allocation7 + $0x1038] sm:$0xff] }
 0x428   :  { %9357 = vmatpush1.bf16.msra.mxu1 %v10955_v57  ;;  %9030 = vmatprep.subr.bf16.mxu0 %v10962_v32  ;;  %v11004_v57 = vcombine.high %v2534_v20, %v2538_v24  ;;  %v2541_v32 = vld [vmem:[#allocation7 + $0xf50] sm:$0xff]  ;;  %v2578_v19 = vld [vmem:[#allocation7 + $0x1078] sm:$0xff] }
 0x429   :  { %9358 = vmatprep.subr.bf16.mxu1 %v10964_v36  ;;  %v2542_v36 = vld [vmem:[#allocation7 + $0xf58] sm:$0xff]  ;;  %v11010_v45 = vcombine.high %v2541_v32, %v2545_v40  ;;  %v11009_v49 = vcombine.low %v2541_v32, %v2545_v40 }
 0x42a   :  { %v11011_v47 = vcombine.low %v2542_v36, %v2546_v39  ;;  %v2586_v32 = vld [vmem:[#allocation7 + $0x10b8] sm:$0xff] }
 0x42b   :  { %9031 = vmatpush1.bf16.msra.mxu0 %v10961_v11  ;;  %v11012_v11 = vcombine.high %v2542_v36, %v2546_v39  ;;  %v11043_v36 = vcombine.low %v2574_v14, %v2578_v19 }
 0x42c   :  { %9359 = vmatpush1.bf16.msra.mxu1 %v10963_v26  ;;  %9032 = vmatprep.subr.bf16.mxu0 %v10970_v3  ;;  %v2549_v26 = vld [vmem:[#allocation7 + $0xf90] sm:$0xff] }
 0x42d   :  { %9360 = vmatprep.subr.bf16.mxu1 %v10972_v30  ;;  %v2553_v3 = vld [vmem:[#allocation7 + $0xfb0] sm:$0xff]  ;;  %v2550_v30 = vld [vmem:[#allocation7 + $0xf98] sm:$0xff] }
 0x42e   :  { %v11018_v38 = vcombine.high %v2549_v26, %v2553_v3  ;;  %v11017_v56 = vcombine.low %v2549_v26, %v2553_v3  ;;  %v11019_v23 = vcombine.low %v2550_v30, %v2554_v48  ;;  %v2594_v26 = vld [vmem:[#allocation7 + $0x10f8] sm:$0xff] }
 0x42f   :  { %9033 = vmatpush1.bf16.msra.mxu0 %v10969_v51  ;;  %v11020_v51 = vcombine.high %v2550_v30, %v2554_v48 }
 0x430   :  { %9361 = vmatpush1.bf16.msra.mxu1 %v10971_v33  ;;  %9034 = vmatprep.subr.bf16.mxu0 %v10978_v8  ;;  %v2557_v33 = vld [vmem:[#allocation7 + $0xfd0] sm:$0xff] }
 0x431   :  { %9362 = vmatprep.subr.bf16.mxu1 %v10980_v52  ;;  %v2561_v8 = vld [vmem:[#allocation7 + $0xff0] sm:$0xff]  ;;  %v2558_v52 = vld [vmem:[#allocation7 + $0xfd8] sm:$0xff] }
 0x432   :  { %v11026_v18 = vcombine.high %v2557_v33, %v2561_v8  ;;  %v11025_v31 = vcombine.low %v2557_v33, %v2561_v8  ;;  %v11027_v61 = vcombine.low %v2558_v52, %v2562_v55 }
 0x433   :  { %9035 = vmatpush1.bf16.msra.mxu0 %v10977_v37  ;;  %v11028_v37 = vcombine.high %v2558_v52, %v2562_v55  ;;  %v2605_v55 = vld [vmem:[#allocation7 + $0x1150] sm:$0xff] }
 0x434   :  { %9363 = vmatpush1.bf16.msra.mxu1 %v10979_v0  ;;  %9036 = vmatprep.subr.bf16.mxu0 %v10986_v12  ;;  %v2565_v0 = vld [vmem:[#allocation7 + $0x1010] sm:$0xff] }
 0x435   :  { %9364 = vmatprep.subr.bf16.mxu1 %v10988_v58  ;;  %v2569_v12 = vld [vmem:[#allocation7 + $0x1030] sm:$0xff]  ;;  %v2566_v58 = vld [vmem:[#allocation7 + $0x1018] sm:$0xff] }
 0x436   :  { %v11034_v6 = vcombine.high %v2565_v0, %v2569_v12  ;;  %v11035_v20 = vcombine.low %v2566_v58, %v2570_v1 }
 0x437   :  { %9037 = vmatpush1.bf16.msra.mxu0 %v10985_v7  ;;  %v11036_v7 = vcombine.high %v2566_v58, %v2570_v1  ;;  %v2613_v1 = vld [vmem:[#allocation7 + $0x1190] sm:$0xff] }
 0x438   :  { %9365 = vmatpush1.bf16.msra.mxu1 %v10987_v42  ;;  %9038 = vmatprep.subr.bf16.mxu0 %v10994_v13  ;;  %v2573_v42 = vld [vmem:[#allocation7 + $0x1050] sm:$0xff] }
 0x439   :  { %9366 = vmatprep.subr.bf16.mxu1 %v10996_v35  ;;  %v2577_v13 = vld [vmem:[#allocation7 + $0x1070] sm:$0xff]  ;;  %v11033_v35 = vcombine.low %v2565_v0, %v2569_v12 }
 0x43a   :  { %v11042_v24 = vcombine.high %v2573_v42, %v2577_v13  ;;  %v11041_v40 = vcombine.low %v2573_v42, %v2577_v13 }
 0x43b   :  { %9039 = vmatpush1.bf16.msra.mxu0 %v10993_v44  ;;  %v2581_v44 = vld [vmem:[#allocation7 + $0x1090] sm:$0xff] }
 0x43c   :  { %9367 = vmatpush1.bf16.msra.mxu1 %v10995_v27  ;;  %9040 = vmatprep.subr.bf16.mxu0 %v11002_v34  ;;  %v2585_v27 = vld [vmem:[#allocation7 + $0x10b0] sm:$0xff]  ;;  %v11044_v34 = vcombine.high %v2574_v14, %v2578_v19 }
 0x43d   :  { %9368 = vmatprep.subr.bf16.mxu1 %v11004_v57  ;;  %v2582_v57 = vld [vmem:[#allocation7 + $0x1098] sm:$0xff]  ;;  %v11050_v39 = vcombine.high %v2581_v44, %v2585_v27  ;;  %v11049_v3 = vcombine.low %v2581_v44, %v2585_v27  ;;  %v2621_v14 = vld [vmem:[#allocation7 + $0x11d0] sm:$0xff] }
 0x43e   :  { %v2625_v19 = vld [vmem:[#allocation7 + $0x11f0] sm:$0xff] }
 0x43f   :  { %9041 = vmatpush1.bf16.msra.mxu0 %v11001_v41  ;;  %v11052_v41 = vcombine.high %v2582_v57, %v2586_v32 }
 0x440   :  { %9369 = vmatpush1.bf16.msra.mxu1 %v11003_v43  ;;  %9042 = vmatprep.subr.bf16.mxu0 %v11010_v45  ;;  %v2589_v43 = vld [vmem:[#allocation7 + $0x10d0] sm:$0xff] }
 0x441   :  { %9370 = vmatprep.subr.bf16.mxu1 %v11012_v11  ;;  %v2593_v45 = vld [vmem:[#allocation7 + $0x10f0] sm:$0xff]  ;;  %v2590_v11 = vld [vmem:[#allocation7 + $0x10d8] sm:$0xff] }
 0x442   :  { %v11058_v30 = vcombine.high %v2589_v43, %v2593_v45  ;;  %v11060_v48 = vcombine.high %v2590_v11, %v2594_v26  ;;  %v11059_v33 = vcombine.low %v2590_v11, %v2594_v26  ;;  %v2637_v26 = vld [vmem:[#allocation7 + $0x1250] sm:$0xff] }
 0x443   :  { %9043 = vmatpush1.bf16.msra.mxu0 %v11009_v49  ;;  %v2597_v49 = vld [vmem:[#allocation7 + $0x1110] sm:$0xff] }
 0x444   :  { %9371 = vmatpush1.bf16.msra.mxu1 %v11011_v47  ;;  %9044 = vmatprep.subr.bf16.mxu0 %v11018_v38  ;;  %v2601_v47 = vld [vmem:[#allocation7 + $0x1130] sm:$0xff]  ;;  %v2598_v38 = vld [vmem:[#allocation7 + $0x1118] sm:$0xff] }
 0x445   :  { %9372 = vmatprep.subr.bf16.mxu1 %v11020_v51  ;;  %v2602_v51 = vld [vmem:[#allocation7 + $0x1138] sm:$0xff]  ;;  %v11066_v8 = vcombine.high %v2597_v49, %v2601_v47 }
 0x446   :  { %v11068_v52 = vcombine.high %v2598_v38, %v2602_v51  ;;  %v11067_v0 = vcombine.low %v2598_v38, %v2602_v51  ;;  %v2645_v51 = vld [vmem:[#allocation7 + $0x1290] sm:$0xff] }
 0x447   :  { %9045 = vmatpush1.bf16.msra.mxu0 %v11017_v56  ;;  %v2609_v56 = vld [vmem:[#allocation7 + $0x1170] sm:$0xff] }
 0x448   :  { %9373 = vmatpush1.bf16.msra.mxu1 %v11019_v23  ;;  %9046 = vmatprep.subr.bf16.mxu0 %v11026_v18  ;;  %v2606_v23 = vld [vmem:[#allocation7 + $0x1158] sm:$0xff]  ;;  %v11074_v12 = vcombine.high %v2605_v55, %v2609_v56 }
 0x449   :  { %9374 = vmatprep.subr.bf16.mxu1 %v11028_v37  ;;  %v2610_v18 = vld [vmem:[#allocation7 + $0x1178] sm:$0xff]  ;;  %v11065_v37 = vcombine.low %v2597_v49, %v2601_v47 }
 0x44a   :  { %v11076_v58 = vcombine.high %v2606_v23, %v2610_v18  ;;  %v11075_v42 = vcombine.low %v2606_v23, %v2610_v18  ;;  %v2653_v18 = vld [vmem:[#allocation7 + $0x12d0] sm:$0xff] }
 0x44b   :  { %9047 = vmatpush1.bf16.msra.mxu0 %v11025_v31  ;;  %v2617_v31 = vld [vmem:[#allocation7 + $0x11b0] sm:$0xff] }
 0x44c   :  { %9375 = vmatpush1.bf16.msra.mxu1 %v11027_v61  ;;  %9057 = vmatprep.subr.bf16.mxu0 %v11034_v6  ;;  %v2614_v61 = vld [vmem:[#allocation7 + $0x1198] sm:$0xff]  ;;  %v11082_v13 = vcombine.high %v2613_v1, %v2617_v31  ;;  %v11081_v44 = vcombine.low %v2613_v1, %v2617_v31 }
 0x44d   :  { %9385 = vmatprep.subr.bf16.mxu1 %v11036_v7  ;;  %v2618_v6 = vld [vmem:[#allocation7 + $0x11b8] sm:$0xff]  ;;  %v11073_v7 = vcombine.low %v2605_v55, %v2609_v56 }
 0x44e   :  { %9049 = vmatmul.mubr.bf16.vlgmr.msra.gmra.mrb[20].mxu0 %v12262_v60  ;;  %v11083_v27 = vcombine.low %v2614_v61, %v2618_v6 }
 0x44f   :  { %9377 = vmatmul.mubr.bf16.vlgmr.msra.gmra.mrb[20].mxu1 %v12262_v60  ;;  %9058 = vmatpush1.bf16.msra.mxu0 %v11033_v35  ;;  %v11051_v60 = vcombine.low %v2582_v57, %v2586_v32  ;;  %v11084_v35 = vcombine.high %v2614_v61, %v2618_v6  ;;  %v2629_v32 = vld [vmem:[#allocation7 + $0x1210] sm:$0xff] }
 0x450   :  { %9089 = vmatprep.mubr.bf16.mxu0 %v12264_v5  ;;  %9386 = vmatpush1.bf16.msra.mxu1 %v11035_v20  ;;  %v2622_v20 = vld [vmem:[#allocation7 + $0x11d8] sm:$0xff]  ;;  %v2661_v6 = vld [vmem:[#allocation7 + $0x1310] sm:$0xff] }
 0x451   :  { %9417 = vmatprep.mubr.bf16.mxu1 %v12264_v5  ;;  %9059 = vmatprep.subr.bf16.mxu0 %v11042_v24  ;;  %v11057_v5 = vcombine.low %v2589_v43, %v2593_v45  ;;  %v2626_v24 = vld [vmem:[#allocation7 + $0x11f8] sm:$0xff] }
 0x452   :  { %9387 = vmatprep.subr.bf16.mxu1 %v11044_v34  ;;  %v11090_v34 = vcombine.high %v2621_v14, %v2625_v19  ;;  %v11092_v57 = vcombine.high %v2622_v20, %v2626_v24  ;;  %v11091_v43 = vcombine.low %v2622_v20, %v2626_v24  ;;  %v2669_v24 = vld [vmem:[#allocation7 + $0x1350] sm:$0xff] }
 0x453   :  { %9060 = vmatpush1.bf16.msra.mxu0 %v11041_v40  ;;  %v2633_v40 = vld [vmem:[#allocation7 + $0x1230] sm:$0xff] }
 0x454   :  { %9388 = vmatpush1.bf16.msra.mxu1 %v11043_v36  ;;  %9061 = vmatprep.subr.bf16.mxu0 %v11050_v39  ;;  %v2630_v36 = vld [vmem:[#allocation7 + $0x1218] sm:$0xff]  ;;  %v11098_v45 = vcombine.high %v2629_v32, %v2633_v40 }
 0x455   :  { %9389 = vmatprep.subr.bf16.mxu1 %v11052_v41  ;;  %v2634_v39 = vld [vmem:[#allocation7 + $0x1238] sm:$0xff]  ;;  %v11089_v41 = vcombine.low %v2621_v14, %v2625_v19 }
 0x456   :  { %v11100_v11 = vcombine.high %v2630_v36, %v2634_v39  ;;  %v11099_v49 = vcombine.low %v2630_v36, %v2634_v39  ;;  %v2677_v39 = vld [vmem:[#allocation7 + $0x1390] sm:$0xff] }
 0x457   :  { %9062 = vmatpush1.bf16.msra.mxu0 %v11049_v3  ;;  %v2641_v3 = vld [vmem:[#allocation7 + $0x1270] sm:$0xff] }
 0x458   :  { %9390 = vmatpush1.bf16.msra.mxu1 %v11051_v60  ;;  %9063 = vmatprep.subr.bf16.mxu0 %v11058_v30  ;;  %v2638_v60 = vld [vmem:[#allocation7 + $0x1258] sm:$0xff]  ;;  %v11106_v47 = vcombine.high %v2637_v26, %v2641_v3 }
 0x459   :  { %9391 = vmatprep.subr.bf16.mxu1 %v11060_v48  ;;  %v2642_v30 = vld [vmem:[#allocation7 + $0x1278] sm:$0xff]  ;;  %v11097_v48 = vcombine.low %v2629_v32, %v2633_v40 }
 0x45a   :  { %v11108_v38 = vcombine.high %v2638_v60, %v2642_v30  ;;  %v11107_v55 = vcombine.low %v2638_v60, %v2642_v30  ;;  %v2685_v30 = vld [vmem:[#allocation7 + $0x13d0] sm:$0xff] }
 0x45b   :  { %9064 = vmatpush1.bf16.msra.mxu0 %v11057_v5  ;;  %v2649_v5 = vld [vmem:[#allocation7 + $0x12b0] sm:$0xff] }
 0x45c   :  { %9392 = vmatpush1.bf16.msra.mxu1 %v11059_v33  ;;  %9065 = vmatprep.subr.bf16.mxu0 %v11066_v8  ;;  %v2646_v33 = vld [vmem:[#allocation7 + $0x1298] sm:$0xff]  ;;  %v11114_v56 = vcombine.high %v2645_v51, %v2649_v5 }
 0x45d   :  { %9393 = vmatprep.subr.bf16.mxu1 %v11068_v52  ;;  %v2650_v8 = vld [vmem:[#allocation7 + $0x12b8] sm:$0xff]  ;;  %v11105_v52 = vcombine.low %v2637_v26, %v2641_v3 }
 0x45e   :  { %v11116_v23 = vcombine.high %v2646_v33, %v2650_v8  ;;  %v11115_v1 = vcombine.low %v2646_v33, %v2650_v8  ;;  %v2693_v8 = vld [vmem:[#allocation7 + $0x1410] sm:$0xff] }
 0x45f   :  { %9066 = vmatpush1.bf16.msra.mxu0 %v11065_v37  ;;  %v2657_v37 = vld [vmem:[#allocation7 + $0x12f0] sm:$0xff] }
 0x460   :  { %9394 = vmatpush1.bf16.msra.mxu1 %v11067_v0  ;;  %9067 = vmatprep.subr.bf16.mxu0 %v11074_v12  ;;  %v2654_v0 = vld [vmem:[#allocation7 + $0x12d8] sm:$0xff]  ;;  %v11122_v31 = vcombine.high %v2653_v18, %v2657_v37 }
 0x461   :  { %9395 = vmatprep.subr.bf16.mxu1 %v11076_v58  ;;  %v2658_v12 = vld [vmem:[#allocation7 + $0x12f8] sm:$0xff]  ;;  %v11113_v58 = vcombine.low %v2645_v51, %v2649_v5 }
 0x462   :  { %v11124_v61 = vcombine.high %v2654_v0, %v2658_v12  ;;  %v11123_v14 = vcombine.low %v2654_v0, %v2658_v12  ;;  %v2701_v12 = vld [vmem:[#allocation7 + $0x1450] sm:$0xff] }
 0x463   :  { %9068 = vmatpush1.bf16.msra.mxu0 %v11073_v7  ;;  %v2665_v7 = vld [vmem:[#allocation7 + $0x1330] sm:$0xff] }
 0x464   :  { %9396 = vmatpush1.bf16.msra.mxu1 %v11075_v42  ;;  %9069 = vmatprep.subr.bf16.mxu0 %v11082_v13  ;;  %v2662_v42 = vld [vmem:[#allocation7 + $0x1318] sm:$0xff]  ;;  %v11130_v19 = vcombine.high %v2661_v6, %v2665_v7 }
 0x465   :  { %9397 = vmatprep.subr.bf16.mxu1 %v11084_v35  ;;  %v2666_v13 = vld [vmem:[#allocation7 + $0x1338] sm:$0xff]  ;;  %v11121_v35 = vcombine.low %v2653_v18, %v2657_v37 }
 0x466   :  { %v11132_v20 = vcombine.high %v2662_v42, %v2666_v13  ;;  %v11131_v32 = vcombine.low %v2662_v42, %v2666_v13  ;;  %v2709_v42 = vld [vmem:[#allocation7 + $0x1490] sm:$0xff] }
 0x467   :  { %9070 = vmatpush1.bf16.msra.mxu0 %v11081_v44  ;;  %v2673_v44 = vld [vmem:[#allocation7 + $0x1370] sm:$0xff] }
 0x468   :  { %9398 = vmatpush1.bf16.msra.mxu1 %v11083_v27  ;;  %9071 = vmatprep.subr.bf16.mxu0 %v11090_v34  ;;  %v2670_v27 = vld [vmem:[#allocation7 + $0x1358] sm:$0xff]  ;;  %v11138_v40 = vcombine.high %v2669_v24, %v2673_v44  ;;  %v2713_v13 = vld [vmem:[#allocation7 + $0x14b0] sm:$0xff] }
 0x469   :  { %9399 = vmatprep.subr.bf16.mxu1 %v11092_v57  ;;  %v2674_v34 = vld [vmem:[#allocation7 + $0x1378] sm:$0xff]  ;;  %v11129_v57 = vcombine.low %v2661_v6, %v2665_v7 }
 0x46a   :  { %v11140_v36 = vcombine.high %v2670_v27, %v2674_v34  ;;  %v11139_v26 = vcombine.low %v2670_v27, %v2674_v34  ;;  %v2717_v34 = vld [vmem:[#allocation7 + $0x14d0] sm:$0xff] }
 0x46b   :  { %9072 = vmatpush1.bf16.msra.mxu0 %v11089_v41  ;;  %v2681_v41 = vld [vmem:[#allocation7 + $0x13b0] sm:$0xff] }
 0x46c   :  { %9400 = vmatpush1.bf16.msra.mxu1 %v11091_v43  ;;  %9073 = vmatprep.subr.bf16.mxu0 %v11098_v45  ;;  %v2678_v43 = vld [vmem:[#allocation7 + $0x1398] sm:$0xff]  ;;  %v11146_v3 = vcombine.high %v2677_v39, %v2681_v41 }
 0x46d   :  { %9401 = vmatprep.subr.bf16.mxu1 %v11100_v11  ;;  %v2682_v45 = vld [vmem:[#allocation7 + $0x13b8] sm:$0xff]  ;;  %v11137_v11 = vcombine.low %v2669_v24, %v2673_v44  ;;  %v11178_v44 = vcombine.high %v2709_v42, %v2713_v13 }
 0x46e   :  { %v11148_v60 = vcombine.high %v2678_v43, %v2682_v45  ;;  %v11147_v51 = vcombine.low %v2678_v43, %v2682_v45  ;;  %v2725_v43 = vld [vmem:[#allocation7 + $0x1510] sm:$0xff] }
 0x46f   :  { %9074 = vmatpush1.bf16.msra.mxu0 %v11097_v48  ;;  %v2689_v48 = vld [vmem:[#allocation7 + $0x13f0] sm:$0xff] }
 0x470   :  { %9402 = vmatpush1.bf16.msra.mxu1 %v11099_v49  ;;  %9075 = vmatprep.subr.bf16.mxu0 %v11106_v47  ;;  %v2686_v49 = vld [vmem:[#allocation7 + $0x13d8] sm:$0xff]  ;;  %v11154_v5 = vcombine.high %v2685_v30, %v2689_v48  ;;  %v2729_v45 = vld [vmem:[#allocation7 + $0x1530] sm:$0xff] }
 0x471   :  { %9403 = vmatprep.subr.bf16.mxu1 %v11108_v38  ;;  %v2690_v47 = vld [vmem:[#allocation7 + $0x13f8] sm:$0xff]  ;;  %v11145_v38 = vcombine.low %v2677_v39, %v2681_v41 }
 0x472   :  { %v11156_v33 = vcombine.high %v2686_v49, %v2690_v47  ;;  %v11155_v18 = vcombine.low %v2686_v49, %v2690_v47  ;;  %v2737_v49 = vld [vmem:[#allocation7 + $0x1570] sm:$0xff]  ;;  %v2734_v47 = vld [vmem:[#allocation7 + $0x1558] sm:$0xff] }
 0x473   :  { %9076 = vmatpush1.bf16.msra.mxu0 %v11105_v52  ;;  %v2697_v52 = vld [vmem:[#allocation7 + $0x1430] sm:$0xff] }
 0x474   :  { %9404 = vmatpush1.bf16.msra.mxu1 %v11107_v55  ;;  %9077 = vmatprep.subr.bf16.mxu0 %v11114_v56  ;;  %v2694_v55 = vld [vmem:[#allocation7 + $0x1418] sm:$0xff]  ;;  %v11162_v37 = vcombine.high %v2693_v8, %v2697_v52 }
 0x475   :  { %9405 = vmatprep.subr.bf16.mxu1 %v11116_v23  ;;  %v2698_v56 = vld [vmem:[#allocation7 + $0x1438] sm:$0xff]  ;;  %v11153_v23 = vcombine.low %v2685_v30, %v2689_v48  ;;  %v2733_v48 = vld [vmem:[#allocation7 + $0x1550] sm:$0xff] }
 0x476   :  { %v11164_v0 = vcombine.high %v2694_v55, %v2698_v56  ;;  %v11163_v6 = vcombine.low %v2694_v55, %v2698_v56  ;;  %v2745_v55 = vld [vmem:[#allocation7 + $0x15b0] sm:$0xff]  ;;  %v2742_v56 = vld [vmem:[#allocation7 + $0x1598] sm:$0xff] }
 0x477   :  { %9078 = vmatpush1.bf16.msra.mxu0 %v11113_v58  ;;  %v2705_v58 = vld [vmem:[#allocation7 + $0x1470] sm:$0xff] }
 0x478   :  { %9406 = vmatpush1.bf16.msra.mxu1 %v11115_v1  ;;  %9079 = vmatprep.subr.bf16.mxu0 %v11122_v31  ;;  %v11161_v1 = vcombine.low %v2693_v8, %v2697_v52  ;;  %v2702_v31 = vld [vmem:[#allocation7 + $0x1458] sm:$0xff]  ;;  %v11170_v7 = vcombine.high %v2701_v12, %v2705_v58  ;;  %v2741_v52 = vld [vmem:[#allocation7 + $0x1590] sm:$0xff] }
 0x479   :  { %9407 = vmatprep.subr.bf16.mxu1 %v11124_v61  ;;  %v2706_v61 = vld [vmem:[#allocation7 + $0x1478] sm:$0xff] }
 0x47a   :  { %v11171_v24 = vcombine.low %v2702_v31, %v2706_v61 }
 0x47b   :  { %9080 = vmatpush1.bf16.msra.mxu0 %v11121_v35  ;;  %v11172_v35 = vcombine.high %v2702_v31, %v2706_v61  ;;  %v2750_v31 = vld [vmem:[#allocation7 + $0x15d8] sm:$0xff] }
 0x47c   :  { %9408 = vmatpush1.bf16.msra.mxu1 %v11123_v14  ;;  %9081 = vmatprep.subr.bf16.mxu0 %v11130_v19  ;;  %v2710_v14 = vld [vmem:[#allocation7 + $0x1498] sm:$0xff] }
 0x47d   :  { %9409 = vmatprep.subr.bf16.mxu1 %v11132_v20  ;;  %v2714_v19 = vld [vmem:[#allocation7 + $0x14b8] sm:$0xff]  ;;  %v11169_v20 = vcombine.low %v2701_v12, %v2705_v58  ;;  %v2749_v58 = vld [vmem:[#allocation7 + $0x15d0] sm:$0xff] }
 0x47e   :  { %v11180_v27 = vcombine.high %v2710_v14, %v2714_v19  ;;  %v2754_v61 = vld [vmem:[#allocation7 + $0x15f8] sm:$0xff] }
 0x47f   :  { %9082 = vmatpush1.bf16.msra.mxu0 %v11129_v57  ;;  %v2721_v57 = vld [vmem:[#allocation7 + $0x14f0] sm:$0xff] }
 0x480   :  { %9410 = vmatpush1.bf16.msra.mxu1 %v11131_v32  ;;  %9083 = vmatprep.subr.bf16.mxu0 %v11138_v40  ;;  %v2718_v32 = vld [vmem:[#allocation7 + $0x14d8] sm:$0xff]  ;;  %v11186_v39 = vcombine.high %v2717_v34, %v2721_v57 }
 0x481   :  { %9411 = vmatprep.subr.bf16.mxu1 %v11140_v36  ;;  %v2722_v40 = vld [vmem:[#allocation7 + $0x14f8] sm:$0xff]  ;;  %v11177_v36 = vcombine.low %v2709_v42, %v2713_v13  ;;  %v11220_v13 = vcombine.high %v2750_v31, %v2754_v61 }
 0x482   :  { %v11188_v41 = vcombine.high %v2718_v32, %v2722_v40 }
 0x483   :  { %9084 = vmatpush1.bf16.msra.mxu0 %v11137_v11  ;;  %v2726_v11 = vld [vmem:[#allocation7 + $0x1518] sm:$0xff] }
 0x484   :  { %9412 = vmatpush1.bf16.msra.mxu1 %v11139_v26  ;;  %9085 = vmatprep.subr.bf16.mxu0 %v11146_v3  ;;  %v2730_v26 = vld [vmem:[#allocation7 + $0x1538] sm:$0xff]  ;;  %v11187_v3 = vcombine.low %v2718_v32, %v2722_v40  ;;  %v2769_v32 = vld [vmem:[#allocation7 + $0x1670] sm:$0xff] }
 0x485   :  { %9413 = vmatprep.subr.bf16.mxu1 %v11148_v60  ;;  %v11194_v60 = vcombine.high %v2725_v43, %v2729_v45  ;;  %v11196_v30 = vcombine.high %v2726_v11, %v2730_v26  ;;  %v2766_v40 = vld [vmem:[#allocation7 + $0x1658] sm:$0xff] }
 0x487   :  { %9086 = vmatpush1.bf16.msra.mxu0 %v11145_v38  ;;  %v2738_v38 = vld [vmem:[#allocation7 + $0x1578] sm:$0xff] }
 0x488   :  { %9414 = vmatpush1.bf16.msra.mxu1 %v11147_v51  ;;  %9087 = vmatprep.subr.bf16.mxu0 %v11154_v5  ;;  %v11193_v51 = vcombine.low %v2725_v43, %v2729_v45  ;;  %v11195_v5 = vcombine.low %v2726_v11, %v2730_v26  ;;  %v11204_v8 = vcombine.high %v2734_v47, %v2738_v38  ;;  %v2773_v45 = vld [vmem:[#allocation7 + $0x1690] sm:$0xff]  ;;  %v2774_v26 = vld [vmem:[#allocation7 + $0x1698] sm:$0xff] }
 0x489   :  { %9415 = vmatprep.subr.bf16.mxu1 %v11156_v33  ;;  %v11202_v33 = vcombine.high %v2733_v48, %v2737_v49  ;;  %v2777_v11 = vld [vmem:[#allocation7 + $0x16b0] sm:$0xff] }
 0x48b   :  { %9088 = vmatpush1.bf16.msra.mxu0 %v11153_v23  ;;  %v2746_v23 = vld [vmem:[#allocation7 + $0x15b8] sm:$0xff] }
 0x48c   :  { %9416 = vmatpush1.bf16.msra.mxu1 %v11155_v18  ;;  %9098 = vmatprep.subr.bf16.mxu0 %v11162_v37  ;;  %v11201_v18 = vcombine.low %v2733_v48, %v2737_v49  ;;  %v11203_v37 = vcombine.low %v2734_v47, %v2738_v38  ;;  %v11212_v12 = vcombine.high %v2742_v56, %v2746_v23  ;;  %v2781_v49 = vld [vmem:[#allocation7 + $0x16d0] sm:$0xff]  ;;  %v2782_v38 = vld [vmem:[#allocation7 + $0x16d8] sm:$0xff] }
 0x48d   :  { %9426 = vmatprep.subr.bf16.mxu1 %v11164_v0  ;;  %v11210_v0 = vcombine.high %v2741_v52, %v2745_v55  ;;  %v2785_v47 = vld [vmem:[#allocation7 + $0x16f0] sm:$0xff] }
 0x48e   :  { %9090 = vmatmul.mubr.bf16.vlgmr.msra.gmra.mrb[20].mxu0 %v12276_v21 }
 0x48f   :  { %9418 = vmatmul.mubr.bf16.vlgmr.msra.gmra.mrb[20].mxu1 %v12276_v21  ;;  %9099 = vmatpush1.bf16.msra.mxu0 %v11161_v1  ;;  %v11179_v21 = vcombine.low %v2710_v14, %v2714_v19  ;;  %v2753_v1 = vld [vmem:[#allocation7 + $0x15f0] sm:$0xff]  ;;  %v2758_v19 = vld [vmem:[#allocation7 + $0x1618] sm:$0xff] }
 0x490   :  { %9130 = vmatprep.mubr.bf16.mxu0 %v12278_v28  ;;  %9427 = vmatpush1.bf16.msra.mxu1 %v11163_v6  ;;  %v11209_v6 = vcombine.low %v2741_v52, %v2745_v55  ;;  %v11218_v42 = vcombine.high %v2749_v58, %v2753_v1  ;;  %v2761_v14 = vld [vmem:[#allocation7 + $0x1630] sm:$0xff] }
 0x491   :  { %9458 = vmatprep.mubr.bf16.mxu1 %v12278_v28  ;;  %9100 = vmatprep.subr.bf16.mxu0 %v11170_v7  ;;  %v11185_v28 = vcombine.low %v2717_v34, %v2721_v57  ;;  %v11211_v7 = vcombine.low %v2742_v56, %v2746_v23  ;;  %v2765_v57 = vld [vmem:[#allocation7 + $0x1650] sm:$0xff]  ;;  %v2790_v23 = vld [vmem:[#allocation7 + $0x1718] sm:$0xff] }
 0x492   :  { %9428 = vmatprep.subr.bf16.mxu1 %v11172_v35  ;;  %v2757_v35 = vld [vmem:[#allocation7 + $0x1610] sm:$0xff] }
 0x493   :  { %9101 = vmatpush1.bf16.msra.mxu0 %v11169_v20  ;;  %v2762_v20 = vld [vmem:[#allocation7 + $0x1638] sm:$0xff]  ;;  %v2789_v55 = vld [vmem:[#allocation7 + $0x1710] sm:$0xff] }
 0x494   :  { %9429 = vmatpush1.bf16.msra.mxu1 %v11171_v24  ;;  %9102 = vmatprep.subr.bf16.mxu0 %v11178_v44  ;;  %v11217_v24 = vcombine.low %v2749_v58, %v2753_v1  ;;  %v11219_v44 = vcombine.low %v2750_v31, %v2754_v61  ;;  %v11228_v34 = vcombine.high %v2758_v19, %v2762_v20  ;;  %v2793_v56 = vld [vmem:[#allocation7 + $0x1730] sm:$0xff]  ;;  %v2798_v61 = vld [vmem:[#allocation7 + $0x1758] sm:$0xff] }
 0x495   :  { %9430 = vmatprep.subr.bf16.mxu1 %v11180_v27  ;;  %v11226_v27 = vcombine.high %v2757_v35, %v2761_v14  ;;  %v2797_v1 = vld [vmem:[#allocation7 + $0x1750] sm:$0xff] }
 0x496   :  { %v2801_v31 = vld [vmem:[#allocation7 + $0x1770] sm:$0xff] }
 0x497   :  { %9103 = vmatpush1.bf16.msra.mxu0 %v11177_v36  ;;  %v2770_v36 = vld [vmem:[#allocation7 + $0x1678] sm:$0xff] }
 0x498   :  { %9431 = vmatpush1.bf16.msra.mxu1 %v11179_v21  ;;  %9104 = vmatprep.subr.bf16.mxu0 %v11186_v39  ;;  %v11225_v21 = vcombine.low %v2757_v35, %v2761_v14  ;;  %v11227_v39 = vcombine.low %v2758_v19, %v2762_v20  ;;  %v11236_v43 = vcombine.high %v2766_v40, %v2770_v36  ;;  %v2805_v14 = vld [vmem:[#allocation7 + $0x1790] sm:$0xff]  ;;  %v2806_v20 = vld [vmem:[#allocation7 + $0x1798] sm:$0xff] }
 0x499   :  { %9432 = vmatprep.subr.bf16.mxu1 %v11188_v41  ;;  %v11234_v41 = vcombine.high %v2765_v57, %v2769_v32  ;;  %v2809_v19 = vld [vmem:[#allocation7 + $0x17b0] sm:$0xff] }
 0x49b   :  { %9105 = vmatpush1.bf16.msra.mxu0 %v11185_v28  ;;  %v2778_v28 = vld [vmem:[#allocation7 + $0x16b8] sm:$0xff] }
 0x49c   :  { %9433 = vmatpush1.bf16.msra.mxu1 %v11187_v3  ;;  %9106 = vmatprep.subr.bf16.mxu0 %v11194_v60  ;;  %v11233_v3 = vcombine.low %v2765_v57, %v2769_v32  ;;  %v11235_v60 = vcombine.low %v2766_v40, %v2770_v36  ;;  %v11244_v48 = vcombine.high %v2774_v26, %v2778_v28  ;;  %v2813_v32 = vld [vmem:[#allocation7 + $0x17d0] sm:$0xff]  ;;  %v2814_v36 = vld [vmem:[#allocation7 + $0x17d8] sm:$0xff] }
 0x49d   :  { %9434 = vmatprep.subr.bf16.mxu1 %v11196_v30  ;;  %v11242_v30 = vcombine.high %v2773_v45, %v2777_v11  ;;  %v2817_v40 = vld [vmem:[#allocation7 + $0x17f0] sm:$0xff] }
 0x49f   :  { %9107 = vmatpush1.bf16.msra.mxu0 %v11193_v51  ;;  %v2786_v51 = vld [vmem:[#allocation7 + $0x16f8] sm:$0xff] }
 0x4a0   :  { %9435 = vmatpush1.bf16.msra.mxu1 %v11195_v5  ;;  %9108 = vmatprep.subr.bf16.mxu0 %v11202_v33  ;;  %v11241_v5 = vcombine.low %v2773_v45, %v2777_v11  ;;  %v11243_v33 = vcombine.low %v2774_v26, %v2778_v28  ;;  %v11252_v52 = vcombine.high %v2782_v38, %v2786_v51  ;;  %v2821_v11 = vld [vmem:[#allocation7 + $0x1810] sm:$0xff]  ;;  %v2822_v28 = vld [vmem:[#allocation7 + $0x1818] sm:$0xff] }
 0x4a1   :  { %9436 = vmatprep.subr.bf16.mxu1 %v11204_v8  ;;  %v11250_v8 = vcombine.high %v2781_v49, %v2785_v47  ;;  %v2825_v26 = vld [vmem:[#allocation7 + $0x1830] sm:$0xff] }
 0x4a3   :  { %9109 = vmatpush1.bf16.msra.mxu0 %v11201_v18  ;;  %v2794_v18 = vld [vmem:[#allocation7 + $0x1738] sm:$0xff] }
 0x4a4   :  { %9437 = vmatpush1.bf16.msra.mxu1 %v11203_v37  ;;  %9110 = vmatprep.subr.bf16.mxu0 %v11210_v0  ;;  %v11249_v37 = vcombine.low %v2781_v49, %v2785_v47  ;;  %v11251_v0 = vcombine.low %v2782_v38, %v2786_v51  ;;  %v11260_v58 = vcombine.high %v2790_v23, %v2794_v18  ;;  %v2829_v47 = vld [vmem:[#allocation7 + $0x1850] sm:$0xff] }
 0x4a5   :  { %9438 = vmatprep.subr.bf16.mxu1 %v11212_v12  ;;  %v11258_v12 = vcombine.high %v2789_v55, %v2793_v56  ;;  %v2833_v38 = vld [vmem:[#allocation7 + $0x1870] sm:$0xff]  ;;  %v11289_v51 = vcombine.low %v2821_v11, %v2825_v26 }
 0x4a7   :  { %9111 = vmatpush1.bf16.msra.mxu0 %v11209_v6  ;;  %v2802_v6 = vld [vmem:[#allocation7 + $0x1778] sm:$0xff] }
 0x4a8   :  { %9439 = vmatpush1.bf16.msra.mxu1 %v11211_v7  ;;  %9112 = vmatprep.subr.bf16.mxu0 %v11218_v42  ;;  %v11257_v7 = vcombine.low %v2789_v55, %v2793_v56  ;;  %v11259_v42 = vcombine.low %v2790_v23, %v2794_v18  ;;  %v11268_v35 = vcombine.high %v2798_v61, %v2802_v6  ;;  %v2837_v55 = vld [vmem:[#allocation7 + $0x1890] sm:$0xff]  ;;  %v2838_v18 = vld [vmem:[#allocation7 + $0x1898] sm:$0xff] }
 0x4a9   :  { %9440 = vmatprep.subr.bf16.mxu1 %v11220_v13  ;;  %v11266_v13 = vcombine.high %v2797_v1, %v2801_v31  ;;  %v2841_v56 = vld [vmem:[#allocation7 + $0x18b0] sm:$0xff] }
 0x4ab   :  { %9113 = vmatpush1.bf16.msra.mxu0 %v11217_v24  ;;  %v2810_v24 = vld [vmem:[#allocation7 + $0x17b8] sm:$0xff] }
 0x4ac   :  { %9441 = vmatpush1.bf16.msra.mxu1 %v11219_v44  ;;  %9114 = vmatprep.subr.bf16.mxu0 %v11226_v27  ;;  %v11265_v44 = vcombine.low %v2797_v1, %v2801_v31  ;;  %v11267_v27 = vcombine.low %v2798_v61, %v2802_v6  ;;  %v11276_v57 = vcombine.high %v2806_v20, %v2810_v24  ;;  %v2845_v31 = vld [vmem:[#allocation7 + $0x18d0] sm:$0xff]  ;;  %v2846_v6 = vld [vmem:[#allocation7 + $0x18d8] sm:$0xff] }
 0x4ad   :  { %9442 = vmatprep.subr.bf16.mxu1 %v11228_v34  ;;  %v11274_v34 = vcombine.high %v2805_v14, %v2809_v19  ;;  %v2849_v61 = vld [vmem:[#allocation7 + $0x18f0] sm:$0xff] }
 0x4af   :  { %9115 = vmatpush1.bf16.msra.mxu0 %v11225_v21  ;;  %v2818_v21 = vld [vmem:[#allocation7 + $0x17f8] sm:$0xff] }
 0x4b0   :  { %9443 = vmatpush1.bf16.msra.mxu1 %v11227_v39  ;;  %9116 = vmatprep.subr.bf16.mxu0 %v11234_v41  ;;  %v11273_v39 = vcombine.low %v2805_v14, %v2809_v19  ;;  %v11275_v41 = vcombine.low %v2806_v20, %v2810_v24  ;;  %v11284_v45 = vcombine.high %v2814_v36, %v2818_v21  ;;  %v2853_v14 = vld [vmem:[#allocation7 + $0x1910] sm:$0xff]  ;;  %v2854_v20 = vld [vmem:[#allocation7 + $0x1918] sm:$0xff] }
 0x4b1   :  { %9444 = vmatprep.subr.bf16.mxu1 %v11236_v43  ;;  %v11282_v43 = vcombine.high %v2813_v32, %v2817_v40  ;;  %v2857_v19 = vld [vmem:[#allocation7 + $0x1930] sm:$0xff]  ;;  %v2858_v24 = vld [vmem:[#allocation7 + $0x1938] sm:$0xff] }
 0x4b3   :  { %9117 = vmatpush1.bf16.msra.mxu0 %v11233_v3  ;;  %v2826_v3 = vld [vmem:[#allocation7 + $0x1838] sm:$0xff] }
 0x4b4   :  { %9445 = vmatpush1.bf16.msra.mxu1 %v11235_v60  ;;  %9118 = vmatprep.subr.bf16.mxu0 %v11242_v30  ;;  %v11281_v60 = vcombine.low %v2813_v32, %v2817_v40  ;;  %v11283_v30 = vcombine.low %v2814_v36, %v2818_v21  ;;  %v11292_v49 = vcombine.high %v2822_v28, %v2826_v3  ;;  %v2865_v32 = vld [vmem:[#allocation7 + $0x1970] sm:$0xff]  ;;  %v2862_v40 = vld [vmem:[#allocation7 + $0x1958] sm:$0xff] }
 0x4b5   :  { %9446 = vmatprep.subr.bf16.mxu1 %v11244_v48  ;;  %v11290_v48 = vcombine.high %v2821_v11, %v2825_v26  ;;  %v2866_v36 = vld [vmem:[#allocation7 + $0x1978] sm:$0xff]  ;;  %v11321_v21 = vcombine.low %v2853_v14, %v2857_v19  ;;  %v2873_v11 = vld [vmem:[#allocation7 + $0x19b0] sm:$0xff] }
 0x4b6   :  { %v2870_v26 = vld [vmem:[#allocation7 + $0x1998] sm:$0xff] }
 0x4b7   :  { %9119 = vmatpush1.bf16.msra.mxu0 %v11241_v5  ;;  %v2830_v5 = vld [vmem:[#allocation7 + $0x1858] sm:$0xff] }
 0x4b8   :  { %9447 = vmatpush1.bf16.msra.mxu1 %v11243_v33  ;;  %9120 = vmatprep.subr.bf16.mxu0 %v11250_v8  ;;  %v2834_v33 = vld [vmem:[#allocation7 + $0x1878] sm:$0xff]  ;;  %v11291_v8 = vcombine.low %v2822_v28, %v2826_v3 }
 0x4b9   :  { %9448 = vmatprep.subr.bf16.mxu1 %v11252_v52  ;;  %v11298_v52 = vcombine.high %v2829_v47, %v2833_v38  ;;  %v11300_v23 = vcombine.high %v2830_v5, %v2834_v33  ;;  %v2874_v28 = vld [vmem:[#allocation7 + $0x19b8] sm:$0xff] }
 0x4bb   :  { %9121 = vmatpush1.bf16.msra.mxu0 %v11249_v37  ;;  %v2842_v37 = vld [vmem:[#allocation7 + $0x18b8] sm:$0xff] }
 0x4bc   :  { %9449 = vmatpush1.bf16.msra.mxu1 %v11251_v0  ;;  %9122 = vmatprep.subr.bf16.mxu0 %v11258_v12  ;;  %v11297_v0 = vcombine.low %v2829_v47, %v2833_v38  ;;  %v11299_v12 = vcombine.low %v2830_v5, %v2834_v33  ;;  %v11308_v1 = vcombine.high %v2838_v18, %v2842_v37  ;;  %v2881_v47 = vld [vmem:[#allocation7 + $0x19f0] sm:$0xff]  ;;  %v2878_v38 = vld [vmem:[#allocation7 + $0x19d8] sm:$0xff] }
 0x4bd   :  { %9450 = vmatprep.subr.bf16.mxu1 %v11260_v58  ;;  %v11306_v58 = vcombine.high %v2837_v55, %v2841_v56  ;;  %v11339_v33 = vcombine.low %v2870_v26, %v2874_v28 }
 0x4bf   :  { %9123 = vmatpush1.bf16.msra.mxu0 %v11257_v7  ;;  %v2850_v7 = vld [vmem:[#allocation7 + $0x18f8] sm:$0xff] }
 0x4c0   :  { %9451 = vmatpush1.bf16.msra.mxu1 %v11259_v42  ;;  %9124 = vmatprep.subr.bf16.mxu0 %v11266_v13  ;;  %v11305_v42 = vcombine.low %v2837_v55, %v2841_v56  ;;  %v11314_v13 = vcombine.high %v2845_v31, %v2849_v61  ;;  %v2885_v55 = vld [vmem:[#allocation7 + $0x1a10] sm:$0xff] }
 0x4c1   :  { %9452 = vmatprep.subr.bf16.mxu1 %v11268_v35  ;;  %v11316_v35 = vcombine.high %v2846_v6, %v2850_v7  ;;  %v2889_v56 = vld [vmem:[#allocation7 + $0x1a30] sm:$0xff] }
 0x4c3   :  { %9125 = vmatpush1.bf16.msra.mxu0 %v11265_v44  ;;  %v11315_v44 = vcombine.low %v2846_v6, %v2850_v7  ;;  %v2898_v6 = vld [vmem:[#allocation7 + $0x1a78] sm:$0xff]  ;;  %v11353_v7 = vcombine.low %v2885_v55, %v2889_v56 }
 0x4c4   :  { %9453 = vmatpush1.bf16.msra.mxu1 %v11267_v27  ;;  %9126 = vmatprep.subr.bf16.mxu0 %v11274_v34  ;;  %v11322_v27 = vcombine.high %v2853_v14, %v2857_v19  ;;  %v11324_v34 = vcombine.high %v2854_v20, %v2858_v24  ;;  %v2905_v14 = vld [vmem:[#allocation7 + $0x1ab0] sm:$0xff]  ;;  %v2902_v19 = vld [vmem:[#allocation7 + $0x1a98] sm:$0xff] }
 0x4c5   :  { %9454 = vmatprep.subr.bf16.mxu1 %v11276_v57  ;;  %v2861_v57 = vld [vmem:[#allocation7 + $0x1950] sm:$0xff] }
 0x4c6   :  { %v11329_v3 = vcombine.low %v2861_v57, %v2865_v32 }
 0x4c7   :  { %9127 = vmatpush1.bf16.msra.mxu0 %v11273_v39  ;;  %v11323_v39 = vcombine.low %v2854_v20, %v2858_v24  ;;  %v2906_v20 = vld [vmem:[#allocation7 + $0x1ab8] sm:$0xff] }
 0x4c8   :  { %9455 = vmatpush1.bf16.msra.mxu1 %v11275_v41  ;;  %9128 = vmatprep.subr.bf16.mxu0 %v11282_v43  ;;  %v11330_v41 = vcombine.high %v2861_v57, %v2865_v32  ;;  %v11332_v43 = vcombine.high %v2862_v40, %v2866_v36  ;;  %v2913_v57 = vld [vmem:[#allocation7 + $0x1af0] sm:$0xff]  ;;  %v2910_v32 = vld [vmem:[#allocation7 + $0x1ad8] sm:$0xff] }
 0x4c9   :  { %9456 = vmatprep.subr.bf16.mxu1 %v11284_v45  ;;  %v2869_v45 = vld [vmem:[#allocation7 + $0x1990] sm:$0xff] }
 0x4ca   :  { %v11337_v5 = vcombine.low %v2869_v45, %v2873_v11 }
 0x4cb   :  { %9129 = vmatpush1.bf16.msra.mxu0 %v11281_v60  ;;  %v11331_v60 = vcombine.low %v2862_v40, %v2866_v36  ;;  %v2914_v40 = vld [vmem:[#allocation7 + $0x1af8] sm:$0xff] }
 0x4cc   :  { %9457 = vmatpush1.bf16.msra.mxu1 %v11283_v30  ;;  %9139 = vmatprep.subr.bf16.mxu0 %v11290_v48  ;;  %v11338_v30 = vcombine.high %v2869_v45, %v2873_v11  ;;  %v11340_v48 = vcombine.high %v2870_v26, %v2874_v28  ;;  %v2921_v45 = vld [vmem:[#allocation7 + $0x1b30] sm:$0xff]  ;;  %v2918_v11 = vld [vmem:[#allocation7 + $0x1b18] sm:$0xff] }
 0x4cd   :  { %9467 = vmatprep.subr.bf16.mxu1 %v11292_v49  ;;  %v2877_v49 = vld [vmem:[#allocation7 + $0x19d0] sm:$0xff]  ;;  %v2922_v26 = vld [vmem:[#allocation7 + $0x1b38] sm:$0xff] }
 0x4ce   :  { %9131 = vmatmul.mubr.bf16.vlgmr.msra.gmra.mrb[20].mxu0 %v12290_v46 }
 0x4cf   :  { %9459 = vmatmul.mubr.bf16.vlgmr.msra.gmra.mrb[20].mxu1 %v12290_v46  ;;  %9140 = vmatpush1.bf16.msra.mxu0 %v11289_v51  ;;  %v11307_v46 = vcombine.low %v2838_v18, %v2842_v37  ;;  %v2882_v51 = vld [vmem:[#allocation7 + $0x19f8] sm:$0xff]  ;;  %v11345_v37 = vcombine.low %v2877_v49, %v2881_v47 }
 0x4d0   :  { %9171 = vmatprep.mubr.bf16.mxu0 %v12292_v50  ;;  %9468 = vmatpush1.bf16.msra.mxu1 %v11291_v8  ;;  %v11346_v8 = vcombine.high %v2877_v49, %v2881_v47  ;;  %v2890_v18 = vld [vmem:[#allocation7 + $0x1a38] sm:$0xff]  ;;  %v2929_v49 = vld [vmem:[#allocation7 + $0x1b70] sm:$0xff] }
 0x4d1   :  { %9499 = vmatprep.mubr.bf16.mxu1 %v12292_v50  ;;  %9141 = vmatprep.subr.bf16.mxu0 %v11298_v52  ;;  %v11313_v50 = vcombine.low %v2845_v31, %v2849_v61  ;;  %v11348_v52 = vcombine.high %v2878_v38, %v2882_v51  ;;  %v2897_v31 = vld [vmem:[#allocation7 + $0x1a70] sm:$0xff]  ;;  %v2894_v61 = vld [vmem:[#allocation7 + $0x1a58] sm:$0xff] }
 0x4d2   :  { %9469 = vmatprep.subr.bf16.mxu1 %v11300_v23  ;;  %v2886_v23 = vld [vmem:[#allocation7 + $0x1a18] sm:$0xff] }
 0x4d3   :  { %9142 = vmatpush1.bf16.msra.mxu0 %v11297_v0  ;;  %v11347_v0 = vcombine.low %v2878_v38, %v2882_v51  ;;  %v2926_v47 = vld [vmem:[#allocation7 + $0x1b58] sm:$0xff] }
 0x4d4   :  { %9470 = vmatpush1.bf16.msra.mxu1 %v11299_v12  ;;  %9143 = vmatprep.subr.bf16.mxu0 %v11306_v58  ;;  %v11354_v12 = vcombine.high %v2885_v55, %v2889_v56  ;;  %v11356_v58 = vcombine.high %v2886_v23, %v2890_v18  ;;  %v2930_v38 = vld [vmem:[#allocation7 + $0x1b78] sm:$0xff]  ;;  %v2937_v55 = vld [vmem:[#allocation7 + $0x1bb0] sm:$0xff] }
 0x4d5   :  { %9471 = vmatprep.subr.bf16.mxu1 %v11308_v1  ;;  %v2893_v1 = vld [vmem:[#allocation7 + $0x1a50] sm:$0xff]  ;;  %v2934_v56 = vld [vmem:[#allocation7 + $0x1b98] sm:$0xff] }
 0x4d6   :  { %v11361_v24 = vcombine.low %v2893_v1, %v2897_v31 }
 0x4d7   :  { %9144 = vmatpush1.bf16.msra.mxu0 %v11305_v42  ;;  %v11355_v42 = vcombine.low %v2886_v23, %v2890_v18  ;;  %v2938_v23 = vld [vmem:[#allocation7 + $0x1bb8] sm:$0xff] }
 0x4d8   :  { %9472 = vmatpush1.bf16.msra.mxu1 %v11307_v46  ;;  %9145 = vmatprep.subr.bf16.mxu0 %v11314_v13  ;;  %v11362_v46 = vcombine.high %v2893_v1, %v2897_v31  ;;  %v11364_v13 = vcombine.high %v2894_v61, %v2898_v6  ;;  %v2945_v1 = vld [vmem:[#allocation7 + $0x1bf0] sm:$0xff]  ;;  %v2942_v31 = vld [vmem:[#allocation7 + $0x1bd8] sm:$0xff] }
 0x4d9   :  { %9473 = vmatprep.subr.bf16.mxu1 %v11316_v35  ;;  %v2901_v35 = vld [vmem:[#allocation7 + $0x1a90] sm:$0xff] }
 0x4da   :  { %v11369_v36 = vcombine.low %v2901_v35, %v2905_v14 }
 0x4db   :  { %9146 = vmatpush1.bf16.msra.mxu0 %v11313_v50  ;;  %v11363_v50 = vcombine.low %v2894_v61, %v2898_v6  ;;  %v2946_v61 = vld [vmem:[#allocation7 + $0x1bf8] sm:$0xff] }
 0x4dc   :  { %9474 = vmatpush1.bf16.msra.mxu1 %v11315_v44  ;;  %9147 = vmatprep.subr.bf16.mxu0 %v11322_v27  ;;  %v11370_v44 = vcombine.high %v2901_v35, %v2905_v14  ;;  %v11372_v27 = vcombine.high %v2902_v19, %v2906_v20  ;;  %v2953_v35 = vld [vmem:[#allocation7 + $0x1c30] sm:$0xff]  ;;  %v2950_v14 = vld [vmem:[#allocation7 + $0x1c18] sm:$0xff] }
 0x4dd   :  { %9475 = vmatprep.subr.bf16.mxu1 %v11324_v34  ;;  %v2909_v34 = vld [vmem:[#allocation7 + $0x1ad0] sm:$0xff] }
 0x4de   :  { %v11377_v28 = vcombine.low %v2909_v34, %v2913_v57 }
 0x4df   :  { %9148 = vmatpush1.bf16.msra.mxu0 %v11321_v21  ;;  %v11371_v21 = vcombine.low %v2902_v19, %v2906_v20  ;;  %v2954_v19 = vld [vmem:[#allocation7 + $0x1c38] sm:$0xff] }
 0x4e0   :  { %9476 = vmatpush1.bf16.msra.mxu1 %v11323_v39  ;;  %9149 = vmatprep.subr.bf16.mxu0 %v11330_v41  ;;  %v11378_v39 = vcombine.high %v2909_v34, %v2913_v57  ;;  %v11380_v41 = vcombine.high %v2910_v32, %v2914_v40  ;;  %v2961_v34 = vld [vmem:[#allocation7 + $0x1c70] sm:$0xff] }
 0x4e1   :  { %9477 = vmatprep.subr.bf16.mxu1 %v11332_v43  ;;  %v2917_v43 = vld [vmem:[#allocation7 + $0x1b10] sm:$0xff] }
 0x4e2   :  { %v11385_v51 = vcombine.low %v2917_v43, %v2921_v45 }
 0x4e3   :  { %9150 = vmatpush1.bf16.msra.mxu0 %v11329_v3  ;;  %v11379_v3 = vcombine.low %v2910_v32, %v2914_v40  ;;  %v2958_v32 = vld [vmem:[#allocation7 + $0x1c58] sm:$0xff] }
 0x4e4   :  { %9478 = vmatpush1.bf16.msra.mxu1 %v11331_v60  ;;  %9151 = vmatprep.subr.bf16.mxu0 %v11338_v30  ;;  %v11386_v60 = vcombine.high %v2917_v43, %v2921_v45  ;;  %v11388_v30 = vcombine.high %v2918_v11, %v2922_v26  ;;  %v2962_v40 = vld [vmem:[#allocation7 + $0x1c78] sm:$0xff] }
 0x4e5   :  { %9479 = vmatprep.subr.bf16.mxu1 %v11340_v48  ;;  %v2925_v48 = vld [vmem:[#allocation7 + $0x1b50] sm:$0xff]  ;;  %v11428_v43 = vcombine.high %v2958_v32, %v2962_v40  ;;  %v2966_v45 = vld [vmem:[#allocation7 + $0x1c98] sm:$0xff] }
 0x4e6   :  { %v11393_v18 = vcombine.low %v2925_v48, %v2929_v49 }
 0x4e7   :  { %9152 = vmatpush1.bf16.msra.mxu0 %v11337_v5  ;;  %v11387_v5 = vcombine.low %v2918_v11, %v2922_v26  ;;  %v2970_v11 = vld [vmem:[#allocation7 + $0x1cb8] sm:$0xff] }
 0x4e8   :  { %9480 = vmatpush1.bf16.msra.mxu1 %v11339_v33  ;;  %9153 = vmatprep.subr.bf16.mxu0 %v11346_v8  ;;  %v11394_v33 = vcombine.high %v2925_v48, %v2929_v49  ;;  %v11396_v8 = vcombine.high %v2926_v47, %v2930_v38  ;;  %v2977_v48 = vld [vmem:[#allocation7 + $0x1cf0] sm:$0xff]  ;;  %v2974_v49 = vld [vmem:[#allocation7 + $0x1cd8] sm:$0xff] }
 0x4e9   :  { %9481 = vmatprep.subr.bf16.mxu1 %v11348_v52  ;;  %v2933_v52 = vld [vmem:[#allocation7 + $0x1b90] sm:$0xff] }
 0x4ea   :  { %v11401_v6 = vcombine.low %v2933_v52, %v2937_v55 }
 0x4eb   :  { %9154 = vmatpush1.bf16.msra.mxu0 %v11345_v37  ;;  %v11395_v37 = vcombine.low %v2926_v47, %v2930_v38  ;;  %v2978_v47 = vld [vmem:[#allocation7 + $0x1cf8] sm:$0xff] }
 0x4ec   :  { %9482 = vmatpush1.bf16.msra.mxu1 %v11347_v0  ;;  %9155 = vmatprep.subr.bf16.mxu0 %v11354_v12  ;;  %v11402_v0 = vcombine.high %v2933_v52, %v2937_v55  ;;  %v11404_v12 = vcombine.high %v2934_v56, %v2938_v23  ;;  %v2982_v52 = vld [vmem:[#allocation7 + $0x1d18] sm:$0xff] }
 0x4ed   :  { %9483 = vmatprep.subr.bf16.mxu1 %v11356_v58  ;;  %v2941_v58 = vld [vmem:[#allocation7 + $0x1bd0] sm:$0xff]  ;;  %v2986_v55 = vld [vmem:[#allocation7 + $0x1d38] sm:$0xff] }
 0x4ee   :  { %v11409_v20 = vcombine.low %v2941_v58, %v2945_v1 }
 0x4ef   :  { %9156 = vmatpush1.bf16.msra.mxu0 %v11353_v7  ;;  %v11403_v7 = vcombine.low %v2934_v56, %v2938_v23  ;;  %v11443_v56 = vcombine.low %v2974_v49, %v2978_v47 }
 0x4f0   :  { %9484 = vmatpush1.bf16.msra.mxu1 %v11355_v42  ;;  %9157 = vmatprep.subr.bf16.mxu0 %v11362_v46  ;;  %v11410_v42 = vcombine.high %v2941_v58, %v2945_v1  ;;  %v11412_v46 = vcombine.high %v2942_v31, %v2946_v61  ;;  %v2994_v58 = vld [vmem:[#allocation7 + $0x1d78] sm:$0xff] }
 0x4f1   :  { %9485 = vmatprep.subr.bf16.mxu1 %v11364_v13  ;;  %v2949_v13 = vld [vmem:[#allocation7 + $0x1c10] sm:$0xff] }
 0x4f2   :  { %v11417_v57 = vcombine.low %v2949_v13, %v2953_v35 }
 0x4f3   :  { %9158 = vmatpush1.bf16.msra.mxu0 %v11361_v24  ;;  %v11411_v24 = vcombine.low %v2942_v31, %v2946_v61  ;;  %v11451_v31 = vcombine.low %v2982_v52, %v2986_v55 }
 0x4f4   :  { %9486 = vmatpush1.bf16.msra.mxu1 %v11363_v50  ;;  %9159 = vmatprep.subr.bf16.mxu0 %v11370_v44  ;;  %v11418_v50 = vcombine.high %v2949_v13, %v2953_v35  ;;  %v11420_v44 = vcombine.high %v2950_v14, %v2954_v19  ;;  %v3002_v13 = vld [vmem:[#allocation7 + $0x1db8] sm:$0xff] }
 0x4f5   :  { %9487 = vmatprep.subr.bf16.mxu1 %v11372_v27  ;;  %v2957_v27 = vld [vmem:[#allocation7 + $0x1c50] sm:$0xff] }
 0x4f6   :  { %v11425_v26 = vcombine.low %v2957_v27, %v2961_v34 }
 0x4f7   :  { %9160 = vmatpush1.bf16.msra.mxu0 %v11369_v36  ;;  %v11419_v36 = vcombine.low %v2950_v14, %v2954_v19 }
 0x4f8   :  { %9488 = vmatpush1.bf16.msra.mxu1 %v11371_v21  ;;  %9161 = vmatprep.subr.bf16.mxu0 %v11378_v39  ;;  %v11426_v21 = vcombine.high %v2957_v27, %v2961_v34  ;;  %v2965_v39 = vld [vmem:[#allocation7 + $0x1c90] sm:$0xff]  ;;  %v3010_v27 = vld [vmem:[#allocation7 + $0x1df8] sm:$0xff] }
 0x4f9   :  { %9489 = vmatprep.subr.bf16.mxu1 %v11380_v41  ;;  %v2969_v41 = vld [vmem:[#allocation7 + $0x1cb0] sm:$0xff] }
 0x4fa   :  { %v11433_v38 = vcombine.low %v2965_v39, %v2969_v41 }
 0x4fb   :  { %9162 = vmatpush1.bf16.msra.mxu0 %v11377_v28  ;;  %v11427_v28 = vcombine.low %v2958_v32, %v2962_v40 }
 0x4fc   :  { %9490 = vmatpush1.bf16.msra.mxu1 %v11379_v3  ;;  %9163 = vmatprep.subr.bf16.mxu0 %v11386_v60  ;;  %v11434_v3 = vcombine.high %v2965_v39, %v2969_v41  ;;  %v11436_v60 = vcombine.high %v2966_v45, %v2970_v11  ;;  %v3014_v39 = vld [vmem:[#allocation7 + $0x1e18] sm:$0xff] }
 0x4fd   :  { %9491 = vmatprep.subr.bf16.mxu1 %v11388_v30  ;;  %v2973_v30 = vld [vmem:[#allocation7 + $0x1cd0] sm:$0xff]  ;;  %v3018_v41 = vld [vmem:[#allocation7 + $0x1e38] sm:$0xff] }
 0x4ff   :  { %9164 = vmatpush1.bf16.msra.mxu0 %v11385_v51  ;;  %v11442_v51 = vcombine.high %v2973_v30, %v2977_v48 }
 0x500   :  { %9492 = vmatpush1.bf16.msra.mxu1 %v11387_v5  ;;  %9165 = vmatprep.subr.bf16.mxu0 %v11394_v33  ;;  %v11444_v5 = vcombine.high %v2974_v49, %v2978_v47  ;;  %v2981_v33 = vld [vmem:[#allocation7 + $0x1d10] sm:$0xff]  ;;  %v11483_v49 = vcombine.low %v3014_v39, %v3018_v41 }
 0x501   :  { %9493 = vmatprep.subr.bf16.mxu1 %v11396_v8  ;;  %v2985_v8 = vld [vmem:[#allocation7 + $0x1d30] sm:$0xff] }
 0x502   :  { %v11450_v23 = vcombine.high %v2981_v33, %v2985_v8  ;;  %v11449_v1 = vcombine.low %v2981_v33, %v2985_v8  ;;  %v3034_v33 = vld [vmem:[#allocation7 + $0x1eb8] sm:$0xff] }
 0x503   :  { %9166 = vmatpush1.bf16.msra.mxu0 %v11393_v18  ;;  %v11452_v18 = vcombine.high %v2982_v52, %v2986_v55 }
 0x504   :  { %9494 = vmatpush1.bf16.msra.mxu1 %v11395_v37  ;;  %9167 = vmatprep.subr.bf16.mxu0 %v11402_v0  ;;  %v2989_v37 = vld [vmem:[#allocation7 + $0x1d50] sm:$0xff] }
 0x505   :  { %9495 = vmatprep.subr.bf16.mxu1 %v11404_v12  ;;  %v2993_v0 = vld [vmem:[#allocation7 + $0x1d70] sm:$0xff]  ;;  %v2990_v12 = vld [vmem:[#allocation7 + $0x1d58] sm:$0xff] }
 0x506   :  { %v11458_v61 = vcombine.high %v2989_v37, %v2993_v0  ;;  %v11457_v35 = vcombine.low %v2989_v37, %v2993_v0  ;;  %v11459_v14 = vcombine.low %v2990_v12, %v2994_v58  ;;  %v3042_v37 = vld [vmem:[#allocation7 + $0x1ef8] sm:$0xff] }
 0x507   :  { %9168 = vmatpush1.bf16.msra.mxu0 %v11401_v6  ;;  %v11460_v6 = vcombine.high %v2990_v12, %v2994_v58 }
 0x508   :  { %9496 = vmatpush1.bf16.msra.mxu1 %v11403_v7  ;;  %9169 = vmatprep.subr.bf16.mxu0 %v11410_v42  ;;  %v2997_v7 = vld [vmem:[#allocation7 + $0x1d90] sm:$0xff] }
 0x509   :  { %9497 = vmatprep.subr.bf16.mxu1 %v11412_v46  ;;  %v3001_v42 = vld [vmem:[#allocation7 + $0x1db0] sm:$0xff]  ;;  %v2998_v46 = vld [vmem:[#allocation7 + $0x1d98] sm:$0xff] }
 0x50a   :  { %v11466_v19 = vcombine.high %v2997_v7, %v3001_v42  ;;  %v11465_v34 = vcombine.low %v2997_v7, %v3001_v42  ;;  %v3050_v7 = vld [vmem:[#allocation7 + $0x1f38] sm:$0xff] }
 0x50b   :  { %9170 = vmatpush1.bf16.msra.mxu0 %v11409_v20  ;;  %v11468_v20 = vcombine.high %v2998_v46, %v3002_v13 }
 0x50c   :  { %9498 = vmatpush1.bf16.msra.mxu1 %v11411_v24  ;;  %9180 = vmatprep.subr.bf16.mxu0 %v11418_v50  ;;  %v3005_v24 = vld [vmem:[#allocation7 + $0x1dd0] sm:$0xff] }
 0x50d   :  { %9508 = vmatprep.subr.bf16.mxu1 %v11420_v44  ;;  %v3009_v50 = vld [vmem:[#allocation7 + $0x1df0] sm:$0xff]  ;;  %v3006_v44 = vld [vmem:[#allocation7 + $0x1dd8] sm:$0xff] }
 0x50e   :  { %9172 = vmatmul.mubr.bf16.vlgmr.msra.gmra.mrb[20].mxu0 %v12306_v2  ;;  %v11474_v32 = vcombine.high %v3005_v24, %v3009_v50  ;;  %v11476_v40 = vcombine.high %v3006_v44, %v3010_v27 }
 0x50f   :  { %9500 = vmatmul.mubr.bf16.vlgmr.msra.gmra.mrb[20].mxu1 %v12306_v2  ;;  %9181 = vmatpush1.bf16.msra.mxu0 %v11417_v57  ;;  %v11435_v2 = vcombine.low %v2966_v45, %v2970_v11  ;;  %v11467_v57 = vcombine.low %v2998_v46, %v3002_v13  ;;  %v11475_v45 = vcombine.low %v3006_v44, %v3010_v27 }
 0x510   :  { %9212 = vmatprep.mubr.bf16.mxu0 %v12308_v9  ;;  %9509 = vmatpush1.bf16.msra.mxu1 %v11419_v36  ;;  %v3013_v36 = vld [vmem:[#allocation7 + $0x1e10] sm:$0xff] }
 0x511   :  { %9540 = vmatprep.mubr.bf16.mxu1 %v12308_v9  ;;  %9182 = vmatprep.subr.bf16.mxu0 %v11426_v21  ;;  %v11441_v9 = vcombine.low %v2973_v30, %v2977_v48  ;;  %v3017_v21 = vld [vmem:[#allocation7 + $0x1e30] sm:$0xff]  ;;  %v3026_v30 = vld [vmem:[#allocation7 + $0x1e78] sm:$0xff] }
 0x512   :  { %9510 = vmatprep.subr.bf16.mxu1 %v11428_v43  ;;  %v11473_v43 = vcombine.low %v3005_v24, %v3009_v50  ;;  %v11482_v11 = vcombine.high %v3013_v36, %v3017_v21  ;;  %v11481_v48 = vcombine.low %v3013_v36, %v3017_v21  ;;  %v3058_v24 = vld [vmem:[#allocation7 + $0x1f78] sm:$0xff] }
 0x513   :  { %9183 = vmatpush1.bf16.msra.mxu0 %v11425_v26  ;;  %v11484_v26 = vcombine.high %v3014_v39, %v3018_v41  ;;  %v3066_v36 = vld [vmem:[#allocation7 + $0x1fb8] sm:$0xff] }
 0x514   :  { %9511 = vmatpush1.bf16.msra.mxu1 %v11427_v28  ;;  %9184 = vmatprep.subr.bf16.mxu0 %v11434_v3  ;;  %v3021_v28 = vld [vmem:[#allocation7 + $0x1e50] sm:$0xff] }
 0x515   :  { %9512 = vmatprep.subr.bf16.mxu1 %v11436_v60  ;;  %v3025_v3 = vld [vmem:[#allocation7 + $0x1e70] sm:$0xff]  ;;  %v3022_v60 = vld [vmem:[#allocation7 + $0x1e58] sm:$0xff] }
 0x516   :  { %v11490_v47 = vcombine.high %v3021_v28, %v3025_v3  ;;  %v11489_v8 = vcombine.low %v3021_v28, %v3025_v3  ;;  %v11491_v52 = vcombine.low %v3022_v60, %v3026_v30  ;;  %v3074_v28 = vld [vmem:[#allocation7 + $0x1ff8] sm:$0xff]  ;;  %v12359_v3 = vld [vmem:[#allocation8] sm:$0xff] }
 0x517   :  { %9185 = vmatpush1.bf16.msra.mxu0 %v11433_v38  ;;  %v11492_v38 = vcombine.high %v3022_v60, %v3026_v30 }
 0x518   :  { %9513 = vmatpush1.bf16.msra.mxu1 %v11435_v2  ;;  %9186 = vmatprep.subr.bf16.mxu0 %v11442_v51  ;;  %v3029_v2 = vld [vmem:[#allocation7 + $0x1e90] sm:$0xff] }
 0x519   :  { %9514 = vmatprep.subr.bf16.mxu1 %v11444_v5  ;;  %v3033_v51 = vld [vmem:[#allocation7 + $0x1eb0] sm:$0xff]  ;;  %v3030_v5 = vld [vmem:[#allocation7 + $0x1e98] sm:$0xff] }
 0x51a   :  { %v11498_v55 = vcombine.high %v3029_v2, %v3033_v51  ;;  %v11497_v0 = vcombine.low %v3029_v2, %v3033_v51  ;;  %v11499_v12 = vcombine.low %v3030_v5, %v3034_v33 }
 0x51b   :  { %9187 = vmatpush1.bf16.msra.mxu0 %v11441_v9  ;;  %v11500_v9 = vcombine.high %v3030_v5, %v3034_v33  ;;  %v11825_v5 = vld [vmem:[%s12595_s5 + $0x40] sm:$0xff]  }
 0x51c   :  { %9515 = vmatpush1.bf16.msra.mxu1 %v11443_v56  ;;  %9188 = vmatprep.subr.bf16.mxu0 %v11450_v23  ;;  %v3037_v56 = vld [vmem:[#allocation7 + $0x1ed0] sm:$0xff] }
 0x51d   :  { %9516 = vmatprep.subr.bf16.mxu1 %v11452_v18  ;;  %v3041_v23 = vld [vmem:[#allocation7 + $0x1ef0] sm:$0xff]  ;;  %v3038_v18 = vld [vmem:[#allocation7 + $0x1ed8] sm:$0xff] }
 0x51e   :  { %v11506_v58 = vcombine.high %v3037_v56, %v3041_v23  ;;  %v11505_v42 = vcombine.low %v3037_v56, %v3041_v23  ;;  %v11507_v46 = vcombine.low %v3038_v18, %v3042_v37  ;;  %v11826_v33 = vld [vmem:[%s12595_s5 + $0xc0] sm:$0xff]   ;;  %v11831_v56 = vld [vmem:[%s12595_s5 + $0x8] sm:$0xff]  }
 0x51f   :  { %9189 = vmatpush1.bf16.msra.mxu0 %v11449_v1  ;;  %v11508_v1 = vcombine.high %v3038_v18, %v3042_v37  ;;  %v11832_v23 = vld [vmem:[%s12595_s5 + $0x88] sm:$0xff]   ;;  %v11833_v18 = vld [vmem:[%s12595_s5 + $0x50] sm:$0xff]  }
 0x520   :  { %9517 = vmatpush1.bf16.msra.mxu1 %v11451_v31  ;;  %9190 = vmatprep.subr.bf16.mxu0 %v11458_v61  ;;  %v3045_v31 = vld [vmem:[#allocation7 + $0x1f10] sm:$0xff]  ;;  %v11835_v37 = vld [vmem:[%s12595_s5 + $0x10] sm:$0xff]  }
 0x521   :  { %9518 = vmatprep.subr.bf16.mxu1 %v11460_v6  ;;  %v3049_v61 = vld [vmem:[#allocation7 + $0x1f30] sm:$0xff]  ;;  %v3046_v6 = vld [vmem:[#allocation7 + $0x1f18] sm:$0xff] }
 0x522   :  { %v11514_v13 = vcombine.high %v3045_v31, %v3049_v61  ;;  %v11513_v50 = vcombine.low %v3045_v31, %v3049_v61  ;;  %v11515_v44 = vcombine.low %v3046_v6, %v3050_v7  ;;  %v11840_v31 = vld [vmem:[%s12595_s5 + $0x98] sm:$0xff]   ;;  %v11841_v61 = vld [vmem:[%s12595_s5 + $0x60] sm:$0xff]  }
 0x523   :  { %9191 = vmatpush1.bf16.msra.mxu0 %v11457_v35  ;;  %v11516_v35 = vcombine.high %v3046_v6, %v3050_v7  ;;  %v11842_v6 = vld [vmem:[%s12595_s5 + $0xe0] sm:$0xff]  }
 0x524   :  { %9519 = vmatpush1.bf16.msra.mxu1 %v11459_v14  ;;  %9192 = vmatprep.subr.bf16.mxu0 %v11466_v19  ;;  %v3053_v14 = vld [vmem:[#allocation7 + $0x1f50] sm:$0xff] }
 0x525   :  { %9520 = vmatprep.subr.bf16.mxu1 %v11468_v20  ;;  %v3057_v19 = vld [vmem:[#allocation7 + $0x1f70] sm:$0xff]  ;;  %v3054_v20 = vld [vmem:[#allocation7 + $0x1f58] sm:$0xff] }
 0x526   :  { %v11522_v27 = vcombine.high %v3053_v14, %v3057_v19  ;;  %v11521_v21 = vcombine.low %v3053_v14, %v3057_v19  ;;  %v11523_v39 = vcombine.low %v3054_v20, %v3058_v24  ;;  %v11843_v7 = vld [vmem:[%s12595_s5 + $0x20] sm:$0xff]   ;;  %v11848_v14 = vld [vmem:[%s12595_s5 + $0xa8] sm:$0xff]   ;;  %v11849_v19 = vld [vmem:[%s12595_s5 + $0x70] sm:$0xff]  }
 0x527   :  { %9193 = vmatpush1.bf16.msra.mxu0 %v11465_v34  ;;  %v11524_v34 = vcombine.high %v3054_v20, %v3058_v24  ;;  %v11850_v20 = vld [vmem:[%s12595_s5 + $0xf0] sm:$0xff]  }
 0x528   :  { %9521 = vmatpush1.bf16.msra.mxu1 %v11467_v57  ;;  %9194 = vmatprep.subr.bf16.mxu0 %v11474_v32  ;;  %v3061_v57 = vld [vmem:[#allocation7 + $0x1f90] sm:$0xff]  ;;  %v11851_v24 = vld [vmem:[%s12595_s5 + $0x30] sm:$0xff]  }
 0x529   :  { %9522 = vmatprep.subr.bf16.mxu1 %v11476_v40  ;;  %v3065_v32 = vld [vmem:[#allocation7 + $0x1fb0] sm:$0xff]  ;;  %v3062_v40 = vld [vmem:[#allocation7 + $0x1f98] sm:$0xff] }
 0x52a   :  { %v11530_v41 = vcombine.high %v3061_v57, %v3065_v32  ;;  %v11529_v60 = vcombine.low %v3061_v57, %v3065_v32  ;;  %v11531_v30 = vcombine.low %v3062_v40, %v3066_v36  ;;  %v11854_v57 = vld [vmem:[%s12595_s5 + $0xf8] sm:$0xff]  }
 0x52b   :  { %9195 = vmatpush1.bf16.msra.mxu0 %v11473_v43  ;;  %v11532_v43 = vcombine.high %v3062_v40, %v3066_v36  ;;  %v11856_v40 = vld [vmem:[%s12595_s5 + $0xb8] sm:$0xff]  }
 0x52c   :  { %9523 = vmatpush1.bf16.msra.mxu1 %v11475_v45  ;;  %9196 = vmatprep.subr.bf16.mxu0 %v11482_v11  ;;  %v3069_v45 = vld [vmem:[#allocation7 + $0x1fd0] sm:$0xff] }
 0x52d   :  { %9524 = vmatprep.subr.bf16.mxu1 %v11484_v26  ;;  %v3073_v11 = vld [vmem:[#allocation7 + $0x1ff0] sm:$0xff]  ;;  %v3070_v26 = vld [vmem:[#allocation7 + $0x1fd8] sm:$0xff] }
 0x52e   :  { %v11537_v2 = vcombine.low %v3069_v45, %v3073_v11  ;;  %v11539_v51 = vcombine.low %v3070_v26, %v3074_v28 }
 0x52f   :  { %9197 = vmatpush1.bf16.msra.mxu0 %v11481_v48  ;;  %v11538_v48 = vcombine.high %v3069_v45, %v3073_v11  ;;  %v11862_v45 = vld [vmem:[%s12595_s5 + $0x1c8] sm:$0xff]  }
 0x530   :  { %9525 = vmatpush1.bf16.msra.mxu1 %v11483_v49  ;;  %9198 = vmatprep.subr.bf16.mxu0 %v11490_v47  ;;  %v11540_v49 = vcombine.high %v3070_v26, %v3074_v28  ;;  %v3084_v47 = vrot.slane %v12359_v3, %v12149_v59  ;;  %v11863_v11 = vld [vmem:[%s12595_s5 + $0x108] sm:$0xff]   ;;  %v11865_v28 = vld [vmem:[%s12595_s5 + $0x150] sm:$0xff]  }
 0x531   :  { %9526 = vmatprep.subr.bf16.mxu1 %v11492_v38  ;;  %v3092_v38 = vrot.slane %v12359_v3, %v12169_v29  ;;  %v11827_v29 = vld [vmem:[%s12595_s5] sm:$0xff]   ;;  %v11864_v26 = vld [vmem:[%s12595_s5 + $0x188] sm:$0xff]  }
 0x533   :  { %9199 = vmatpush1.bf16.msra.mxu0 %v11489_v8  ;;  %v11695_v8 = vadd.f32 %v12339_v17, %v3084_v47  ;;  %v11697_v59 = vadd.f32 %v12341_v25, %v3092_v38  ;;  %v11830_v17 = vld [vmem:[%s12595_s5 + $0xc8] sm:$0xff]   ;;  %v11870_v47 = vld [vmem:[%s12595_s5 + $0x1d8] sm:$0xff]  }
 0x534   :  { %9527 = vmatpush1.bf16.msra.mxu1 %v11491_v52  ;;  %9200 = vmatprep.subr.bf16.mxu0 %v11498_v55  ;;  %v11828_v52 = vld [vmem:[%s12595_s5 + $0x80] sm:$0xff]   ;;  %v11829_v55 = vld [vmem:[%s12595_s5 + $0x48] sm:$0xff]   ;;  %v11871_v38 = vld [vmem:[%s12595_s5 + $0x118] sm:$0xff]  }
 0x535   :  { %9528 = vmatprep.subr.bf16.mxu1 %v11500_v9  ;;  %v9550_v9 = vpack.c.bf16 %v11695_v8, %v11695_v8  ;;  %v9552_v25 = vpack.c.bf16 %v11697_v59, %v11697_v59  ;;  %v11876_v8 = vld [vmem:[%s12595_s5 + $0x1a0] sm:$0xff]   ;;  %v11877_v59 = vld [vmem:[%s12595_s5 + $0x168] sm:$0xff]  }
 0x537   :  { %9201 = vmatpush1.bf16.msra.mxu0 %v11497_v0  ;;  %v11836_v0 = vld [vmem:[%s12595_s5 + $0x90] sm:$0xff]  }
 0x538   :  { %9529 = vmatpush1.bf16.msra.mxu1 %v11499_v12  ;;  %9202 = vmatprep.subr.bf16.mxu0 %v11506_v58  ;;  %v11837_v12 = vld [vmem:[%s12595_s5 + $0x58] sm:$0xff]  }
 0x539   :  { %9530 = vmatprep.subr.bf16.mxu1 %v11508_v1  ;;  %v11838_v58 = vld [vmem:[%s12595_s5 + $0xd8] sm:$0xff]  }
 0x53a   :  { %v11839_v1 = vld [vmem:[%s12595_s5 + $0x18] sm:$0xff]  }
 0x53b   :  { %9203 = vmatpush1.bf16.msra.mxu0 %v11505_v42  ;;  %v11844_v42 = vld [vmem:[%s12595_s5 + $0xa0] sm:$0xff]  }
 0x53c   :  { %9531 = vmatpush1.bf16.msra.mxu1 %v11507_v46  ;;  %9204 = vmatprep.subr.bf16.mxu0 %v11514_v13  ;;  %v11845_v46 = vld [vmem:[%s12595_s5 + $0x68] sm:$0xff]  }
 0x53d   :  { %9532 = vmatprep.subr.bf16.mxu1 %v11516_v35  ;;  %v11846_v13 = vld [vmem:[%s12595_s5 + $0xe8] sm:$0xff]  }
 0x53e   :  { %v11847_v35 = vld [vmem:[%s12595_s5 + $0x28] sm:$0xff]  }
 0x53f   :  { %9205 = vmatpush1.bf16.msra.mxu0 %v11513_v50  ;;  %v3080_v50 = vrot.slane %v12359_v3, %v12166_v53  ;;  %v11855_v53 = vld [vmem:[%s12595_s5 + $0x38] sm:$0xff]  }
 0x540   :  { %9533 = vmatpush1.bf16.msra.mxu1 %v11515_v44  ;;  %9206 = vmatprep.subr.bf16.mxu0 %v11522_v27  ;;  %v11852_v44 = vld [vmem:[%s12595_s5 + $0xb0] sm:$0xff]   ;;  %v11853_v27 = vld [vmem:[%s12595_s5 + $0x78] sm:$0xff]  }
 0x541   :  { %9534 = vmatprep.subr.bf16.mxu1 %v11524_v34  ;;  %v3088_v34 = vrot.slane %v12359_v3, %v12194_v62  ;;  %v11694_v32 = vadd.f32 %v12335_v10, %v3080_v50  ;;  %v11857_v62 = vld [vmem:[%s12595_s5 + $0x140] sm:$0xff]  }
 0x542   :  { %v11859_v10 = vld [vmem:[%s12595_s5 + $0x100] sm:$0xff]  }
 0x543   :  { %9207 = vmatpush1.bf16.msra.mxu0 %v11521_v21  ;;  %v11696_v36 = vadd.f32 %v12337_v16, %v3088_v34  ;;  %v11858_v21 = vld [vmem:[%s12595_s5 + $0x1c0] sm:$0xff]   ;;  %v11861_v16 = vld [vmem:[%s12595_s5 + $0x148] sm:$0xff]  }
 0x544   :  { %9535 = vmatpush1.bf16.msra.mxu1 %v11523_v39  ;;  %9208 = vmatprep.subr.bf16.mxu0 %v11530_v41  ;;  %v9549_v39 = vpack.c.bf16 %v11694_v32, %v11694_v32  ;;  %v11860_v41 = vld [vmem:[%s12595_s5 + $0x180] sm:$0xff]  }
 0x545   :  { %9536 = vmatprep.subr.bf16.mxu1 %v11532_v43  ;;  %v9551_v43 = vpack.c.bf16 %v11696_v36, %v11696_v36 }
 0x547   :  { %9209 = vmatpush1.bf16.msra.mxu0 %v11529_v60  ;;  %v11866_v60 = vld [vmem:[%s12595_s5 + $0x1d0] sm:$0xff]  }
 0x548   :  { %9537 = vmatpush1.bf16.msra.mxu1 %v11531_v30  ;;  %9210 = vmatprep.subr.bf16.mxu0 %v11538_v48  ;;  %v11867_v30 = vld [vmem:[%s12595_s5 + $0x110] sm:$0xff]  }
 0x549   :  { %9538 = vmatprep.subr.bf16.mxu1 %v11540_v49  ;;  %v11868_v48 = vld [vmem:[%s12595_s5 + $0x190] sm:$0xff]   ;;  %v11869_v49 = vld [vmem:[%s12595_s5 + $0x158] sm:$0xff]  }
 0x54b   :  { %9211 = vmatpush1.bf16.msra.mxu0 %v11537_v2  ;;  %v11872_v2 = vld [vmem:[%s12595_s5 + $0x198] sm:$0xff]  }
 0x54c   :  { %9539 = vmatpush1.bf16.msra.mxu1 %v11539_v51  ;;  %11606 = vmatprep.subr.bf16.mxu0 %v11825_v5  ;;  %v11873_v51 = vld [vmem:[%s12595_s5 + $0x160] sm:$0xff]  }
 0x54d   :  { %11628 = vmatprep.subr.bf16.mxu1 %v11826_v33  ;;  %v11874_v5 = vld [vmem:[%s12595_s5 + $0x1e0] sm:$0xff]  }
 0x54e   :  { %9213 = vmatmul.mubr.bf16.vlgmr.msra.gmra.mrb[20].mxu0 %v12317_v22  ;;  %v11875_v33 = vld [vmem:[%s12595_s5 + $0x120] sm:$0xff]  }
 0x54f   :  { %9541 = vmatmul.mubr.bf16.vlgmr.msra.gmra.mrb[20].mxu1 %v12317_v22  ;;  %11607 = vmatpush3.bf16.msra.mxu0 %v11827_v29  ;;  %v11834_v22 = vld [vmem:[%s12595_s5 + $0xd0] sm:$0xff]   ;;  %v11878_v29 = vld [vmem:[%s12595_s5 + $0x1e8] sm:$0xff]  }
 0x550   :  { %10108 = vmatprep.mubr.bf16.mxu0 %v9550_v9  ;;  %11629 = vmatpush3.bf16.msra.mxu1 %v11828_v52  ;;  %v11879_v52 = vld [vmem:[%s12595_s5 + $0x128] sm:$0xff]   ;;  %v11881_v9 = vld [vmem:[%s12595_s5 + $0x170] sm:$0xff]  }
 0x551   :  { %10148 = vmatprep.mubr.bf16.mxu1 %v9552_v25  ;;  %11608 = vmatprep.subr.bf16.mxu0 %v11829_v55  ;;  %v11880_v55 = vld [vmem:[%s12595_s5 + $0x1a8] sm:$0xff]   ;;  %v11883_v25 = vld [vmem:[%s12595_s5 + $0x130] sm:$0xff]  }
 0x552   :  { %11630 = vmatprep.subr.bf16.mxu1 %v11830_v17  ;;  %v11882_v17 = vld [vmem:[%s12595_s5 + $0x1f0] sm:$0xff]  }
 0x553   :  { %11609 = vmatpush3.bf16.msra.mxu0 %v11831_v56  ;;  %v11884_v56 = vld [vmem:[%s12595_s5 + $0x1b0] sm:$0xff]  }
 0x554   :  { %11631 = vmatpush3.bf16.msra.mxu1 %v11832_v23  ;;  %11610 = vmatprep.subr.bf16.mxu0 %v11833_v18  ;;  %v11885_v23 = vld [vmem:[%s12595_s5 + $0x178] sm:$0xff]  }
 0x555   :  { %11632 = vmatprep.subr.bf16.mxu1 %v11834_v22  ;;  %v11886_v18 = vld [vmem:[%s12595_s5 + $0x1f8] sm:$0xff]  }
 0x556   :  { %v11887_v22 = vld [vmem:[%s12595_s5 + $0x138] sm:$0xff]  }
 0x557   :  { %11611 = vmatpush3.bf16.msra.mxu0 %v11835_v37  ;;  %v11888_v37 = vld [vmem:[%s12595_s5 + $0x1b8] sm:$0xff]  }
 0x558   :  { %11633 = vmatpush3.bf16.msra.mxu1 %v11836_v0  ;;  %11612 = vmatprep.subr.bf16.mxu0 %v11837_v12  ;;  %v3096_v0 = vrot.slane %v12359_v3, %v12222_v54  ;;  %v3104_v12 = vrot.slane %v12359_v3, %v12252_v15 }
 0x559   :  { %11634 = vmatprep.subr.bf16.mxu1 %v11838_v58  ;;  %v3100_v58 = vrot.slane %v12359_v3, %v12197_v4 }
 0x55b   :  { %11613 = vmatpush3.bf16.msra.mxu0 %v11839_v1  ;;  %v3108_v1 = vrot.slane %v12359_v3, %v12225_v63  ;;  %v11541_v3 = vld [vmem:[%s12596_s6] ss:$0 sm:$0xff]  ;;  %s12021_s6 = smov [#allocation10]  }
 0x55c   :  { %11635 = vmatpush3.bf16.msra.mxu1 %v11840_v31  ;;  %11614 = vmatprep.subr.bf16.mxu0 %v11841_v61  ;;  %s10248_s19 = sshll.u32 %s12021_s6, 4  ;;  %s10249_s19 = int_to_ptr.vmem [resolvable:$true] %s10248_s19 }
 0x55d   :  { %11636 = vmatprep.subr.bf16.mxu1 %v11842_v6  ;;  %s11983_s20 = scalar_lea.vmem %s10249_s19, 128  ;;  %p11988_p5 = scmp.lt.s32.totalorder %s10249_s19, %s10249_s19 }
 0x55e   :  { %p11984_p4 = scmp.ne.s32.totalorder %s10249_s19, %s11983_s20  ;;  %p11989_p6 = scmp.lt.s32.totalorder %s11983_s20, %s11983_s20 }
 0x55f   :  { %11615 = vmatpush3.bf16.msra.mxu0 %v11843_v7 }
 0x560   :  { %11637 = vmatpush3.bf16.msra.mxu1 %v11844_v42  ;;  %11616 = vmatprep.subr.bf16.mxu0 %v11845_v46  ;;  %p11990_p7 = por %p11989_p6, %p11988_p5 }
 0x561   :  { %11638 = vmatprep.subr.bf16.mxu1 %v11846_v13 }
 0x562   :  { %p11991_p8 = pnand %p11990_p7, %p11984_p4 }
 0x563   :  { %11617 = vmatpush3.bf16.msra.mxu0 %v11847_v35 }
 0x564   :  { %11639 = vmatpush3.bf16.msra.mxu1 %v11848_v14  ;;  %11618 = vmatprep.subr.bf16.mxu0 %v11849_v19 }
 0x565   :  { %11640 = vmatprep.subr.bf16.mxu1 %v11850_v20 }
 0x567   :  { %11619 = vmatpush3.bf16.msra.mxu0 %v11851_v24 }
 0x568   :  { %11641 = vmatpush3.bf16.msra.mxu1 %v11852_v44  ;;  %11620 = vmatprep.subr.bf16.mxu0 %v11853_v27 }
 0x569   :  { %11642 = vmatprep.subr.bf16.mxu1 %v11854_v57 }
 0x56b   :  { %11621 = vmatpush3.bf16.msra.mxu0 %v11855_v53 }
 0x56c   :  { %11643 = vmatpush3.bf16.msra.mxu1 %v11856_v40  ;;  %11650 = vmatprep.subr.bf16.mxu0 %v11857_v62 }
 0x56d   :  { %11672 = vmatprep.subr.bf16.mxu1 %v11858_v21 }
 0x56e   :  { %10109 = vmatmul.mubr.bf16.vlgmr.msra.gmra.mrb[24].mxu0 %v9549_v39 }
 0x56f   :  { %10149 = vmatmul.mubr.bf16.vlgmr.msra.gmra.mrb[24].mxu1 %v9551_v43  ;;  %11651 = vmatpush3.bf16.msra.mxu0 %v11859_v10 }
 0x570   :  { %11673 = vmatpush3.bf16.msra.mxu1 %v11860_v41  ;;  %11652 = vmatprep.subr.bf16.mxu0 %v11861_v16 }
 0x571   :  { %11674 = vmatprep.subr.bf16.mxu1 %v11862_v45 }
 0x573   :  { %11653 = vmatpush3.bf16.msra.mxu0 %v11863_v11 }
 0x574   :  { %11675 = vmatpush3.bf16.msra.mxu1 %v11864_v26  ;;  %11654 = vmatprep.subr.bf16.mxu0 %v11865_v28 }
 0x575   :  { %11676 = vmatprep.subr.bf16.mxu1 %v11866_v60 }
 0x577   :  { %11655 = vmatpush3.bf16.msra.mxu0 %v11867_v30 }
 0x578   :  { %11677 = vmatpush3.bf16.msra.mxu1 %v11868_v48  ;;  %11656 = vmatprep.subr.bf16.mxu0 %v11869_v49 }
 0x579   :  { %11678 = vmatprep.subr.bf16.mxu1 %v11870_v47 }
 0x57b   :  { %11657 = vmatpush3.bf16.msra.mxu0 %v11871_v38 }
 0x57c   :  { %11679 = vmatpush3.bf16.msra.mxu1 %v11872_v2  ;;  %11658 = vmatprep.subr.bf16.mxu0 %v11873_v51 }
 0x57d   :  { %11680 = vmatprep.subr.bf16.mxu1 %v11874_v5 }
 0x57f   :  { %11659 = vmatpush3.bf16.msra.mxu0 %v11875_v33 }
 0x580   :  { %11681 = vmatpush3.bf16.msra.mxu1 %v11876_v8  ;;  %11660 = vmatprep.subr.bf16.mxu0 %v11877_v59 }
 0x581   :  { %11682 = vmatprep.subr.bf16.mxu1 %v11878_v29 }
 0x583   :  { %11661 = vmatpush3.bf16.msra.mxu0 %v11879_v52 }
 0x584   :  { %11683 = vmatpush3.bf16.msra.mxu1 %v11880_v55  ;;  %11662 = vmatprep.subr.bf16.mxu0 %v11881_v9 }
 0x585   :  { %11684 = vmatprep.subr.bf16.mxu1 %v11882_v17 }
 0x587   :  { %11663 = vmatpush3.bf16.msra.mxu0 %v11883_v25 }
 0x588   :  { %11685 = vmatpush3.bf16.msra.mxu1 %v11884_v56  ;;  %11664 = vmatprep.subr.bf16.mxu0 %v11885_v23 }
 0x589   :  { %11686 = vmatprep.subr.bf16.mxu1 %v11886_v18 }
 0x58b   :  { %11665 = vmatpush3.bf16.msra.mxu0 %v11887_v22 }
 0x58c   :  { %11687 = vmatpush3.bf16.msra.mxu1 %v11888_v37 }
 0x621   :  { %v9214_v31 = vpop.f32.mrb[20].mxu0 }
 0x622   :  { %v11698_v61 = vadd.f32 %v9214_v31, %v3096_v0  ;;  %v9542_v6 = vpop.f32.mrb[20].mxu1  ;;  %v9216_v7 = vpop.f32.mrb[21].mxu0 }
 0x623   :  { %v11700_v42 = vadd.f32 %v9542_v6, %v3104_v12  ;;  %v11699_v46 = vadd.f32 %v9216_v7, %v3100_v58  ;;  %v9544_v13 = vpop.f32.mrb[21].mxu1  ;;  %v9218_v35 = vpop.f32.mrb[22].mxu0 }
 0x624   :  { %v11701_v14 = vadd.f32 %v9544_v13, %v3108_v1  ;;  %v9546_v19 = vpop.f32.mrb[22].mxu1  ;;  %v9219_v54 = vpop.f32.mrb[23].mxu0  ;;  %v9553_v15 = vpack.c.bf16 %v11698_v61, %v11698_v61 }
 0x625   :  { %v9554_v20 = vpack.c.bf16 %v11699_v46, %v11699_v46  ;;  %v9547_v24 = vpop.f32.mrb[23].mxu1  ;;  %v9555_v44 = vpack.c.bf16 %v11700_v42, %v11700_v42 }
 0x626   :  { %v9556_v50 = vpack.c.bf16 %v11701_v14, %v11701_v14 }
 0x627   :  { %10188 = vmatprep.mubr.bf16.mxu0 %v9554_v20 }
 0x628   :  { %10228 = vmatprep.mubr.bf16.mxu1 %v9556_v50  ;;  %10189 = vmatmul.mubr.bf16.vlgmr.msra.gmra.mrb[28].mxu0 %v9553_v15 }
 0x629   :  { %10229 = vmatmul.mubr.bf16.vlgmr.msra.gmra.mrb[28].mxu1 %v9555_v44 }
 0x641   :  { %v11622_v4 = vpop.f32.mrb[24].mxu0 }
 0x642   :  { %v11644_v63 = vpop.f32.mrb[24].mxu1  ;;  %v11623_v27 = vpop.f32.mrb[25].mxu0 }
 0x643   :  { %v11624_v34 = vadd.f32 %v11623_v27, %v11622_v4  ;;  %v11645_v57 = vpop.f32.mrb[25].mxu1  ;;  %v11625_v53 = vpop.f32.mrb[26].mxu0 }
 0x644   :  { %v11646_v32 = vadd.f32 %v11645_v57, %v11644_v63  ;;  %v11647_v40 = vpop.f32.mrb[26].mxu1  ;;  %v11626_v62 = vpop.f32.mrb[27].mxu0 }
 0x645   :  { %v10111_v36 = vadd.f32 %v11624_v34, %v11541_v3  ;;  %v11648_v21 = vpop.f32.mrb[27].mxu1 }
 0x647   :  { %v10151_v10 = vadd.f32 %v11646_v32, %v10111_v36 }
 0x6fb   :  { %v11666_v39 = vpop.f32.mrb[28].mxu0 }
 0x6fc   :  { %v11688_v41 = vpop.f32.mrb[28].mxu1  ;;  %v11667_v16 = vpop.f32.mrb[29].mxu0 }
 0x6fd   :  { %v11668_v43 = vadd.f32 %v11667_v16, %v11666_v39  ;;  %v11689_v45 = vpop.f32.mrb[29].mxu1  ;;  %v11669_v11 = vpop.f32.mrb[30].mxu0 }
 0x6fe   :  { %v11690_v26 = vadd.f32 %v11689_v45, %v11688_v41  ;;  %v11691_v28 = vpop.f32.mrb[30].mxu1  ;;  %v11670_v60 = vpop.f32.mrb[31].mxu0 }
 0x6ff   :  { %v10191_v30 = vadd.f32 %v11668_v43, %v10151_v10  ;;  %v11692_v48 = vpop.f32.mrb[31].mxu1 }
 0x701   :  { %v10231_v49 = vadd.f32 %v11690_v26, %v10191_v30 }
 0x703   :  { %v10236_v47 = vsub.f32 0.0, %v10231_v49 }
 0x705   :  { %v10237_v38 = vmul.f32 1.442695, %v10236_v47 }
 0x707   :  { %11889 = vpow2.f32 %v10237_v38 }
 0x711   :  { %v11890_v2 = vpop.eup %11889 }
 0x712   :  { %v10239_v51 = vadd.f32 1.0, %v11890_v2 }
 0x714   :  { %11891 = vrcp.f32 %v10239_v51 }
 0x71e   :  { %v11892_v5 = vpop.eup %11891 }
 0x71f   :  { %10241 = vst [vmem:[#allocation10] sm:$0xff] %v11892_v5 }
 0x720   :  { %11994 = shalt.err (!%p11991_p8)
}
 0x721   :  { %s11995_s2 = scalar_lea.hbm %s12597_s7, 128 }
 0x722   :  { %p11996_p9 = scmp.ne.s32.totalorder %s12597_s7, %s11995_s2  ;;  %p11999_p10 = scmp.lt.u32.totalorder %s11995_s2, %s12597_s7 }
 0x724   :  { %p12001_p11 = pnand %p11999_p10, %p11996_p9 }
 0x726   :  { %12004 = shalt.err (!%p12001_p11)
}
 0x727   :  { %10251 = dma.vmem_to_hbm [thread:$0]  %s10249_s19, 128, %s12597_s7, [#allocation4]  }
 0x728   :  { %12011 = dma.done.wait [#allocation4], 128  }
 0x729   :  { %12012 = vsyncadd [#allocation4], 4294967168 }
 0x72a   :  { %10255 = vsyncpa [#allocation3], 1 }
 0x72b   :  { %10256 = vsyncpa [#allocation6], 1 }
 0x72c   :  { %10257 = vsyncpa [#allocation9], 1 }
 0x72d   :  { %10258 = vsyncpa [#allocation4], 1 }

</bundles_post_ra>
